<compile_context>
chip_gen: v5e
topology: v5e:2x2
jax: 0.10.0
libtpu: 0.0.40
codegen_flags: <defaults>
</compile_context>

<pallas_src>
import functools

import jax
import jax.numpy as jnp
from jax.experimental import pallas as pl
from jax.experimental.pallas import tpu as pltpu


def _round_up(x, m):
    return ((x + m - 1) // m) * m


def _pick_batch_block(n, h, w):
    """Images per grid step: push M = Nb*H*W toward >=256 (MXU width)."""
    target = max(1, -(-256 // (h * w)))          # ceil(256 / (H*W))
    nb = min(n, target, 8)
    while n % nb != 0:
        nb -= 1
    return nb


def _mgd_stage_kernel(s_ref, m_ref, t_ref, w1_ref, b1_ref, w2_ref, b2_ref,
                      loss_ref, pad_ref):
    """Nb batch images of one distillation stage.

    Block shapes (C lane-padded to a multiple of 128):
      s_ref    : (Nb, H, W, C)      bf16  student features
      m_ref    : (Nb, H, W, 1)      f32   random binary mask (lane broadcast)
      t_ref    : (Nb, H, W, C)      f32   teacher features
      w*_ref   : (3, 3, C, C)       bf16  HWIO conv weights (Buffered(1))
      b*_ref   : (1, C)             bf16
      loss_ref : (1, 8, 128)        f32   lane-dense per-block partial sum
      pad_ref  : (Nb, H+2, W+2, C)  bf16  zero-padded conv-input scratch
    """
    nb, h, w, c = s_ref.shape
    mb = nb * h * w

    def conv3x3(w_ref, b_ref):
        # Hoist the sublane (dx) shift out of the tap loop: 3 shifted copies,
        # reused across the 3 dy taps (dy slices a leading axis -> free).
        shifted = [pad_ref[:, :, dx:dx + w, :] for dx in range(3)]
        acc = None
        for dy in range(3):
            rows = [sh[:, dy:dy + h, :, :].reshape(mb, c) for sh in shifted]
            for dx in range(3):
                tap = jnp.dot(rows[dx], w_ref[dy, dx, :, :],
                              preferred_element_type=jnp.float32)
                # Seed with the first tap (no zeros init) so the compiler can
                # use accumulating matmuls instead of MRF-pop + VPU add.
                acc = tap if acc is None else acc + tap
        return acc + b_ref[...].astype(jnp.float32)        # (mb, c) + (1, c)

    # Masked student features in bf16 (mask is exactly 0/1, so exact).
    x = s_ref[...] * m_ref[...].astype(jnp.bfloat16)

    # Zero only the 1-pixel border slabs; the interior is fully overwritten
    # before each conv.
    pad_ref[:, 0:1, :, :] = jnp.zeros((nb, 1, w + 2, c), pad_ref.dtype)
    pad_ref[:, h + 1:h + 2, :, :] = jnp.zeros((nb, 1, w + 2, c), pad_ref.dtype)
    pad_ref[:, :, 0:1, :] = jnp.zeros((nb, h + 2, 1, c), pad_ref.dtype)
    pad_ref[:, :, w + 1:w + 2, :] = jnp.zeros((nb, h + 2, 1, c), pad_ref.dtype)

    # ---- conv1 + ReLU ----
    # NOTE: the interior starts at sublane offset 1 (masked store); only worth
    # restructuring (right/bottom-only padding) if the v5e store slot binds.
    pad_ref[:, 1:h + 1, 1:w + 1, :] = x
    h1 = jnp.maximum(conv3x3(w1_ref, b1_ref), 0.0)         # (mb, c) f32

    # ---- conv2 ----
    pad_ref[:, 1:h + 1, 1:w + 1, :] = h1.reshape(nb, h, w, c).astype(jnp.bfloat16)
    h2 = conv3x3(w2_ref, b2_ref)                           # (mb, c) f32

    # ---- partial sum of squared error (padded channels diff == 0) ----
    diff = h2 - t_ref[...].reshape(mb, c)
    total = jnp.sum(diff * diff)
    loss_ref[...] = jnp.broadcast_to(total, (1, 8, 128))   # lane-dense scalar out


def mgd_stage_loss(s_nhwc, m_nhwc, t_nhwc, w1, b1, w2, b2):
    """sum((generation(student * mask) - teacher)^2) / N for one stage."""
    n, h, w, c = s_nhwc.shape
    c_pad = _round_up(c, 128)                    # lane-dense channel padding
    s_nhwc = s_nhwc.astype(jnp.bfloat16)
    m_nhwc = m_nhwc.astype(jnp.float32)
    t_nhwc = t_nhwc.astype(jnp.float32)
    w1, w2 = w1.astype(jnp.bfloat16), w2.astype(jnp.bfloat16)
    b1, b2 = b1.astype(jnp.bfloat16), b2.astype(jnp.bfloat16)
    if c_pad != c:                               # exact no-op padding for the loss
        dc = c_pad - c
        s_nhwc = jnp.pad(s_nhwc, ((0, 0), (0, 0), (0, 0), (0, dc)))
        t_nhwc = jnp.pad(t_nhwc, ((0, 0), (0, 0), (0, 0), (0, dc)))
        w1 = jnp.pad(w1, ((0, 0), (0, 0), (0, dc), (0, dc)))
        w2 = jnp.pad(w2, ((0, 0), (0, 0), (0, dc), (0, dc)))
        b1 = jnp.pad(b1, ((0, 0), (0, dc)))
        b2 = jnp.pad(b2, ((0, 0), (0, dc)))

    nb = _pick_batch_block(n, h, w)
    grid = (n // nb,)

    # VMEM budget: 2x-buffered activations + 1x-buffered weights + scratch +
    # in-kernel temporaries, with headroom; capped below v7x's 64 MiB physical.
    act = nb * h * w * c_pad
    need = (2 * act * 2                                    # student (bf16)
            + 2 * act * 4                                  # teacher (f32)
            + 2 * nb * h * w * 4                           # mask (f32)
            + 2 * 9 * c_pad * c_pad * 2 + 2 * c_pad * 2    # weights/bias x1
            + 2 * 8 * 128 * 4                              # output
            + nb * (h + 2) * (w + 2) * c_pad * 2           # pad scratch (bf16)
            + 3 * nb * (h + 2) * w * c_pad * 2             # dx-shifted copies
            + 4 * act * 4)                                 # acc/h1/diff temporaries
    vmem_limit = min(max(int(need * 1.25) + (2 << 20), 16 << 20), 56 << 20)

    wspec = functools.partial(pl.BlockSpec, pipeline_mode=pl.Buffered(1))
    partial = pl.pallas_call(
        _mgd_stage_kernel,
        out_shape=jax.ShapeDtypeStruct((n // nb, 8, 128), jnp.float32),
        grid_spec=pltpu.PrefetchScalarGridSpec(
            num_scalar_prefetch=0,
            grid=grid,
            in_specs=[
                pl.BlockSpec((nb, h, w, c_pad), lambda g: (g, 0, 0, 0)),
                pl.BlockSpec((nb, h, w, 1), lambda g: (g, 0, 0, 0)),
                pl.BlockSpec((nb, h, w, c_pad), lambda g: (g, 0, 0, 0)),
                wspec((3, 3, c_pad, c_pad), lambda g: (0, 0, 0, 0)),
                wspec((1, c_pad), lambda g: (0, 0)),
                wspec((3, 3, c_pad, c_pad), lambda g: (0, 0, 0, 0)),
                wspec((1, c_pad), lambda g: (0, 0)),
            ],
            out_specs=pl.BlockSpec((1, 8, 128), lambda g: (g, 0, 0)),
            scratch_shapes=[pltpu.VMEM((nb, h + 2, w + 2, c_pad), jnp.bfloat16)],
        ),
        compiler_params=pltpu.CompilerParams(
            dimension_semantics=("parallel",),
            vmem_limit_bytes=vmem_limit),
    )(s_nhwc, m_nhwc, t_nhwc, w1, b1, w2, b2)
    return jnp.sum(partial[:, 0, 0]) / n


class MGDLossPallas:
    """JAX/Pallas port of MGDLoss (forward pass)."""

    def __init__(self, channels_s, channels_t, alpha_mgd=2e-5, lambda_mgd=0.65,
                 key=None):
        del channels_s  # unused, as in the reference module
        self.alpha_mgd = alpha_mgd
        self.lambda_mgd = lambda_mgd
        key = jax.random.PRNGKey(42) if key is None else key
        self.params = []
        for c in channels_t:
            key, k1, k2, k3, k4 = jax.random.split(key, 5)
            fan_in = c * 3 * 3
            bound = 1.0 / (fan_in ** 0.5)  # PyTorch Conv2d default init range
            w1 = jax.random.uniform(k1, (3, 3, c, c), jnp.float32, -bound, bound)
            b1 = jax.random.uniform(k2, (1, c), jnp.float32, -bound, bound)
            w2 = jax.random.uniform(k3, (3, 3, c, c), jnp.float32, -bound, bound)
            b2 = jax.random.uniform(k4, (1, c), jnp.float32, -bound, bound)
            # Weights/biases live in bf16: MXU-native operands, half the VMEM.
            self.params.append(tuple(p.astype(jnp.bfloat16)
                                     for p in (w1, b1, w2, b2)))
        # Single XLA program for the whole forward (mask gen, transposes and
        # every stage kernel compile/dispatch together).
        self._forward = jax.jit(self._forward_impl)

    def _forward_impl(self, y_s, y_t, params, mask_key):
        total = jnp.float32(0.0)
        for (s, t), (w1, b1, w2, b2) in zip(zip(y_s, y_t), params):
            n, c, h, w = t.shape
            mask_key, mkey = jax.random.split(mask_key)
            rand = jax.random.uniform(mkey, (n, 1, h, w), jnp.float32)
            mat = jnp.where(rand > 1.0 - self.lambda_mgd, 0.0, 1.0)
            mat = mat.astype(jnp.float32)
            # TODO(synk): mask could be drawn in-kernel via pltpu.prng_*; kept
            # in the wrapper so the jax.random stream stays reproducible.
            # NCHW -> NHWC layout plumbing in plain JAX (accepted overhead).
            s_nhwc = jnp.transpose(s, (0, 2, 3, 1))
            t_nhwc = jnp.transpose(t, (0, 2, 3, 1))
            m_nhwc = jnp.transpose(mat, (0, 2, 3, 1))
            stage = mgd_stage_loss(s_nhwc, m_nhwc, t_nhwc, w1, b1, w2, b2)
            total = total + stage * self.alpha_mgd
        return total

    def __call__(self, y_s, y_t, mask_key):
        assert len(y_s) == len(y_t)
        for s, t in zip(y_s, y_t):
            assert s.shape == t.shape
        return self._forward(tuple(y_s), tuple(y_t), tuple(self.params), mask_key)

    # Pure-JAX reference of one stage with the same bf16-operand /
    # f32-accumulation arithmetic as the kernel (for validation).
    def ref_stage(self, s_nhwc, m_nhwc, t_nhwc, idx):
        w1, b1, w2, b2 = self.params[idx]
        n = s_nhwc.shape[0]
        x = s_nhwc.astype(jnp.bfloat16) * m_nhwc.astype(jnp.bfloat16)
        dn = jax.lax.conv_dimension_numbers(x.shape, w1.shape,
                                            ("NHWC", "HWIO", "NHWC"))
        h = jax.lax.conv_general_dilated(
            x, w1, (1, 1), "SAME", dimension_numbers=dn,
            preferred_element_type=jnp.float32)
        h = h + b1.reshape(1, 1, 1, -1).astype(jnp.float32)
        h = jnp.maximum(h, 0.0).astype(jnp.bfloat16)
        h = jax.lax.conv_general_dilated(
            h, w2, (1, 1), "SAME", dimension_numbers=dn,
            preferred_element_type=jnp.float32)
        h = h + b2.reshape(1, 1, 1, -1).astype(jnp.float32)
        return jnp.sum((h - t_nhwc.astype(jnp.float32)) ** 2) / n


if __name__ == "__main__":
    key = jax.random.PRNGKey(0)
    kfeat, kmask, kparam = jax.random.split(key, 3)

    # Two FPN-like stages with small synthetic shapes (NCHW, as in PyTorch).
    channels_t = [4, 8]
    channels_s = [4, 8]
    shapes = [(2, 4, 16, 16), (2, 8, 8, 8)]

    y_s, y_t = [], []
    for shp in shapes:
        kfeat, ks, kt = jax.random.split(kfeat, 3)
        y_s.append(jax.random.normal(ks, shp, jnp.float32))
        y_t.append(jax.random.normal(kt, shp, jnp.float32))

    model = MGDLossPallas(channels_s, channels_t, key=kparam)
    loss = jax.block_until_ready(model(y_s, y_t, mask_key=kmask))

    # Validate the Pallas stage kernel against the bf16-operand JAX reference,
    # replaying the same deterministic mask sequence as _forward_impl.
    chk_key = kmask
    ref_total = jnp.float32(0.0)
    for idx, (s, t) in enumerate(zip(y_s, y_t)):
        n, c, h, w = t.shape
        chk_key, mkey = jax.random.split(chk_key)
        rand = jax.random.uniform(mkey, (n, 1, h, w), jnp.float32)
        mat = jnp.where(rand > 1.0 - model.lambda_mgd, 0.0, 1.0).astype(jnp.float32)
        s_nhwc = jnp.transpose(s, (0, 2, 3, 1))
        t_nhwc = jnp.transpose(t, (0, 2, 3, 1))
        m_nhwc = jnp.transpose(mat, (0, 2, 3, 1))
        got = mgd_stage_loss(s_nhwc, m_nhwc, t_nhwc, *model.params[idx])
        want = model.ref_stage(s_nhwc, m_nhwc, t_nhwc, idx)
        assert jnp.allclose(got, want, rtol=2e-2, atol=1e-2), (idx, got, want)
        ref_total = ref_total + want * model.alpha_mgd

    assert jnp.isfinite(loss)
    assert jnp.allclose(loss, ref_total, rtol=2e-2, atol=1e-6), (loss, ref_total)
    print("KERNEL_OK")
</pallas_src>

<mosaic_0001>
module attributes {stable_mosaic.version = 11 : i64} {
  func.func @_mgd_stage_kernel(%arg0: i32, %arg1: memref<2x8x8x128xbf16, #tpu.memory_space<vmem>>, %arg2: memref<2x8x8x1xf32, #tpu.memory_space<vmem>>, %arg3: memref<2x8x8x128xf32, #tpu.memory_space<vmem>>, %arg4: memref<3x3x128x128xbf16, #tpu.memory_space<vmem>>, %arg5: memref<1x128xbf16, #tpu.memory_space<vmem>>, %arg6: memref<3x3x128x128xbf16, #tpu.memory_space<vmem>>, %arg7: memref<1x128xbf16, #tpu.memory_space<vmem>>, %arg8: memref<1x8x128xf32, #tpu.memory_space<vmem>>, %arg9: memref<2x10x10x128xbf16, #tpu.memory_space<vmem>>) attributes {dimension_semantics = [#tpu.dimension_semantics<parallel>], iteration_bounds = array<i64: 1>, scalar_prefetch = 0 : i64, scratch_operands = 1 : i64, tpu.core_type = #tpu.core_type<tc>, window_params = [{transform_indices = @transform_0, window_bounds = array<i64: 2, 8, 8, 128>}, {transform_indices = @transform_1, window_bounds = array<i64: 2, 8, 8, 1>}, {transform_indices = @transform_2, window_bounds = array<i64: 2, 8, 8, 128>}, {pipeline_mode = #tpu.pipeline_mode<synchronous>, transform_indices = @transform_3, window_bounds = array<i64: 3, 3, 128, 128>}, {pipeline_mode = #tpu.pipeline_mode<synchronous>, transform_indices = @transform_4, window_bounds = array<i64: 1, 128>}, {pipeline_mode = #tpu.pipeline_mode<synchronous>, transform_indices = @transform_5, window_bounds = array<i64: 3, 3, 128, 128>}, {pipeline_mode = #tpu.pipeline_mode<synchronous>, transform_indices = @transform_6, window_bounds = array<i64: 1, 128>}, {transform_indices = @transform_7, window_bounds = array<i64: 1, 8, 128>}]} {
    %c0 = arith.constant 0 : index
    %c0_0 = arith.constant 0 : index
    %c0_1 = arith.constant 0 : index
    %c0_2 = arith.constant 0 : index
    %0 = vector.load %arg1[%c0, %c0_0, %c0_1, %c0_2] : memref<2x8x8x128xbf16, #tpu.memory_space<vmem>>, vector<2x8x8x128xbf16>
    %c0_3 = arith.constant 0 : index
    %c0_4 = arith.constant 0 : index
    %c0_5 = arith.constant 0 : index
    %c0_6 = arith.constant 0 : index
    %1 = vector.load %arg2[%c0_3, %c0_4, %c0_5, %c0_6] : memref<2x8x8x1xf32, #tpu.memory_space<vmem>>, vector<2x8x8x1xf32>
    %2 = arith.truncf %1 : vector<2x8x8x1xf32> to vector<2x8x8x1xbf16>
    %3 = vector.broadcast %2 : vector<2x8x8x1xbf16> to vector<2x8x8x128xbf16>
    %4 = arith.mulf %0, %3 : vector<2x8x8x128xbf16>
    %cst = arith.constant 0.000000e+00 : bf16
    %5 = vector.broadcast %cst : bf16 to vector<2x1x10x128xbf16>
    %c0_7 = arith.constant 0 : index
    %c0_8 = arith.constant 0 : index
    %c0_9 = arith.constant 0 : index
    %c0_10 = arith.constant 0 : index
    %6 = vector.load %arg9[%c0_7, %c0_8, %c0_9, %c0_10] : memref<2x10x10x128xbf16, #tpu.memory_space<vmem>>, vector<2x1x10x128xbf16>
    tpu.vector_store %arg9[%c0_7, %c0_8, %c0_9, %c0_10], %5 {strides = array<i32>} : memref<2x10x10x128xbf16, #tpu.memory_space<vmem>>, vector<2x1x10x128xbf16>,
    %cst_11 = arith.constant 0.000000e+00 : bf16
    %7 = vector.broadcast %cst_11 : bf16 to vector<2x1x10x128xbf16>
    %c0_12 = arith.constant 0 : index
    %c9 = arith.constant 9 : index
    %c0_13 = arith.constant 0 : index
    %c0_14 = arith.constant 0 : index
    %8 = vector.load %arg9[%c0_12, %c9, %c0_13, %c0_14] : memref<2x10x10x128xbf16, #tpu.memory_space<vmem>>, vector<2x1x10x128xbf16>
    tpu.vector_store %arg9[%c0_12, %c9, %c0_13, %c0_14], %7 {strides = array<i32>} : memref<2x10x10x128xbf16, #tpu.memory_space<vmem>>, vector<2x1x10x128xbf16>,
    %cst_15 = arith.constant 0.000000e+00 : bf16
    %9 = vector.broadcast %cst_15 : bf16 to vector<2x10x1x128xbf16>
    %c0_16 = arith.constant 0 : index
    %c0_17 = arith.constant 0 : index
    %c0_18 = arith.constant 0 : index
    %c0_19 = arith.constant 0 : index
    %10 = vector.load %arg9[%c0_16, %c0_17, %c0_18, %c0_19] : memref<2x10x10x128xbf16, #tpu.memory_space<vmem>>, vector<2x10x1x128xbf16>
    tpu.vector_store %arg9[%c0_16, %c0_17, %c0_18, %c0_19], %9 {strides = array<i32>} : memref<2x10x10x128xbf16, #tpu.memory_space<vmem>>, vector<2x10x1x128xbf16>,
    %cst_20 = arith.constant 0.000000e+00 : bf16
    %11 = vector.broadcast %cst_20 : bf16 to vector<2x10x1x128xbf16>
    %c0_21 = arith.constant 0 : index
    %c0_22 = arith.constant 0 : index
    %c9_23 = arith.constant 9 : index
    %c0_24 = arith.constant 0 : index
    %12 = vector.load %arg9[%c0_21, %c0_22, %c9_23, %c0_24] : memref<2x10x10x128xbf16, #tpu.memory_space<vmem>>, vector<2x10x1x128xbf16>
    tpu.vector_store %arg9[%c0_21, %c0_22, %c9_23, %c0_24], %11 {strides = array<i32>} : memref<2x10x10x128xbf16, #tpu.memory_space<vmem>>, vector<2x10x1x128xbf16>,
    %c0_25 = arith.constant 0 : index
    %c1 = arith.constant 1 : index
    %c1_26 = arith.constant 1 : index
    %c0_27 = arith.constant 0 : index
    %13 = vector.load %arg9[%c0_25, %c1, %c1_26, %c0_27] : memref<2x10x10x128xbf16, #tpu.memory_space<vmem>>, vector<2x8x8x128xbf16>
    tpu.vector_store %arg9[%c0_25, %c1, %c1_26, %c0_27], %4 {strides = array<i32>} : memref<2x10x10x128xbf16, #tpu.memory_space<vmem>>, vector<2x8x8x128xbf16>,
    %c0_28 = arith.constant 0 : index
    %c0_29 = arith.constant 0 : index
    %c0_30 = arith.constant 0 : index
    %c0_31 = arith.constant 0 : index
    %14 = vector.load %arg9[%c0_28, %c0_29, %c0_30, %c0_31] : memref<2x10x10x128xbf16, #tpu.memory_space<vmem>>, vector<2x10x8x128xbf16>
    %c0_32 = arith.constant 0 : index
    %c0_33 = arith.constant 0 : index
    %c1_34 = arith.constant 1 : index
    %c0_35 = arith.constant 0 : index
    %15 = vector.load %arg9[%c0_32, %c0_33, %c1_34, %c0_35] : memref<2x10x10x128xbf16, #tpu.memory_space<vmem>>, vector<2x10x8x128xbf16>
    %c0_36 = arith.constant 0 : index
    %c0_37 = arith.constant 0 : index
    %c2 = arith.constant 2 : index
    %c0_38 = arith.constant 0 : index
    %16 = vector.load %arg9[%c0_36, %c0_37, %c2, %c0_38] : memref<2x10x10x128xbf16, #tpu.memory_space<vmem>>, vector<2x10x8x128xbf16>
    %17 = vector.extract_strided_slice %14 {offsets = [0, 0, 0, 0], sizes = [2, 8, 8, 128], strides = [1, 1, 1, 1]} : vector<2x10x8x128xbf16> to vector<2x8x8x128xbf16>
    %18 = vector.shape_cast %17 : vector<2x8x8x128xbf16> to vector<128x128xbf16>
    %19 = vector.extract_strided_slice %15 {offsets = [0, 0, 0, 0], sizes = [2, 8, 8, 128], strides = [1, 1, 1, 1]} : vector<2x10x8x128xbf16> to vector<2x8x8x128xbf16>
    %20 = vector.shape_cast %19 : vector<2x8x8x128xbf16> to vector<128x128xbf16>
    %21 = vector.extract_strided_slice %16 {offsets = [0, 0, 0, 0], sizes = [2, 8, 8, 128], strides = [1, 1, 1, 1]} : vector<2x10x8x128xbf16> to vector<2x8x8x128xbf16>
    %22 = vector.shape_cast %21 : vector<2x8x8x128xbf16> to vector<128x128xbf16>
    %c0_39 = arith.constant 0 : index
    %c0_40 = arith.constant 0 : index
    %c0_41 = arith.constant 0 : index
    %c0_42 = arith.constant 0 : index
    %23 = vector.load %arg4[%c0_39, %c0_40, %c0_41, %c0_42] : memref<3x3x128x128xbf16, #tpu.memory_space<vmem>>, vector<1x1x128x128xbf16>
    %24 = vector.shape_cast %23 : vector<1x1x128x128xbf16> to vector<128x128xbf16>
    %cst_43 = arith.constant dense<0.000000e+00> : vector<128x128xf32>
    %25 = tpu.matmul %18, %24, %cst_43 {dimension_numbers = #tpu.dot_dimension_numbers<[1], [0], [0], [1], [0, 0, 1, 1], [], []>} : vector<128x128xbf16>, vector<128x128xbf16>, vector<128x128xf32> -> vector<128x128xf32>
    %c0_44 = arith.constant 0 : index
    %c1_45 = arith.constant 1 : index
    %c0_46 = arith.constant 0 : index
    %c0_47 = arith.constant 0 : index
    %26 = vector.load %arg4[%c0_44, %c1_45, %c0_46, %c0_47] : memref<3x3x128x128xbf16, #tpu.memory_space<vmem>>, vector<1x1x128x128xbf16>
    %27 = vector.shape_cast %26 : vector<1x1x128x128xbf16> to vector<128x128xbf16>
    %cst_48 = arith.constant dense<0.000000e+00> : vector<128x128xf32>
    %28 = tpu.matmul %20, %27, %cst_48 {dimension_numbers = #tpu.dot_dimension_numbers<[1], [0], [0], [1], [0, 0, 1, 1], [], []>} : vector<128x128xbf16>, vector<128x128xbf16>, vector<128x128xf32> -> vector<128x128xf32>
    %29 = arith.addf %25, %28 : vector<128x128xf32>
    %c0_49 = arith.constant 0 : index
    %c2_50 = arith.constant 2 : index
    %c0_51 = arith.constant 0 : index
    %c0_52 = arith.constant 0 : index
    %30 = vector.load %arg4[%c0_49, %c2_50, %c0_51, %c0_52] : memref<3x3x128x128xbf16, #tpu.memory_space<vmem>>, vector<1x1x128x128xbf16>
    %31 = vector.shape_cast %30 : vector<1x1x128x128xbf16> to vector<128x128xbf16>
    %cst_53 = arith.constant dense<0.000000e+00> : vector<128x128xf32>
    %32 = tpu.matmul %22, %31, %cst_53 {dimension_numbers = #tpu.dot_dimension_numbers<[1], [0], [0], [1], [0, 0, 1, 1], [], []>} : vector<128x128xbf16>, vector<128x128xbf16>, vector<128x128xf32> -> vector<128x128xf32>
    %33 = arith.addf %29, %32 : vector<128x128xf32>
    %34 = vector.extract_strided_slice %14 {offsets = [0, 1, 0, 0], sizes = [2, 8, 8, 128], strides = [1, 1, 1, 1]} : vector<2x10x8x128xbf16> to vector<2x8x8x128xbf16>
    %35 = vector.shape_cast %34 : vector<2x8x8x128xbf16> to vector<128x128xbf16>
    %36 = vector.extract_strided_slice %15 {offsets = [0, 1, 0, 0], sizes = [2, 8, 8, 128], strides = [1, 1, 1, 1]} : vector<2x10x8x128xbf16> to vector<2x8x8x128xbf16>
    %37 = vector.shape_cast %36 : vector<2x8x8x128xbf16> to vector<128x128xbf16>
    %38 = vector.extract_strided_slice %16 {offsets = [0, 1, 0, 0], sizes = [2, 8, 8, 128], strides = [1, 1, 1, 1]} : vector<2x10x8x128xbf16> to vector<2x8x8x128xbf16>
    %39 = vector.shape_cast %38 : vector<2x8x8x128xbf16> to vector<128x128xbf16>
    %c1_54 = arith.constant 1 : index
    %c0_55 = arith.constant 0 : index
    %c0_56 = arith.constant 0 : index
    %c0_57 = arith.constant 0 : index
    %40 = vector.load %arg4[%c1_54, %c0_55, %c0_56, %c0_57] : memref<3x3x128x128xbf16, #tpu.memory_space<vmem>>, vector<1x1x128x128xbf16>
    %41 = vector.shape_cast %40 : vector<1x1x128x128xbf16> to vector<128x128xbf16>
    %cst_58 = arith.constant dense<0.000000e+00> : vector<128x128xf32>
    %42 = tpu.matmul %35, %41, %cst_58 {dimension_numbers = #tpu.dot_dimension_numbers<[1], [0], [0], [1], [0, 0, 1, 1], [], []>} : vector<128x128xbf16>, vector<128x128xbf16>, vector<128x128xf32> -> vector<128x128xf32>
    %43 = arith.addf %33, %42 : vector<128x128xf32>
    %c1_59 = arith.constant 1 : index
    %c1_60 = arith.constant 1 : index
    %c0_61 = arith.constant 0 : index
    %c0_62 = arith.constant 0 : index
    %44 = vector.load %arg4[%c1_59, %c1_60, %c0_61, %c0_62] : memref<3x3x128x128xbf16, #tpu.memory_space<vmem>>, vector<1x1x128x128xbf16>
    %45 = vector.shape_cast %44 : vector<1x1x128x128xbf16> to vector<128x128xbf16>
    %cst_63 = arith.constant dense<0.000000e+00> : vector<128x128xf32>
    %46 = tpu.matmul %37, %45, %cst_63 {dimension_numbers = #tpu.dot_dimension_numbers<[1], [0], [0], [1], [0, 0, 1, 1], [], []>} : vector<128x128xbf16>, vector<128x128xbf16>, vector<128x128xf32> -> vector<128x128xf32>
    %47 = arith.addf %43, %46 : vector<128x128xf32>
    %c1_64 = arith.constant 1 : index
    %c2_65 = arith.constant 2 : index
    %c0_66 = arith.constant 0 : index
    %c0_67 = arith.constant 0 : index
    %48 = vector.load %arg4[%c1_64, %c2_65, %c0_66, %c0_67] : memref<3x3x128x128xbf16, #tpu.memory_space<vmem>>, vector<1x1x128x128xbf16>
    %49 = vector.shape_cast %48 : vector<1x1x128x128xbf16> to vector<128x128xbf16>
    %cst_68 = arith.constant dense<0.000000e+00> : vector<128x128xf32>
    %50 = tpu.matmul %39, %49, %cst_68 {dimension_numbers = #tpu.dot_dimension_numbers<[1], [0], [0], [1], [0, 0, 1, 1], [], []>} : vector<128x128xbf16>, vector<128x128xbf16>, vector<128x128xf32> -> vector<128x128xf32>
    %51 = arith.addf %47, %50 : vector<128x128xf32>
    %52 = vector.extract_strided_slice %14 {offsets = [0, 2, 0, 0], sizes = [2, 8, 8, 128], strides = [1, 1, 1, 1]} : vector<2x10x8x128xbf16> to vector<2x8x8x128xbf16>
    %53 = vector.shape_cast %52 : vector<2x8x8x128xbf16> to vector<128x128xbf16>
    %54 = vector.extract_strided_slice %15 {offsets = [0, 2, 0, 0], sizes = [2, 8, 8, 128], strides = [1, 1, 1, 1]} : vector<2x10x8x128xbf16> to vector<2x8x8x128xbf16>
    %55 = vector.shape_cast %54 : vector<2x8x8x128xbf16> to vector<128x128xbf16>
    %56 = vector.extract_strided_slice %16 {offsets = [0, 2, 0, 0], sizes = [2, 8, 8, 128], strides = [1, 1, 1, 1]} : vector<2x10x8x128xbf16> to vector<2x8x8x128xbf16>
    %57 = vector.shape_cast %56 : vector<2x8x8x128xbf16> to vector<128x128xbf16>
    %c2_69 = arith.constant 2 : index
    %c0_70 = arith.constant 0 : index
    %c0_71 = arith.constant 0 : index
    %c0_72 = arith.constant 0 : index
    %58 = vector.load %arg4[%c2_69, %c0_70, %c0_71, %c0_72] : memref<3x3x128x128xbf16, #tpu.memory_space<vmem>>, vector<1x1x128x128xbf16>
    %59 = vector.shape_cast %58 : vector<1x1x128x128xbf16> to vector<128x128xbf16>
    %cst_73 = arith.constant dense<0.000000e+00> : vector<128x128xf32>
    %60 = tpu.matmul %53, %59, %cst_73 {dimension_numbers = #tpu.dot_dimension_numbers<[1], [0], [0], [1], [0, 0, 1, 1], [], []>} : vector<128x128xbf16>, vector<128x128xbf16>, vector<128x128xf32> -> vector<128x128xf32>
    %61 = arith.addf %51, %60 : vector<128x128xf32>
    %c2_74 = arith.constant 2 : index
    %c1_75 = arith.constant 1 : index
    %c0_76 = arith.constant 0 : index
    %c0_77 = arith.constant 0 : index
    %62 = vector.load %arg4[%c2_74, %c1_75, %c0_76, %c0_77] : memref<3x3x128x128xbf16, #tpu.memory_space<vmem>>, vector<1x1x128x128xbf16>
    %63 = vector.shape_cast %62 : vector<1x1x128x128xbf16> to vector<128x128xbf16>
    %cst_78 = arith.constant dense<0.000000e+00> : vector<128x128xf32>
    %64 = tpu.matmul %55, %63, %cst_78 {dimension_numbers = #tpu.dot_dimension_numbers<[1], [0], [0], [1], [0, 0, 1, 1], [], []>} : vector<128x128xbf16>, vector<128x128xbf16>, vector<128x128xf32> -> vector<128x128xf32>
    %65 = arith.addf %61, %64 : vector<128x128xf32>
    %c2_79 = arith.constant 2 : index
    %c2_80 = arith.constant 2 : index
    %c0_81 = arith.constant 0 : index
    %c0_82 = arith.constant 0 : index
    %66 = vector.load %arg4[%c2_79, %c2_80, %c0_81, %c0_82] : memref<3x3x128x128xbf16, #tpu.memory_space<vmem>>, vector<1x1x128x128xbf16>
    %67 = vector.shape_cast %66 : vector<1x1x128x128xbf16> to vector<128x128xbf16>
    %cst_83 = arith.constant dense<0.000000e+00> : vector<128x128xf32>
    %68 = tpu.matmul %57, %67, %cst_83 {dimension_numbers = #tpu.dot_dimension_numbers<[1], [0], [0], [1], [0, 0, 1, 1], [], []>} : vector<128x128xbf16>, vector<128x128xbf16>, vector<128x128xf32> -> vector<128x128xf32>
    %69 = arith.addf %65, %68 : vector<128x128xf32>
    %c0_84 = arith.constant 0 : index
    %c0_85 = arith.constant 0 : index
    %70 = vector.load %arg5[%c0_84, %c0_85] : memref<1x128xbf16, #tpu.memory_space<vmem>>, vector<1x128xbf16>
    %71 = arith.extf %70 : vector<1x128xbf16> to vector<1x128xf32>
    %72 = vector.broadcast %71 : vector<1x128xf32> to vector<128x128xf32>
    %73 = arith.addf %69, %72 : vector<128x128xf32>
    %cst_86 = arith.constant 0.000000e+00 : f32
    %74 = vector.broadcast %cst_86 : f32 to vector<128x128xf32>
    %75 = arith.maximumf %73, %74 : vector<128x128xf32>
    %76 = vector.shape_cast %75 : vector<128x128xf32> to vector<2x8x8x128xf32>
    %77 = arith.truncf %76 : vector<2x8x8x128xf32> to vector<2x8x8x128xbf16>
    %c0_87 = arith.constant 0 : index
    %c1_88 = arith.constant 1 : index
    %c1_89 = arith.constant 1 : index
    %c0_90 = arith.constant 0 : index
    %78 = vector.load %arg9[%c0_87, %c1_88, %c1_89, %c0_90] : memref<2x10x10x128xbf16, #tpu.memory_space<vmem>>, vector<2x8x8x128xbf16>
    tpu.vector_store %arg9[%c0_87, %c1_88, %c1_89, %c0_90], %77 {strides = array<i32>} : memref<2x10x10x128xbf16, #tpu.memory_space<vmem>>, vector<2x8x8x128xbf16>,
    %c0_91 = arith.constant 0 : index
    %c0_92 = arith.constant 0 : index
    %c0_93 = arith.constant 0 : index
    %c0_94 = arith.constant 0 : index
    %79 = vector.load %arg9[%c0_91, %c0_92, %c0_93, %c0_94] : memref<2x10x10x128xbf16, #tpu.memory_space<vmem>>, vector<2x10x8x128xbf16>
    %c0_95 = arith.constant 0 : index
    %c0_96 = arith.constant 0 : index
    %c1_97 = arith.constant 1 : index
    %c0_98 = arith.constant 0 : index
    %80 = vector.load %arg9[%c0_95, %c0_96, %c1_97, %c0_98] : memref<2x10x10x128xbf16, #tpu.memory_space<vmem>>, vector<2x10x8x128xbf16>
    %c0_99 = arith.constant 0 : index
    %c0_100 = arith.constant 0 : index
    %c2_101 = arith.constant 2 : index
    %c0_102 = arith.constant 0 : index
    %81 = vector.load %arg9[%c0_99, %c0_100, %c2_101, %c0_102] : memref<2x10x10x128xbf16, #tpu.memory_space<vmem>>, vector<2x10x8x128xbf16>
    %82 = vector.extract_strided_slice %79 {offsets = [0, 0, 0, 0], sizes = [2, 8, 8, 128], strides = [1, 1, 1, 1]} : vector<2x10x8x128xbf16> to vector<2x8x8x128xbf16>
    %83 = vector.shape_cast %82 : vector<2x8x8x128xbf16> to vector<128x128xbf16>
    %84 = vector.extract_strided_slice %80 {offsets = [0, 0, 0, 0], sizes = [2, 8, 8, 128], strides = [1, 1, 1, 1]} : vector<2x10x8x128xbf16> to vector<2x8x8x128xbf16>
    %85 = vector.shape_cast %84 : vector<2x8x8x128xbf16> to vector<128x128xbf16>
    %86 = vector.extract_strided_slice %81 {offsets = [0, 0, 0, 0], sizes = [2, 8, 8, 128], strides = [1, 1, 1, 1]} : vector<2x10x8x128xbf16> to vector<2x8x8x128xbf16>
    %87 = vector.shape_cast %86 : vector<2x8x8x128xbf16> to vector<128x128xbf16>
    %c0_103 = arith.constant 0 : index
    %c0_104 = arith.constant 0 : index
    %c0_105 = arith.constant 0 : index
    %c0_106 = arith.constant 0 : index
    %88 = vector.load %arg6[%c0_103, %c0_104, %c0_105, %c0_106] : memref<3x3x128x128xbf16, #tpu.memory_space<vmem>>, vector<1x1x128x128xbf16>
    %89 = vector.shape_cast %88 : vector<1x1x128x128xbf16> to vector<128x128xbf16>
    %cst_107 = arith.constant dense<0.000000e+00> : vector<128x128xf32>
    %90 = tpu.matmul %83, %89, %cst_107 {dimension_numbers = #tpu.dot_dimension_numbers<[1], [0], [0], [1], [0, 0, 1, 1], [], []>} : vector<128x128xbf16>, vector<128x128xbf16>, vector<128x128xf32> -> vector<128x128xf32>
    %c0_108 = arith.constant 0 : index
    %c1_109 = arith.constant 1 : index
    %c0_110 = arith.constant 0 : index
    %c0_111 = arith.constant 0 : index
    %91 = vector.load %arg6[%c0_108, %c1_109, %c0_110, %c0_111] : memref<3x3x128x128xbf16, #tpu.memory_space<vmem>>, vector<1x1x128x128xbf16>
    %92 = vector.shape_cast %91 : vector<1x1x128x128xbf16> to vector<128x128xbf16>
    %cst_112 = arith.constant dense<0.000000e+00> : vector<128x128xf32>
    %93 = tpu.matmul %85, %92, %cst_112 {dimension_numbers = #tpu.dot_dimension_numbers<[1], [0], [0], [1], [0, 0, 1, 1], [], []>} : vector<128x128xbf16>, vector<128x128xbf16>, vector<128x128xf32> -> vector<128x128xf32>
    %94 = arith.addf %90, %93 : vector<128x128xf32>
    %c0_113 = arith.constant 0 : index
    %c2_114 = arith.constant 2 : index
    %c0_115 = arith.constant 0 : index
    %c0_116 = arith.constant 0 : index
    %95 = vector.load %arg6[%c0_113, %c2_114, %c0_115, %c0_116] : memref<3x3x128x128xbf16, #tpu.memory_space<vmem>>, vector<1x1x128x128xbf16>
    %96 = vector.shape_cast %95 : vector<1x1x128x128xbf16> to vector<128x128xbf16>
    %cst_117 = arith.constant dense<0.000000e+00> : vector<128x128xf32>
    %97 = tpu.matmul %87, %96, %cst_117 {dimension_numbers = #tpu.dot_dimension_numbers<[1], [0], [0], [1], [0, 0, 1, 1], [], []>} : vector<128x128xbf16>, vector<128x128xbf16>, vector<128x128xf32> -> vector<128x128xf32>
    %98 = arith.addf %94, %97 : vector<128x128xf32>
    %99 = vector.extract_strided_slice %79 {offsets = [0, 1, 0, 0], sizes = [2, 8, 8, 128], strides = [1, 1, 1, 1]} : vector<2x10x8x128xbf16> to vector<2x8x8x128xbf16>
    %100 = vector.shape_cast %99 : vector<2x8x8x128xbf16> to vector<128x128xbf16>
    %101 = vector.extract_strided_slice %80 {offsets = [0, 1, 0, 0], sizes = [2, 8, 8, 128], strides = [1, 1, 1, 1]} : vector<2x10x8x128xbf16> to vector<2x8x8x128xbf16>
    %102 = vector.shape_cast %101 : vector<2x8x8x128xbf16> to vector<128x128xbf16>
    %103 = vector.extract_strided_slice %81 {offsets = [0, 1, 0, 0], sizes = [2, 8, 8, 128], strides = [1, 1, 1, 1]} : vector<2x10x8x128xbf16> to vector<2x8x8x128xbf16>
    %104 = vector.shape_cast %103 : vector<2x8x8x128xbf16> to vector<128x128xbf16>
    %c1_118 = arith.constant 1 : index
    %c0_119 = arith.constant 0 : index
    %c0_120 = arith.constant 0 : index
    %c0_121 = arith.constant 0 : index
    %105 = vector.load %arg6[%c1_118, %c0_119, %c0_120, %c0_121] : memref<3x3x128x128xbf16, #tpu.memory_space<vmem>>, vector<1x1x128x128xbf16>
    %106 = vector.shape_cast %105 : vector<1x1x128x128xbf16> to vector<128x128xbf16>
    %cst_122 = arith.constant dense<0.000000e+00> : vector<128x128xf32>
    %107 = tpu.matmul %100, %106, %cst_122 {dimension_numbers = #tpu.dot_dimension_numbers<[1], [0], [0], [1], [0, 0, 1, 1], [], []>} : vector<128x128xbf16>, vector<128x128xbf16>, vector<128x128xf32> -> vector<128x128xf32>
    %108 = arith.addf %98, %107 : vector<128x128xf32>
    %c1_123 = arith.constant 1 : index
    %c1_124 = arith.constant 1 : index
    %c0_125 = arith.constant 0 : index
    %c0_126 = arith.constant 0 : index
    %109 = vector.load %arg6[%c1_123, %c1_124, %c0_125, %c0_126] : memref<3x3x128x128xbf16, #tpu.memory_space<vmem>>, vector<1x1x128x128xbf16>
    %110 = vector.shape_cast %109 : vector<1x1x128x128xbf16> to vector<128x128xbf16>
    %cst_127 = arith.constant dense<0.000000e+00> : vector<128x128xf32>
    %111 = tpu.matmul %102, %110, %cst_127 {dimension_numbers = #tpu.dot_dimension_numbers<[1], [0], [0], [1], [0, 0, 1, 1], [], []>} : vector<128x128xbf16>, vector<128x128xbf16>, vector<128x128xf32> -> vector<128x128xf32>
    %112 = arith.addf %108, %111 : vector<128x128xf32>
    %c1_128 = arith.constant 1 : index
    %c2_129 = arith.constant 2 : index
    %c0_130 = arith.constant 0 : index
    %c0_131 = arith.constant 0 : index
    %113 = vector.load %arg6[%c1_128, %c2_129, %c0_130, %c0_131] : memref<3x3x128x128xbf16, #tpu.memory_space<vmem>>, vector<1x1x128x128xbf16>
    %114 = vector.shape_cast %113 : vector<1x1x128x128xbf16> to vector<128x128xbf16>
    %cst_132 = arith.constant dense<0.000000e+00> : vector<128x128xf32>
    %115 = tpu.matmul %104, %114, %cst_132 {dimension_numbers = #tpu.dot_dimension_numbers<[1], [0], [0], [1], [0, 0, 1, 1], [], []>} : vector<128x128xbf16>, vector<128x128xbf16>, vector<128x128xf32> -> vector<128x128xf32>
    %116 = arith.addf %112, %115 : vector<128x128xf32>
    %117 = vector.extract_strided_slice %79 {offsets = [0, 2, 0, 0], sizes = [2, 8, 8, 128], strides = [1, 1, 1, 1]} : vector<2x10x8x128xbf16> to vector<2x8x8x128xbf16>
    %118 = vector.shape_cast %117 : vector<2x8x8x128xbf16> to vector<128x128xbf16>
    %119 = vector.extract_strided_slice %80 {offsets = [0, 2, 0, 0], sizes = [2, 8, 8, 128], strides = [1, 1, 1, 1]} : vector<2x10x8x128xbf16> to vector<2x8x8x128xbf16>
    %120 = vector.shape_cast %119 : vector<2x8x8x128xbf16> to vector<128x128xbf16>
    %121 = vector.extract_strided_slice %81 {offsets = [0, 2, 0, 0], sizes = [2, 8, 8, 128], strides = [1, 1, 1, 1]} : vector<2x10x8x128xbf16> to vector<2x8x8x128xbf16>
    %122 = vector.shape_cast %121 : vector<2x8x8x128xbf16> to vector<128x128xbf16>
    %c2_133 = arith.constant 2 : index
    %c0_134 = arith.constant 0 : index
    %c0_135 = arith.constant 0 : index
    %c0_136 = arith.constant 0 : index
    %123 = vector.load %arg6[%c2_133, %c0_134, %c0_135, %c0_136] : memref<3x3x128x128xbf16, #tpu.memory_space<vmem>>, vector<1x1x128x128xbf16>
    %124 = vector.shape_cast %123 : vector<1x1x128x128xbf16> to vector<128x128xbf16>
    %cst_137 = arith.constant dense<0.000000e+00> : vector<128x128xf32>
    %125 = tpu.matmul %118, %124, %cst_137 {dimension_numbers = #tpu.dot_dimension_numbers<[1], [0], [0], [1], [0, 0, 1, 1], [], []>} : vector<128x128xbf16>, vector<128x128xbf16>, vector<128x128xf32> -> vector<128x128xf32>
    %126 = arith.addf %116, %125 : vector<128x128xf32>
    %c2_138 = arith.constant 2 : index
    %c1_139 = arith.constant 1 : index
    %c0_140 = arith.constant 0 : index
    %c0_141 = arith.constant 0 : index
    %127 = vector.load %arg6[%c2_138, %c1_139, %c0_140, %c0_141] : memref<3x3x128x128xbf16, #tpu.memory_space<vmem>>, vector<1x1x128x128xbf16>
    %128 = vector.shape_cast %127 : vector<1x1x128x128xbf16> to vector<128x128xbf16>
    %cst_142 = arith.constant dense<0.000000e+00> : vector<128x128xf32>
    %129 = tpu.matmul %120, %128, %cst_142 {dimension_numbers = #tpu.dot_dimension_numbers<[1], [0], [0], [1], [0, 0, 1, 1], [], []>} : vector<128x128xbf16>, vector<128x128xbf16>, vector<128x128xf32> -> vector<128x128xf32>
    %130 = arith.addf %126, %129 : vector<128x128xf32>
    %c2_143 = arith.constant 2 : index
    %c2_144 = arith.constant 2 : index
    %c0_145 = arith.constant 0 : index
    %c0_146 = arith.constant 0 : index
    %131 = vector.load %arg6[%c2_143, %c2_144, %c0_145, %c0_146] : memref<3x3x128x128xbf16, #tpu.memory_space<vmem>>, vector<1x1x128x128xbf16>
    %132 = vector.shape_cast %131 : vector<1x1x128x128xbf16> to vector<128x128xbf16>
    %cst_147 = arith.constant dense<0.000000e+00> : vector<128x128xf32>
    %133 = tpu.matmul %122, %132, %cst_147 {dimension_numbers = #tpu.dot_dimension_numbers<[1], [0], [0], [1], [0, 0, 1, 1], [], []>} : vector<128x128xbf16>, vector<128x128xbf16>, vector<128x128xf32> -> vector<128x128xf32>
    %134 = arith.addf %130, %133 : vector<128x128xf32>
    %c0_148 = arith.constant 0 : index
    %c0_149 = arith.constant 0 : index
    %135 = vector.load %arg7[%c0_148, %c0_149] : memref<1x128xbf16, #tpu.memory_space<vmem>>, vector<1x128xbf16>
    %136 = arith.extf %135 : vector<1x128xbf16> to vector<1x128xf32>
    %137 = vector.broadcast %136 : vector<1x128xf32> to vector<128x128xf32>
    %138 = arith.addf %134, %137 : vector<128x128xf32>
    %c0_150 = arith.constant 0 : index
    %c0_151 = arith.constant 0 : index
    %c0_152 = arith.constant 0 : index
    %c0_153 = arith.constant 0 : index
    %139 = vector.load %arg3[%c0_150, %c0_151, %c0_152, %c0_153] : memref<2x8x8x128xf32, #tpu.memory_space<vmem>>, vector<2x8x8x128xf32>
    %140 = vector.shape_cast %139 : vector<2x8x8x128xf32> to vector<128x128xf32>
    %141 = arith.subf %138, %140 : vector<128x128xf32>
    %142 = arith.mulf %141, %141 : vector<128x128xf32>
    %143 = vector.shape_cast %142 : vector<128x128xf32> to vector<1x128x128xf32>
    %cst_154 = arith.constant dense<0.000000e+00> : vector<1xf32>
    %144 = vector.multi_reduction <add>, %143, %cst_154 [1, 2] : vector<1x128x128xf32> to vector<1xf32>
    %145 = vector.shape_cast %144 : vector<1xf32> to vector<1x1x1xf32>
    %146 = vector.extract %145[0, 0, 0] : f32 from vector<1x1x1xf32>
    %147 = vector.broadcast %146 : f32 to vector<1x8x128xf32>
    %c0_155 = arith.constant 0 : index
    %c0_156 = arith.constant 0 : index
    %c0_157 = arith.constant 0 : index
    %148 = vector.load %arg8[%c0_155, %c0_156, %c0_157] : memref<1x8x128xf32, #tpu.memory_space<vmem>>, vector<1x8x128xf32>
    tpu.vector_store %arg8[%c0_155, %c0_156, %c0_157], %147 {strides = array<i32>} : memref<1x8x128xf32, #tpu.memory_space<vmem>>, vector<1x8x128xf32>,
    return
  }
  func.func @transform_0(%arg0: i32) -> (i32, i32, i32, i32) {
    %c0_i32 = arith.constant 0 : i32
    %c0_i32_0 = arith.constant 0 : i32
    %c0_i32_1 = arith.constant 0 : i32
    %c0_i32_2 = arith.constant 0 : i32
    return %arg0, %c0_i32, %c0_i32_0, %c0_i32_1 : i32, i32, i32, i32
  }
  func.func @transform_1(%arg0: i32) -> (i32, i32, i32, i32) {
    %c0_i32 = arith.constant 0 : i32
    %c0_i32_0 = arith.constant 0 : i32
    %c0_i32_1 = arith.constant 0 : i32
    %c0_i32_2 = arith.constant 0 : i32
    return %arg0, %c0_i32, %c0_i32_0, %c0_i32_1 : i32, i32, i32, i32
  }
  func.func @transform_2(%arg0: i32) -> (i32, i32, i32, i32) {
    %c0_i32 = arith.constant 0 : i32
    %c0_i32_0 = arith.constant 0 : i32
    %c0_i32_1 = arith.constant 0 : i32
    %c0_i32_2 = arith.constant 0 : i32
    return %arg0, %c0_i32, %c0_i32_0, %c0_i32_1 : i32, i32, i32, i32
  }
  func.func @transform_3(%arg0: i32) -> (i32, i32, i32, i32) {
    %c0_i32 = arith.constant 0 : i32
    %c0_i32_0 = arith.constant 0 : i32
    %c0_i32_1 = arith.constant 0 : i32
    %c0_i32_2 = arith.constant 0 : i32
    %c0_i32_3 = arith.constant 0 : i32
    return %c0_i32, %c0_i32_0, %c0_i32_1, %c0_i32_2 : i32, i32, i32, i32
  }
  func.func @transform_4(%arg0: i32) -> (i32, i32) {
    %c0_i32 = arith.constant 0 : i32
    %c0_i32_0 = arith.constant 0 : i32
    %c0_i32_1 = arith.constant 0 : i32
    return %c0_i32, %c0_i32_0 : i32, i32
  }
  func.func @transform_5(%arg0: i32) -> (i32, i32, i32, i32) {
    %c0_i32 = arith.constant 0 : i32
    %c0_i32_0 = arith.constant 0 : i32
    %c0_i32_1 = arith.constant 0 : i32
    %c0_i32_2 = arith.constant 0 : i32
    %c0_i32_3 = arith.constant 0 : i32
    return %c0_i32, %c0_i32_0, %c0_i32_1, %c0_i32_2 : i32, i32, i32, i32
  }
  func.func @transform_6(%arg0: i32) -> (i32, i32) {
    %c0_i32 = arith.constant 0 : i32
    %c0_i32_0 = arith.constant 0 : i32
    %c0_i32_1 = arith.constant 0 : i32
    return %c0_i32, %c0_i32_0 : i32, i32
  }
  func.func @transform_7(%arg0: i32) -> (i32, i32, i32) {
    %c0_i32 = arith.constant 0 : i32
    %c0_i32_0 = arith.constant 0 : i32
    %c0_i32_1 = arith.constant 0 : i32
    return %arg0, %c0_i32, %c0_i32_0 : i32, i32, i32
  }
}

module attributes {stable_mosaic.version = 11 : i64} {
  func.func @_mgd_stage_kernel(%arg0: i32, %arg1: memref<1x16x16x128xbf16, #tpu.memory_space<vmem>>, %arg2: memref<1x16x16x1xf32, #tpu.memory_space<vmem>>, %arg3: memref<1x16x16x128xf32, #tpu.memory_space<vmem>>, %arg4: memref<3x3x128x128xbf16, #tpu.memory_space<vmem>>, %arg5: memref<1x128xbf16, #tpu.memory_space<vmem>>, %arg6: memref<3x3x128x128xbf16, #tpu.memory_space<vmem>>, %arg7: memref<1x128xbf16, #tpu.memory_space<vmem>>, %arg8: memref<1x8x128xf32, #tpu.memory_space<vmem>>, %arg9: memref<1x18x18x128xbf16, #tpu.memory_space<vmem>>) attributes {dimension_semantics = [#tpu.dimension_semantics<parallel>], iteration_bounds = array<i64: 2>, scalar_prefetch = 0 : i64, scratch_operands = 1 : i64, tpu.core_type = #tpu.core_type<tc>, window_params = [{transform_indices = @transform_0, window_bounds = array<i64: 1, 16, 16, 128>}, {transform_indices = @transform_1, window_bounds = array<i64: 1, 16, 16, 1>}, {transform_indices = @transform_2, window_bounds = array<i64: 1, 16, 16, 128>}, {pipeline_mode = #tpu.pipeline_mode<synchronous>, transform_indices = @transform_3, window_bounds = array<i64: 3, 3, 128, 128>}, {pipeline_mode = #tpu.pipeline_mode<synchronous>, transform_indices = @transform_4, window_bounds = array<i64: 1, 128>}, {pipeline_mode = #tpu.pipeline_mode<synchronous>, transform_indices = @transform_5, window_bounds = array<i64: 3, 3, 128, 128>}, {pipeline_mode = #tpu.pipeline_mode<synchronous>, transform_indices = @transform_6, window_bounds = array<i64: 1, 128>}, {transform_indices = @transform_7, window_bounds = array<i64: 1, 8, 128>}]} {
    %c0 = arith.constant 0 : index
    %c0_0 = arith.constant 0 : index
    %c0_1 = arith.constant 0 : index
    %c0_2 = arith.constant 0 : index
    %0 = vector.load %arg1[%c0, %c0_0, %c0_1, %c0_2] : memref<1x16x16x128xbf16, #tpu.memory_space<vmem>>, vector<1x16x16x128xbf16>
    %c0_3 = arith.constant 0 : index
    %c0_4 = arith.constant 0 : index
    %c0_5 = arith.constant 0 : index
    %c0_6 = arith.constant 0 : index
    %1 = vector.load %arg2[%c0_3, %c0_4, %c0_5, %c0_6] : memref<1x16x16x1xf32, #tpu.memory_space<vmem>>, vector<1x16x16x1xf32>
    %2 = arith.truncf %1 : vector<1x16x16x1xf32> to vector<1x16x16x1xbf16>
    %3 = vector.broadcast %2 : vector<1x16x16x1xbf16> to vector<1x16x16x128xbf16>
    %4 = arith.mulf %0, %3 : vector<1x16x16x128xbf16>
    %cst = arith.constant 0.000000e+00 : bf16
    %5 = vector.broadcast %cst : bf16 to vector<1x1x18x128xbf16>
    %c0_7 = arith.constant 0 : index
    %c0_8 = arith.constant 0 : index
    %c0_9 = arith.constant 0 : index
    %c0_10 = arith.constant 0 : index
    %6 = vector.load %arg9[%c0_7, %c0_8, %c0_9, %c0_10] : memref<1x18x18x128xbf16, #tpu.memory_space<vmem>>, vector<1x1x18x128xbf16>
    tpu.vector_store %arg9[%c0_7, %c0_8, %c0_9, %c0_10], %5 {strides = array<i32>} : memref<1x18x18x128xbf16, #tpu.memory_space<vmem>>, vector<1x1x18x128xbf16>,
    %cst_11 = arith.constant 0.000000e+00 : bf16
    %7 = vector.broadcast %cst_11 : bf16 to vector<1x1x18x128xbf16>
    %c0_12 = arith.constant 0 : index
    %c17 = arith.constant 17 : index
    %c0_13 = arith.constant 0 : index
    %c0_14 = arith.constant 0 : index
    %8 = vector.load %arg9[%c0_12, %c17, %c0_13, %c0_14] : memref<1x18x18x128xbf16, #tpu.memory_space<vmem>>, vector<1x1x18x128xbf16>
    tpu.vector_store %arg9[%c0_12, %c17, %c0_13, %c0_14], %7 {strides = array<i32>} : memref<1x18x18x128xbf16, #tpu.memory_space<vmem>>, vector<1x1x18x128xbf16>,
    %cst_15 = arith.constant 0.000000e+00 : bf16
    %9 = vector.broadcast %cst_15 : bf16 to vector<1x18x1x128xbf16>
    %c0_16 = arith.constant 0 : index
    %c0_17 = arith.constant 0 : index
    %c0_18 = arith.constant 0 : index
    %c0_19 = arith.constant 0 : index
    %10 = vector.load %arg9[%c0_16, %c0_17, %c0_18, %c0_19] : memref<1x18x18x128xbf16, #tpu.memory_space<vmem>>, vector<1x18x1x128xbf16>
    tpu.vector_store %arg9[%c0_16, %c0_17, %c0_18, %c0_19], %9 {strides = array<i32>} : memref<1x18x18x128xbf16, #tpu.memory_space<vmem>>, vector<1x18x1x128xbf16>,
    %cst_20 = arith.constant 0.000000e+00 : bf16
    %11 = vector.broadcast %cst_20 : bf16 to vector<1x18x1x128xbf16>
    %c0_21 = arith.constant 0 : index
    %c0_22 = arith.constant 0 : index
    %c17_23 = arith.constant 17 : index
    %c0_24 = arith.constant 0 : index
    %12 = vector.load %arg9[%c0_21, %c0_22, %c17_23, %c0_24] : memref<1x18x18x128xbf16, #tpu.memory_space<vmem>>, vector<1x18x1x128xbf16>
    tpu.vector_store %arg9[%c0_21, %c0_22, %c17_23, %c0_24], %11 {strides = array<i32>} : memref<1x18x18x128xbf16, #tpu.memory_space<vmem>>, vector<1x18x1x128xbf16>,
    %c0_25 = arith.constant 0 : index
    %c1 = arith.constant 1 : index
    %c1_26 = arith.constant 1 : index
    %c0_27 = arith.constant 0 : index
    %13 = vector.load %arg9[%c0_25, %c1, %c1_26, %c0_27] : memref<1x18x18x128xbf16, #tpu.memory_space<vmem>>, vector<1x16x16x128xbf16>
    tpu.vector_store %arg9[%c0_25, %c1, %c1_26, %c0_27], %4 {strides = array<i32>} : memref<1x18x18x128xbf16, #tpu.memory_space<vmem>>, vector<1x16x16x128xbf16>,
    %c0_28 = arith.constant 0 : index
    %c0_29 = arith.constant 0 : index
    %c0_30 = arith.constant 0 : index
    %c0_31 = arith.constant 0 : index
    %14 = vector.load %arg9[%c0_28, %c0_29, %c0_30, %c0_31] : memref<1x18x18x128xbf16, #tpu.memory_space<vmem>>, vector<1x18x16x128xbf16>
    %c0_32 = arith.constant 0 : index
    %c0_33 = arith.constant 0 : index
    %c1_34 = arith.constant 1 : index
    %c0_35 = arith.constant 0 : index
    %15 = vector.load %arg9[%c0_32, %c0_33, %c1_34, %c0_35] : memref<1x18x18x128xbf16, #tpu.memory_space<vmem>>, vector<1x18x16x128xbf16>
    %c0_36 = arith.constant 0 : index
    %c0_37 = arith.constant 0 : index
    %c2 = arith.constant 2 : index
    %c0_38 = arith.constant 0 : index
    %16 = vector.load %arg9[%c0_36, %c0_37, %c2, %c0_38] : memref<1x18x18x128xbf16, #tpu.memory_space<vmem>>, vector<1x18x16x128xbf16>
    %17 = vector.extract_strided_slice %14 {offsets = [0, 0, 0, 0], sizes = [1, 16, 16, 128], strides = [1, 1, 1, 1]} : vector<1x18x16x128xbf16> to vector<1x16x16x128xbf16>
    %18 = vector.shape_cast %17 : vector<1x16x16x128xbf16> to vector<256x128xbf16>
    %19 = vector.extract_strided_slice %15 {offsets = [0, 0, 0, 0], sizes = [1, 16, 16, 128], strides = [1, 1, 1, 1]} : vector<1x18x16x128xbf16> to vector<1x16x16x128xbf16>
    %20 = vector.shape_cast %19 : vector<1x16x16x128xbf16> to vector<256x128xbf16>
    %21 = vector.extract_strided_slice %16 {offsets = [0, 0, 0, 0], sizes = [1, 16, 16, 128], strides = [1, 1, 1, 1]} : vector<1x18x16x128xbf16> to vector<1x16x16x128xbf16>
    %22 = vector.shape_cast %21 : vector<1x16x16x128xbf16> to vector<256x128xbf16>
    %c0_39 = arith.constant 0 : index
    %c0_40 = arith.constant 0 : index
    %c0_41 = arith.constant 0 : index
    %c0_42 = arith.constant 0 : index
    %23 = vector.load %arg4[%c0_39, %c0_40, %c0_41, %c0_42] : memref<3x3x128x128xbf16, #tpu.memory_space<vmem>>, vector<1x1x128x128xbf16>
    %24 = vector.shape_cast %23 : vector<1x1x128x128xbf16> to vector<128x128xbf16>
    %cst_43 = arith.constant dense<0.000000e+00> : vector<256x128xf32>
    %25 = tpu.matmul %18, %24, %cst_43 {dimension_numbers = #tpu.dot_dimension_numbers<[1], [0], [0], [1], [0, 0, 1, 1], [], []>} : vector<256x128xbf16>, vector<128x128xbf16>, vector<256x128xf32> -> vector<256x128xf32>
    %c0_44 = arith.constant 0 : index
    %c1_45 = arith.constant 1 : index
    %c0_46 = arith.constant 0 : index
    %c0_47 = arith.constant 0 : index
    %26 = vector.load %arg4[%c0_44, %c1_45, %c0_46, %c0_47] : memref<3x3x128x128xbf16, #tpu.memory_space<vmem>>, vector<1x1x128x128xbf16>
    %27 = vector.shape_cast %26 : vector<1x1x128x128xbf16> to vector<128x128xbf16>
    %cst_48 = arith.constant dense<0.000000e+00> : vector<256x128xf32>
    %28 = tpu.matmul %20, %27, %cst_48 {dimension_numbers = #tpu.dot_dimension_numbers<[1], [0], [0], [1], [0, 0, 1, 1], [], []>} : vector<256x128xbf16>, vector<128x128xbf16>, vector<256x128xf32> -> vector<256x128xf32>
    %29 = arith.addf %25, %28 : vector<256x128xf32>
    %c0_49 = arith.constant 0 : index
    %c2_50 = arith.constant 2 : index
    %c0_51 = arith.constant 0 : index
    %c0_52 = arith.constant 0 : index
    %30 = vector.load %arg4[%c0_49, %c2_50, %c0_51, %c0_52] : memref<3x3x128x128xbf16, #tpu.memory_space<vmem>>, vector<1x1x128x128xbf16>
    %31 = vector.shape_cast %30 : vector<1x1x128x128xbf16> to vector<128x128xbf16>
    %cst_53 = arith.constant dense<0.000000e+00> : vector<256x128xf32>
    %32 = tpu.matmul %22, %31, %cst_53 {dimension_numbers = #tpu.dot_dimension_numbers<[1], [0], [0], [1], [0, 0, 1, 1], [], []>} : vector<256x128xbf16>, vector<128x128xbf16>, vector<256x128xf32> -> vector<256x128xf32>
    %33 = arith.addf %29, %32 : vector<256x128xf32>
    %34 = vector.extract_strided_slice %14 {offsets = [0, 1, 0, 0], sizes = [1, 16, 16, 128], strides = [1, 1, 1, 1]} : vector<1x18x16x128xbf16> to vector<1x16x16x128xbf16>
    %35 = vector.shape_cast %34 : vector<1x16x16x128xbf16> to vector<256x128xbf16>
    %36 = vector.extract_strided_slice %15 {offsets = [0, 1, 0, 0], sizes = [1, 16, 16, 128], strides = [1, 1, 1, 1]} : vector<1x18x16x128xbf16> to vector<1x16x16x128xbf16>
    %37 = vector.shape_cast %36 : vector<1x16x16x128xbf16> to vector<256x128xbf16>
    %38 = vector.extract_strided_slice %16 {offsets = [0, 1, 0, 0], sizes = [1, 16, 16, 128], strides = [1, 1, 1, 1]} : vector<1x18x16x128xbf16> to vector<1x16x16x128xbf16>
    %39 = vector.shape_cast %38 : vector<1x16x16x128xbf16> to vector<256x128xbf16>
    %c1_54 = arith.constant 1 : index
    %c0_55 = arith.constant 0 : index
    %c0_56 = arith.constant 0 : index
    %c0_57 = arith.constant 0 : index
    %40 = vector.load %arg4[%c1_54, %c0_55, %c0_56, %c0_57] : memref<3x3x128x128xbf16, #tpu.memory_space<vmem>>, vector<1x1x128x128xbf16>
    %41 = vector.shape_cast %40 : vector<1x1x128x128xbf16> to vector<128x128xbf16>
    %cst_58 = arith.constant dense<0.000000e+00> : vector<256x128xf32>
    %42 = tpu.matmul %35, %41, %cst_58 {dimension_numbers = #tpu.dot_dimension_numbers<[1], [0], [0], [1], [0, 0, 1, 1], [], []>} : vector<256x128xbf16>, vector<128x128xbf16>, vector<256x128xf32> -> vector<256x128xf32>
    %43 = arith.addf %33, %42 : vector<256x128xf32>
    %c1_59 = arith.constant 1 : index
    %c1_60 = arith.constant 1 : index
    %c0_61 = arith.constant 0 : index
    %c0_62 = arith.constant 0 : index
    %44 = vector.load %arg4[%c1_59, %c1_60, %c0_61, %c0_62] : memref<3x3x128x128xbf16, #tpu.memory_space<vmem>>, vector<1x1x128x128xbf16>
    %45 = vector.shape_cast %44 : vector<1x1x128x128xbf16> to vector<128x128xbf16>
    %cst_63 = arith.constant dense<0.000000e+00> : vector<256x128xf32>
    %46 = tpu.matmul %37, %45, %cst_63 {dimension_numbers = #tpu.dot_dimension_numbers<[1], [0], [0], [1], [0, 0, 1, 1], [], []>} : vector<256x128xbf16>, vector<128x128xbf16>, vector<256x128xf32> -> vector<256x128xf32>
    %47 = arith.addf %43, %46 : vector<256x128xf32>
    %c1_64 = arith.constant 1 : index
    %c2_65 = arith.constant 2 : index
    %c0_66 = arith.constant 0 : index
    %c0_67 = arith.constant 0 : index
    %48 = vector.load %arg4[%c1_64, %c2_65, %c0_66, %c0_67] : memref<3x3x128x128xbf16, #tpu.memory_space<vmem>>, vector<1x1x128x128xbf16>
    %49 = vector.shape_cast %48 : vector<1x1x128x128xbf16> to vector<128x128xbf16>
    %cst_68 = arith.constant dense<0.000000e+00> : vector<256x128xf32>
    %50 = tpu.matmul %39, %49, %cst_68 {dimension_numbers = #tpu.dot_dimension_numbers<[1], [0], [0], [1], [0, 0, 1, 1], [], []>} : vector<256x128xbf16>, vector<128x128xbf16>, vector<256x128xf32> -> vector<256x128xf32>
    %51 = arith.addf %47, %50 : vector<256x128xf32>
    %52 = vector.extract_strided_slice %14 {offsets = [0, 2, 0, 0], sizes = [1, 16, 16, 128], strides = [1, 1, 1, 1]} : vector<1x18x16x128xbf16> to vector<1x16x16x128xbf16>
    %53 = vector.shape_cast %52 : vector<1x16x16x128xbf16> to vector<256x128xbf16>
    %54 = vector.extract_strided_slice %15 {offsets = [0, 2, 0, 0], sizes = [1, 16, 16, 128], strides = [1, 1, 1, 1]} : vector<1x18x16x128xbf16> to vector<1x16x16x128xbf16>
    %55 = vector.shape_cast %54 : vector<1x16x16x128xbf16> to vector<256x128xbf16>
    %56 = vector.extract_strided_slice %16 {offsets = [0, 2, 0, 0], sizes = [1, 16, 16, 128], strides = [1, 1, 1, 1]} : vector<1x18x16x128xbf16> to vector<1x16x16x128xbf16>
    %57 = vector.shape_cast %56 : vector<1x16x16x128xbf16> to vector<256x128xbf16>
    %c2_69 = arith.constant 2 : index
    %c0_70 = arith.constant 0 : index
    %c0_71 = arith.constant 0 : index
    %c0_72 = arith.constant 0 : index
    %58 = vector.load %arg4[%c2_69, %c0_70, %c0_71, %c0_72] : memref<3x3x128x128xbf16, #tpu.memory_space<vmem>>, vector<1x1x128x128xbf16>
    %59 = vector.shape_cast %58 : vector<1x1x128x128xbf16> to vector<128x128xbf16>
    %cst_73 = arith.constant dense<0.000000e+00> : vector<256x128xf32>
    %60 = tpu.matmul %53, %59, %cst_73 {dimension_numbers = #tpu.dot_dimension_numbers<[1], [0], [0], [1], [0, 0, 1, 1], [], []>} : vector<256x128xbf16>, vector<128x128xbf16>, vector<256x128xf32> -> vector<256x128xf32>
    %61 = arith.addf %51, %60 : vector<256x128xf32>
    %c2_74 = arith.constant 2 : index
    %c1_75 = arith.constant 1 : index
    %c0_76 = arith.constant 0 : index
    %c0_77 = arith.constant 0 : index
    %62 = vector.load %arg4[%c2_74, %c1_75, %c0_76, %c0_77] : memref<3x3x128x128xbf16, #tpu.memory_space<vmem>>, vector<1x1x128x128xbf16>
    %63 = vector.shape_cast %62 : vector<1x1x128x128xbf16> to vector<128x128xbf16>
    %cst_78 = arith.constant dense<0.000000e+00> : vector<256x128xf32>
    %64 = tpu.matmul %55, %63, %cst_78 {dimension_numbers = #tpu.dot_dimension_numbers<[1], [0], [0], [1], [0, 0, 1, 1], [], []>} : vector<256x128xbf16>, vector<128x128xbf16>, vector<256x128xf32> -> vector<256x128xf32>
    %65 = arith.addf %61, %64 : vector<256x128xf32>
    %c2_79 = arith.constant 2 : index
    %c2_80 = arith.constant 2 : index
    %c0_81 = arith.constant 0 : index
    %c0_82 = arith.constant 0 : index
    %66 = vector.load %arg4[%c2_79, %c2_80, %c0_81, %c0_82] : memref<3x3x128x128xbf16, #tpu.memory_space<vmem>>, vector<1x1x128x128xbf16>
    %67 = vector.shape_cast %66 : vector<1x1x128x128xbf16> to vector<128x128xbf16>
    %cst_83 = arith.constant dense<0.000000e+00> : vector<256x128xf32>
    %68 = tpu.matmul %57, %67, %cst_83 {dimension_numbers = #tpu.dot_dimension_numbers<[1], [0], [0], [1], [0, 0, 1, 1], [], []>} : vector<256x128xbf16>, vector<128x128xbf16>, vector<256x128xf32> -> vector<256x128xf32>
    %69 = arith.addf %65, %68 : vector<256x128xf32>
    %c0_84 = arith.constant 0 : index
    %c0_85 = arith.constant 0 : index
    %70 = vector.load %arg5[%c0_84, %c0_85] : memref<1x128xbf16, #tpu.memory_space<vmem>>, vector<1x128xbf16>
    %71 = arith.extf %70 : vector<1x128xbf16> to vector<1x128xf32>
    %72 = vector.broadcast %71 : vector<1x128xf32> to vector<256x128xf32>
    %73 = arith.addf %69, %72 : vector<256x128xf32>
    %cst_86 = arith.constant 0.000000e+00 : f32
    %74 = vector.broadcast %cst_86 : f32 to vector<256x128xf32>
    %75 = arith.maximumf %73, %74 : vector<256x128xf32>
    %76 = vector.shape_cast %75 : vector<256x128xf32> to vector<1x16x16x128xf32>
    %77 = arith.truncf %76 : vector<1x16x16x128xf32> to vector<1x16x16x128xbf16>
    %c0_87 = arith.constant 0 : index
    %c1_88 = arith.constant 1 : index
    %c1_89 = arith.constant 1 : index
    %c0_90 = arith.constant 0 : index
    %78 = vector.load %arg9[%c0_87, %c1_88, %c1_89, %c0_90] : memref<1x18x18x128xbf16, #tpu.memory_space<vmem>>, vector<1x16x16x128xbf16>
    tpu.vector_store %arg9[%c0_87, %c1_88, %c1_89, %c0_90], %77 {strides = array<i32>} : memref<1x18x18x128xbf16, #tpu.memory_space<vmem>>, vector<1x16x16x128xbf16>,
    %c0_91 = arith.constant 0 : index
    %c0_92 = arith.constant 0 : index
    %c0_93 = arith.constant 0 : index
    %c0_94 = arith.constant 0 : index
    %79 = vector.load %arg9[%c0_91, %c0_92, %c0_93, %c0_94] : memref<1x18x18x128xbf16, #tpu.memory_space<vmem>>, vector<1x18x16x128xbf16>
    %c0_95 = arith.constant 0 : index
    %c0_96 = arith.constant 0 : index
    %c1_97 = arith.constant 1 : index
    %c0_98 = arith.constant 0 : index
    %80 = vector.load %arg9[%c0_95, %c0_96, %c1_97, %c0_98] : memref<1x18x18x128xbf16, #tpu.memory_space<vmem>>, vector<1x18x16x128xbf16>
    %c0_99 = arith.constant 0 : index
    %c0_100 = arith.constant 0 : index
    %c2_101 = arith.constant 2 : index
    %c0_102 = arith.constant 0 : index
    %81 = vector.load %arg9[%c0_99, %c0_100, %c2_101, %c0_102] : memref<1x18x18x128xbf16, #tpu.memory_space<vmem>>, vector<1x18x16x128xbf16>
    %82 = vector.extract_strided_slice %79 {offsets = [0, 0, 0, 0], sizes = [1, 16, 16, 128], strides = [1, 1, 1, 1]} : vector<1x18x16x128xbf16> to vector<1x16x16x128xbf16>
    %83 = vector.shape_cast %82 : vector<1x16x16x128xbf16> to vector<256x128xbf16>
    %84 = vector.extract_strided_slice %80 {offsets = [0, 0, 0, 0], sizes = [1, 16, 16, 128], strides = [1, 1, 1, 1]} : vector<1x18x16x128xbf16> to vector<1x16x16x128xbf16>
    %85 = vector.shape_cast %84 : vector<1x16x16x128xbf16> to vector<256x128xbf16>
    %86 = vector.extract_strided_slice %81 {offsets = [0, 0, 0, 0], sizes = [1, 16, 16, 128], strides = [1, 1, 1, 1]} : vector<1x18x16x128xbf16> to vector<1x16x16x128xbf16>
    %87 = vector.shape_cast %86 : vector<1x16x16x128xbf16> to vector<256x128xbf16>
    %c0_103 = arith.constant 0 : index
    %c0_104 = arith.constant 0 : index
    %c0_105 = arith.constant 0 : index
    %c0_106 = arith.constant 0 : index
    %88 = vector.load %arg6[%c0_103, %c0_104, %c0_105, %c0_106] : memref<3x3x128x128xbf16, #tpu.memory_space<vmem>>, vector<1x1x128x128xbf16>
    %89 = vector.shape_cast %88 : vector<1x1x128x128xbf16> to vector<128x128xbf16>
    %cst_107 = arith.constant dense<0.000000e+00> : vector<256x128xf32>
    %90 = tpu.matmul %83, %89, %cst_107 {dimension_numbers = #tpu.dot_dimension_numbers<[1], [0], [0], [1], [0, 0, 1, 1], [], []>} : vector<256x128xbf16>, vector<128x128xbf16>, vector<256x128xf32> -> vector<256x128xf32>
    %c0_108 = arith.constant 0 : index
    %c1_109 = arith.constant 1 : index
    %c0_110 = arith.constant 0 : index
    %c0_111 = arith.constant 0 : index
    %91 = vector.load %arg6[%c0_108, %c1_109, %c0_110, %c0_111] : memref<3x3x128x128xbf16, #tpu.memory_space<vmem>>, vector<1x1x128x128xbf16>
    %92 = vector.shape_cast %91 : vector<1x1x128x128xbf16> to vector<128x128xbf16>
    %cst_112 = arith.constant dense<0.000000e+00> : vector<256x128xf32>
    %93 = tpu.matmul %85, %92, %cst_112 {dimension_numbers = #tpu.dot_dimension_numbers<[1], [0], [0], [1], [0, 0, 1, 1], [], []>} : vector<256x128xbf16>, vector<128x128xbf16>, vector<256x128xf32> -> vector<256x128xf32>
    %94 = arith.addf %90, %93 : vector<256x128xf32>
    %c0_113 = arith.constant 0 : index
    %c2_114 = arith.constant 2 : index
    %c0_115 = arith.constant 0 : index
    %c0_116 = arith.constant 0 : index
    %95 = vector.load %arg6[%c0_113, %c2_114, %c0_115, %c0_116] : memref<3x3x128x128xbf16, #tpu.memory_space<vmem>>, vector<1x1x128x128xbf16>
    %96 = vector.shape_cast %95 : vector<1x1x128x128xbf16> to vector<128x128xbf16>
    %cst_117 = arith.constant dense<0.000000e+00> : vector<256x128xf32>
    %97 = tpu.matmul %87, %96, %cst_117 {dimension_numbers = #tpu.dot_dimension_numbers<[1], [0], [0], [1], [0, 0, 1, 1], [], []>} : vector<256x128xbf16>, vector<128x128xbf16>, vector<256x128xf32> -> vector<256x128xf32>
    %98 = arith.addf %94, %97 : vector<256x128xf32>
    %99 = vector.extract_strided_slice %79 {offsets = [0, 1, 0, 0], sizes = [1, 16, 16, 128], strides = [1, 1, 1, 1]} : vector<1x18x16x128xbf16> to vector<1x16x16x128xbf16>
    %100 = vector.shape_cast %99 : vector<1x16x16x128xbf16> to vector<256x128xbf16>
    %101 = vector.extract_strided_slice %80 {offsets = [0, 1, 0, 0], sizes = [1, 16, 16, 128], strides = [1, 1, 1, 1]} : vector<1x18x16x128xbf16> to vector<1x16x16x128xbf16>
    %102 = vector.shape_cast %101 : vector<1x16x16x128xbf16> to vector<256x128xbf16>
    %103 = vector.extract_strided_slice %81 {offsets = [0, 1, 0, 0], sizes = [1, 16, 16, 128], strides = [1, 1, 1, 1]} : vector<1x18x16x128xbf16> to vector<1x16x16x128xbf16>
    %104 = vector.shape_cast %103 : vector<1x16x16x128xbf16> to vector<256x128xbf16>
    %c1_118 = arith.constant 1 : index
    %c0_119 = arith.constant 0 : index
    %c0_120 = arith.constant 0 : index
    %c0_121 = arith.constant 0 : index
    %105 = vector.load %arg6[%c1_118, %c0_119, %c0_120, %c0_121] : memref<3x3x128x128xbf16, #tpu.memory_space<vmem>>, vector<1x1x128x128xbf16>
    %106 = vector.shape_cast %105 : vector<1x1x128x128xbf16> to vector<128x128xbf16>
    %cst_122 = arith.constant dense<0.000000e+00> : vector<256x128xf32>
    %107 = tpu.matmul %100, %106, %cst_122 {dimension_numbers = #tpu.dot_dimension_numbers<[1], [0], [0], [1], [0, 0, 1, 1], [], []>} : vector<256x128xbf16>, vector<128x128xbf16>, vector<256x128xf32> -> vector<256x128xf32>
    %108 = arith.addf %98, %107 : vector<256x128xf32>
    %c1_123 = arith.constant 1 : index
    %c1_124 = arith.constant 1 : index
    %c0_125 = arith.constant 0 : index
    %c0_126 = arith.constant 0 : index
    %109 = vector.load %arg6[%c1_123, %c1_124, %c0_125, %c0_126] : memref<3x3x128x128xbf16, #tpu.memory_space<vmem>>, vector<1x1x128x128xbf16>
    %110 = vector.shape_cast %109 : vector<1x1x128x128xbf16> to vector<128x128xbf16>
    %cst_127 = arith.constant dense<0.000000e+00> : vector<256x128xf32>
    %111 = tpu.matmul %102, %110, %cst_127 {dimension_numbers = #tpu.dot_dimension_numbers<[1], [0], [0], [1], [0, 0, 1, 1], [], []>} : vector<256x128xbf16>, vector<128x128xbf16>, vector<256x128xf32> -> vector<256x128xf32>
    %112 = arith.addf %108, %111 : vector<256x128xf32>
    %c1_128 = arith.constant 1 : index
    %c2_129 = arith.constant 2 : index
    %c0_130 = arith.constant 0 : index
    %c0_131 = arith.constant 0 : index
    %113 = vector.load %arg6[%c1_128, %c2_129, %c0_130, %c0_131] : memref<3x3x128x128xbf16, #tpu.memory_space<vmem>>, vector<1x1x128x128xbf16>
    %114 = vector.shape_cast %113 : vector<1x1x128x128xbf16> to vector<128x128xbf16>
    %cst_132 = arith.constant dense<0.000000e+00> : vector<256x128xf32>
    %115 = tpu.matmul %104, %114, %cst_132 {dimension_numbers = #tpu.dot_dimension_numbers<[1], [0], [0], [1], [0, 0, 1, 1], [], []>} : vector<256x128xbf16>, vector<128x128xbf16>, vector<256x128xf32> -> vector<256x128xf32>
    %116 = arith.addf %112, %115 : vector<256x128xf32>
    %117 = vector.extract_strided_slice %79 {offsets = [0, 2, 0, 0], sizes = [1, 16, 16, 128], strides = [1, 1, 1, 1]} : vector<1x18x16x128xbf16> to vector<1x16x16x128xbf16>
    %118 = vector.shape_cast %117 : vector<1x16x16x128xbf16> to vector<256x128xbf16>
    %119 = vector.extract_strided_slice %80 {offsets = [0, 2, 0, 0], sizes = [1, 16, 16, 128], strides = [1, 1, 1, 1]} : vector<1x18x16x128xbf16> to vector<1x16x16x128xbf16>
    %120 = vector.shape_cast %119 : vector<1x16x16x128xbf16> to vector<256x128xbf16>
    %121 = vector.extract_strided_slice %81 {offsets = [0, 2, 0, 0], sizes = [1, 16, 16, 128], strides = [1, 1, 1, 1]} : vector<1x18x16x128xbf16> to vector<1x16x16x128xbf16>
    %122 = vector.shape_cast %121 : vector<1x16x16x128xbf16> to vector<256x128xbf16>
    %c2_133 = arith.constant 2 : index
    %c0_134 = arith.constant 0 : index
    %c0_135 = arith.constant 0 : index
    %c0_136 = arith.constant 0 : index
    %123 = vector.load %arg6[%c2_133, %c0_134, %c0_135, %c0_136] : memref<3x3x128x128xbf16, #tpu.memory_space<vmem>>, vector<1x1x128x128xbf16>
    %124 = vector.shape_cast %123 : vector<1x1x128x128xbf16> to vector<128x128xbf16>
    %cst_137 = arith.constant dense<0.000000e+00> : vector<256x128xf32>
    %125 = tpu.matmul %118, %124, %cst_137 {dimension_numbers = #tpu.dot_dimension_numbers<[1], [0], [0], [1], [0, 0, 1, 1], [], []>} : vector<256x128xbf16>, vector<128x128xbf16>, vector<256x128xf32> -> vector<256x128xf32>
    %126 = arith.addf %116, %125 : vector<256x128xf32>
    %c2_138 = arith.constant 2 : index
    %c1_139 = arith.constant 1 : index
    %c0_140 = arith.constant 0 : index
    %c0_141 = arith.constant 0 : index
    %127 = vector.load %arg6[%c2_138, %c1_139, %c0_140, %c0_141] : memref<3x3x128x128xbf16, #tpu.memory_space<vmem>>, vector<1x1x128x128xbf16>
    %128 = vector.shape_cast %127 : vector<1x1x128x128xbf16> to vector<128x128xbf16>
    %cst_142 = arith.constant dense<0.000000e+00> : vector<256x128xf32>
    %129 = tpu.matmul %120, %128, %cst_142 {dimension_numbers = #tpu.dot_dimension_numbers<[1], [0], [0], [1], [0, 0, 1, 1], [], []>} : vector<256x128xbf16>, vector<128x128xbf16>, vector<256x128xf32> -> vector<256x128xf32>
    %130 = arith.addf %126, %129 : vector<256x128xf32>
    %c2_143 = arith.constant 2 : index
    %c2_144 = arith.constant 2 : index
    %c0_145 = arith.constant 0 : index
    %c0_146 = arith.constant 0 : index
    %131 = vector.load %arg6[%c2_143, %c2_144, %c0_145, %c0_146] : memref<3x3x128x128xbf16, #tpu.memory_space<vmem>>, vector<1x1x128x128xbf16>
    %132 = vector.shape_cast %131 : vector<1x1x128x128xbf16> to vector<128x128xbf16>
    %cst_147 = arith.constant dense<0.000000e+00> : vector<256x128xf32>
    %133 = tpu.matmul %122, %132, %cst_147 {dimension_numbers = #tpu.dot_dimension_numbers<[1], [0], [0], [1], [0, 0, 1, 1], [], []>} : vector<256x128xbf16>, vector<128x128xbf16>, vector<256x128xf32> -> vector<256x128xf32>
    %134 = arith.addf %130, %133 : vector<256x128xf32>
    %c0_148 = arith.constant 0 : index
    %c0_149 = arith.constant 0 : index
    %135 = vector.load %arg7[%c0_148, %c0_149] : memref<1x128xbf16, #tpu.memory_space<vmem>>, vector<1x128xbf16>
    %136 = arith.extf %135 : vector<1x128xbf16> to vector<1x128xf32>
    %137 = vector.broadcast %136 : vector<1x128xf32> to vector<256x128xf32>
    %138 = arith.addf %134, %137 : vector<256x128xf32>
    %c0_150 = arith.constant 0 : index
    %c0_151 = arith.constant 0 : index
    %c0_152 = arith.constant 0 : index
    %c0_153 = arith.constant 0 : index
    %139 = vector.load %arg3[%c0_150, %c0_151, %c0_152, %c0_153] : memref<1x16x16x128xf32, #tpu.memory_space<vmem>>, vector<1x16x16x128xf32>
    %140 = vector.shape_cast %139 : vector<1x16x16x128xf32> to vector<256x128xf32>
    %141 = arith.subf %138, %140 : vector<256x128xf32>
    %142 = arith.mulf %141, %141 : vector<256x128xf32>
    %143 = vector.shape_cast %142 : vector<256x128xf32> to vector<1x256x128xf32>
    %cst_154 = arith.constant dense<0.000000e+00> : vector<1xf32>
    %144 = vector.multi_reduction <add>, %143, %cst_154 [1, 2] : vector<1x256x128xf32> to vector<1xf32>
    %145 = vector.shape_cast %144 : vector<1xf32> to vector<1x1x1xf32>
    %146 = vector.extract %145[0, 0, 0] : f32 from vector<1x1x1xf32>
    %147 = vector.broadcast %146 : f32 to vector<1x8x128xf32>
    %c0_155 = arith.constant 0 : index
    %c0_156 = arith.constant 0 : index
    %c0_157 = arith.constant 0 : index
    %148 = vector.load %arg8[%c0_155, %c0_156, %c0_157] : memref<1x8x128xf32, #tpu.memory_space<vmem>>, vector<1x8x128xf32>
    tpu.vector_store %arg8[%c0_155, %c0_156, %c0_157], %147 {strides = array<i32>} : memref<1x8x128xf32, #tpu.memory_space<vmem>>, vector<1x8x128xf32>,
    return
  }
  func.func @transform_0(%arg0: i32) -> (i32, i32, i32, i32) {
    %c0_i32 = arith.constant 0 : i32
    %c0_i32_0 = arith.constant 0 : i32
    %c0_i32_1 = arith.constant 0 : i32
    %c0_i32_2 = arith.constant 0 : i32
    return %arg0, %c0_i32, %c0_i32_0, %c0_i32_1 : i32, i32, i32, i32
  }
  func.func @transform_1(%arg0: i32) -> (i32, i32, i32, i32) {
    %c0_i32 = arith.constant 0 : i32
    %c0_i32_0 = arith.constant 0 : i32
    %c0_i32_1 = arith.constant 0 : i32
    %c0_i32_2 = arith.constant 0 : i32
    return %arg0, %c0_i32, %c0_i32_0, %c0_i32_1 : i32, i32, i32, i32
  }
  func.func @transform_2(%arg0: i32) -> (i32, i32, i32, i32) {
    %c0_i32 = arith.constant 0 : i32
    %c0_i32_0 = arith.constant 0 : i32
    %c0_i32_1 = arith.constant 0 : i32
    %c0_i32_2 = arith.constant 0 : i32
    return %arg0, %c0_i32, %c0_i32_0, %c0_i32_1 : i32, i32, i32, i32
  }
  func.func @transform_3(%arg0: i32) -> (i32, i32, i32, i32) {
    %c0_i32 = arith.constant 0 : i32
    %c0_i32_0 = arith.constant 0 : i32
    %c0_i32_1 = arith.constant 0 : i32
    %c0_i32_2 = arith.constant 0 : i32
    %c0_i32_3 = arith.constant 0 : i32
    return %c0_i32, %c0_i32_0, %c0_i32_1, %c0_i32_2 : i32, i32, i32, i32
  }
  func.func @transform_4(%arg0: i32) -> (i32, i32) {
    %c0_i32 = arith.constant 0 : i32
    %c0_i32_0 = arith.constant 0 : i32
    %c0_i32_1 = arith.constant 0 : i32
    return %c0_i32, %c0_i32_0 : i32, i32
  }
  func.func @transform_5(%arg0: i32) -> (i32, i32, i32, i32) {
    %c0_i32 = arith.constant 0 : i32
    %c0_i32_0 = arith.constant 0 : i32
    %c0_i32_1 = arith.constant 0 : i32
    %c0_i32_2 = arith.constant 0 : i32
    %c0_i32_3 = arith.constant 0 : i32
    return %c0_i32, %c0_i32_0, %c0_i32_1, %c0_i32_2 : i32, i32, i32, i32
  }
  func.func @transform_6(%arg0: i32) -> (i32, i32) {
    %c0_i32 = arith.constant 0 : i32
    %c0_i32_0 = arith.constant 0 : i32
    %c0_i32_1 = arith.constant 0 : i32
    return %c0_i32, %c0_i32_0 : i32, i32
  }
  func.func @transform_7(%arg0: i32) -> (i32, i32, i32) {
    %c0_i32 = arith.constant 0 : i32
    %c0_i32_0 = arith.constant 0 : i32
    %c0_i32_1 = arith.constant 0 : i32
    return %arg0, %c0_i32, %c0_i32_0 : i32, i32, i32
  }
}

</mosaic_0001>

<bundles_post_ra>
// kernel: _forward_impl.3
= control target key start
LH: loop header
LB: loop body
LE: loop exit
PB: predicated region body
PF: predicated region fallthrough
CT: control target
= control target key end

     0   :  { %v5734_v0 = vmov 0   ;;  %vm292_vm0 = vcmask 1040384   ;;  %vm293_vm1 = vsmask.f32 256  ;;  %v301_v16 = vld [vmem:[#allocation2 + $0x10] sm:$0x1]  ;;  %s8006_s1 = inlined_call_operand.vmem [shape: f32[2,8,8,1], index: 1, kind: input, shape index: {}]   ;;  %s8007_s3 = inlined_call_operand.vmem [shape: bf16[3,3,128,128], index: 3, kind: input, shape index: {}]   ;;  %s8008_s0 = inlined_call_operand.vmem [shape: bf16[2,8,8,128], index: 0, kind: input, shape index: {}]   ;;  %s8009_s5 = inlined_call_operand.vmem [shape: bf16[3,3,128,128], index: 5, kind: input, shape index: {}]   ;;  %s8010_s4 = inlined_call_operand.vmem [shape: bf16[1,128], index: 4, kind: input, shape index: {}]   ;;  %s8011_s6 = inlined_call_operand.vmem [shape: bf16[1,128], index: 6, kind: input, shape index: {}]   ;;  %s8012_s2 = inlined_call_operand.vmem [shape: f32[2,8,8,128], index: 2, kind: input, shape index: {}]   ;;  %s8013_s7 = inlined_call_operand.vmem [shape: f32[1,8,128], index: 7, kind: output, shape index: {}]  }
   0x1   :  { %5732 = vset.pattern.permute.xlu1 %v5734_v0  ;;  %283 = vst [vmem:[#allocation2] sm:$0xf] %v5734_v0  ;;  %5731 = vset.pattern.permute.xlu0 %v5734_v0  ;;  %v52_v1 = vld [vmem:[%s8006_s1 + $0x48] sm:$0xff]  ;;  %v51_v2 = vld [vmem:[%s8006_s1 + $0x40] sm:$0xff]  ;;  %v53_v7 = vld [vmem:[%s8006_s1 + $0x50] sm:$0xff]  ;;  %vm578_vm5 = vcmask 1043456  }
   0x2   :  { %v44_v3 = vld [vmem:[%s8006_s1 + $0x8] sm:$0xff]  ;;  %284 = vst [vmem:[#allocation2 + $0x4] sm:$0x1] %v5734_v0  ;;  %v68_v4 = vpack.c.bf16 %v52_v1, %v52_v1  ;;  %v67_v5 = vpack.c.bf16 %v51_v2, %v51_v2  ;;  %5733 = vset.pattern.permute.xlu2 %v5734_v0  ;;  %v43_v8 = vld [vmem:[%s8006_s1] sm:$0xff]  ;;  %v45_v9 = vld [vmem:[%s8006_s1 + $0x10] sm:$0xff]  ;;  %v69_v10 = vpack.c.bf16 %v53_v7, %v53_v7  ;;  %vm995_vm10 = vcmask 1042432  }
   0x3   :  { %v60_v6 = vpack.c.bf16 %v44_v3, %v44_v3  ;;  %285 = vst [vmem:[#allocation2 + $0x50] sm:$0xf] %v5734_v0  ;;  %v59_v11 = vpack.c.bf16 %v43_v8, %v43_v8  ;;  %v61_v12 = vpack.c.bf16 %v45_v9, %v45_v9  ;;  %v55_v13 = vld [vmem:[%s8006_s1 + $0x60] sm:$0xff]  ;;  %v54_v14 = vld [vmem:[%s8006_s1 + $0x58] sm:$0xff]  ;;  %vm5800_vm2 = vmand %vm292_vm0, %vm293_vm1  ;;  %vm355_vm3 = vsmask.f32 7938 }
   0x4   :  { %286 = vst [vmem:[#allocation2 + $0x54] sm:$0x1] %v5734_v0  ;;  %158 = vperm.xlu1 %5732, %v68_v4   ;;  %149 = vperm.xlu0 %5731, %v67_v5   ;;  %v363_v17 = vld [vmem:[#allocation2 + $0x14] sm:$0x1]  ;;  %v46_v18 = vld [vmem:[%s8006_s1 + $0x18] sm:$0xff]  ;;  %v302_v19 = vsel %vm5800_vm2, 0, %v301_v16  ;;  %vm5810_vm4 = vmand %vm292_vm0, %vm355_vm3  ;;  %v71_v22 = vpack.c.bf16 %v55_v13, %v55_v13  ;;  %v70_v23 = vpack.c.bf16 %v54_v14, %v54_v14 }
   0x5   :  { %288 = vst [vmem:[#allocation2 + $0x48] sm:$0xf] %v5734_v0  ;;  %86 = vperm.xlu2 %5733, %v60_v6   ;;  %v364_v21 = vsel %vm5810_vm4, 0, %v363_v17  ;;  %v62_v24 = vpack.c.bf16 %v46_v18, %v46_v18  ;;  %v56_v25 = vld [vmem:[%s8006_s1 + $0x68] sm:$0xff]  ;;  %v47_v26 = vld [vmem:[%s8006_s1 + $0x20] sm:$0xff]  ;;  %v57_v27 = vld [vmem:[%s8006_s1 + $0x70] sm:$0xff] }
   0x6   :  { %289 = vst [vmem:[#allocation2 + $0x4c] sm:$0x1] %v5734_v0  ;;  %v72_v28 = vpack.c.bf16 %v56_v25, %v56_v25  ;;  %v63_v29 = vpack.c.bf16 %v47_v26, %v47_v26  ;;  %v73_v30 = vpack.c.bf16 %v57_v27, %v57_v27  ;;  %v49_v31 = vld [vmem:[%s8006_s1 + $0x30] sm:$0xff]  ;;  %v48_v32 = vld [vmem:[%s8006_s1 + $0x28] sm:$0xff]  ;;  %v50_v33 = vld [vmem:[%s8006_s1 + $0x38] sm:$0xff]  ;;  %vm996_vm11 = vcmask 1046532  }
   0x7   :  { %290 = vst [vmem:[#allocation2 + $0x98] sm:$0xf] %v5734_v0  ;;  %v65_v34 = vpack.c.bf16 %v49_v31, %v49_v31  ;;  %v64_v35 = vpack.c.bf16 %v48_v32, %v48_v32  ;;  %v66_v36 = vpack.c.bf16 %v50_v33, %v50_v33  ;;  %v58_v37 = vld [vmem:[%s8006_s1 + $0x78] sm:$0xff]  ;;  %v307_v44 = vld [vmem:[#allocation2 + $0x20] sm:$0x1]  ;;  %v5534_v48 = vld [vmem:[%s8007_s3 + $0x30] sm:$0xff] }
   0x8   :  { %291 = vst [vmem:[#allocation2 + $0x9c] sm:$0x1] %v5734_v0  ;;  %v74_v38 = vpack.c.bf16 %v58_v37, %v58_v37  ;;  %v304_v39 = vld [vmem:[#allocation2 + $0x18] sm:$0x1]  ;;  %v366_v40 = vld [vmem:[#allocation2 + $0x1c] sm:$0x1]  ;;  %vm5913_vm6 = vmand %vm578_vm5, %vm355_vm3 }
   0x9   :  { %303 = vst [vmem:[#allocation2 + $0x10] sm:$0x1] %v302_v19  ;;  %v305_v41 = vsel %vm5800_vm2, 0, %v304_v39  ;;  %v367_v42 = vsel %vm5810_vm4, 0, %v366_v40  ;;  %v5535_v43 = vld [vmem:[%s8007_s3 + $0x38] sm:$0xff]  ;;  %v308_v46 = vsel %vm5800_vm2, 0, %v307_v44  ;;  %vm6464_vm12 = vmor %vm995_vm10, %vm996_vm11 }
   0xa   :  { %365 = vst [vmem:[#allocation2 + $0x14] sm:$0x1] %v364_v21  ;;  %5719 = vmatpush.bf16.msra.mxu3 %v5535_v43  ;;  %1320 = vmatpush.bf16.msra.mxu1 %v5535_v43  ;;  %v369_v45 = vld [vmem:[#allocation2 + $0x24] sm:$0x1]  ;;  %v5735_v49 = vmov 839922192  }
   0xb   :  { %306 = vst [vmem:[#allocation2 + $0x18] sm:$0x1] %v305_v41  ;;  %v370_v47 = vsel %vm5810_vm4, 0, %v369_v45  ;;  %v81_v50 = vunpack.c.l.s4 %v5735_v49  ;;  %v5854_v51 = vld [vmem:[%s8008_s0] sm:$0xff]   ;;  %v328_v56 = vld [vmem:[#allocation2 + $0x58] sm:$0x1] }
   0xc   :  { %167 = vperm.xlu1 %5732, %v69_v10   ;;  %77 = vperm.xlu0 %5731, %v59_v11   ;;  %368 = vst [vmem:[#allocation2 + $0x1c] sm:$0x1] %v367_v42  ;;  %v331_v52 = vld [vmem:[#allocation2 + $0x60] sm:$0x1]  ;;  %v393_v53 = vld [vmem:[#allocation2 + $0x64] sm:$0x1]  ;;  %v5675_v0 = vunpack.c.h.bf16 %v5854_v51 }
   0xd   :  { %95 = vperm.xlu2 %5733, %v61_v12   ;;  %309 = vst [vmem:[#allocation2 + $0x20] sm:$0x1] %v308_v46  ;;  %v332_v54 = vsel %vm5800_vm2, 0, %v331_v52  ;;  %v394_v55 = vsel %vm5810_vm4, 0, %v393_v53  ;;  %v390_v57 = vld [vmem:[#allocation2 + $0x5c] sm:$0x1]  ;;  %v5870_v62 = vunpack.c.0.s8 %v81_v50 }
   0xe   :  { %371 = vst [vmem:[#allocation2 + $0x24] sm:$0x1] %v370_v47  ;;  %5720 = vmatpush.bf16.msra.mxu3 %v5534_v48  ;;  %1321 = vmatpush.bf16.msra.mxu1 %v5534_v48  ;;  %v329_v58 = vsel %vm5800_vm2, 0, %v328_v56  ;;  %v391_v59 = vsel %vm5810_vm4, 0, %v390_v57  ;;  %v5533_v60 = vld [vmem:[%s8007_s3 + $0x28] sm:$0xff]  ;;  %v5543_v61 = vld [vmem:[%s8007_s3 + $0x78] sm:$0xff] }
   0xf   :  { %333 = vst [vmem:[#allocation2 + $0x60] sm:$0x1] %v332_v54  ;;  %5711 = vmatpush.bf16.msra.mxu2 %v5543_v61  ;;  %1175 = vmatpush.bf16.msra.mxu0 %v5543_v61  ;;  %v5532_v2 = vld [vmem:[%s8007_s3 + $0x20] sm:$0xff]  ;;  %v5542_v4 = vld [vmem:[%s8007_s3 + $0x70] sm:$0xff]  ;;  %v5883_v6 = vld [vmem:[%s8008_s0 + $0x8] sm:$0xff]  }
  0x10   :  { %395 = vst [vmem:[#allocation2 + $0x64] sm:$0x1] %v394_v55  ;;  %v5531_v7 = vld [vmem:[%s8007_s3 + $0x18] sm:$0xff]  ;;  %v334_v9 = vld [vmem:[#allocation2 + $0x68] sm:$0x1]  ;;  %v5678_v18 = vunpack.c.l.bf16 %v5883_v6  ;;  %v5530_v32 = vld [vmem:[%s8007_s3 + $0x10] sm:$0xff]  ;;  %v5679_v47 = vunpack.c.h.bf16 %v5883_v6 }
  0x11   :  { %330 = vst [vmem:[#allocation2 + $0x58] sm:$0x1] %v329_v58  ;;  %v396_v10 = vld [vmem:[#allocation2 + $0x6c] sm:$0x1]  ;;  %v335_v12 = vsel %vm5800_vm2, 0, %v334_v9  ;;  %v5540_v33 = vld [vmem:[%s8007_s3 + $0x60] sm:$0xff] }
  0x12   :  { %5721 = vmatpush.bf16.msra.mxu3 %v5533_v60  ;;  %392 = vst [vmem:[#allocation2 + $0x5c] sm:$0x1] %v391_v59  ;;  %1322 = vmatpush.bf16.msra.mxu1 %v5533_v60  ;;  %v397_v13 = vsel %vm5810_vm4, 0, %v396_v10  ;;  %v298_v14 = vld [vmem:[#allocation2 + $0x8] sm:$0x1]  ;;  %v5539_v45 = vld [vmem:[%s8007_s3 + $0x58] sm:$0xff] }
  0x13   :  { %5712 = vmatpush.bf16.msra.mxu2 %v5542_v4  ;;  %1176 = vmatpush.bf16.msra.mxu0 %v5542_v4  ;;  %336 = vst [vmem:[#allocation2 + $0x68] sm:$0x1] %v335_v12  ;;  %v5541_v21 = vld [vmem:[%s8007_s3 + $0x68] sm:$0xff]  ;;  %v299_v26 = vsel %vm5800_vm2, 0, %v298_v14  ;;  %v319_v39 = vld [vmem:[#allocation2 + $0x40] sm:$0x1] }
  0x14   :  { %185 = vperm.xlu1 %5732, %v71_v22   ;;  %176 = vperm.xlu0 %5731, %v70_v23   ;;  %v586_v22 = vld [vmem:[#allocation2 + $0x10] sm:$0xf]  ;;  %v589_v23 = vld [vmem:[#allocation2 + $0x14] sm:$0x1]  ;;  %v408_v25 = vld [vmem:[#allocation2 + $0x8c] sm:$0x1] }
  0x15   :  { %104 = vperm.xlu2 %5733, %v62_v24   ;;  %v346_v24 = vld [vmem:[#allocation2 + $0x88] sm:$0x1]  ;;  %398 = vst [vmem:[#allocation2 + $0x6c] sm:$0x1] %v397_v13  ;;  %v360_v31 = vld [vmem:[#allocation2 + $0xc] sm:$0x1] }
  0x16   :  { %5722 = vmatpush.bf16.msra.mxu3 %v5532_v2  ;;  %1323 = vmatpush.bf16.msra.mxu1 %v5532_v2  ;;  %v361_v37 = vsel %vm5810_vm4, 0, %v360_v31  ;;  %300 = vst [vmem:[#allocation2 + $0x8] sm:$0x1] %v299_v26  ;;  %v5529_v40 = vld [vmem:[%s8007_s3 + $0x8] sm:$0xff]  ;;  %v320_v44 = vsel %vm5800_vm2, 0, %v319_v39  ;;  %v5936_v58 = vld [vmem:[%s8008_s0 + $0x20] sm:$0xff]  }
  0x17   :  { %5713 = vmatpush.bf16.msra.mxu2 %v5541_v21  ;;  %1177 = vmatpush.bf16.msra.mxu0 %v5541_v21  ;;  %362 = vst [vmem:[#allocation2 + $0xc] sm:$0x1] %v361_v37  ;;  %v381_v48 = vld [vmem:[#allocation2 + $0x44] sm:$0x1]  ;;  %v592_v54 = vld [vmem:[#allocation2 + $0x18] sm:$0xf]  ;;  %v5691_v6 = vunpack.c.h.bf16 %v5936_v58 }
  0x18   :  { %v382_v53 = vsel %vm5810_vm4, 0, %v381_v48  ;;  %321 = vst [vmem:[#allocation2 + $0x40] sm:$0x1] %v320_v44  ;;  %v340_v55 = vld [vmem:[#allocation2 + $0x78] sm:$0x1]  ;;  %v5941_v59 = vld [vmem:[%s8008_s0 + $0x28] sm:$0xff]  }
  0x19   :  { %383 = vst [vmem:[#allocation2 + $0x44] sm:$0x1] %v382_v53  ;;  %v341_v60 = vsel %vm5800_vm2, 0, %v340_v55  ;;  %v595_v61 = vld [vmem:[#allocation2 + $0x1c] sm:$0x1]  ;;  %v5528_v21 = vld [vmem:[%s8007_s3] sm:$0xff] }
  0x1a   :  { %5723 = vmatpush.bf16.msra.mxu3 %v5531_v7  ;;  %1324 = vmatpush.bf16.msra.mxu1 %v5531_v7  ;;  %342 = vst [vmem:[#allocation2 + $0x78] sm:$0x1] %v341_v60  ;;  %v5690_v7 = vunpack.c.l.bf16 %v5936_v58  ;;  %v5958_v9 = vld [vmem:[%s8008_s0 + $0x18] sm:$0xff]   ;;  %v372_v53 = vld [vmem:[#allocation2 + $0x2c] sm:$0x1] }
  0x1b   :  { %5714 = vmatpush.bf16.msra.mxu2 %v5540_v33  ;;  %1178 = vmatpush.bf16.msra.mxu0 %v5540_v33  ;;  %v5687_v33 = vunpack.c.h.bf16 %v5958_v9  ;;  %vm736_vm7 = vsmask.f32 3328  ;;  %vm737_vm8 = vsmask.f32 7440 }
  0x1c   :  { %194 = vperm.xlu1 %5732, %v72_v28   ;;  %113 = vperm.xlu0 %5731, %v63_v29   ;;  %v347_v29 = vsel %vm5800_vm2, 0, %v346_v24  ;;  %vm6171_vm9 = vmor %vm736_vm7, %vm737_vm8 }
  0x1d   :  { %203 = vperm.xlu2 %5733, %v73_v30   ;;  %v409_v30 = vsel %vm5810_vm4, 0, %v408_v25  ;;  %348 = vst [vmem:[#allocation2 + $0x88] sm:$0x1] %v347_v29  ;;  %v343_v29 = vld [vmem:[#allocation2 + $0x80] sm:$0x1] }
  0x1e   :  { %410 = vst [vmem:[#allocation2 + $0x8c] sm:$0x1] %v409_v30  ;;  %5724 = vmatpush.bf16.msra.mxu3 %v5530_v32  ;;  %1325 = vmatpush.bf16.msra.mxu1 %v5530_v32  ;;  %v344_v39 = vsel %vm5800_vm2, 0, %v343_v29 }
  0x1f   :  { %5715 = vmatpush.bf16.msra.mxu2 %v5539_v45  ;;  %1179 = vmatpush.bf16.msra.mxu0 %v5539_v45  ;;  %345 = vst [vmem:[#allocation2 + $0x80] sm:$0x1] %v344_v39 }
  0x22   :  { %5725 = vmatpush.bf16.msra.mxu3 %v5529_v40  ;;  %1326 = vmatpush.bf16.msra.mxu1 %v5529_v40 }
  0x24   :  { %131 = vperm.xlu1 %5732, %v65_v34   ;;  %122 = vperm.xlu0 %5731, %v64_v35  }
  0x25   :  { %140 = vperm.xlu2 %5733, %v66_v36  }
  0x26   :  { %5726 = vmatpush.bf16.msra.mxu3 %v5528_v21  ;;  %1327 = vmatpush.bf16.msra.mxu1 %v5528_v21 }
  0x2c   :  { %212 = vperm.xlu0 %5731, %v74_v38   ;;  %v8064_v38 = vmov 0 }
  0x2d   :  { %v8065_v38 = vsel %vm5913_vm6, 4294967295, %v8064_v38 }
  0x2e   :  { %8066 = vst [vmem:[#allocation3_spill] sm:$0xff] %v8065_v38 }
  0x5f   :  { %v87_v63 = vpop.permute.xlu2 %86 }
  0x60   :  { %v92_v1 = vperm.slane %v87_v63, %v5870_v62  ;;  %v402_v63 = vld [vmem:[#allocation2 + $0x7c] sm:$0x1] }
  0x61   :  { %v403_v4 = vsel %vm5810_vm4, 0, %v402_v63 }
  0x62   :  { %v236_v3 = vunpack.c.l.bf16 %v92_v1  ;;  %404 = vst [vmem:[#allocation2 + $0x7c] sm:$0x1] %v403_v4 }
  0x64   :  { %v252_v5 = vmul.f32 %v5675_v0, %v236_v3  ;;  %v5948_v3 = vld [vmem:[%s8008_s0 + $0x38] sm:$0xff]  }
  0x65   :  { %v5702_v26 = vunpack.c.l.bf16 %v5948_v3 }
  0x66   :  { %v268_v8 = vpack.c.bf16 %v252_v5, %v252_v5  ;;  %v337_v5 = vld [vmem:[#allocation2 + $0x70] sm:$0x1] }
  0x67   :  { %v96_v11 = vpop.permute.xlu2 %95  ;;  %v338_v10 = vsel %vm5800_vm2, 0, %v337_v5 }
  0x68   :  { %v426_v16 = vshrl.u32 %v268_v8, 16  ;;  %v429_v17 = vshll.u32 %v268_v8, 16  ;;  %v101_v19 = vperm.slane %v96_v11, %v5870_v62  ;;  %v5694_v8 = vunpack.c.l.bf16 %v5941_v59  ;;  %v325_v11 = vld [vmem:[#allocation2 + $0x50] sm:$0x1]  ;;  %339 = vst [vmem:[#allocation2 + $0x70] sm:$0x1] %v338_v10 }
  0x69   :  { %v326_v40 = vsel %vm5800_vm2, 0, %v325_v11  ;;  %v5536_v10 = vld [vmem:[%s8007_s3 + $0x40] sm:$0xff] }
  0x6a   :  { %v428_v27 = vrot.slane %v426_v16, 7  ;;  %v237_v28 = vunpack.c.l.bf16 %v101_v19  ;;  %v399_v19 = vld [vmem:[#allocation2 + $0x74] sm:$0x1]  ;;  %327 = vst [vmem:[#allocation2 + $0x50] sm:$0x1] %v326_v40 }
  0x6b   :  { %v295_v11 = vld [vmem:[#allocation2] sm:$0x1] }
  0x6c   :  { %v431_v34 = vor.u32 %v429_v17, %v428_v27  ;;  %v432_v35 = vrot.slane %v428_v27, 4  ;;  %v253_v36 = vmul.f32 %v5678_v18, %v237_v28  ;;  %v5674_v18 = vunpack.c.l.bf16 %v5854_v51  ;;  %v5979_v27 = vld [vmem:[%s8008_s0 + $0x30] sm:$0xff]  }
  0x6d   :  { %v400_v28 = vsel %vm5810_vm4, 0, %v399_v19  ;;  %v5698_v45 = vunpack.c.l.bf16 %v5979_v27  ;;  %v634_v19 = vld [vmem:[#allocation2 + $0x60] sm:$0xf]  ;;  %v296_v39 = vsel %vm5800_vm2, 0, %v295_v11 }
  0x6e   :  { %v587_v41 = vsel %vm5913_vm6, %v431_v34, %v586_v22  ;;  %v590_v42 = vsel %vm5800_vm2, %v432_v35, %v589_v23  ;;  %v269_v43 = vpack.c.bf16 %v253_v36, %v253_v36  ;;  %v5538_v22 = vld [vmem:[%s8007_s3 + $0x50] sm:$0xff]  ;;  %v598_v35 = vld [vmem:[#allocation2 + $0x20] sm:$0xf]  ;;  %401 = vst [vmem:[#allocation2 + $0x74] sm:$0x1] %v400_v28 }
  0x6f   :  { %588 = vst [vmem:[#allocation2 + $0x10] sm:$0xf] %v587_v41  ;;  %v105_v46 = vpop.permute.xlu2 %104  ;;  %v5988_v34 = vld [vmem:[%s8008_s0 + $0x10] sm:$0xff]   ;;  %5716 = vmatpush.bf16.msra.mxu2 %v5538_v22  ;;  %v5537_v41 = vld [vmem:[%s8007_s3 + $0x48] sm:$0xff]  ;;  %1180 = vmatpush.bf16.msra.mxu0 %v5538_v22 }
  0x70   :  { %591 = vst [vmem:[#allocation2 + $0x14] sm:$0x1] %v590_v42  ;;  %v434_v49 = vshrl.u32 %v269_v43, 16  ;;  %v437_v50 = vshll.u32 %v269_v43, 16  ;;  %v110_v52 = vperm.slane %v105_v46, %v5870_v62  ;;  %v601_v42 = vld [vmem:[#allocation2 + $0x24] sm:$0x1]  ;;  %v5695_v46 = vunpack.c.h.bf16 %v5941_v59 }
  0x71   :  { %297 = vst [vmem:[#allocation2] sm:$0x1] %v296_v39 }
  0x72   :  { %v436_v56 = vrot.slane %v434_v49, 7  ;;  %v238_v57 = vunpack.c.l.bf16 %v110_v52  ;;  %v405_v49 = vld [vmem:[#allocation2 + $0x84] sm:$0x1]  ;;  %v310_v52 = vld [vmem:[#allocation2 + $0x28] sm:$0x1] }
  0x73   :  { %v406_v58 = vsel %vm5810_vm4, 0, %v405_v49  ;;  %5717 = vmatpush.bf16.msra.mxu2 %v5537_v41  ;;  %v311_v63 = vsel %vm5800_vm2, 0, %v310_v52  ;;  %1181 = vmatpush.bf16.msra.mxu0 %v5537_v41 }
  0x74   :  { %v439_v0 = vor.u32 %v437_v50, %v436_v56  ;;  %v440_v1 = vrot.slane %v436_v56, 4  ;;  %v254_v2 = vmul.f32 %v5679_v47, %v238_v57  ;;  %v5699_v50 = vunpack.c.h.bf16 %v5979_v27  ;;  %407 = vst [vmem:[#allocation2 + $0x84] sm:$0x1] %v406_v58 }
  0x75   :  { %312 = vst [vmem:[#allocation2 + $0x28] sm:$0x1] %v311_v63 }
  0x76   :  { %v593_v12 = vsel %vm5913_vm6, %v439_v0, %v592_v54  ;;  %v596_v13 = vsel %vm5800_vm2, %v440_v1, %v595_v61  ;;  %v270_v14 = vpack.c.bf16 %v254_v2, %v254_v2  ;;  %v159_v16 = vpop.permute.xlu1 %158  ;;  %v150_v17 = vpop.permute.xlu0 %149  ;;  %v5682_v54 = vunpack.c.l.bf16 %v5988_v34 }
  0x77   :  { %594 = vst [vmem:[#allocation2 + $0x18] sm:$0xf] %v593_v12  ;;  %v164_v23 = vperm.slane %v159_v16, %v5870_v62  ;;  %v155_v24 = vperm.slane %v150_v17, %v5870_v62  ;;  %v204_v25 = vpop.permute.xlu2 %203  ;;  %v373_v0 = vsel %vm5810_vm4, 0, %v372_v53  ;;  %5718 = vmatpush.bf16.msra.mxu2 %v5536_v10  ;;  %1182 = vmatpush.bf16.msra.mxu0 %v5536_v10 }
  0x78   :  { %597 = vst [vmem:[#allocation2 + $0x1c] sm:$0x1] %v596_v13  ;;  %v442_v30 = vshrl.u32 %v270_v14, 16  ;;  %v445_v31 = vshll.u32 %v270_v14, 16  ;;  %v209_v32 = vperm.slane %v204_v25, %v5870_v62  ;;  %v637_v25 = vld [vmem:[#allocation2 + $0x64] sm:$0x1] }
  0x79   :  { %v244_v36 = vunpack.c.l.bf16 %v164_v23  ;;  %v243_v37 = vunpack.c.l.bf16 %v155_v24  ;;  %374 = vst [vmem:[#allocation2 + $0x2c] sm:$0x1] %v373_v0 }
  0x7a   :  { %v444_v43 = vrot.slane %v442_v30, 7  ;;  %v249_v44 = vunpack.c.l.bf16 %v209_v32  ;;  %v5683_v30 = vunpack.c.h.bf16 %v5988_v34  ;;  %v631_v32 = vld [vmem:[#allocation2 + $0x5c] sm:$0x1] }
  0x7b   :  { %v260_v47 = vmul.f32 %v5691_v6, %v244_v36  ;;  %v259_v48 = vmul.f32 %v5690_v7, %v243_v37  ;;  %v5686_v7 = vunpack.c.l.bf16 %v5958_v9  ;;  %v5558_v9 = vld [vmem:[%s8007_s3 + $0xf0] sm:$0xff] }
  0x7c   :  { %v447_v55 = vor.u32 %v445_v31, %v444_v43  ;;  %v448_v56 = vrot.slane %v444_v43, 4  ;;  %v265_v57 = vmul.f32 %v5702_v26, %v249_v44  ;;  %v628_v31 = vld [vmem:[#allocation2 + $0x58] sm:$0xf]  ;;  %v664_v44 = vld [vmem:[#allocation2 + $0x88] sm:$0xf] }
  0x7d   :  { %v276_v60 = vpack.c.bf16 %v260_v47, %v260_v47  ;;  %v275_v61 = vpack.c.bf16 %v259_v48, %v259_v48  ;;  %v667_v47 = vld [vmem:[#allocation2 + $0x8c] sm:$0x1] }
  0x7e   :  { %v599_v1 = vsel %vm5913_vm6, %v447_v55, %v598_v35  ;;  %v602_v2 = vsel %vm5800_vm2, %v448_v56, %v601_v42  ;;  %v281_v4 = vpack.c.bf16 %v265_v57, %v265_v57  ;;  %v168_v5 = vpop.permute.xlu1 %167  ;;  %v78_v6 = vpop.permute.xlu0 %77  ;;  %v6025_v55 = vld [vmem:[#allocation2 + $0x50] sm:$0xf] }
  0x7f   :  { %600 = vst [vmem:[#allocation2 + $0x20] sm:$0xf] %v599_v1  ;;  %v490_v12 = vshrl.u32 %v276_v60, 16  ;;  %v493_v13 = vshll.u32 %v276_v60, 16  ;;  %v482_v14 = vshrl.u32 %v275_v61, 16  ;;  %v485_v16 = vshll.u32 %v275_v61, 16  ;;  %v141_v17 = vpop.permute.xlu2 %140 }
  0x80   :  { %603 = vst [vmem:[#allocation2 + $0x24] sm:$0x1] %v602_v2  ;;  %v530_v21 = vshrl.u32 %v281_v4, 16  ;;  %v533_v22 = vshll.u32 %v281_v4, 16  ;;  %v173_v23 = vperm.slane %v168_v5, %v5870_v62  ;;  %v83_v24 = vperm.slane %v78_v6, %v5870_v62  ;;  %v316_v6 = vld [vmem:[#allocation2 + $0x38] sm:$0x1] }
  0x81   :  { %v492_v26 = vrot.slane %v490_v12, 7  ;;  %v484_v28 = vrot.slane %v482_v14, 7  ;;  %v146_v29 = vperm.slane %v141_v17, %v5870_v62  ;;  %v852_v5 = vshrl.u32 %v6025_v55, 16  ;;  %v640_v14 = vld [vmem:[#allocation2 + $0x68] sm:$0xf] }
  0x82   :  { %v532_v35 = vrot.slane %v530_v21, 7  ;;  %v245_v36 = vunpack.c.l.bf16 %v173_v23  ;;  %v235_v37 = vunpack.c.l.bf16 %v83_v24  ;;  %v580_v17 = vld [vmem:[#allocation2 + $0x8] sm:$0xf] }
  0x83   :  { %v495_v40 = vor.u32 %v493_v13, %v492_v26  ;;  %v496_v41 = vrot.slane %v492_v26, 4  ;;  %v487_v42 = vor.u32 %v485_v16, %v484_v28  ;;  %v488_v43 = vrot.slane %v484_v28, 4  ;;  %v643_v16 = vld [vmem:[#allocation2 + $0x6c] sm:$0x1] }
  0x84   :  { %v535_v48 = vor.u32 %v533_v22, %v532_v35  ;;  %v536_v49 = vrot.slane %v532_v35, 4  ;;  %v261_v52 = vmul.f32 %v5694_v8, %v245_v36  ;;  %v251_v53 = vmul.f32 %v5674_v18, %v235_v37 }
  0x85   :  { %v635_v56 = vsel %vm5913_vm6, %v495_v40, %v634_v19  ;;  %v638_v57 = vsel %vm5800_vm2, %v496_v41, %v637_v25  ;;  %v629_v58 = vsel %vm5913_vm6, %v487_v42, %v628_v31  ;;  %v632_v60 = vsel %vm5800_vm2, %v488_v43, %v631_v32 }
  0x86   :  { %636 = vst [vmem:[#allocation2 + $0x60] sm:$0xf] %v635_v56  ;;  %v665_v51 = vsel %vm5913_vm6, %v535_v48, %v664_v44  ;;  %v668_v8 = vsel %vm5800_vm2, %v536_v49, %v667_v47  ;;  %v277_v18 = vpack.c.bf16 %v261_v52, %v261_v52  ;;  %v267_v61 = vpack.c.bf16 %v251_v53, %v251_v53  ;;  %v186_v63 = vpop.permute.xlu1 %185  ;;  %v177_v0 = vpop.permute.xlu0 %176  ;;  %v622_v48 = vld [vmem:[#allocation2 + $0x40] sm:$0xf]  ;;  %v625_v49 = vld [vmem:[#allocation2 + $0x44] sm:$0x1] }
  0x87   :  { %639 = vst [vmem:[#allocation2 + $0x64] sm:$0x1] %v638_v57  ;;  %v242_v1 = vunpack.c.l.bf16 %v146_v29  ;;  %v191_v2 = vperm.slane %v186_v63, %v5870_v62  ;;  %v182_v4 = vperm.slane %v177_v0, %v5870_v62  ;;  %v6044_v23 = vrot.slane %v852_v5, 4  ;;  %v583_v29 = vld [vmem:[#allocation2 + $0xc] sm:$0x1] }
  0x88   :  { %630 = vst [vmem:[#allocation2 + $0x58] sm:$0xf] %v629_v58  ;;  %v498_v10 = vshrl.u32 %v277_v18, 16  ;;  %v501_v11 = vshll.u32 %v277_v18, 16  ;;  %v418_v12 = vshrl.u32 %v267_v61, 16  ;;  %v421_v13 = vshll.u32 %v267_v61, 16 }
  0x89   :  { %633 = vst [vmem:[#allocation2 + $0x5c] sm:$0x1] %v632_v60  ;;  %v258_v19 = vmul.f32 %v5687_v33, %v242_v1  ;;  %v247_v21 = vunpack.c.l.bf16 %v191_v2  ;;  %v246_v22 = vunpack.c.l.bf16 %v182_v4  ;;  %v855_v26 = vshll.u32 %v6025_v55, 16  ;;  %v378_v56 = vld [vmem:[#allocation2 + $0x3c] sm:$0x1] }
  0x8a   :  { %666 = vst [vmem:[#allocation2 + $0x88] sm:$0xf] %v665_v51  ;;  %v500_v24 = vrot.slane %v498_v10, 7  ;;  %v420_v25 = vrot.slane %v418_v12, 7  ;;  %v1248_v28 = vunpack.c.l.b16 %v6025_v55  ;;  %v317_v35 = vsel %vm5800_vm2, 0, %v316_v6 }
  0x8b   :  { %669 = vst [vmem:[#allocation2 + $0x8c] sm:$0x1] %v668_v8  ;;  %v274_v31 = vpack.c.bf16 %v258_v19, %v258_v19  ;;  %v263_v32 = vmul.f32 %v5698_v45, %v247_v21  ;;  %v262_v33 = vmul.f32 %v5695_v46, %v246_v22  ;;  %v652_v8 = vld [vmem:[#allocation2 + $0x78] sm:$0xf]  ;;  %v655_v18 = vld [vmem:[#allocation2 + $0x7c] sm:$0x1] }
  0x8c   :  { %v503_v36 = vor.u32 %v501_v11, %v500_v24  ;;  %v504_v37 = vrot.slane %v500_v24, 4  ;;  %v423_v39 = vor.u32 %v421_v13, %v420_v25  ;;  %v424_v40 = vrot.slane %v420_v25, 4  ;;  %318 = vst [vmem:[#allocation2 + $0x38] sm:$0x1] %v317_v35  ;;  %v646_v10 = vld [vmem:[#allocation2 + $0x70] sm:$0xf] }
  0x8d   :  { %v474_v41 = vshrl.u32 %v274_v31, 16  ;;  %v477_v42 = vshll.u32 %v274_v31, 16  ;;  %v279_v43 = vpack.c.bf16 %v263_v32, %v263_v32  ;;  %v278_v44 = vpack.c.bf16 %v262_v33, %v262_v33  ;;  %v649_v11 = vld [vmem:[#allocation2 + $0x74] sm:$0x1]  ;;  %v5551_v13 = vld [vmem:[%s8007_s3 + $0xb8] sm:$0xff] }
  0x8e   :  { %v641_v47 = vsel %vm5913_vm6, %v503_v36, %v640_v14  ;;  %v644_v45 = vsel %vm5800_vm2, %v504_v37, %v643_v16  ;;  %v581_v59 = vsel %vm5913_vm6, %v423_v39, %v580_v17  ;;  %v584_v46 = vsel %vm5800_vm2, %v424_v40, %v583_v29  ;;  %v195_v52 = vpop.permute.xlu1 %194  ;;  %v114_v53 = vpop.permute.xlu0 %113  ;;  %v313_v21 = vld [vmem:[#allocation2 + $0x30] sm:$0x1]  ;;  %v5559_v22 = vld [vmem:[%s8007_s3 + $0xf8] sm:$0xff]  ;;  %v375_v31 = vld [vmem:[#allocation2 + $0x34] sm:$0x1]  ;;  %1466 = vmatpush.bf16.msrb.mxu2 %v5551_v13 }
  0x8f   :  { %642 = vst [vmem:[#allocation2 + $0x68] sm:$0xf] %v641_v47  ;;  %v476_v57 = vrot.slane %v474_v41, 7  ;;  %v514_v58 = vshrl.u32 %v279_v43, 16  ;;  %v517_v60 = vshll.u32 %v279_v43, 16  ;;  %v506_v51 = vshrl.u32 %v278_v44, 16  ;;  %1656 = vmatpush.bf16.msrb.mxu3 %v5559_v22 }
  0x90   :  { %645 = vst [vmem:[#allocation2 + $0x6c] sm:$0x1] %v644_v45  ;;  %v509_v61 = vshll.u32 %v278_v44, 16  ;;  %v200_v63 = vperm.slane %v195_v52, %v5870_v62  ;;  %v119_v0 = vperm.slane %v114_v53, %v5870_v62  ;;  %v6064_v1 = vld [vmem:[#allocation2 + $0x58] sm:$0xf]  ;;  %v6066_v2 = vrot.slane %v855_v26, 5 }
  0x91   :  { %582 = vst [vmem:[#allocation2 + $0x8] sm:$0xf] %v581_v59  ;;  %v479_v4 = vor.u32 %v477_v42, %v476_v57  ;;  %v480_v5 = vrot.slane %v476_v57, 4  ;;  %v516_v6 = vrot.slane %v514_v58, 7  ;;  %v508_v12 = vrot.slane %v506_v51, 7  ;;  %v5550_v22 = vld [vmem:[%s8007_s3 + $0xb0] sm:$0xff] }
  0x92   :  { %585 = vst [vmem:[#allocation2 + $0xc] sm:$0x1] %v584_v46  ;;  %v248_v14 = vunpack.c.l.bf16 %v200_v63  ;;  %v239_v16 = vunpack.c.l.bf16 %v119_v0  ;;  %v8015_v17 = vunpack.c.l.b16 %v6064_v1  ;;  %v379_v19 = vsel %vm5810_vm4, 0, %v378_v56  ;;  %v676_v37 = vld [vmem:[#allocation2] sm:$0xf]  ;;  %1467 = vmatpush.bf16.msrb.mxu2 %v5550_v22 }
  0x93   :  { %v623_v24 = vsel %vm5913_vm6, %v479_v4, %v622_v48  ;;  %v626_v25 = vsel %vm5800_vm2, %v480_v5, %v625_v49  ;;  %v519_v26 = vor.u32 %v517_v60, %v516_v6  ;;  %v520_v29 = vrot.slane %v516_v6, 4  ;;  %380 = vst [vmem:[#allocation2 + $0x3c] sm:$0x1] %v379_v19  ;;  %v387_v46 = vld [vmem:[#allocation2 + $0x54] sm:$0x1]  ;;  %1657 = vmatpush.bf16.msrb.mxu3 %v5558_v9 }
  0x94   :  { %624 = vst [vmem:[#allocation2 + $0x40] sm:$0xf] %v623_v24  ;;  %v511_v32 = vor.u32 %v509_v61, %v508_v12  ;;  %v512_v33 = vrot.slane %v508_v12, 4  ;;  %v264_v35 = vmul.f32 %v5699_v50, %v248_v14  ;;  %v255_v36 = vmul.f32 %v5682_v54, %v239_v16  ;;  %v658_v56 = vld [vmem:[#allocation2 + $0x80] sm:$0xf]  ;;  %v5567_v24 = vld [vmem:[%s8007_s3 + $0x138] sm:$0xff] }
  0x95   :  { %627 = vst [vmem:[#allocation2 + $0x44] sm:$0x1] %v626_v25  ;;  %v653_v39 = vsel %vm5913_vm6, %v519_v26, %v652_v8  ;;  %v656_v40 = vsel %vm5800_vm2, %v520_v29, %v655_v18  ;;  %v1260_v41 = vpack.c.b16 %v8015_v17, %v1248_v28  ;;  %v314_v27 = vsel %vm5800_vm2, 0, %v313_v21  ;;  %v661_v57 = vld [vmem:[#allocation2 + $0x84] sm:$0x1]  ;;  %1804 = vmatpush.bf16.msrb.mxu0 %v5567_v24 }
  0x96   :  { %654 = vst [vmem:[#allocation2 + $0x78] sm:$0xf] %v653_v39  ;;  %v647_v50 = vsel %vm5913_vm6, %v511_v32, %v646_v10  ;;  %v650_v54 = vsel %vm5800_vm2, %v512_v33, %v649_v11  ;;  %v280_v42 = vpack.c.bf16 %v264_v35, %v264_v35  ;;  %v271_v43 = vpack.c.bf16 %v255_v36, %v255_v36  ;;  %v132_v44 = vpop.permute.xlu1 %131  ;;  %v123_v47 = vpop.permute.xlu0 %122  ;;  %v604_v63 = vld [vmem:[#allocation2 + $0x28] sm:$0xf]  ;;  %v607_v6 = vld [vmem:[#allocation2 + $0x2c] sm:$0x1] }
  0x97   :  { %657 = vst [vmem:[#allocation2 + $0x7c] sm:$0x1] %v656_v40  ;;  %1348 = vmatmul.bf16.vlgmr.msra.gmra.mxu3 %v1260_v41  ;;  %v137_v55 = vperm.slane %v132_v44, %v5870_v62  ;;  %v376_v28 = vsel %vm5810_vm4, 0, %v375_v31  ;;  %v128_v45 = vperm.slane %v123_v47, %v5870_v62  ;;  %v740_v59 = vshrl.u32 %v676_v37, 16  ;;  %v6135_v32 = vld [vmem:[#allocation2 + $0x68] sm:$0xf] }
  0x98   :  { %648 = vst [vmem:[#allocation2 + $0x70] sm:$0xf] %v647_v50  ;;  %v522_v48 = vshrl.u32 %v280_v42, 16  ;;  %v525_v49 = vshll.u32 %v280_v42, 16  ;;  %v450_v52 = vshrl.u32 %v271_v43, 16  ;;  %v453_v53 = vshll.u32 %v271_v43, 16 }
  0x99   :  { %651 = vst [vmem:[#allocation2 + $0x74] sm:$0x1] %v650_v54  ;;  %v241_v58 = vunpack.c.l.bf16 %v137_v55  ;;  %v240_v60 = vunpack.c.l.bf16 %v128_v45  ;;  %v6103_v51 = vld [vmem:[#allocation2 + $0x8] sm:$0xf]  ;;  %v6105_v8 = vrot.slane %v740_v59, 4  ;;  %v743_v18 = vshll.u32 %v676_v37, 16 }
  0x9a   :  { %v524_v61 = vrot.slane %v522_v48, 7  ;;  %v452_v0 = vrot.slane %v450_v52, 7  ;;  %315 = vst [vmem:[#allocation2 + $0x30] sm:$0x1] %v314_v27  ;;  %v1240_v4 = vunpack.c.l.b16 %v676_v37  ;;  %v8025_v5 = vunpack.c.l.b16 %v6103_v51  ;;  %v6137_v39 = vld [vmem:[#allocation2 + $0x5c] sm:$0x1] }
  0x9b   :  { %v257_v10 = vmul.f32 %v5686_v7, %v241_v58  ;;  %377 = vst [vmem:[#allocation2 + $0x34] sm:$0x1] %v376_v28  ;;  %v256_v11 = vmul.f32 %v5683_v30, %v240_v60  ;;  %v6112_v12 = vrot.slane %v743_v18, 5  ;;  %v388_v13 = vsel %vm5810_vm4, 0, %v387_v46  ;;  %v349_v40 = vld [vmem:[#allocation2 + $0x90] sm:$0x1] }
  0x9c   :  { %v527_v14 = vor.u32 %v525_v49, %v524_v61  ;;  %v528_v16 = vrot.slane %v524_v61, 4  ;;  %v455_v19 = vor.u32 %v453_v53, %v452_v0  ;;  %v456_v21 = vrot.slane %v452_v0, 4  ;;  %389 = vst [vmem:[#allocation2 + $0x54] sm:$0x1] %v388_v13  ;;  %v616_v27 = vld [vmem:[#allocation2 + $0x38] sm:$0xf] }
  0x9d   :  { %v273_v34 = vpack.c.bf16 %v257_v10, %v257_v10  ;;  %v272_v7 = vpack.c.bf16 %v256_v11, %v256_v11  ;;  %v1256_v30 = vpack.c.b16 %v8025_v5, %v1240_v4  ;;  %v619_v50 = vld [vmem:[#allocation2 + $0x3c] sm:$0x1]  ;;  %v858_v54 = vor.u32 %v6066_v2, %v6044_v23  ;;  %v6143_v44 = vld [vmem:[#allocation2 + $0x60] sm:$0xf]  ;;  %v411_v49 = vld [vmem:[#allocation2 + $0x94] sm:$0x1] }
  0x9e   :  { %v659_v25 = vsel %vm5913_vm6, %v527_v14, %v658_v56  ;;  %v662_v26 = vsel %vm5800_vm2, %v528_v16, %v661_v57  ;;  %v605_v29 = vsel %vm5913_vm6, %v455_v19, %v604_v63  ;;  %v608_v31 = vsel %vm5800_vm2, %v456_v21, %v607_v6  ;;  %v213_v41 = vpop.permute.xlu0 %212  ;;  %v357_v52 = vld [vmem:[#allocation2 + $0x4] sm:$0x1]  ;;  %v5557_v18 = vld [vmem:[%s8007_s3 + $0xe8] sm:$0xff]  ;;  %v5566_v4 = vld [vmem:[%s8007_s3 + $0x130] sm:$0xff] }
  0x9f   :  { %660 = vst [vmem:[#allocation2 + $0x80] sm:$0xf] %v659_v25  ;;  %v466_v33 = vshrl.u32 %v273_v34, 16  ;;  %v469_v35 = vshll.u32 %v273_v34, 16  ;;  %v458_v36 = vshrl.u32 %v272_v7, 16  ;;  %v461_v37 = vshll.u32 %v272_v7, 16  ;;  %1328 = vmatmul.bf16.vlgmr.msra.gmra.mxu1 %v1256_v30  ;;  %1658 = vmatpush.bf16.msrb.mxu3 %v5557_v18 }
  0xa0   :  { %663 = vst [vmem:[#allocation2 + $0x84] sm:$0x1] %v662_v26  ;;  %v866_v42 = vshrl.u32 %v6064_v1, 16  ;;  %v869_v43 = vshll.u32 %v6064_v1, 16  ;;  %v5703_v45 = vunpack.c.h.bf16 %v5948_v3  ;;  %v859_v46 = vrot.slane %v858_v54, 4  ;;  %v5549_v3 = vld [vmem:[%s8007_s3 + $0xa8] sm:$0xff]  ;;  %1805 = vmatpush.bf16.msrb.mxu0 %v5566_v4 }
  0xa1   :  { %606 = vst [vmem:[#allocation2 + $0x28] sm:$0xf] %v605_v29  ;;  %v468_v47 = vrot.slane %v466_v33, 7  ;;  %v610_v55 = vld [vmem:[#allocation2 + $0x30] sm:$0xf]  ;;  %v460_v28 = vrot.slane %v458_v36, 7  ;;  %v218_v23 = vperm.slane %v213_v41, %v5870_v62  ;;  %v8023_v2 = vunpack.c.l.b16 %v6135_v32  ;;  %1468 = vmatpush.bf16.msrb.mxu2 %v5549_v3 }
  0xa2   :  { %609 = vst [vmem:[#allocation2 + $0x2c] sm:$0x1] %v608_v31  ;;  %v613_v59 = vld [vmem:[#allocation2 + $0x34] sm:$0x1]  ;;  %v868_v48 = vrot.slane %v866_v42, 4  ;;  %v871_v62 = vrot.slane %v869_v43, 5  ;;  %v8014_v14 = vunpack.c.l.b16 %v6143_v44 }
  0xa3   :  { %v471_v53 = vor.u32 %v469_v35, %v468_v47  ;;  %v472_v56 = vrot.slane %v468_v47, 4  ;;  %v463_v57 = vor.u32 %v461_v37, %v460_v28  ;;  %v464_v58 = vrot.slane %v460_v28, 4  ;;  %v6148_v60 = vld [vmem:[#allocation2 + $0x54] sm:$0x1]  ;;  %v6178_v9 = vld [vmem:[#allocation2 + $0x10] sm:$0xf] }
  0xa4   :  { %v861_v61 = vshll.u32 %v6148_v60, 16  ;;  %v875_v63 = vshll.u32 %v6137_v39, 16  ;;  %v350_v0 = vsel %vm5800_vm2, 0, %v349_v40  ;;  %v872_v21 = vor.u32 %v871_v62, %v868_v48  ;;  %v6190_v25 = vld [vmem:[#allocation2 + $0xc] sm:$0x1]  ;;  %v5548_v48 = vld [vmem:[%s8007_s3 + $0xa0] sm:$0xff] }
  0xa5   :  { %v617_v6 = vsel %vm5913_vm6, %v471_v53, %v616_v27  ;;  %v620_v10 = vsel %vm5800_vm2, %v472_v56, %v619_v50  ;;  %v611_v11 = vsel %vm5913_vm6, %v463_v57, %v610_v55  ;;  %351 = vst [vmem:[#allocation2 + $0x90] sm:$0x1] %v350_v0  ;;  %v614_v16 = vsel %vm5800_vm2, %v464_v58, %v613_v59  ;;  %v6199_v40 = vld [vmem:[#allocation2 + $0x18] sm:$0xf]  ;;  %v6208_v28 = vld [vmem:[#allocation2 + $0x64] sm:$0x1] }
  0xa6   :  { %618 = vst [vmem:[#allocation2 + $0x38] sm:$0xf] %v617_v6  ;;  %v863_v19 = vrot.slane %v861_v61, 5  ;;  %v877_v22 = vrot.slane %v875_v63, 5  ;;  %v412_v34 = vsel %vm5810_vm4, 0, %v411_v49  ;;  %v250_v7 = vunpack.c.l.bf16 %v218_v23  ;;  %v5556_v57 = vld [vmem:[%s8007_s3 + $0xe0] sm:$0xff]  ;;  %1469 = vmatpush.bf16.msrb.mxu2 %v5548_v48 }
  0xa7   :  { %621 = vst [vmem:[#allocation2 + $0x3c] sm:$0x1] %v620_v10  ;;  %v6186_v30 = vpack.c.b16 %v8023_v2, %v8014_v14  ;;  %v358_v24 = vsel %vm5810_vm4, 0, %v357_v52  ;;  %v873_v29 = vrot.slane %v872_v21, 4  ;;  %v754_v31 = vshrl.u32 %v6103_v51, 16  ;;  %v5565_v58 = vld [vmem:[%s8007_s3 + $0x128] sm:$0xff]  ;;  %1659 = vmatpush.bf16.msrb.mxu3 %v5556_v57 }
  0xa8   :  { %612 = vst [vmem:[#allocation2 + $0x30] sm:$0xf] %v611_v11  ;;  %v864_v26 = vsel %vm6171_vm9, %v859_v46, %v863_v19  ;;  %v757_v33 = vshll.u32 %v6103_v51, 16  ;;  %v266_v36 = vmul.f32 %v5703_v45, %v250_v7  ;;  %v746_v37 = vor.u32 %v6112_v12, %v6105_v8  ;;  %v6210_v12 = vld [vmem:[#allocation2 + $0x6c] sm:$0x1]  ;;  %v5547_v11 = vld [vmem:[%s8007_s3 + $0x98] sm:$0xff]  ;;  %1806 = vmatpush.bf16.msrb.mxu0 %v5565_v58 }
  0xa9   :  { %8069 = vst [vmem:[#allocation4_spill] sm:$0xff] %v6186_v30  ;;  %v1103_v35 = vunpack.c.l.b16 %v864_v26  ;;  %1353 = vmatmul.bf16.gmra.mxu3 %v6186_v30  ;;  %v878_v41 = vsel %vm6171_vm9, %v873_v29, %v877_v22  ;;  %v756_v27 = vrot.slane %v754_v31, 4  ;;  %v763_v54 = vshll.u32 %v6190_v25, 16  ;;  %v6227_v56 = vld [vmem:[#allocation2 + $0x78] sm:$0xf]  ;;  %v5544_v5 = vld [vmem:[%s8007_s3 + $0x80] sm:$0xff] }
  0xaa   :  { %615 = vst [vmem:[#allocation2 + $0x34] sm:$0x1] %v614_v16  ;;  %v759_v50 = vrot.slane %v757_v33, 5  ;;  %v6204_v42 = vunpack.c.l.b16 %v878_v41  ;;  %v282_v43 = vpack.c.bf16 %v266_v36, %v266_v36  ;;  %v8024_v47 = vunpack.c.l.b16 %v6178_v9  ;;  %v6235_v63 = vld [vmem:[#allocation2 + $0x70] sm:$0xf]  ;;  %v5575_v16 = vld [vmem:[%s8007_s3 + $0x178] sm:$0xff]  ;;  %1470 = vmatpush.bf16.msrb.mxu2 %v5547_v11 }
  0xab   :  { %413 = vst [vmem:[#allocation2 + $0x94] sm:$0x1] %v412_v34  ;;  %v8019_v55 = vunpack.c.l.b16 %v6199_v40  ;;  %v880_v45 = vshrl.u32 %v6143_v44, 16  ;;  %v883_v59 = vshll.u32 %v6143_v44, 16  ;;  %v889_v46 = vshll.u32 %v6208_v28, 16  ;;  %v5555_v7 = vld [vmem:[%s8007_s3 + $0xd8] sm:$0xff]  ;;  %1952 = vmatpush.bf16.msrb.mxu1 %v5575_v16 }
  0xac   :  { %359 = vst [vmem:[#allocation2 + $0x4] sm:$0x1] %v358_v24  ;;  %v760_v8 = vor.u32 %v759_v50, %v756_v27  ;;  %v1115_v49 = vpack.c.b16 %v6204_v42, %v1103_v35  ;;  %v538_v23 = vshrl.u32 %v282_v43, 16  ;;  %v6219_v52 = vrot.slane %v746_v37, 4  ;;  %v670_v19 = vld [vmem:[#allocation2 + $0x90] sm:$0xf]  ;;  %1660 = vmatpush.bf16.msrb.mxu3 %v5555_v7 }
  0xad   :  { %v6225_v53 = vpack.c.b16 %v8019_v55, %v8024_v47  ;;  %v765_v18 = vrot.slane %v763_v54, 5  ;;  %v882_v61 = vrot.slane %v880_v45, 4  ;;  %v885_v62 = vrot.slane %v883_v59, 5  ;;  %v5564_v24 = vld [vmem:[%s8007_s3 + $0x120] sm:$0xff]  ;;  %v5574_v36 = vld [vmem:[%s8007_s3 + $0x170] sm:$0xff] }
  0xae   :  { %v761_v3 = vrot.slane %v760_v8, 4  ;;  %1203 = vmatmul.bf16.vlgmr.msra.gmra.mxu2 %v1115_v49  ;;  %v540_v0 = vrot.slane %v538_v23, 7  ;;  %v541_v4 = vshll.u32 %v282_v43, 16  ;;  %v894_v6 = vshrl.u32 %v6135_v32, 16  ;;  %1807 = vmatpush.bf16.msrb.mxu0 %v5564_v24  ;;  %v6286_v11 = vld [vmem:[#allocation2 + $0x14] sm:$0x1] }
  0xaf   :  { %8070 = vst [vmem:[#allocation5_spill] sm:$0xff] %v6225_v53  ;;  %1333 = vmatmul.bf16.gmra.mxu1 %v6225_v53  ;;  %v897_v10 = vshll.u32 %v6135_v32, 16  ;;  %v886_v21 = vor.u32 %v885_v62, %v882_v61  ;;  %v891_v22 = vrot.slane %v889_v46, 5  ;;  %v903_v34 = vshll.u32 %v6210_v12, 16  ;;  %v6361_v17 = vld [vmem:[#allocation2 + $0x88] sm:$0xf] }
  0xb0   :  { %v543_v29 = vor.u32 %v541_v4, %v540_v0  ;;  %v544_v31 = vrot.slane %v540_v0, 4  ;;  %v766_v33 = vsel %vm6171_vm9, %v761_v3, %v765_v18  ;;  %v896_v35 = vrot.slane %v894_v6, 4  ;;  %1953 = vmatpush.bf16.msrb.mxu1 %v5574_v36  ;;  %v6273_v0 = vld [vmem:[#allocation2 + $0x28] sm:$0xf]  ;;  %v6300_v36 = vld [vmem:[#allocation2 + $0x20] sm:$0xf] }
  0xb1   :  { %v887_v41 = vrot.slane %v886_v21, 4  ;;  %v899_v27 = vrot.slane %v897_v10, 5  ;;  %v8022_v50 = vunpack.c.l.b16 %v6235_v63  ;;  %v8017_v54 = vunpack.c.l.b16 %v6227_v56  ;;  %8074 = vst [vmem:[#allocation9_spill] sm:$0xff] %v6361_v17 }
  0xb2   :  { %v673_v26 = vld [vmem:[#allocation2 + $0x94] sm:$0x1]  ;;  %v671_v43 = vsel %vm5913_vm6, %v543_v29, %v670_v19  ;;  %v768_v59 = vshrl.u32 %v6178_v9, 16  ;;  %v771_v48 = vshll.u32 %v6178_v9, 16  ;;  %v6269_v23 = vunpack.c.l.b16 %v766_v33 }
  0xb3   :  { %v6258_v37 = vld [vmem:[#allocation2 + $0x4] sm:$0x1]  ;;  %v674_v8 = vsel %vm5800_vm2, %v544_v31, %v673_v26  ;;  %672 = vst [vmem:[#allocation2 + $0x90] sm:$0xf] %v671_v43  ;;  %v900_v46 = vor.u32 %v899_v27, %v896_v35  ;;  %v782_v58 = vshrl.u32 %v6199_v40, 16  ;;  %v905_v18 = vrot.slane %v903_v34, 5 }
  0xb4   :  { %v749_v45 = vshll.u32 %v6258_v37, 16  ;;  %675 = vst [vmem:[#allocation2 + $0x94] sm:$0x1] %v674_v8  ;;  %v770_v57 = vrot.slane %v768_v59, 4  ;;  %v773_v61 = vrot.slane %v771_v48, 5  ;;  %v785_v62 = vshll.u32 %v6199_v40, 16 }
  0xb5   :  { %v901_v3 = vrot.slane %v900_v46, 4  ;;  %v892_v6 = vsel %vm6171_vm9, %v887_v41, %v891_v22  ;;  %v6284_v10 = vpack.c.b16 %v8017_v54, %v8022_v50  ;;  %v784_v16 = vrot.slane %v782_v58, 4  ;;  %v6294_v22 = vld [vmem:[#allocation2 + $0x1c] sm:$0x1]  ;;  %v6306_v8 = vld [vmem:[#allocation2 + $0x74] sm:$0x1] }
  0xb6   :  { %v751_v49 = vrot.slane %v749_v45, 5  ;;  %v777_v34 = vshll.u32 %v6286_v11, 16  ;;  %v787_v7 = vrot.slane %v785_v62, 5  ;;  %v774_v24 = vor.u32 %v773_v61, %v770_v57  ;;  %v5573_v57 = vld [vmem:[%s8007_s3 + $0x168] sm:$0xff]  ;;  %v5554_v58 = vld [vmem:[%s8007_s3 + $0xd0] sm:$0xff] }
  0xb7   :  { %8071 = vst [vmem:[#allocation6_spill] sm:$0xff] %v6284_v10  ;;  %v906_v21 = vsel %vm6171_vm9, %v901_v3, %v905_v18  ;;  %v8016_v26 = vunpack.c.l.b16 %v6273_v0  ;;  %v908_v29 = vshrl.u32 %v6235_v63, 16  ;;  %v791_v35 = vshll.u32 %v6294_v22, 16  ;;  %v6328_v62 = vld [vmem:[#allocation2 + $0x7c] sm:$0x1]  ;;  %1954 = vmatpush.bf16.msrb.mxu1 %v5573_v57  ;;  %1661 = vmatpush.bf16.msrb.mxu3 %v5554_v58 }
  0xb8   :  { %v752_v4 = vsel %vm6171_vm9, %v6219_v52, %v751_v49  ;;  %v6291_v52 = vunpack.c.l.b16 %v906_v21  ;;  %v788_v33 = vor.u32 %v787_v7, %v784_v16  ;;  %v911_v41 = vshll.u32 %v6235_v63, 16  ;;  %v5546_v49 = vld [vmem:[%s8007_s3 + $0x90] sm:$0xff]  ;;  %v5572_v7 = vld [vmem:[%s8007_s3 + $0x160] sm:$0xff] }
  0xb9   :  { %v1095_v19 = vunpack.c.l.b16 %v752_v4  ;;  %1358 = vmatmul.bf16.gmra.mxu3 %v6284_v10  ;;  %v6303_v27 = vunpack.c.l.b16 %v892_v6  ;;  %v8018_v43 = vunpack.c.l.b16 %v6300_v36  ;;  %v910_v45 = vrot.slane %v908_v29, 4  ;;  %v5563_v6 = vld [vmem:[%s8007_s3 + $0x118] sm:$0xff]  ;;  %1471 = vmatpush.bf16.msrb.mxu2 %v5546_v49  ;;  %v6339_v29 = vld [vmem:[#allocation2 + $0x80] sm:$0xf] }
  0xba   :  { %v779_v59 = vrot.slane %v777_v34, 5  ;;  %v913_v46 = vrot.slane %v911_v41, 5  ;;  %v922_v48 = vshrl.u32 %v6227_v56, 16  ;;  %v775_v18 = vrot.slane %v774_v24, 4  ;;  %1808 = vmatpush.bf16.msrb.mxu0 %v5563_v6  ;;  %v5553_v41 = vld [vmem:[%s8007_s3 + $0xc8] sm:$0xff]  ;;  %v5571_v6 = vld [vmem:[%s8007_s3 + $0x158] sm:$0xff] }
  0xbb   :  { %v1111_v31 = vpack.c.b16 %v6269_v23, %v1095_v19  ;;  %v6320_v3 = vpack.c.b16 %v6291_v52, %v6303_v27  ;;  %v6326_v61 = vpack.c.b16 %v8016_v26, %v8018_v43  ;;  %v925_v4 = vshll.u32 %v6227_v56, 16  ;;  %1955 = vmatpush.bf16.msrb.mxu1 %v5572_v7  ;;  %1662 = vmatpush.bf16.msrb.mxu3 %v5553_v41  ;;  %v5552_v7 = vld [vmem:[%s8007_s3 + $0xc0] sm:$0xff] }
  0xbc   :  { %v789_v16 = vrot.slane %v788_v33, 4  ;;  %v793_v19 = vrot.slane %v791_v35, 5  ;;  %v914_v21 = vor.u32 %v913_v46, %v910_v45  ;;  %v924_v34 = vrot.slane %v922_v48, 4  ;;  %v5562_v45 = vld [vmem:[%s8007_s3 + $0x110] sm:$0xff] }
  0xbd   :  { %1183 = vmatmul.bf16.vlgmr.msra.gmra.mxu0 %v1111_v31  ;;  %8072 = vst [vmem:[#allocation7_spill] sm:$0xff] %v6320_v3  ;;  %v927_v24 = vrot.slane %v925_v4, 5  ;;  %v5545_v31 = vld [vmem:[%s8007_s3 + $0x88] sm:$0xff]  ;;  %v917_v33 = vshll.u32 %v6306_v8, 16  ;;  %v931_v35 = vshll.u32 %v6328_v62, 16  ;;  %v780_v46 = vsel %vm6171_vm9, %v775_v18, %v779_v59 }
  0xbe   :  { %8073 = vst [vmem:[#allocation8_spill] sm:$0xff] %v6326_v61  ;;  %1208 = vmatmul.bf16.gmra.mxu2 %v6320_v3  ;;  %v794_v49 = vsel %vm6171_vm9, %v789_v16, %v793_v19  ;;  %v915_v57 = vrot.slane %v914_v21, 4  ;;  %v8021_v4 = vunpack.c.l.b16 %v6339_v29  ;;  %v796_v58 = vshrl.u32 %v6300_v36, 16  ;;  %1809 = vmatpush.bf16.msrb.mxu0 %v5562_v45  ;;  %v6386_v45 = vld [vmem:[#allocation2 + $0x30] sm:$0xf] }
  0xbf   :  { %1338 = vmatmul.bf16.gmra.mxu1 %v6326_v61  ;;  %v928_v48 = vor.u32 %v927_v24, %v924_v34  ;;  %1472 = vmatpush.bf16.msrb.mxu2 %v5545_v31  ;;  %v799_v59 = vshll.u32 %v6300_v36, 16  ;;  %v810_v18 = vshrl.u32 %v6273_v0, 16  ;;  %v813_v16 = vshll.u32 %v6273_v0, 16 }
  0xc0   :  { %v919_v19 = vrot.slane %v917_v33, 5  ;;  %v933_v21 = vrot.slane %v931_v35, 5  ;;  %v8020_v34 = vunpack.c.l.b16 %v6361_v17  ;;  %v6370_v24 = vunpack.c.l.b16 %v780_v46  ;;  %v6388_v46 = vld [vmem:[#allocation2 + $0x38] sm:$0xf]  ;;  %1956 = vmatpush.bf16.msrb.mxu1 %v5571_v6  ;;  %1663 = vmatpush.bf16.msrb.mxu3 %v5552_v7 }
  0xc1   :  { %v929_v14 = vrot.slane %v928_v48, 4  ;;  %v936_v31 = vshrl.u32 %v6339_v29, 16  ;;  %v939_v48 = vshll.u32 %v6339_v29, 16  ;;  %v6374_v26 = vunpack.c.l.b16 %v794_v49  ;;  %v5570_v49 = vld [vmem:[%s8007_s3 + $0x150] sm:$0xff] }
  0xc2   :  { %v920_v33 = vsel %vm6171_vm9, %v915_v57, %v919_v19  ;;  %v6384_v41 = vpack.c.b16 %v8020_v34, %v8021_v4  ;;  %v798_v54 = vrot.slane %v796_v58, 4  ;;  %v801_v57 = vrot.slane %v799_v59, 5  ;;  %v5569_v59 = vld [vmem:[%s8007_s3 + $0x148] sm:$0xff] }
  0xc3   :  { %v934_v35 = vsel %vm6171_vm9, %v929_v14, %v933_v21  ;;  %v812_v19 = vrot.slane %v810_v18, 4  ;;  %v815_v43 = vrot.slane %v813_v16, 5  ;;  %v6393_v14 = vld [vmem:[#allocation2 + $0x2c] sm:$0x1]  ;;  %v938_v21 = vrot.slane %v936_v31, 4  ;;  %1473 = vmatpush.bf16.msrb.mxu2 %v5544_v5  ;;  %v5591_v5 = vld [vmem:[%s8007_s3 + $0x1f8] sm:$0xff] }
  0xc4   :  { %8075 = vst [vmem:[#allocation10_spill] sm:$0xff] %v6384_v41  ;;  %v941_v55 = vrot.slane %v939_v48, 5  ;;  %v950_v34 = vshrl.u32 %v6361_v17, 16  ;;  %v953_v4 = vshll.u32 %v6361_v17, 16  ;;  %v6397_v50 = vunpack.c.l.b16 %v920_v33  ;;  %v6408_v16 = vld [vmem:[#allocation2 + $0x24] sm:$0x1]  ;;  %1957 = vmatpush.bf16.msrb.mxu1 %v5570_v49  ;;  %2266 = vmatpush.bf16.msra.mxu3 %v5591_v5 }
  0xc5   :  { %v6399_v6 = vunpack.c.l.b16 %v934_v35  ;;  %v8031_v58 = vunpack.c.l.b16 %v6386_v45  ;;  %v6406_v18 = vpack.c.b16 %v6374_v26, %v6370_v24  ;;  %v802_v31 = vor.u32 %v801_v57, %v798_v54  ;;  %v5561_v54 = vld [vmem:[%s8007_s3 + $0x108] sm:$0xff]  ;;  %v5568_v57 = vld [vmem:[%s8007_s3 + $0x140] sm:$0xff] }
  0xc6   :  { %v805_v7 = vshll.u32 %v6408_v16, 16  ;;  %v816_v48 = vor.u32 %v815_v43, %v812_v19  ;;  %v819_v33 = vshll.u32 %v6393_v14, 16  ;;  %v942_v35 = vor.u32 %v941_v55, %v938_v21  ;;  %v6434_v49 = vld [vmem:[#allocation2 + $0x8c] sm:$0x1]  ;;  %v717_v19 = vld [vmem:[#allocation2 + $0x8] sm:$0xe]  ;;  %1810 = vmatpush.bf16.msrb.mxu0 %v5561_v54 }
  0xc7   :  { %8076 = vst [vmem:[#allocation11_spill] sm:$0xff] %v6406_v18  ;;  %v952_v2 = vrot.slane %v950_v34, 4  ;;  %v955_v47 = vrot.slane %v953_v4, 5  ;;  %v6424_v43 = vpack.c.b16 %v6399_v6, %v6397_v50  ;;  %v8078_v55 = vunpack.c.l.b16 %v6388_v46  ;;  %v6432_v34 = vld [vmem:[#allocation2 + $0x84] sm:$0x1] }
  0xc8   :  { %1958 = vmatpush.bf16.msrb.mxu1 %v5569_v59  ;;  %v718_v21 = vld [vmem:[#allocation2 + $0x10] sm:$0xe]  ;;  %v803_v38 = vrot.slane %v802_v31, 4  ;;  %v817_v10 = vrot.slane %v816_v48, 4  ;;  %v821_v30 = vrot.slane %v819_v33, 5  ;;  %v943_v59 = vrot.slane %v942_v35, 4 }
  0xc9   :  { %1363 = vmatmul.bf16.gmra.mxu3 %v6384_v41  ;;  %8077 = vst [vmem:[#allocation12_spill] sm:$0xff] %v6424_v43  ;;  %v6430_v4 = vpack.c.b16 %v8078_v55, %v8031_v58  ;;  %v807_v41 = vrot.slane %v805_v7, 5  ;;  %v5583_v55 = vld [vmem:[%s8007_s3 + $0x1b8] sm:$0xff]  ;;  %v945_v58 = vshll.u32 %v6432_v34, 16  ;;  %v956_v3 = vor.u32 %v955_v47, %v952_v2  ;;  %v5560_v31 = vld [vmem:[%s8007_s3 + $0x100] sm:$0xff] }
  0xca   :  { %v824_v7 = vshrl.u32 %v6386_v45, 16  ;;  %v827_v48 = vshll.u32 %v6386_v45, 16  ;;  %2130 = vmatpush.bf16.msra.mxu2 %v5583_v55  ;;  %v4657_v33 = vrot.slane %v717_v19, 9  ;;  %v1004_v35 = vrot.slane %v6190_v25, 5  ;;  %1811 = vmatpush.bf16.msrb.mxu0 %v5560_v31 }
  0xcb   :  { %8079 = vst [vmem:[#allocation13_spill] sm:$0xff] %v6430_v4  ;;  %v4658_v2 = vrot.slane %v718_v21, 9  ;;  %v1008_v47 = vrot.slane %v6286_v11, 5  ;;  %v822_v54 = vsel %vm6171_vm9, %v817_v10, %v821_v30  ;;  %v841_v61 = vshll.u32 %v6388_v46, 16 }
  0xcc   :  { %1959 = vmatpush.bf16.msrb.mxu1 %v5568_v57  ;;  %v947_v53 = vrot.slane %v945_v58, 5  ;;  %v808_v57 = vsel %vm6171_vm9, %v803_v38, %v807_v41  ;;  %v826_v19 = vrot.slane %v824_v7, 4  ;;  %v829_v55 = vrot.slane %v827_v48, 5 }
  0xcd   :  { %1188 = vmatmul.bf16.gmra.mxu0 %v6406_v18  ;;  %v957_v18 = vrot.slane %v956_v3, 4  ;;  %v6468_v30 = vunpack.c.l.b16 %v822_v54  ;;  %v6474_v11 = vsel %vm6464_vm12, %v4657_v33, %v1004_v35  ;;  %v6478_v38 = vsel %vm6464_vm12, %v4658_v2, %v1008_v47  ;;  %v5599_v33 = vld [vmem:[%s8007_s3 + $0x238] sm:$0xff] }
  0xce   :  { %1213 = vmatmul.bf16.gmra.mxu2 %v6424_v43  ;;  %v959_v43 = vshll.u32 %v6434_v49, 16  ;;  %v948_v10 = vsel %vm6171_vm9, %v943_v59, %v947_v53  ;;  %v8082_v3 = vunpack.c.l.b16 %v6103_v51  ;;  %v8083_v41 = vunpack.c.l.b16 %v6178_v9  ;;  %v6488_v59 = vld [vmem:[#allocation2 + $0x34] sm:$0x1]  ;;  %2402 = vmatpush.bf16.msra.mxu0 %v5599_v33 }
  0xcf   :  { %1343 = vmatmul.bf16.gmra.mxu1 %v6430_v4  ;;  %v838_v4 = vshrl.u32 %v6388_v46, 16  ;;  %v843_v21 = vrot.slane %v841_v61, 5  ;;  %v6484_v5 = vunpack.c.l.b16 %v808_v57  ;;  %v6490_v31 = vunpack.c.l.b16 %v948_v10  ;;  %v6498_v61 = vld [vmem:[#allocation2 + $0x3c] sm:$0x1]  ;;  %v716_v57 = vld [vmem:[#allocation2] sm:$0xe] }
  0xd0   :  { %v961_v17 = vrot.slane %v959_v43, 5  ;;  %v1592_v58 = vpack.c.b16 %v8083_v41, %v8082_v3  ;;  %v830_v7 = vor.u32 %v829_v55, %v826_v19  ;;  %v1387_v48 = vunpack.c.l.b16 %v6474_v11  ;;  %v719_v19 = vld [vmem:[#allocation2 + $0x18] sm:$0xe]  ;;  %v720_v11 = vld [vmem:[#allocation2 + $0x20] sm:$0xe]  ;;  %v5582_v3 = vld [vmem:[%s8007_s3 + $0x1b0] sm:$0xff] }
  0xd1   :  { %v840_v43 = vrot.slane %v838_v4, 4  ;;  %v8039_v51 = vunpack.c.l.b16 %v6478_v38  ;;  %v6496_v9 = vpack.c.b16 %v6468_v30, %v6484_v5  ;;  %v847_v47 = vshll.u32 %v6498_v61, 16  ;;  %v5590_v41 = vld [vmem:[%s8007_s3 + $0x1f0] sm:$0xff]  ;;  %2131 = vmatpush.bf16.msra.mxu2 %v5582_v3 }
  0xd2   :  { %v962_v53 = vsel %vm6171_vm9, %v957_v18, %v961_v17  ;;  %v833_v17 = vshll.u32 %v6488_v59, 16  ;;  %v831_v2 = vrot.slane %v830_v7, 4  ;;  %2267 = vmatpush.bf16.msra.mxu3 %v5590_v41  ;;  %v4659_v7 = vrot.slane %v719_v19, 9 }
  0xd3   :  { %v6500_v4 = vunpack.c.l.b16 %v962_v53  ;;  %v844_v18 = vor.u32 %v843_v21, %v840_v43  ;;  %v1888_v54 = vpack.c.b16 %v8039_v51, %v1387_v48  ;;  %v849_v43 = vrot.slane %v847_v47, 5 }
  0xd4   :  { %v835_v55 = vrot.slane %v833_v17, 5  ;;  %v4656_v21 = vrot.slane %v716_v57, 9  ;;  %v1000_v53 = vrot.slane %v6258_v37, 5  ;;  %v1012_v17 = vrot.slane %v6294_v22, 5 }
  0xd5   :  { %v6509_v35 = vpack.c.b16 %v6500_v4, %v6490_v31  ;;  %v845_v10 = vrot.slane %v844_v18, 4  ;;  %v4660_v18 = vrot.slane %v720_v11, 9  ;;  %v1016_v33 = vrot.slane %v6408_v16, 5 }
  0xd6   :  { %v8085_v51 = vunpack.c.l.b16 %v6135_v32  ;;  %v1744_v37 = vpack.c.b16 %v6303_v27, %v6204_v42  ;;  %v1001_v22 = vsel %vm6464_vm12, %v4656_v21, %v1000_v53  ;;  %v1013_v16 = vsel %vm6464_vm12, %v4659_v7, %v1012_v17  ;;  %v722_v53 = vld [vmem:[#allocation2 + $0x30] sm:$0xe]  ;;  %v384_v7 = vld [vmem:[#allocation2 + $0x4c] sm:$0x1]  ;;  %v352_v17 = vld [vmem:[#allocation2 + $0x98] sm:$0x1] }
  0xd7   :  { %8084 = vst [vmem:[#allocation14_spill] sm:$0xff] %v6509_v35  ;;  %v6546_v32 = vsel %vm6464_vm12, %v4660_v18, %v1016_v33  ;;  %v8089_v19 = vunpack.c.l.b16 %v6227_v56  ;;  %v1745_v11 = vpack.c.b16 %v6397_v50, %v6291_v52  ;;  %v1386_v3 = vunpack.c.l.b16 %v1001_v22  ;;  %v5598_v56 = vld [vmem:[%s8007_s3 + $0x230] sm:$0xff]  ;;  %v5581_v18 = vld [vmem:[%s8007_s3 + $0x1a8] sm:$0xff] }
  0xd8   :  { %v1389_v41 = vunpack.c.l.b16 %v1013_v16  ;;  %2403 = vmatpush.bf16.msra.mxu0 %v5598_v56  ;;  %v5589_v33 = vld [vmem:[%s8007_s3 + $0x1e8] sm:$0xff]  ;;  %2132 = vmatpush.bf16.msra.mxu2 %v5581_v18  ;;  %v385_v16 = vsel %vm5810_vm4, 0, %v384_v7  ;;  %v723_v18 = vld [vmem:[#allocation2 + $0x38] sm:$0xe] }
  0xd9   :  { %1664 = vmatmul.bf16.vlgmr.msrb.gmra.mxu3 %v1592_v58  ;;  %v836_v58 = vsel %vm6171_vm9, %v831_v2, %v835_v55  ;;  %v8090_v55 = vunpack.c.l.b16 %v6339_v29  ;;  %v322_v29 = vld [vmem:[#allocation2 + $0x48] sm:$0x1]  ;;  %v721_v22 = vld [vmem:[#allocation2 + $0x28] sm:$0xe]  ;;  %386 = vst [vmem:[#allocation2 + $0x4c] sm:$0x1] %v385_v16 }
  0xda   :  { %v6536_v47 = vunpack.c.l.b16 %v836_v58  ;;  %v1390_v58 = vunpack.c.l.b16 %v6546_v32  ;;  %2268 = vmatpush.bf16.msra.mxu3 %v5589_v33  ;;  %v5597_v7 = vld [vmem:[%s8007_s3 + $0x228] sm:$0xff]  ;;  %v704_v33 = vld [vmem:[#allocation2 + $0x44] sm:$0x1] }
  0xdb   :  { %v1565_v16 = vrot.slane %v704_v33, 5  ;;  %v733_v27 = vld [vmem:[#allocation2 + $0x88] sm:$0xe] }
  0xdc   :  { %v1889_v21 = vpack.c.b16 %v1390_v58, %v1389_v41  ;;  %2404 = vmatpush.bf16.msra.mxu0 %v5597_v7 }
  0xdd   :  { %1193 = vmatmul.bf16.gmra.mxu0 %v6496_v9 }
  0xde   :  { %1218 = vmatmul.bf16.gmra.mxu2 %v6509_v35  ;;  %v8086_v35 = vunpack.c.l.b16 %v6235_v63  ;;  %v8087_v63 = vunpack.c.l.b16 %v6199_v40 }
  0xdf   :  { %1960 = vmatmul.bf16.vlgmr.msrb.gmra.mxu1 %v1888_v54  ;;  %v850_v54 = vsel %vm6171_vm9, %v845_v10, %v849_v43  ;;  %v6556_v10 = vpack.c.b16 %v8090_v55, %v8089_v19  ;;  %v1402_v43 = vpack.c.b16 %v1387_v48, %v1386_v3  ;;  %v323_v48 = vsel %vm5800_vm2, 0, %v322_v29 }
  0xe0   :  { %v6532_v2 = vpack.c.b16 %v8086_v35, %v8085_v51  ;;  %v6538_v57 = vunpack.c.l.b16 %v850_v54  ;;  %v8088_v51 = vunpack.c.l.b16 %v6300_v36  ;;  %v1746_v36 = vpack.c.b16 %v6490_v31, %v6399_v6  ;;  %v414_v54 = vld [vmem:[#allocation2 + $0x9c] sm:$0x1]  ;;  %324 = vst [vmem:[#allocation2 + $0x48] sm:$0x1] %v323_v48  ;;  %v724_v48 = vld [vmem:[#allocation2 + $0x40] sm:$0xe] }
  0xe1   :  { %v415_v19 = vsel %vm5810_vm4, 0, %v414_v54  ;;  %v4661_v55 = vrot.slane %v721_v22, 9  ;;  %v1020_v3 = vrot.slane %v6393_v14, 5  ;;  %v8091_v29 = vunpack.c.l.b16 %v6273_v0  ;;  %v6617_v54 = vld [vmem:[#allocation2 + $0x40] sm:$0xf] }
  0xe2   :  { %v1593_v35 = vpack.c.b16 %v8088_v51, %v8087_v63  ;;  %v6563_v40 = vpack.c.b16 %v6538_v57, %v6536_v47  ;;  %v4662_v63 = vrot.slane %v722_v53, 9  ;;  %v1024_v51 = vrot.slane %v6488_v59, 5  ;;  %416 = vst [vmem:[#allocation2 + $0x9c] sm:$0x1] %v415_v19 }
  0xe3   :  { %v8092_v59 = vunpack.c.l.b16 %v6386_v45  ;;  %v1740_v53 = vpack.c.b16 %v6370_v24, %v6269_v23  ;;  %v8093_v0 = vunpack.c.l.b16 %v6478_v38  ;;  %v5580_v23 = vld [vmem:[%s8007_s3 + $0x1a0] sm:$0xff]  ;;  %v4663_v38 = vrot.slane %v723_v18, 9 }
  0xe4   :  { %v6591_v56 = vsel %vm6464_vm12, %v4662_v63, %v1024_v51  ;;  %v5588_v24 = vld [vmem:[%s8007_s3 + $0x1e0] sm:$0xff]  ;;  %2133 = vmatpush.bf16.msra.mxu2 %v5580_v23  ;;  %v4800_v22 = vrot.slane %v724_v48, 9  ;;  %v1590_v63 = vunpack.c.l.b16 %v6617_v54  ;;  %v1532_v7 = vshrl.u32 %v6617_v54, 16 }
  0xe5   :  { %v1392_v20 = vunpack.c.l.b16 %v6591_v56  ;;  %2269 = vmatpush.bf16.msra.mxu3 %v5588_v24  ;;  %v8095_v23 = vunpack.c.l.b16 %v6064_v1  ;;  %v8096_v24 = vunpack.c.l.b16 %v6143_v44  ;;  %v1541_v44 = vshll.u32 %v704_v33, 16  ;;  %v5578_v33 = vld [vmem:[%s8007_s3 + $0x190] sm:$0xff] }
  0xe7   :  { %v1596_v48 = vpack.c.b16 %v8096_v24, %v8095_v23 }
  0xe9   :  { %1669 = vmatmul.bf16.gmra.mxu3 %v1593_v35  ;;  %v353_v35 = vsel %vm5800_vm2, 0, %v352_v17  ;;  %v6607_v17 = vpack.c.b16 %v1389_v41, %v8093_v0  ;;  %v1028_v41 = vrot.slane %v6498_v61, 5  ;;  %v1535_v0 = vshll.u32 %v6617_v54, 16 }
  0xea   :  { %354 = vst [vmem:[#allocation2 + $0x98] sm:$0x1] %v353_v35  ;;  %v8094_v35 = vunpack.c.l.b16 %v6388_v46 }
  0xeb   :  { %v1029_v51 = vsel %vm6464_vm12, %v4663_v38, %v1028_v41  ;;  %v1537_v38 = vrot.slane %v1535_v0, 5 }
  0xec   :  { %v1595_v19 = vpack.c.b16 %v1590_v63, %v8094_v35  ;;  %v1393_v61 = vunpack.c.l.b16 %v1029_v51  ;;  %v5595_v51 = vld [vmem:[%s8007_s3 + $0x218] sm:$0xff] }
  0xed   :  { %1198 = vmatmul.bf16.gmra.mxu0 %v6563_v40 }
  0xee   :  { %1474 = vmatmul.bf16.vlgmr.msrb.gmra.mxu2 %v1402_v43  ;;  %v1594_v43 = vpack.c.b16 %v8092_v59, %v8091_v29  ;;  %v5596_v29 = vld [vmem:[%s8007_s3 + $0x220] sm:$0xff]  ;;  %v6669_v35 = vpack.c.b16 %v1393_v61, %v1392_v20 }
  0xef   :  { %1965 = vmatmul.bf16.gmra.mxu1 %v1889_v21  ;;  %v1021_v21 = vsel %vm6464_vm12, %v4661_v55, %v1020_v3  ;;  %v6628_v55 = vsel %vm6464_vm12, %v4800_v22, %v1565_v16  ;;  %v1741_v3 = vpack.c.b16 %v6484_v5, %v6374_v26  ;;  %2405 = vmatpush.bf16.msra.mxu0 %v5596_v29  ;;  %v728_v26 = vld [vmem:[#allocation2 + $0x60] sm:$0xe]  ;;  %v5579_v5 = vld [vmem:[%s8007_s3 + $0x198] sm:$0xff]  ;;  %v730_v29 = vld [vmem:[#allocation2 + $0x70] sm:$0xe] }
  0xf0   :  { %v1391_v14 = vunpack.c.l.b16 %v1021_v21  ;;  %v1886_v56 = vunpack.c.l.b16 %v6628_v55  ;;  %v5587_v21 = vld [vmem:[%s8007_s3 + $0x1d8] sm:$0xff]  ;;  %2134 = vmatpush.bf16.msra.mxu2 %v5579_v5  ;;  %v1742_v22 = vpack.c.b16 %v6536_v47, %v6468_v30  ;;  %v1543_v47 = vrot.slane %v1541_v44, 5  ;;  %v5577_v44 = vld [vmem:[%s8007_s3 + $0x188] sm:$0xff] }
  0xf1   :  { %2270 = vmatpush.bf16.msra.mxu3 %v5587_v21  ;;  %v5586_v21 = vld [vmem:[%s8007_s3 + $0x1d0] sm:$0xff] }
  0xf2   :  { %v1890_v45 = vpack.c.b16 %v1392_v20, %v1391_v14  ;;  %v6638_v46 = vpack.c.b16 %v1391_v14, %v1390_v58  ;;  %v1891_v59 = vpack.c.b16 %v1886_v56, %v1393_v61  ;;  %v1036_v58 = vrot.slane %v6137_v39, 5 }
  0xf3   :  { %v1040_v14 = vrot.slane %v6208_v28, 5  ;;  %v1534_v39 = vrot.slane %v1532_v7, 4  ;;  %2406 = vmatpush.bf16.msra.mxu0 %v5595_v51  ;;  %v4668_v20 = vrot.slane %v730_v29, 9  ;;  %v1048_v61 = vrot.slane %v6306_v8, 5 }
  0xf4   :  { %2135 = vmatpush.bf16.msra.mxu2 %v5578_v33 }
  0xf5   :  { %v1538_v1 = vor.u32 %v1537_v38, %v1534_v39  ;;  %2271 = vmatpush.bf16.msra.mxu3 %v5586_v21  ;;  %v6689_v8 = vsel %vm6464_vm12, %v4668_v20, %v1048_v61  ;;  %v5593_v61 = vld [vmem:[%s8007_s3 + $0x208] sm:$0xff]  ;;  %v734_v21 = vld [vmem:[#allocation2 + $0x90] sm:$0xe] }
  0xf7   :  { %v1539_v30 = vrot.slane %v1538_v1, 4 }
  0xf8   :  { %2136 = vmatpush.bf16.msra.mxu2 %v5577_v44 }
  0xf9   :  { %1674 = vmatmul.bf16.gmra.mxu3 %v1594_v43  ;;  %v727_v43 = vld [vmem:[#allocation2 + $0x58] sm:$0xe] }
  0xfa   :  { %v4665_v32 = vrot.slane %v727_v43, 9 }
  0xfd   :  { %1812 = vmatmul.bf16.vlgmr.msrb.gmra.mxu0 %v1740_v53  ;;  %v4666_v53 = vrot.slane %v728_v26, 9  ;;  %v1032_v26 = vrot.slane %v6148_v60, 5  ;;  %v1544_v60 = vsel %vm6171_vm9, %v1539_v30, %v1543_v47  ;;  %v1052_v30 = vrot.slane %v6328_v62, 5 }
  0xfe   :  { %1479 = vmatmul.bf16.gmra.mxu2 %v6607_v17 }
  0xff   :  { %1970 = vmatmul.bf16.gmra.mxu1 %v1890_v45  ;;  %v1037_v45 = vsel %vm6464_vm12, %v4665_v32, %v1036_v58  ;;  %v6657_v18 = vsel %vm6464_vm12, %v4666_v53, %v1040_v14  ;;  %v1044_v58 = vrot.slane %v6210_v12, 5  ;;  %v6691_v14 = vunpack.c.l.b16 %v1544_v60 }
 0x100   :  { %v1395_v28 = vunpack.c.l.b16 %v1037_v45  ;;  %v1396_v41 = vunpack.c.l.b16 %v6657_v18  ;;  %v1398_v12 = vunpack.c.l.b16 %v6689_v8  ;;  %v5576_v18 = vld [vmem:[%s8007_s3 + $0x180] sm:$0xff] }
 0x101   :  { %v1743_v45 = vpack.c.b16 %v6691_v14, %v6538_v57  ;;  %v1056_v57 = vrot.slane %v6432_v34, 5  ;;  %2137 = vmatpush.bf16.msra.mxu2 %v5576_v18 }
 0x109   :  { %1679 = vmatmul.bf16.gmra.mxu3 %v1595_v19  ;;  %v1892_v19 = vpack.c.b16 %v1396_v41, %v1395_v28 }
 0x10d   :  { %1817 = vmatmul.bf16.gmra.mxu0 %v1741_v3  ;;  %v726_v3 = vld [vmem:[#allocation2 + $0x50] sm:$0xe] }
 0x10e   :  { %1484 = vmatmul.bf16.gmra.mxu2 %v6638_v46  ;;  %v4664_v43 = vrot.slane %v726_v3, 9 }
 0x10f   :  { %1975 = vmatmul.bf16.gmra.mxu1 %v1891_v59  ;;  %v729_v59 = vld [vmem:[#allocation2 + $0x68] sm:$0xe] }
 0x110   :  { %v4667_v32 = vrot.slane %v729_v59, 9  ;;  %v1033_v53 = vsel %vm6464_vm12, %v4664_v43, %v1032_v26 }
 0x111   :  { %v1394_v0 = vunpack.c.l.b16 %v1033_v53 }
 0x112   :  { %v1045_v7 = vsel %vm6464_vm12, %v4667_v32, %v1044_v58  ;;  %v6737_v32 = vld [vmem:[#allocation2 + $0x90] sm:$0xf]  ;;  %v4801_v58 = vrot.slane %v734_v21, 9 }
 0x113   :  { %v1397_v23 = vunpack.c.l.b16 %v1045_v7  ;;  %v1406_v39 = vpack.c.b16 %v1395_v28, %v1394_v0  ;;  %v5585_v28 = vld [vmem:[%s8007_s3 + $0x1c8] sm:$0xff]  ;;  %v1591_v7 = vunpack.c.l.b16 %v6737_v32 }
 0x114   :  { %2272 = vmatpush.bf16.msra.mxu3 %v5585_v28  ;;  %v5592_v28 = vld [vmem:[%s8007_s3 + $0x200] sm:$0xff] }
 0x115   :  { %v1893_v38 = vpack.c.b16 %v1398_v12, %v1397_v23  ;;  %v6734_v33 = vpack.c.b16 %v1397_v23, %v1396_v41  ;;  %v5584_v41 = vld [vmem:[%s8007_s3 + $0x1c0] sm:$0xff]  ;;  %v1060_v23 = vrot.slane %v6434_v49, 5 }
 0x118   :  { %2273 = vmatpush.bf16.msra.mxu3 %v5584_v41 }
 0x119   :  { %1684 = vmatmul.bf16.gmra.mxu3 %v1596_v48  ;;  %v5594_v48 = vld [vmem:[%s8007_s3 + $0x210] sm:$0xff] }
 0x11a   :  { %v1349_v16 = vpop.f32.mrf.mxu3  ;;  %2407 = vmatpush.bf16.msra.mxu0 %v5594_v48 }
 0x11c   :  { %v1329_v41 = vpop.f32.mrf.mxu1 }
 0x11d   :  { %1822 = vmatmul.bf16.gmra.mxu0 %v1742_v22  ;;  %v731_v22 = vld [vmem:[#allocation2 + $0x78] sm:$0xe] }
 0x11e   :  { %1489 = vmatmul.bf16.gmra.mxu2 %v6669_v35  ;;  %v4669_v29 = vrot.slane %v731_v22, 9  ;;  %2408 = vmatpush.bf16.msra.mxu0 %v5593_v61 }
 0x11f   :  { %1980 = vmatmul.bf16.gmra.mxu1 %v1892_v19 }
 0x120   :  { %v1053_v34 = vsel %vm6464_vm12, %v4669_v29, %v1052_v30 }
 0x121   :  { %v1399_v20 = vunpack.c.l.b16 %v1053_v34 }
 0x122   :  { %v1351_v5 = vpop.f32.mrf.mxu3  ;;  %2409 = vmatpush.bf16.msra.mxu0 %v5592_v28 }
 0x123   :  { %v6774_v29 = vpack.c.b16 %v1399_v20, %v1398_v12 }
 0x129   :  { %1689 = vmatmul.bf16.gmra.mxu3 %v6532_v2  ;;  %v732_v2 = vld [vmem:[#allocation2 + $0x80] sm:$0xe] }
 0x12a   :  { %v4670_v1 = vrot.slane %v732_v2, 9 }
 0x12c   :  { %v1354_v24 = vpop.f32.mrf.mxu3  ;;  %v6716_v47 = vsel %vm6464_vm12, %v4670_v1, %v1056_v57 }
 0x12d   :  { %1827 = vmatmul.bf16.gmra.mxu0 %v1743_v45  ;;  %v4671_v45 = vrot.slane %v733_v27, 9 }
 0x12e   :  { %1494 = vmatmul.bf16.gmra.mxu2 %v1406_v39  ;;  %v8097_v39 = vld [vmem:[#allocation9_spill] sm:$0xff] }
 0x12f   :  { %1985 = vmatmul.bf16.gmra.mxu1 %v1893_v38  ;;  %v8098_v38 = vunpack.c.l.b16 %v8097_v39 }
 0x131   :  { %v1204_v51 = vpop.f32.mrf.mxu2  ;;  %v1599_v2 = vpack.c.b16 %v1591_v7, %v8098_v38  ;;  %v1331_v38 = vpop.f32.mrf.mxu1 }
 0x132   :  { %v6711_v19 = vadd.f32 %v1349_v16, %v1204_v51  ;;  %v1400_v16 = vunpack.c.l.b16 %v6716_v47  ;;  %v1549_v47 = vshll.u32 %v6737_v32, 16 }
 0x134   :  { %v1356_v3 = vpop.f32.mrf.mxu3  ;;  %v1551_v12 = vrot.slane %v1549_v47, 5 }
 0x139   :  { %1694 = vmatmul.bf16.gmra.mxu3 %v6556_v10  ;;  %v1206_v43 = vpop.f32.mrf.mxu2  ;;  %v1894_v10 = vpack.c.b16 %v1400_v16, %v1399_v20  ;;  %v8099_v20 = vld [vmem:[#allocation11_spill] sm:$0xff] }
 0x13a   :  { %v6720_v59 = vpop.f32.mrf.mxu0  ;;  %v6724_v26 = vadd.f32 %v1351_v5, %v1206_v43  ;;  %v714_v5 = vld [vmem:[#allocation2 + $0x94] sm:$0x1] }
 0x13b   :  { %v1569_v60 = vrot.slane %v714_v5, 5  ;;  %v1330_v28 = vadd.f32 %v1329_v41, %v6720_v59 }
 0x13c   :  { %v1359_v62 = vpop.f32.mrf.mxu3 }
 0x13d   :  { %1832 = vmatmul.bf16.gmra.mxu0 %v1744_v37  ;;  %v6753_v48 = vsel %vm6464_vm12, %v4801_v58, %v1569_v60 }
 0x13e   :  { %1499 = vmatmul.bf16.gmra.mxu2 %v6734_v33  ;;  %v1887_v51 = vunpack.c.l.b16 %v6753_v48 }
 0x13f   :  { %1990 = vmatmul.bf16.gmra.mxu1 %v1894_v10 }
 0x141   :  { %v1209_v37 = vpop.f32.mrf.mxu2 }
 0x142   :  { %v6739_v42 = vpop.f32.mrf.mxu0  ;;  %v6747_v53 = vadd.f32 %v1354_v24, %v1209_v37  ;;  %v1061_v24 = vsel %vm6464_vm12, %v4671_v45, %v1060_v23  ;;  %v1555_v37 = vshll.u32 %v714_v5, 16 }
 0x143   :  { %v1401_v57 = vunpack.c.l.b16 %v1061_v24  ;;  %v6811_v24 = vld [vmem:[#allocation2 + $0x48] sm:$0xf] }
 0x144   :  { %v1361_v0 = vpop.f32.mrf.mxu3  ;;  %v1557_v18 = vrot.slane %v1555_v37, 5 }
 0x145   :  { %v1895_v30 = vpack.c.b16 %v1887_v51, %v1401_v57  ;;  %v6793_v27 = vpack.c.b16 %v1401_v57, %v1400_v16  ;;  %v2018_v57 = vshrl.u32 %v6811_v24, 16 }
 0x149   :  { %1699 = vmatmul.bf16.gmra.mxu3 %v1599_v2  ;;  %v1211_v49 = vpop.f32.mrf.mxu2 }
 0x14a   :  { %v6761_v22 = vpop.f32.mrf.mxu0  ;;  %v6764_v1 = vadd.f32 %v1356_v3, %v1211_v49  ;;  %v8100_v49 = vld [vmem:[#allocation5_spill] sm:$0xff] }
 0x14c   :  { %v1364_v44 = vpop.f32.mrf.mxu3 }
 0x14d   :  { %1837 = vmatmul.bf16.gmra.mxu0 %v1745_v11  ;;  %v1546_v11 = vshrl.u32 %v6737_v32, 16 }
 0x14e   :  { %1504 = vmatmul.bf16.gmra.mxu2 %v6774_v29 }
 0x14f   :  { %1995 = vmatmul.bf16.gmra.mxu1 %v1895_v30  ;;  %v1548_v8 = vrot.slane %v1546_v11, 4  ;;  %v2020_v11 = vrot.slane %v2018_v57, 4 }
 0x151   :  { %v1214_v50 = vpop.f32.mrf.mxu2  ;;  %v1552_v21 = vor.u32 %v1551_v12, %v1548_v8  ;;  %v1334_v8 = vpop.f32.mrf.mxu1  ;;  %v6819_v12 = vld [vmem:[#allocation2 + $0x4c] sm:$0x1] }
 0x152   :  { %v6779_v3 = vpop.f32.mrf.mxu0  ;;  %v6781_v52 = vadd.f32 %v1359_v62, %v1214_v50 }
 0x153   :  { %v1553_v58 = vrot.slane %v1552_v21, 4  ;;  %v1332_v21 = vadd.f32 %v1331_v38, %v6739_v42  ;;  %v1335_v38 = vadd.f32 %v1334_v8, %v6761_v22  ;;  %v5614_v8 = vld [vmem:[%s8009_s5 + $0x70] sm:$0xff] }
 0x154   :  { %v1366_v34 = vpop.f32.mrf.mxu3 }
 0x159   :  { %2274 = vmatmul.bf16.vlgmr.msra.gmra.mxu3 %v8099_v20  ;;  %v1216_v61 = vpop.f32.mrf.mxu2  ;;  %v1336_v42 = vpop.f32.mrf.mxu1 }
 0x15a   :  { %v6785_v43 = vpop.f32.mrf.mxu0  ;;  %v6788_v10 = vadd.f32 %v1361_v0, %v1216_v61  ;;  %v1558_v0 = vsel %vm6171_vm9, %v1553_v58, %v1557_v18  ;;  %v2027_v61 = vshll.u32 %v6819_v12, 16 }
 0x15b   :  { %v6802_v6 = vunpack.c.l.b16 %v1558_v0  ;;  %v5615_v0 = vld [vmem:[%s8009_s5 + $0x78] sm:$0xff] }
 0x15c   :  { %v1665_v62 = vpop.f32.mrf.mxu3  ;;  %3267 = vmatpush.bf16.msra.mxu1 %v5615_v0 }
 0x15d   :  { %1842 = vmatmul.bf16.gmra.mxu0 %v1746_v36  ;;  %v1747_v36 = vpack.c.b16 %v6802_v6, %v6500_v4 }
 0x15e   :  { %1509 = vmatmul.bf16.gmra.mxu2 %v6793_v27 }
 0x160   :  { %3268 = vmatpush.bf16.msra.mxu1 %v5614_v8 }
 0x161   :  { %v1219_v45 = vpop.f32.mrf.mxu2 }
 0x162   :  { %v6796_v60 = vpop.f32.mrf.mxu0  ;;  %v6798_v23 = vadd.f32 %v1364_v44, %v1219_v45  ;;  %v2021_v44 = vshll.u32 %v6811_v24, 16 }
 0x164   :  { %v1667_v39 = vpop.f32.mrf.mxu3  ;;  %v2023_v47 = vrot.slane %v2021_v44, 5 }
 0x166   :  { %v2024_v20 = vor.u32 %v2023_v47, %v2020_v11 }
 0x168   :  { %v2025_v45 = vrot.slane %v2024_v20, 4 }
 0x169   :  { %2279 = vmatmul.bf16.gmra.mxu3 %v6496_v9  ;;  %v1221_v16 = vpop.f32.mrf.mxu2 }
 0x16a   :  { %v6804_v31 = vpop.f32.mrf.mxu0  ;;  %v6809_v5 = vadd.f32 %v1366_v34, %v1221_v16  ;;  %v8101_v16 = vld [vmem:[#allocation8_spill] sm:$0xff] }
 0x16c   :  { %v1670_v2 = vpop.f32.mrf.mxu3 }
 0x16d   :  { %1847 = vmatmul.bf16.gmra.mxu0 %v1747_v36 }
 0x16e   :  { %2138 = vmatmul.bf16.vlgmr.msra.gmra.mxu2 %v8100_v49 }
 0x171   :  { %v1475_v30 = vpop.f32.mrf.mxu2 }
 0x172   :  { %v6817_v9 = vpop.f32.mrf.mxu0  ;;  %v1515_v4 = vadd.f32 %v1475_v30, %v1330_v28 }
 0x174   :  { %v1672_v50 = vpop.f32.mrf.mxu3  ;;  %v1705_v34 = vadd.f32 %v1665_v62, %v1515_v4  ;;  %v2029_v62 = vrot.slane %v2027_v61, 5 }
 0x179   :  { %2284 = vmatmul.bf16.gmra.mxu3 %v6563_v40  ;;  %v1477_v58 = vpop.f32.mrf.mxu2  ;;  %v2030_v40 = vsel %vm6171_vm9, %v2025_v45, %v2029_v62 }
 0x17a   :  { %v1813_v37 = vpop.f32.mrf.mxu0  ;;  %v1516_v18 = vadd.f32 %v1477_v58, %v1332_v21  ;;  %v2212_v28 = vunpack.c.l.b16 %v2030_v40  ;;  %v8103_v40 = vld [vmem:[#allocation7_spill] sm:$0xff] }
 0x17b   :  { %v6824_v59 = vadd.f32 %v1813_v37, %v1705_v34  ;;  %v1339_v34 = vpop.f32.mrf.mxu1 }
 0x17c   :  { %v1675_v41 = vpop.f32.mrf.mxu3  ;;  %v1706_v36 = vadd.f32 %v1667_v39, %v1516_v18  ;;  %v2214_v11 = vpack.c.b16 %v2212_v28, %v6691_v14  ;;  %v1337_v39 = vadd.f32 %v1336_v42, %v6779_v3  ;;  %v1340_v14 = vadd.f32 %v1339_v34, %v6785_v43  ;;  %v725_v43 = vld [vmem:[#allocation2 + $0x48] sm:$0xe] }
 0x17d   :  { %2410 = vmatmul.bf16.vlgmr.msra.gmra.mxu0 %v6607_v17  ;;  %v2076_v42 = vunpack.c.l.b16 %v6811_v24  ;;  %v4946_v24 = vrot.slane %v725_v43, 9 }
 0x17e   :  { %2143 = vmatmul.bf16.gmra.mxu2 %v8101_v16 }
 0x181   :  { %v1480_v17 = vpop.f32.mrf.mxu2 }
 0x182   :  { %v1815_v49 = vpop.f32.mrf.mxu0  ;;  %v1517_v44 = vadd.f32 %v1480_v17, %v1335_v38 }
 0x183   :  { %v6834_v57 = vadd.f32 %v1815_v49, %v1706_v36  ;;  %v1341_v62 = vpop.f32.mrf.mxu1 }
 0x184   :  { %v1677_v30 = vpop.f32.mrf.mxu3  ;;  %v1707_v4 = vadd.f32 %v1670_v2, %v1517_v44  ;;  %v8102_v2 = vld [vmem:[#allocation13_spill] sm:$0xff]  ;;  %v5613_v44 = vld [vmem:[%s8009_s5 + $0x68] sm:$0xff] }
 0x185   :  { %3269 = vmatpush.bf16.msra.mxu1 %v5613_v44  ;;  %v715_v44 = vld [vmem:[#allocation2 + $0x9c] sm:$0x1] }
 0x189   :  { %2289 = vmatmul.bf16.gmra.mxu3 %v2214_v11  ;;  %v1482_v61 = vpop.f32.mrf.mxu2 }
 0x18a   :  { %v1818_v47 = vpop.f32.mrf.mxu0  ;;  %v1518_v21 = vadd.f32 %v1482_v61, %v1337_v39 }
 0x18b   :  { %v6838_v20 = vadd.f32 %v1818_v47, %v1707_v4  ;;  %v1344_v28 = vpop.f32.mrf.mxu1  ;;  %v2051_v4 = vrot.slane %v6819_v12, 5 }
 0x18c   :  { %v1680_v22 = vpop.f32.mrf.mxu3  ;;  %v1708_v37 = vadd.f32 %v1672_v50, %v1518_v21  ;;  %v1345_v11 = vadd.f32 %v1344_v28, %v6804_v31  ;;  %v8106_v28 = vld [vmem:[#allocation14_spill] sm:$0xff] }
 0x18d   :  { %2415 = vmatmul.bf16.gmra.mxu0 %v6638_v46  ;;  %v1342_v46 = vadd.f32 %v1341_v62, %v6796_v60  ;;  %v2078_v60 = vpack.c.b16 %v2076_v42, %v1590_v63  ;;  %v2052_v61 = vsel %vm6464_vm12, %v4946_v24, %v2051_v4  ;;  %v695_v62 = vld [vmem:[#allocation2 + $0x98] sm:$0xf] }
 0x18e   :  { %2148 = vmatmul.bf16.gmra.mxu2 %v8102_v2  ;;  %v2348_v63 = vunpack.c.l.b16 %v2052_v61  ;;  %v8104_v2 = vld [vmem:[#allocation12_spill] sm:$0xff] }
 0x190   :  { %v2350_v31 = vpack.c.b16 %v2348_v63, %v1886_v56 }
 0x191   :  { %v1485_v18 = vpop.f32.mrf.mxu2 }
 0x192   :  { %v1820_v3 = vpop.f32.mrf.mxu0  ;;  %v1519_v45 = vadd.f32 %v1485_v18, %v1340_v14 }
 0x193   :  { %v6846_v58 = vadd.f32 %v1820_v3, %v1708_v37  ;;  %v1346_v21 = vpop.f32.mrf.mxu1 }
 0x194   :  { %v1682_v0 = vpop.f32.mrf.mxu3  ;;  %v1709_v36 = vadd.f32 %v1675_v41, %v1519_v45  ;;  %v1347_v8 = vadd.f32 %v1346_v21, %v6817_v9  ;;  %v8105_v9 = vld [vmem:[#allocation4_spill] sm:$0xff] }
 0x199   :  { %2294 = vmatmul.bf16.gmra.mxu3 %v8103_v40  ;;  %v1487_v38 = vpop.f32.mrf.mxu2 }
 0x19a   :  { %v1823_v16 = vpop.f32.mrf.mxu0  ;;  %v1520_v49 = vadd.f32 %v1487_v38, %v1342_v46  ;;  %v2035_v46 = vshll.u32 %v695_v62, 16 }
 0x19b   :  { %v6851_v50 = vadd.f32 %v1823_v16, %v1709_v36  ;;  %v2032_v36 = vshrl.u32 %v695_v62, 16 }
 0x19c   :  { %v1685_v17 = vpop.f32.mrf.mxu3  ;;  %v1710_v41 = vadd.f32 %v1677_v30, %v1520_v49  ;;  %v2037_v49 = vrot.slane %v2035_v46, 5  ;;  %v5607_v46 = vld [vmem:[%s8009_s5 + $0x38] sm:$0xff] }
 0x19d   :  { %2420 = vmatmul.bf16.gmra.mxu0 %v6669_v35  ;;  %v2034_v38 = vrot.slane %v2032_v36, 4  ;;  %3412 = vmatpush.bf16.msrb.mxu2 %v5607_v46  ;;  %v5604_v46 = vld [vmem:[%s8009_s5 + $0x20] sm:$0xff] }
 0x19e   :  { %2153 = vmatmul.bf16.gmra.mxu2 %v2078_v60 }
 0x1a1   :  { %v1490_v47 = vpop.f32.mrf.mxu2 }
 0x1a2   :  { %v1825_v39 = vpop.f32.mrf.mxu0  ;;  %v1521_v34 = vadd.f32 %v1490_v47, %v1345_v11  ;;  %v5611_v47 = vld [vmem:[%s8009_s5 + $0x58] sm:$0xff] }
 0x1a3   :  { %v6861_v35 = vadd.f32 %v1825_v39, %v1710_v41  ;;  %v2038_v41 = vor.u32 %v2037_v49, %v2034_v38 }
 0x1a4   :  { %v6865_v30 = vpop.f32.mrf.mxu3  ;;  %v1711_v54 = vadd.f32 %v1680_v22, %v1521_v34  ;;  %v5612_v22 = vld [vmem:[%s8009_s5 + $0x60] sm:$0xff] }
 0x1a5   :  { %3270 = vmatpush.bf16.msra.mxu1 %v5612_v22  ;;  %v2039_v39 = vrot.slane %v2038_v41, 4  ;;  %v735_v41 = vld [vmem:[#allocation2 + $0x98] sm:$0xe] }
 0x1a9   :  { %2299 = vmatmul.bf16.gmra.mxu3 %v8104_v2  ;;  %v1492_v14 = vpop.f32.mrf.mxu2  ;;  %3271 = vmatpush.bf16.msra.mxu1 %v5611_v47  ;;  %v1961_v2 = vpop.f32.mrf.mxu1 }
 0x1aa   :  { %v1828_v37 = vpop.f32.mrf.mxu0  ;;  %v1522_v3 = vadd.f32 %v1492_v14, %v1347_v8 }
 0x1ab   :  { %v6869_v12 = vadd.f32 %v1828_v37, %v1711_v54 }
 0x1ac   :  { %v1690_v18 = vpop.f32.mrf.mxu3  ;;  %v1712_v45 = vadd.f32 %v1682_v0, %v1522_v3  ;;  %v2041_v0 = vshll.u32 %v715_v44, 16 }
 0x1ad   :  { %2425 = vmatmul.bf16.gmra.mxu0 %v2350_v31 }
 0x1ae   :  { %2158 = vmatmul.bf16.gmra.mxu2 %v8105_v9 }
 0x1b1   :  { %v1495_v55 = vpop.f32.mrf.mxu2 }
 0x1b2   :  { %v1830_v16 = vpop.f32.mrf.mxu0  ;;  %v1523_v56 = vadd.f32 %v1495_v55, %v6711_v19  ;;  %v2043_v19 = vrot.slane %v2041_v0, 5 }
 0x1b3   :  { %v6877_v42 = vadd.f32 %v1830_v16, %v1712_v45  ;;  %v8108_v45 = vld [vmem:[#allocation10_spill] sm:$0xff] }
 0x1b4   :  { %v6880_v40 = vpop.f32.mrf.mxu3  ;;  %v1713_v43 = vadd.f32 %v1685_v17, %v1523_v56  ;;  %v8107_v17 = vld [vmem:[#allocation6_spill] sm:$0xff]  ;;  %v2044_v34 = vsel %vm6171_vm9, %v2039_v39, %v2043_v19  ;;  %v2077_v56 = vunpack.c.l.b16 %v695_v62 }
 0x1b5   :  { %v2213_v21 = vunpack.c.l.b16 %v2044_v34 }
 0x1b6   :  { %v2079_v0 = vpack.c.b16 %v2077_v56, %v1591_v7  ;;  %v5620_v56 = vld [vmem:[%s8009_s5 + $0xa0] sm:$0xff] }
 0x1b7   :  { %v2215_v37 = vpack.c.b16 %v2213_v21, %v6802_v6  ;;  %v6911_v6 = vpop.f32.mrf.mxu1  ;;  %v5609_v21 = vld [vmem:[%s8009_s5 + $0x48] sm:$0xff] }
 0x1b9   :  { %2304 = vmatmul.bf16.gmra.mxu3 %v8106_v28  ;;  %v6885_v4 = vpop.f32.mrf.mxu2  ;;  %v2055_v28 = vrot.slane %v715_v44, 5 }
 0x1ba   :  { %v1833_v60 = vpop.f32.mrf.mxu0 }
 0x1bb   :  { %v6883_v24 = vadd.f32 %v1833_v60, %v1713_v43  ;;  %v4947_v60 = vrot.slane %v735_v41, 9  ;;  %v5629_v41 = vld [vmem:[%s8009_s5 + $0xe8] sm:$0xff] }
 0x1bc   :  { %v1695_v11 = vpop.f32.mrf.mxu3 }
 0x1bd   :  { %2430 = vmatmul.bf16.gmra.mxu0 %v6734_v33  ;;  %v2056_v19 = vsel %vm6464_vm12, %v4947_v60, %v2055_v28 }
 0x1be   :  { %2163 = vmatmul.bf16.gmra.mxu2 %v8107_v17  ;;  %v2349_v34 = vunpack.c.l.b16 %v2056_v19 }
 0x1bf   :  { %v6923_v43 = vpop.f32.mrf.mxu1 }
 0x1c0   :  { %v2351_v7 = vpack.c.b16 %v2349_v34, %v1887_v51  ;;  %v5622_v51 = vld [vmem:[%s8009_s5 + $0xb0] sm:$0xff] }
 0x1c1   :  { %v1500_v54 = vpop.f32.mrf.mxu2 }
 0x1c2   :  { %v6894_v61 = vpop.f32.mrf.mxu0  ;;  %v1525_v63 = vadd.f32 %v1500_v54, %v6747_v53  ;;  %v5610_v53 = vld [vmem:[%s8009_s5 + $0x50] sm:$0xff] }
 0x1c3   :  { %3272 = vmatpush.bf16.msra.mxu1 %v5610_v53  ;;  %v2001_v53 = vadd.f32 %v1961_v2, %v6824_v59 }
 0x1c4   :  { %v6897_v33 = vpop.f32.mrf.mxu3  ;;  %v1715_v8 = vadd.f32 %v1690_v18, %v1525_v63  ;;  %v5606_v63 = vld [vmem:[%s8009_s5 + $0x30] sm:$0xff] }
 0x1c5   :  { %3413 = vmatpush.bf16.msrb.mxu2 %v5606_v63  ;;  %v5618_v63 = vld [vmem:[%s8009_s5 + $0x90] sm:$0xff] }
 0x1c7   :  { %3273 = vmatpush.bf16.msra.mxu1 %v5609_v21  ;;  %v5627_v21 = vld [vmem:[%s8009_s5 + $0xd8] sm:$0xff] }
 0x1c9   :  { %2309 = vmatmul.bf16.gmra.mxu3 %v2215_v37  ;;  %v6902_v3 = vpop.f32.mrf.mxu2  ;;  %v5605_v37 = vld [vmem:[%s8009_s5 + $0x28] sm:$0xff] }
 0x1ca   :  { %v1838_v31 = vpop.f32.mrf.mxu0  ;;  %3414 = vmatpush.bf16.msrb.mxu2 %v5605_v37 }
 0x1cb   :  { %v6900_v14 = vadd.f32 %v1838_v31, %v1715_v8  ;;  %v5631_v8 = vld [vmem:[%s8009_s5 + $0xf8] sm:$0xff] }
 0x1cc   :  { %v1700_v22 = vpop.f32.mrf.mxu3  ;;  %3748 = vmatpush.bf16.msrb.mxu0 %v5631_v8  ;;  %v5601_v8 = vld [vmem:[%s8009_s5 + $0x8] sm:$0xff] }
 0x1cd   :  { %2435 = vmatmul.bf16.gmra.mxu0 %v6774_v29 }
 0x1ce   :  { %2168 = vmatmul.bf16.gmra.mxu2 %v8108_v45  ;;  %v2467_v45 = vld [vmem:[%s8010_s4] sm:$0x1] }
 0x1cf   :  { %v2468_v59 = vunpack.c.l.bf16 %v2467_v45  ;;  %3415 = vmatpush.bf16.msrb.mxu2 %v5604_v46 }
 0x1d1   :  { %v1505_v9 = vpop.f32.mrf.mxu2  ;;  %v6991_v28 = vperm.slane %v2468_v59, 0  ;;  %v5617_v59 = vld [vmem:[%s8009_s5 + $0x88] sm:$0xff] }
 0x1d2   :  { %v6909_v18 = vpop.f32.mrf.mxu0  ;;  %v1527_v36 = vadd.f32 %v1505_v9, %v6781_v52 }
 0x1d4   :  { %v6917_v29 = vpop.f32.mrf.mxu3  ;;  %v1717_v16 = vadd.f32 %v1695_v11, %v1527_v36  ;;  %v5621_v36 = vld [vmem:[%s8009_s5 + $0xa8] sm:$0xff] }
 0x1d9   :  { %v6921_v49 = vpop.f32.mrf.mxu2 }
 0x1da   :  { %v1843_v55 = vpop.f32.mrf.mxu0 }
 0x1db   :  { %v6919_v38 = vadd.f32 %v1843_v55, %v1717_v16  ;;  %v5630_v16 = vld [vmem:[%s8009_s5 + $0xf0] sm:$0xff] }
 0x1dc   :  { %v2275_v52 = vpop.f32.mrf.mxu3  ;;  %3749 = vmatpush.bf16.msrb.mxu0 %v5630_v16 }
 0x1dd   :  { %2440 = vmatmul.bf16.gmra.mxu0 %v6793_v27  ;;  %v6935_v27 = vpop.f32.mrf.mxu1 }
 0x1de   :  { %2173 = vmatmul.bf16.gmra.mxu2 %v2079_v0  ;;  %v5603_v0 = vld [vmem:[%s8009_s5 + $0x18] sm:$0xff] }
 0x1df   :  { %3416 = vmatpush.bf16.msrb.mxu2 %v5603_v0 }
 0x1e0   :  { %3750 = vmatpush.bf16.msrb.mxu0 %v5629_v41 }
 0x1e1   :  { %v1510_v39 = vpop.f32.mrf.mxu2 }
 0x1e2   :  { %v6928_v11 = vpop.f32.mrf.mxu0  ;;  %v1529_v62 = vadd.f32 %v1510_v39, %v6798_v23  ;;  %v5623_v23 = vld [vmem:[%s8009_s5 + $0xb8] sm:$0xff] }
 0x1e3   :  { %3558 = vmatpush.bf16.msrb.mxu3 %v5623_v23 }
 0x1e4   :  { %v6933_v47 = vpop.f32.mrf.mxu3  ;;  %v1719_v17 = vadd.f32 %v1700_v22, %v1529_v62  ;;  %v2002_v62 = vadd.f32 %v6911_v6, %v6834_v57  ;;  %v5608_v57 = vld [vmem:[%s8009_s5 + $0x40] sm:$0xff] }
 0x1e5   :  { %v6963_v31 = vpop.f32.mrf.mxu1  ;;  %3274 = vmatpush.bf16.msra.mxu1 %v5608_v57 }
 0x1e7   :  { %3559 = vmatpush.bf16.msrb.mxu3 %v5622_v51 }
 0x1e9   :  { %v6941_v44 = vpop.f32.mrf.mxu2 }
 0x1ea   :  { %v1848_v54 = vpop.f32.mrf.mxu0 }
 0x1eb   :  { %v6937_v32 = vadd.f32 %v1848_v54, %v1719_v17  ;;  %3560 = vmatpush.bf16.msrb.mxu3 %v5621_v36  ;;  %v5619_v54 = vld [vmem:[%s8009_s5 + $0x98] sm:$0xff]  ;;  %v2003_v36 = vadd.f32 %v6923_v43, %v6838_v20 }
 0x1ec   :  { %v6955_v48 = vpop.f32.mrf.mxu3 }
 0x1ed   :  { %2445 = vmatmul.bf16.gmra.mxu0 %v2351_v7  ;;  %v6995_v19 = vpop.f32.mrf.mxu1  ;;  %v5628_v7 = vld [vmem:[%s8009_s5 + $0xe0] sm:$0xff] }
 0x1ee   :  { %3751 = vmatpush.bf16.msrb.mxu0 %v5628_v7 }
 0x1ef   :  { %3561 = vmatpush.bf16.msrb.mxu3 %v5620_v56  ;;  %v5626_v56 = vld [vmem:[%s8009_s5 + $0xd0] sm:$0xff] }
 0x1f1   :  { %v2139_v9 = vpop.f32.mrf.mxu2 }
 0x1f2   :  { %v6965_v22 = vpop.f32.mrf.mxu0  ;;  %v2179_v55 = vadd.f32 %v2139_v9, %v2001_v53  ;;  %3752 = vmatpush.bf16.msrb.mxu0 %v5627_v21  ;;  %v2678_v21 = vld [vmem:[#allocation2 + $0x8] sm:$0xf] }
 0x1f3   :  { %3562 = vmatpush.bf16.msrb.mxu3 %v5619_v54  ;;  %v5625_v54 = vld [vmem:[%s8009_s5 + $0xc8] sm:$0xff] }
 0x1f4   :  { %v6980_v2 = vpop.f32.mrf.mxu3  ;;  %v2315_v60 = vadd.f32 %v2275_v52, %v2179_v55  ;;  %v5602_v52 = vld [vmem:[%s8009_s5 + $0x10] sm:$0xff] }
 0x1f5   :  { %3417 = vmatpush.bf16.msrb.mxu2 %v5602_v52  ;;  %v7035_v20 = vpop.f32.mrf.mxu1  ;;  %v1524_v52 = vadd.f32 %v6885_v4, %v6724_v26 }
 0x1f6   :  { %3753 = vmatpush.bf16.msrb.mxu0 %v5626_v56 }
 0x1f7   :  { %3563 = vmatpush.bf16.msrb.mxu3 %v5618_v63  ;;  %v1526_v63 = vadd.f32 %v6902_v3, %v6764_v1  ;;  %v2004_v1 = vadd.f32 %v6935_v27, %v6846_v58 }
 0x1f9   :  { %v2141_v34 = vpop.f32.mrf.mxu2  ;;  %3418 = vmatpush.bf16.msrb.mxu2 %v5601_v8  ;;  %v2681_v8 = vld [vmem:[#allocation2 + $0xc] sm:$0x1] }
 0x1fa   :  { %v2411_v39 = vpop.f32.mrf.mxu0  ;;  %v2180_v23 = vadd.f32 %v2141_v34, %v2002_v62  ;;  %v5616_v34 = vld [vmem:[%s8009_s5 + $0x80] sm:$0xff]  ;;  %3754 = vmatpush.bf16.msrb.mxu0 %v5625_v54 }
 0x1fb   :  { %v2451_v17 = vadd.f32 %v2411_v39, %v2315_v60  ;;  %v7033_v60 = vld [vmem:[#allocation2] sm:$0xf]  ;;  %3564 = vmatpush.bf16.msrb.mxu3 %v5617_v59  ;;  %v2794_v59 = vld [vmem:[#allocation2 + $0x4] sm:$0x1] }
 0x1fc   :  { %v2316_v37 = vadd.f32 %v6933_v47, %v2180_v23  ;;  %v7020_v53 = vpop.f32.mrf.mxu3  ;;  %v5600_v47 = vld [vmem:[%s8009_s5] sm:$0xff]  ;;  %v2835_v62 = vshrl.u32 %v7033_v60, 16  ;;  %v3092_v54 = vrot.slane %v2794_v59, 5 }
 0x1fd   :  { %v2470_v6 = vadd.f32 %v6991_v28, %v2451_v17  ;;  %v2838_v17 = vshll.u32 %v7033_v60, 16  ;;  %3419 = vmatpush.bf16.msrb.mxu2 %v5600_v47  ;;  %v1716_v47 = vadd.f32 %v6880_v40, %v1526_v63  ;;  %v2005_v40 = vadd.f32 %v6963_v31, %v6851_v50 }
 0x1fe   :  { %v7082_v50 = vadd.f32 %v6995_v19, %v6861_v35 }
 0x1ff   :  { %v2486_v51 = vmax.f32 %v2470_v6, 0.0  ;;  %3565 = vmatpush.bf16.msrb.mxu3 %v5616_v34  ;;  %v7077_v63 = vadd.f32 %v6909_v18, %v1716_v47 }
 0x201   :  { %v2502_v45 = vpack.c.bf16 %v2486_v51, %v2486_v51  ;;  %v2144_v55 = vpop.f32.mrf.mxu2  ;;  %v2837_v51 = vrot.slane %v2835_v62, 4  ;;  %v2844_v62 = vshll.u32 %v2794_v59, 16 }
 0x202   :  { %v2413_v9 = vpop.f32.mrf.mxu0  ;;  %v2181_v0 = vadd.f32 %v2144_v55, %v2003_v36 }
 0x203   :  { %v2519_v46 = vshrl.u32 %v2502_v45, 16  ;;  %v2452_v16 = vadd.f32 %v2413_v9, %v2316_v37  ;;  %v2522_v41 = vshll.u32 %v2502_v45, 16  ;;  %v2840_v37 = vrot.slane %v2838_v17, 5 }
 0x204   :  { %v2317_v6 = vadd.f32 %v6955_v48, %v2181_v0  ;;  %v7055_v4 = vpop.f32.mrf.mxu3  ;;  %v1714_v48 = vadd.f32 %v6865_v30, %v1524_v52  ;;  %v5624_v0 = vld [vmem:[%s8009_s5 + $0xc0] sm:$0xff]  ;;  %v5639_v30 = vld [vmem:[%s8009_s5 + $0x138] sm:$0xff]  ;;  %v7073_v52 = vpop.f32.mrf.mxu1  ;;  %v2846_v18 = vrot.slane %v2844_v62, 5 }
 0x205   :  { %v2521_v43 = vrot.slane %v2519_v46, 7  ;;  %v2471_v39 = vadd.f32 %v6991_v28, %v2452_v16  ;;  %3755 = vmatpush.bf16.msrb.mxu0 %v5624_v0  ;;  %3896 = vmatpush.bf16.msrb.mxu1 %v5639_v30 }
 0x206   :  { %v7069_v17 = vadd.f32 %v6894_v61, %v1714_v48  ;;  %v2687_v61 = vld [vmem:[#allocation2 + $0x14] sm:$0x1] }
 0x207   :  { %v2524_v7 = vor.u32 %v2522_v41, %v2521_v43  ;;  %v2525_v23 = vrot.slane %v2521_v43, 4  ;;  %v2487_v57 = vmax.f32 %v2471_v39, 0.0  ;;  %v2814_v41 = vld [vmem:[#allocation2] sm:$0xe]  ;;  %v2841_v43 = vor.u32 %v2840_v37, %v2837_v51 }
 0x208   :  { %v5092_v34 = vrot.slane %v2814_v41, 9 }
 0x209   :  { %v2679_v9 = vsel %vm5913_vm6, %v2524_v7, %v2678_v21  ;;  %v2682_v36 = vsel %vm5800_vm2, %v2525_v23, %v2681_v8  ;;  %v2503_v26 = vpack.c.bf16 %v2487_v57, %v2487_v57  ;;  %v2146_v55 = vpop.f32.mrf.mxu2  ;;  %v2684_v21 = vld [vmem:[#allocation2 + $0x10] sm:$0xf]  ;;  %v3332_v8 = vunpack.c.l.b16 %v7033_v60 }
 0x20a   :  { %2680 = vst [vmem:[#allocation2 + $0x8] sm:$0xf] %v2679_v9  ;;  %v2416_v46 = vpop.f32.mrf.mxu0  ;;  %v2182_v56 = vadd.f32 %v2146_v55, %v2004_v1  ;;  %v2842_v31 = vrot.slane %v2841_v43, 4  ;;  %v3093_v35 = vsel %vm6464_vm12, %v5092_v34, %v3092_v54 }
 0x20b   :  { %2683 = vst [vmem:[#allocation2 + $0xc] sm:$0x1] %v2682_v36  ;;  %v2527_v3 = vshrl.u32 %v2503_v26, 16  ;;  %v2453_v16 = vadd.f32 %v2416_v46, %v2317_v6  ;;  %v2530_v58 = vshll.u32 %v2503_v26, 16  ;;  %v3478_v34 = vunpack.c.l.b16 %v3093_v35 }
 0x20c   :  { %v2318_v6 = vadd.f32 %v6980_v2, %v2182_v56  ;;  %v7090_v47 = vpop.f32.mrf.mxu3  ;;  %v2847_v54 = vsel %vm6171_vm9, %v2842_v31, %v2846_v18 }
 0x20d   :  { %v2529_v39 = vrot.slane %v2527_v3, 7  ;;  %v2472_v27 = vadd.f32 %v6991_v28, %v2453_v16 }
 0x20f   :  { %v2532_v7 = vor.u32 %v2530_v58, %v2529_v39  ;;  %v2533_v23 = vrot.slane %v2529_v39, 4  ;;  %v2488_v57 = vmax.f32 %v2472_v27, 0.0 }
 0x211   :  { %v2685_v51 = vsel %vm5913_vm6, %v2532_v7, %v2684_v21  ;;  %v2688_v37 = vsel %vm5800_vm2, %v2533_v23, %v2687_v61  ;;  %v2504_v9 = vpack.c.bf16 %v2488_v57, %v2488_v57  ;;  %v2775_v2 = vld [vmem:[#allocation2 + $0x8] sm:$0xf]  ;;  %v2149_v55 = vpop.f32.mrf.mxu2  ;;  %v2690_v21 = vld [vmem:[#allocation2 + $0x18] sm:$0xf]  ;;  %v2693_v61 = vld [vmem:[#allocation2 + $0x1c] sm:$0x1] }
 0x212   :  { %v2815_v36 = vld [vmem:[#allocation2 + $0x8] sm:$0xe]  ;;  %2686 = vst [vmem:[#allocation2 + $0x10] sm:$0xf] %v2685_v51  ;;  %v2418_v26 = vpop.f32.mrf.mxu0  ;;  %v2849_v48 = vshrl.u32 %v2775_v2, 16  ;;  %v2852_v46 = vshll.u32 %v2775_v2, 16  ;;  %v3333_v60 = vunpack.c.l.b16 %v2775_v2  ;;  %v2183_v56 = vadd.f32 %v2149_v55, %v2005_v40 }
 0x213   :  { %v2795_v1 = vld [vmem:[#allocation2 + $0xc] sm:$0x1]  ;;  %2689 = vst [vmem:[#allocation2 + $0x14] sm:$0x1] %v2688_v37  ;;  %v2535_v19 = vshrl.u32 %v2504_v9, 16  ;;  %v2538_v3 = vshll.u32 %v2504_v9, 16  ;;  %v2454_v16 = vadd.f32 %v2418_v26, %v2318_v6  ;;  %v1981_v9 = vpop.f32.mrf.mxu1  ;;  %v3187_v26 = vunpack.c.l.b16 %v2847_v54 }
 0x214   :  { %v5093_v59 = vrot.slane %v2815_v36, 9  ;;  %v2851_v41 = vrot.slane %v2849_v48, 4  ;;  %v2854_v0 = vrot.slane %v2852_v46, 5  ;;  %v3348_v43 = vpack.c.b16 %v3333_v60, %v3332_v8 }
 0x215   :  { %v2537_v30 = vrot.slane %v2535_v19, 7  ;;  %v2473_v39 = vadd.f32 %v6991_v28, %v2454_v16  ;;  %v3096_v58 = vrot.slane %v2795_v1, 5  ;;  %v2858_v27 = vshll.u32 %v2795_v1, 16 }
 0x216   :  { %3420 = vmatmul.bf16.vlgmr.msrb.gmra.mxu2 %v3348_v43  ;;  %v2319_v62 = vadd.f32 %v7020_v53, %v2183_v56  ;;  %v2855_v7 = vor.u32 %v2854_v0, %v2851_v41  ;;  %v7103_v53 = vadd.f32 %v7035_v20, %v6869_v12  ;;  %v1528_v48 = vadd.f32 %v6921_v49, %v6788_v10  ;;  %v5638_v43 = vld [vmem:[%s8009_s5 + $0x130] sm:$0xff] }
 0x217   :  { %v2540_v23 = vor.u32 %v2538_v3, %v2537_v30  ;;  %v2541_v57 = vrot.slane %v2537_v30, 4  ;;  %v2489_v6 = vmax.f32 %v2473_v39, 0.0  ;;  %v7098_v40 = vsel %vm6464_vm12, %v5093_v59, %v3096_v58  ;;  %3897 = vmatpush.bf16.msrb.mxu1 %v5638_v43 }
 0x218   :  { %v3479_v8 = vunpack.c.l.b16 %v7098_v40  ;;  %v2856_v51 = vrot.slane %v2855_v7, 4  ;;  %v2860_v37 = vrot.slane %v2858_v27, 5  ;;  %v7130_v27 = vpop.f32.mrf.mxu3 }
 0x219   :  { %v2691_v31 = vsel %vm5913_vm6, %v2540_v23, %v2690_v21  ;;  %v2694_v2 = vsel %vm5800_vm2, %v2541_v57, %v2693_v61  ;;  %v2505_v36 = vpack.c.bf16 %v2489_v6, %v2489_v6  ;;  %v7109_v18 = vld [vmem:[#allocation2 + $0x10] sm:$0xf]  ;;  %v2151_v16 = vpop.f32.mrf.mxu2  ;;  %v2696_v21 = vld [vmem:[#allocation2 + $0x20] sm:$0xf] }
 0x21a   :  { %2692 = vst [vmem:[#allocation2 + $0x18] sm:$0xf] %v2691_v31  ;;  %v2421_v46 = vpop.f32.mrf.mxu0  ;;  %v3494_v12 = vpack.c.b16 %v3479_v8, %v3478_v34  ;;  %v3334_v20 = vunpack.c.l.b16 %v7109_v18  ;;  %v2861_v1 = vsel %vm6171_vm9, %v2856_v51, %v2860_v37  ;;  %v7120_v59 = vld [vmem:[#allocation2 + $0x14] sm:$0x1]  ;;  %v2184_v10 = vadd.f32 %v2151_v16, %v7082_v50  ;;  %v2816_v56 = vld [vmem:[#allocation2 + $0x10] sm:$0xe] }
 0x21b   :  { %2695 = vst [vmem:[#allocation2 + $0x1c] sm:$0x1] %v2694_v2  ;;  %v2543_v35 = vshrl.u32 %v2505_v36, 16  ;;  %v2546_v19 = vshll.u32 %v2505_v36, 16  ;;  %v2455_v3 = vadd.f32 %v2421_v46, %v2319_v62  ;;  %v7118_v55 = vunpack.c.l.b16 %v2861_v1  ;;  %v1983_v1 = vpop.f32.mrf.mxu1 }
 0x21c   :  { %3566 = vmatmul.bf16.vlgmr.msrb.gmra.mxu3 %v3494_v12  ;;  %v3684_v49 = vpack.c.b16 %v3334_v20, %v3333_v60  ;;  %v3100_v41 = vrot.slane %v7120_v59, 5  ;;  %v2863_v0 = vshrl.u32 %v7109_v18, 16  ;;  %v5094_v62 = vrot.slane %v2816_v56, 9 }
 0x21d   :  { %v2545_v30 = vrot.slane %v2543_v35, 7  ;;  %v2474_v39 = vadd.f32 %v6991_v28, %v2455_v3  ;;  %v3203_v58 = vpack.c.b16 %v7118_v55, %v3187_v26  ;;  %v7133_v50 = vadd.f32 %v6897_v33, %v1528_v48  ;;  %v2699_v33 = vld [vmem:[#allocation2 + $0x24] sm:$0x1] }
 0x21e   :  { %3756 = vmatmul.bf16.vlgmr.msrb.gmra.mxu0 %v3684_v49  ;;  %v2320_v60 = vadd.f32 %v7055_v4, %v2184_v10  ;;  %v7138_v34 = vadd.f32 %v7073_v52, %v6877_v42  ;;  %v2866_v54 = vshll.u32 %v7109_v18, 16  ;;  %v3101_v6 = vsel %vm6464_vm12, %v5094_v62, %v3100_v41 }
 0x21f   :  { %v2548_v7 = vor.u32 %v2546_v19, %v2545_v30  ;;  %v2549_v23 = vrot.slane %v2545_v30, 4  ;;  %v2490_v57 = vmax.f32 %v2474_v39, 0.0  ;;  %3275 = vmatmul.bf16.vlgmr.msra.gmra.mxu1 %v3203_v58  ;;  %v3480_v61 = vunpack.c.l.b16 %v3101_v6 }
 0x220   :  { %v2865_v51 = vrot.slane %v2863_v0, 4  ;;  %v2872_v4 = vshll.u32 %v7120_v59, 16  ;;  %v7145_v37 = vadd.f32 %v1981_v9, %v6883_v24  ;;  %v2868_v18 = vrot.slane %v2866_v54, 5  ;;  %v2702_v54 = vld [vmem:[#allocation2 + $0x28] sm:$0xf] }
 0x221   :  { %v2697_v42 = vsel %vm5913_vm6, %v2548_v7, %v2696_v21  ;;  %v2700_v52 = vsel %vm5800_vm2, %v2549_v23, %v2699_v33  ;;  %v2506_v31 = vpack.c.bf16 %v2490_v57, %v2490_v57  ;;  %v7151_v2 = vld [vmem:[#allocation2 + $0x18] sm:$0xf]  ;;  %v7158_v12 = vpack.c.b16 %v3480_v61, %v3479_v8  ;;  %v2154_v16 = vpop.f32.mrf.mxu2  ;;  %v7173_v23 = vpop.f32.mrf.mxu3  ;;  %v2705_v57 = vld [vmem:[#allocation2 + $0x2c] sm:$0x1] }
 0x222   :  { %v2817_v36 = vld [vmem:[#allocation2 + $0x18] sm:$0xe]  ;;  %2698 = vst [vmem:[#allocation2 + $0x20] sm:$0xf] %v2697_v42  ;;  %v2423_v26 = vpop.f32.mrf.mxu0  ;;  %v2877_v48 = vshrl.u32 %v7151_v2, 16  ;;  %v2880_v46 = vshll.u32 %v7151_v2, 16  ;;  %v3335_v24 = vunpack.c.l.b16 %v7151_v2  ;;  %v2185_v10 = vadd.f32 %v2154_v16, %v7103_v53 }
 0x223   :  { %v2797_v9 = vld [vmem:[#allocation2 + $0x1c] sm:$0x1]  ;;  %2701 = vst [vmem:[#allocation2 + $0x24] sm:$0x1] %v2700_v52  ;;  %v2551_v35 = vshrl.u32 %v2506_v31, 16  ;;  %v2554_v19 = vshll.u32 %v2506_v31, 16  ;;  %v2456_v3 = vadd.f32 %v2423_v26, %v2320_v60  ;;  %v2869_v40 = vor.u32 %v2868_v18, %v2865_v51 }
 0x224   :  { %v5095_v59 = vrot.slane %v2817_v36, 9  ;;  %v2879_v49 = vrot.slane %v2877_v48, 4  ;;  %v2882_v56 = vrot.slane %v2880_v46, 5  ;;  %v7161_v41 = vpack.c.b16 %v3335_v24, %v3334_v20 }
 0x225   :  { %v2553_v0 = vrot.slane %v2551_v35, 7  ;;  %v2475_v43 = vadd.f32 %v6991_v28, %v2456_v3  ;;  %v3104_v30 = vrot.slane %v2797_v9, 5  ;;  %v2321_v8 = vadd.f32 %v7090_v47, %v2185_v10 }
 0x226   :  { %3425 = vmatmul.bf16.gmra.mxu2 %v7161_v41  ;;  %v2883_v39 = vor.u32 %v2882_v56, %v2879_v49  ;;  %v2886_v58 = vshll.u32 %v2797_v9, 16  ;;  %v7167_v62 = vadd.f32 %v1983_v1, %v7069_v17  ;;  %v2870_v21 = vrot.slane %v2869_v40, 4  ;;  %v5637_v49 = vld [vmem:[%s8009_s5 + $0x128] sm:$0xff]  ;;  %v7196_v56 = vpop.f32.mrf.mxu1 }
 0x227   :  { %v2556_v60 = vor.u32 %v2554_v19, %v2553_v0  ;;  %v2557_v53 = vrot.slane %v2553_v0, 4  ;;  %v2491_v7 = vmax.f32 %v2475_v43, 0.0  ;;  %v7171_v20 = vsel %vm6464_vm12, %v5095_v59, %v3104_v30  ;;  %3898 = vmatpush.bf16.msrb.mxu1 %v5637_v49 }
 0x228   :  { %v3481_v6 = vunpack.c.l.b16 %v7171_v20  ;;  %v2874_v47 = vrot.slane %v2872_v4, 5  ;;  %v2884_v33 = vrot.slane %v2883_v39, 4  ;;  %v2888_v31 = vrot.slane %v2886_v58, 5 }
 0x229   :  { %v2703_v17 = vsel %vm5913_vm6, %v2556_v60, %v2702_v54  ;;  %v2706_v51 = vsel %vm5800_vm2, %v2557_v53, %v2705_v57  ;;  %v2507_v42 = vpack.c.bf16 %v2491_v7, %v2491_v7  ;;  %v7180_v52 = vld [vmem:[#allocation2 + $0x20] sm:$0xf]  ;;  %v2156_v1 = vpop.f32.mrf.mxu2  ;;  %v7210_v7 = vadd.f32 %v6941_v44, %v6809_v5  ;;  %v2708_v57 = vld [vmem:[#allocation2 + $0x30] sm:$0xf]  ;;  %v7224_v5 = vpop.f32.mrf.mxu3 }
 0x22a   :  { %2704 = vst [vmem:[#allocation2 + $0x28] sm:$0xf] %v2703_v17  ;;  %v2426_v2 = vpop.f32.mrf.mxu0  ;;  %v7184_v36 = vpack.c.b16 %v3481_v6, %v3480_v61  ;;  %v2891_v18 = vshrl.u32 %v7180_v52, 16  ;;  %v2894_v4 = vshll.u32 %v7180_v52, 16  ;;  %v3336_v26 = vunpack.c.l.b16 %v7180_v52  ;;  %v2798_v19 = vld [vmem:[#allocation2 + $0x24] sm:$0x1] }
 0x22b   :  { %2707 = vst [vmem:[#allocation2 + $0x2c] sm:$0x1] %v2706_v51  ;;  %v2559_v48 = vshrl.u32 %v2507_v42, 16  ;;  %v2562_v46 = vshll.u32 %v2507_v42, 16  ;;  %v2457_v9 = vadd.f32 %v2426_v2, %v2321_v8  ;;  %v2875_v35 = vsel %vm6171_vm9, %v2870_v21, %v2874_v47  ;;  %v2818_v10 = vld [vmem:[#allocation2 + $0x20] sm:$0xe] }
 0x22c   :  { %8110 = vst [vmem:[#allocation9_spill] sm:$0xff] %v7184_v36  ;;  %3571 = vmatmul.bf16.gmra.mxu3 %v7184_v36  ;;  %v2186_v61 = vadd.f32 %v2156_v1, %v7138_v34  ;;  %v2893_v3 = vrot.slane %v2891_v18, 4  ;;  %v2896_v16 = vrot.slane %v2894_v4, 5  ;;  %v3685_v59 = vpack.c.b16 %v3336_v26, %v3335_v24  ;;  %v2711_v21 = vld [vmem:[#allocation2 + $0x34] sm:$0x1] }
 0x22d   :  { %v2561_v0 = vrot.slane %v2559_v48, 7  ;;  %v2476_v43 = vadd.f32 %v6991_v28, %v2457_v9  ;;  %v2889_v30 = vsel %vm6171_vm9, %v2884_v33, %v2888_v31  ;;  %v7201_v40 = vunpack.c.l.b16 %v2875_v35 }
 0x22e   :  { %3761 = vmatmul.bf16.gmra.mxu0 %v3685_v59  ;;  %v7203_v34 = vunpack.c.l.b16 %v2889_v30  ;;  %v2322_v24 = vadd.f32 %v7130_v27, %v2186_v61  ;;  %v5096_v8 = vrot.slane %v2818_v10, 9  ;;  %v3108_v39 = vrot.slane %v2798_v19, 5 }
 0x22f   :  { %v2564_v58 = vor.u32 %v2562_v46, %v2561_v0  ;;  %v2565_v60 = vrot.slane %v2561_v0, 4  ;;  %v2492_v53 = vmax.f32 %v2476_v43, 0.0  ;;  %v2897_v33 = vor.u32 %v2896_v16, %v2893_v3 }
 0x230   :  { %v7214_v47 = vpack.c.b16 %v7203_v34, %v7201_v40  ;;  %v7218_v27 = vsel %vm6464_vm12, %v5096_v8, %v3108_v39  ;;  %v2900_v31 = vshll.u32 %v2798_v19, 16 }
 0x231   :  { %v2709_v17 = vsel %vm5913_vm6, %v2564_v58, %v2708_v57  ;;  %v2712_v51 = vsel %vm5800_vm2, %v2565_v60, %v2711_v21  ;;  %v2508_v42 = vpack.c.bf16 %v2492_v53, %v2492_v53  ;;  %v7226_v44 = vld [vmem:[#allocation2 + $0x28] sm:$0xf]  ;;  %v8045_v9 = vunpack.c.l.b16 %v7218_v27  ;;  %v2159_v3 = vpop.f32.mrf.mxu2  ;;  %v7239_v53 = vpop.f32.mrf.mxu1 }
 0x232   :  { %v2819_v52 = vld [vmem:[#allocation2 + $0x28] sm:$0xe]  ;;  %2710 = vst [vmem:[#allocation2 + $0x30] sm:$0xf] %v2709_v17  ;;  %3280 = vmatmul.bf16.gmra.mxu1 %v7214_v47  ;;  %v2428_v2 = vpop.f32.mrf.mxu0  ;;  %v2905_v18 = vshrl.u32 %v7226_v44, 16  ;;  %v2908_v4 = vshll.u32 %v7226_v44, 16  ;;  %v3337_v48 = vunpack.c.l.b16 %v7226_v44  ;;  %v2187_v19 = vadd.f32 %v2159_v3, %v7145_v37 }
 0x233   :  { %v2799_v46 = vld [vmem:[#allocation2 + $0x2c] sm:$0x1]  ;;  %2713 = vst [vmem:[#allocation2 + $0x34] sm:$0x1] %v2712_v51  ;;  %v2567_v1 = vshrl.u32 %v2508_v42, 16  ;;  %v2570_v35 = vshll.u32 %v2508_v42, 16  ;;  %v2458_v61 = vadd.f32 %v2428_v2, %v2322_v24 }
 0x234   :  { %v5097_v16 = vrot.slane %v2819_v52, 9  ;;  %v2907_v59 = vrot.slane %v2905_v18, 4  ;;  %v2910_v10 = vrot.slane %v2908_v4, 5  ;;  %v7234_v49 = vpack.c.b16 %v3337_v48, %v3336_v26  ;;  %v2714_v17 = vld [vmem:[#allocation2 + $0x38] sm:$0xf] }
 0x235   :  { %v2569_v0 = vrot.slane %v2567_v1, 7  ;;  %v2477_v43 = vadd.f32 %v6991_v28, %v2458_v61  ;;  %v3112_v30 = vrot.slane %v2799_v46, 5  ;;  %v2898_v8 = vrot.slane %v2897_v33, 4  ;;  %v2717_v51 = vld [vmem:[#allocation2 + $0x3c] sm:$0x1] }
 0x236   :  { %3430 = vmatmul.bf16.gmra.mxu2 %v7234_v49  ;;  %v2323_v39 = vadd.f32 %v7173_v23, %v2187_v19  ;;  %v2902_v58 = vrot.slane %v2900_v31, 5  ;;  %v2911_v60 = vor.u32 %v2910_v10, %v2907_v59  ;;  %v2914_v24 = vshll.u32 %v2799_v46, 16  ;;  %v7265_v10 = vpop.f32.mrf.mxu3 }
 0x237   :  { %v2572_v57 = vor.u32 %v2570_v35, %v2569_v0  ;;  %v2573_v37 = vrot.slane %v2569_v0, 4  ;;  %v2493_v21 = vmax.f32 %v2477_v43, 0.0  ;;  %v7243_v26 = vsel %vm6464_vm12, %v5097_v16, %v3112_v30 }
 0x238   :  { %v8044_v33 = vunpack.c.l.b16 %v7243_v26  ;;  %v2903_v42 = vsel %vm6171_vm9, %v2898_v8, %v2902_v58  ;;  %v2912_v23 = vrot.slane %v2911_v60, 4  ;;  %v2916_v44 = vrot.slane %v2914_v24, 5 }
 0x239   :  { %v2715_v52 = vsel %vm5913_vm6, %v2572_v57, %v2714_v17  ;;  %v2718_v31 = vsel %vm5800_vm2, %v2573_v37, %v2717_v51  ;;  %v2509_v2 = vpack.c.bf16 %v2493_v21, %v2493_v21  ;;  %v7252_v18 = vld [vmem:[#allocation2 + $0x30] sm:$0xf]  ;;  %v7254_v4 = vunpack.c.l.b16 %v2903_v42  ;;  %v2161_v0 = vpop.f32.mrf.mxu2  ;;  %v5636_v37 = vld [vmem:[%s8009_s5 + $0x120] sm:$0xff] }
 0x23a   :  { %2716 = vst [vmem:[#allocation2 + $0x38] sm:$0xf] %v2715_v52  ;;  %v2431_v46 = vpop.f32.mrf.mxu0  ;;  %v7260_v1 = vpack.c.b16 %v8044_v33, %v8045_v9  ;;  %v2919_v35 = vshrl.u32 %v7252_v18, 16  ;;  %v2922_v61 = vshll.u32 %v7252_v18, 16  ;;  %v3338_v3 = vunpack.c.l.b16 %v7252_v18  ;;  %v2800_v30 = vld [vmem:[#allocation2 + $0x34] sm:$0x1]  ;;  %3899 = vmatpush.bf16.msrb.mxu1 %v5636_v37 }
 0x23b   :  { %2719 = vst [vmem:[#allocation2 + $0x3c] sm:$0x1] %v2718_v31  ;;  %v2575_v16 = vshrl.u32 %v2509_v2, 16  ;;  %v2578_v19 = vshll.u32 %v2509_v2, 16  ;;  %v2459_v59 = vadd.f32 %v2431_v46, %v2323_v39  ;;  %v2917_v43 = vsel %vm6171_vm9, %v2912_v23, %v2916_v44  ;;  %v2820_v57 = vld [vmem:[#allocation2 + $0x30] sm:$0xe] }
 0x23c   :  { %8111 = vst [vmem:[#allocation11_spill] sm:$0xff] %v7260_v1  ;;  %3576 = vmatmul.bf16.gmra.mxu3 %v7260_v1  ;;  %v2188_v8 = vadd.f32 %v2161_v0, %v7167_v62  ;;  %v2921_v58 = vrot.slane %v2919_v35, 4  ;;  %v2924_v60 = vrot.slane %v2922_v61, 5  ;;  %v3686_v24 = vpack.c.b16 %v3338_v3, %v3337_v48  ;;  %v2720_v35 = vld [vmem:[#allocation2 + $0x40] sm:$0xf] }
 0x23d   :  { %v2577_v39 = vrot.slane %v2575_v16, 7  ;;  %v2478_v21 = vadd.f32 %v6991_v28, %v2459_v59  ;;  %v7275_v17 = vunpack.c.l.b16 %v2917_v43  ;;  %v5098_v51 = vrot.slane %v2820_v57, 9 }
 0x23e   :  { %3766 = vmatmul.bf16.gmra.mxu0 %v3686_v24  ;;  %v2324_v42 = vadd.f32 %v7224_v5, %v2188_v8  ;;  %v3116_v23 = vrot.slane %v2800_v30, 5  ;;  %v2925_v44 = vor.u32 %v2924_v60, %v2921_v58  ;;  %v2928_v62 = vshll.u32 %v2800_v30, 16  ;;  %v2723_v5 = vld [vmem:[#allocation2 + $0x44] sm:$0x1] }
 0x23f   :  { %v2580_v52 = vor.u32 %v2578_v19, %v2577_v39  ;;  %v2581_v48 = vrot.slane %v2577_v39, 4  ;;  %v2494_v31 = vmax.f32 %v2478_v21, 0.0  ;;  %v7280_v2 = vpack.c.b16 %v7275_v17, %v7254_v4  ;;  %v7292_v19 = vpop.f32.mrf.mxu1 }
 0x240   :  { %v7284_v18 = vadd.f32 %v6928_v11, %v7133_v50  ;;  %v1720_v46 = vadd.f32 %v6917_v29, %v7210_v7  ;;  %v2011_v61 = vadd.f32 %v7196_v56, %v6900_v14  ;;  %v7290_v16 = vrot.slane %v2925_v44, 4 }
 0x241   :  { %v2721_v59 = vsel %vm5913_vm6, %v2580_v52, %v2720_v35  ;;  %v2724_v0 = vsel %vm5800_vm2, %v2581_v48, %v2723_v5  ;;  %v2510_v11 = vpack.c.bf16 %v2494_v31, %v2494_v31  ;;  %v7298_v50 = vld [vmem:[#allocation2 + $0x38] sm:$0xf]  ;;  %v2930_v29 = vrot.slane %v2928_v62, 5  ;;  %v2164_v37 = vpop.f32.mrf.mxu2  ;;  %v2302_v35 = vpop.f32.mrf.mxu3 }
 0x242   :  { %v2821_v43 = vld [vmem:[#allocation2 + $0x38] sm:$0xe]  ;;  %2722 = vst [vmem:[#allocation2 + $0x40] sm:$0xf] %v2721_v59  ;;  %3285 = vmatmul.bf16.gmra.mxu1 %v7280_v2  ;;  %v2433_v7 = vpop.f32.mrf.mxu0  ;;  %v2933_v14 = vshrl.u32 %v7298_v50, 16  ;;  %v2936_v56 = vshll.u32 %v7298_v50, 16  ;;  %v3339_v30 = vunpack.c.l.b16 %v7298_v50  ;;  %v7306_v58 = vsel %vm6464_vm12, %v5098_v51, %v3116_v23 }
 0x243   :  { %v2801_v8 = vld [vmem:[#allocation2 + $0x3c] sm:$0x1]  ;;  %2725 = vst [vmem:[#allocation2 + $0x44] sm:$0x1] %v2724_v0  ;;  %v2583_v60 = vshrl.u32 %v2510_v11, 16  ;;  %v2586_v24 = vshll.u32 %v2510_v11, 16  ;;  %v2460_v57 = vadd.f32 %v2433_v7, %v2324_v42  ;;  %v2189_v21 = vadd.f32 %v2164_v37, %v2011_v61 }
 0x244   :  { %v5099_v39 = vrot.slane %v2821_v43, 9  ;;  %v2935_v44 = vrot.slane %v2933_v14, 4  ;;  %v2938_v62 = vrot.slane %v2936_v56, 5  ;;  %v7308_v52 = vpack.c.b16 %v3339_v30, %v3338_v3  ;;  %v7311_v50 = vld [vmem:[#allocation2 + $0x50] sm:$0xf] }
 0x245   :  { %v2585_v48 = vrot.slane %v2583_v60, 7  ;;  %v2479_v31 = vadd.f32 %v6991_v28, %v2460_v57  ;;  %v3120_v5 = vrot.slane %v2801_v8, 5  ;;  %v2942_v59 = vshll.u32 %v2801_v8, 16  ;;  %v2726_v11 = vld [vmem:[#allocation2 + $0x58] sm:$0xf] }
 0x246   :  { %3435 = vmatmul.bf16.gmra.mxu2 %v7308_v52  ;;  %v2325_v51 = vadd.f32 %v7265_v10, %v2189_v21  ;;  %v8043_v42 = vunpack.c.l.b16 %v7306_v58  ;;  %v2931_v23 = vsel %vm6171_vm9, %v7290_v16, %v2930_v29  ;;  %v2939_v3 = vor.u32 %v2938_v62, %v2935_v44  ;;  %v2729_v14 = vld [vmem:[#allocation2 + $0x5c] sm:$0x1] }
 0x247   :  { %v2588_v61 = vor.u32 %v2586_v24, %v2585_v48  ;;  %v2589_v0 = vrot.slane %v2585_v48, 4  ;;  %v2495_v43 = vmax.f32 %v2479_v31, 0.0  ;;  %v7321_v7 = vsel %vm6464_vm12, %v5099_v39, %v3120_v5  ;;  %v1993_v31 = vpop.f32.mrf.mxu1 }
 0x248   :  { %v8042_v56 = vunpack.c.l.b16 %v7321_v7  ;;  %v2940_v8 = vrot.slane %v2939_v3, 4  ;;  %v2944_v10 = vrot.slane %v2942_v59, 5  ;;  %v2947_v60 = vshrl.u32 %v7311_v50, 16 }
 0x249   :  { %v2727_v57 = vsel %vm5913_vm6, %v2588_v61, %v2726_v11  ;;  %v2730_v16 = vsel %vm5800_vm2, %v2589_v0, %v2729_v14  ;;  %v2511_v29 = vpack.c.bf16 %v2495_v43, %v2495_v43  ;;  %v7329_v24 = vld [vmem:[#allocation2 + $0x40] sm:$0xf]  ;;  %v2950_v37 = vshll.u32 %v7311_v50, 16  ;;  %v2166_v3 = vpop.f32.mrf.mxu2  ;;  %v2804_v61 = vld [vmem:[#allocation2 + $0x54] sm:$0x1] }
 0x24a   :  { %v7333_v39 = vadd.f32 %v6965_v22, %v1720_v46  ;;  %2728 = vst [vmem:[#allocation2 + $0x58] sm:$0xf] %v2727_v57  ;;  %v2436_v21 = vpop.f32.mrf.mxu0  ;;  %v7339_v44 = vpack.c.b16 %v8042_v56, %v8043_v42  ;;  %v2012_v62 = vadd.f32 %v7239_v53, %v7077_v63  ;;  %v8041_v48 = vunpack.c.l.b16 %v7329_v24  ;;  %v2824_v43 = vld [vmem:[#allocation2 + $0x50] sm:$0xe] }
 0x24b   :  { %2731 = vst [vmem:[#allocation2 + $0x5c] sm:$0x1] %v2730_v16  ;;  %v2591_v5 = vshrl.u32 %v2511_v29, 16  ;;  %v2461_v59 = vadd.f32 %v2436_v21, %v2325_v51  ;;  %v2945_v22 = vsel %vm6171_vm9, %v2940_v8, %v2944_v10  ;;  %v7346_v46 = vunpack.c.l.b16 %v2931_v23  ;;  %v5635_v51 = vld [vmem:[%s8009_s5 + $0x118] sm:$0xff] }
 0x24c   :  { %8112 = vst [vmem:[#allocation5_spill] sm:$0xff] %v7339_v44  ;;  %v2594_v0 = vshll.u32 %v2511_v29, 16  ;;  %3581 = vmatmul.bf16.gmra.mxu3 %v7339_v44  ;;  %v2190_v11 = vadd.f32 %v2166_v3, %v2012_v62  ;;  %v3687_v63 = vpack.c.b16 %v8041_v48, %v3339_v30  ;;  %v2949_v53 = vrot.slane %v2947_v60, 4  ;;  %3900 = vmatpush.bf16.msrb.mxu1 %v5635_v51  ;;  %v2305_v3 = vpop.f32.mrf.mxu3 }
 0x24d   :  { %v2593_v14 = vrot.slane %v2591_v5, 7  ;;  %v2480_v57 = vadd.f32 %v6991_v28, %v2461_v59  ;;  %v7355_v8 = vunpack.c.l.b16 %v2945_v22  ;;  %v2952_v23 = vrot.slane %v2950_v37, 5  ;;  %v2732_v59 = vld [vmem:[#allocation2 + $0x60] sm:$0xf]  ;;  %v2735_v22 = vld [vmem:[#allocation2 + $0x64] sm:$0x1] }
 0x24e   :  { %3771 = vmatmul.bf16.gmra.mxu0 %v3687_v63  ;;  %v2326_v10 = vadd.f32 %v2302_v35, %v2190_v11  ;;  %v2013_v16 = vadd.f32 %v7292_v19, %v6919_v38  ;;  %v5100_v29 = vrot.slane %v2824_v43, 9  ;;  %v3124_v21 = vrot.slane %v2804_v61, 5 }
 0x24f   :  { %v2596_v30 = vor.u32 %v2594_v0, %v2593_v14  ;;  %v2597_v60 = vrot.slane %v2593_v14, 4  ;;  %v2496_v62 = vmax.f32 %v2480_v57, 0.0  ;;  %v7361_v5 = vpack.c.b16 %v7355_v8, %v7346_v46  ;;  %v7379_v48 = vpop.f32.mrf.mxu1 }
 0x250   :  { %v3340_v37 = vunpack.c.l.b16 %v7311_v50  ;;  %v3125_v35 = vsel %vm6464_vm12, %v5100_v29, %v3124_v21  ;;  %v7367_v38 = vadd.f32 %v1993_v31, %v7284_v18  ;;  %v2953_v19 = vor.u32 %v2952_v23, %v2949_v53 }
 0x251   :  { %v2733_v0 = vsel %vm5913_vm6, %v2596_v30, %v2732_v59  ;;  %v2736_v11 = vsel %vm5800_vm2, %v2597_v60, %v2735_v22  ;;  %v2512_v63 = vpack.c.bf16 %v2496_v62, %v2496_v62  ;;  %v7373_v43 = vld [vmem:[#allocation2 + $0x58] sm:$0xf]  ;;  %v2956_v14 = vshll.u32 %v2804_v61, 16  ;;  %v2169_v60 = vpop.f32.mrf.mxu2 }
 0x252   :  { %v2825_v51 = vld [vmem:[#allocation2 + $0x58] sm:$0xe]  ;;  %2734 = vst [vmem:[#allocation2 + $0x60] sm:$0xf] %v2733_v0  ;;  %3290 = vmatmul.bf16.gmra.mxu1 %v7361_v5  ;;  %v2438_v50 = vpop.f32.mrf.mxu0  ;;  %v2961_v57 = vshrl.u32 %v7373_v43, 16  ;;  %v2964_v18 = vshll.u32 %v7373_v43, 16  ;;  %v3341_v31 = vunpack.c.l.b16 %v7373_v43  ;;  %v3486_v23 = vunpack.c.l.b16 %v3125_v35 }
 0x253   :  { %v2805_v53 = vld [vmem:[#allocation2 + $0x5c] sm:$0x1]  ;;  %2737 = vst [vmem:[#allocation2 + $0x64] sm:$0x1] %v2736_v11  ;;  %v2599_v29 = vshrl.u32 %v2512_v63, 16  ;;  %v2602_v21 = vshll.u32 %v2512_v63, 16  ;;  %v2462_v30 = vadd.f32 %v2438_v50, %v2326_v10  ;;  %v2191_v59 = vadd.f32 %v2169_v60, %v2013_v16 }
 0x254   :  { %v5101_v62 = vrot.slane %v2825_v51, 9  ;;  %v2963_v61 = vrot.slane %v2961_v57, 4  ;;  %v2966_v22 = vrot.slane %v2964_v18, 5  ;;  %v3352_v0 = vpack.c.b16 %v3341_v31, %v3340_v37  ;;  %v2738_v37 = vld [vmem:[#allocation2 + $0x68] sm:$0xf] }
 0x255   :  { %v2601_v56 = vrot.slane %v2599_v29, 7  ;;  %v2481_v54 = vadd.f32 %v6991_v28, %v2462_v30  ;;  %v3128_v42 = vrot.slane %v2805_v53, 5  ;;  %v2954_v33 = vrot.slane %v2953_v19, 4  ;;  %v2741_v51 = vld [vmem:[#allocation2 + $0x6c] sm:$0x1] }
 0x256   :  { %3440 = vmatmul.bf16.gmra.mxu2 %v3352_v0  ;;  %v2327_v43 = vadd.f32 %v2305_v3, %v2191_v59  ;;  %v2958_v35 = vrot.slane %v2956_v14, 5  ;;  %v2967_v11 = vor.u32 %v2966_v22, %v2963_v61  ;;  %v2970_v9 = vshll.u32 %v2805_v53, 16  ;;  %v2307_v14 = vpop.f32.mrf.mxu3 }
 0x257   :  { %v2604_v63 = vor.u32 %v2602_v21, %v2601_v56  ;;  %v2605_v10 = vrot.slane %v2601_v56, 4  ;;  %v2497_v50 = vmax.f32 %v2481_v54, 0.0  ;;  %v7384_v16 = vsel %vm6464_vm12, %v5101_v62, %v3128_v42 }
 0x258   :  { %v8048_v57 = vunpack.c.l.b16 %v7384_v16  ;;  %v2959_v18 = vsel %vm6171_vm9, %v2954_v33, %v2958_v35  ;;  %v2968_v19 = vrot.slane %v2967_v11, 4  ;;  %v2972_v29 = vrot.slane %v2970_v9, 5 }
 0x259   :  { %v2739_v3 = vsel %vm5913_vm6, %v2604_v63, %v2738_v37  ;;  %v2742_v56 = vsel %vm5800_vm2, %v2605_v10, %v2741_v51  ;;  %v2513_v54 = vpack.c.bf16 %v2497_v50, %v2497_v50  ;;  %v7393_v53 = vld [vmem:[#allocation2 + $0x60] sm:$0xf]  ;;  %v3195_v42 = vunpack.c.l.b16 %v2959_v18  ;;  %v2171_v22 = vpop.f32.mrf.mxu2  ;;  %v5634_v37 = vld [vmem:[%s8009_s5 + $0x110] sm:$0xff] }
 0x25a   :  { %2740 = vst [vmem:[#allocation2 + $0x68] sm:$0xf] %v2739_v3  ;;  %v2441_v21 = vpop.f32.mrf.mxu0  ;;  %v3498_v30 = vpack.c.b16 %v8048_v57, %v3486_v23  ;;  %v2975_v33 = vshrl.u32 %v7393_v53, 16  ;;  %v2978_v9 = vshll.u32 %v7393_v53, 16  ;;  %v3342_v60 = vunpack.c.l.b16 %v7393_v53  ;;  %v2806_v35 = vld [vmem:[#allocation2 + $0x64] sm:$0x1]  ;;  %3901 = vmatpush.bf16.msrb.mxu1 %v5634_v37 }
 0x25b   :  { %2743 = vst [vmem:[#allocation2 + $0x6c] sm:$0x1] %v2742_v56  ;;  %v2607_v62 = vshrl.u32 %v2513_v54, 16  ;;  %v2610_v59 = vshll.u32 %v2513_v54, 16  ;;  %v2463_v61 = vadd.f32 %v2441_v21, %v2327_v43  ;;  %v2973_v0 = vsel %vm6171_vm9, %v2968_v19, %v2972_v29  ;;  %v2826_v50 = vld [vmem:[#allocation2 + $0x60] sm:$0xe] }
 0x25c   :  { %3586 = vmatmul.bf16.gmra.mxu3 %v3498_v30  ;;  %v2192_v11 = vadd.f32 %v2171_v22, %v7367_v38  ;;  %v2977_v63 = vrot.slane %v2975_v33, 4  ;;  %v2980_v23 = vrot.slane %v2978_v9, 5  ;;  %v3688_v10 = vpack.c.b16 %v3342_v60, %v3341_v31  ;;  %v1998_v38 = vpop.f32.mrf.mxu1  ;;  %v2744_v33 = vld [vmem:[#allocation2 + $0x70] sm:$0xf]  ;;  %v2747_v9 = vld [vmem:[#allocation2 + $0x74] sm:$0x1] }
 0x25d   :  { %v2609_v51 = vrot.slane %v2607_v62, 7  ;;  %v2482_v18 = vadd.f32 %v6991_v28, %v2463_v61  ;;  %v7407_v43 = vunpack.c.l.b16 %v2973_v0  ;;  %v5102_v3 = vrot.slane %v2826_v50, 9 }
 0x25e   :  { %3776 = vmatmul.bf16.gmra.mxu0 %v3688_v10  ;;  %v2328_v19 = vadd.f32 %v2307_v14, %v2192_v11  ;;  %v3132_v29 = vrot.slane %v2806_v35, 5  ;;  %v2981_v56 = vor.u32 %v2980_v23, %v2977_v63  ;;  %v2984_v54 = vshll.u32 %v2806_v35, 16  ;;  %v2310_v37 = vpop.f32.mrf.mxu3 }
 0x25f   :  { %v2612_v53 = vor.u32 %v2610_v59, %v2609_v51  ;;  %v2613_v31 = vrot.slane %v2609_v51, 4  ;;  %v2498_v21 = vmax.f32 %v2482_v18, 0.0  ;;  %v3207_v30 = vpack.c.b16 %v7407_v43, %v3195_v42 }
 0x260   :  { %v2015_v62 = vadd.f32 %v7379_v48, %v6937_v32  ;;  %v7413_v61 = vadd.f32 %v1998_v38, %v7333_v39  ;;  %v7415_v22 = vrot.slane %v2981_v56, 4  ;;  %v8113_v14 = vunpack.c.l.b16 %v7218_v27 }
 0x261   :  { %v2745_v59 = vsel %vm5913_vm6, %v2612_v53, %v2744_v33  ;;  %v2748_v42 = vsel %vm5800_vm2, %v2613_v31, %v2747_v9  ;;  %v2514_v35 = vpack.c.bf16 %v2498_v21, %v2498_v21  ;;  %v7427_v11 = vld [vmem:[#allocation2 + $0x68] sm:$0xf]  ;;  %v7429_v39 = vrot.slane %v2984_v54, 5  ;;  %v2174_v18 = vpop.f32.mrf.mxu2  ;;  %v5647_v54 = vld [vmem:[%s8009_s5 + $0x178] sm:$0xff]  ;;  %v5646_v9 = vld [vmem:[%s8009_s5 + $0x170] sm:$0xff] }
 0x262   :  { %v7421_v0 = vpack.c.b16 %v8113_v14, %v3481_v6  ;;  %v2827_v32 = vld [vmem:[#allocation2 + $0x68] sm:$0xe]  ;;  %2746 = vst [vmem:[#allocation2 + $0x70] sm:$0xf] %v2745_v59  ;;  %3295 = vmatmul.bf16.gmra.mxu1 %v3207_v30  ;;  %v2443_v48 = vpop.f32.mrf.mxu0  ;;  %v2989_v20 = vshrl.u32 %v7427_v11, 16  ;;  %v2992_v6 = vshll.u32 %v7427_v11, 16  ;;  %v3343_v27 = vunpack.c.l.b16 %v7427_v11  ;;  %4044 = vmatpush.bf16.msra.mxu2 %v5647_v54 }
 0x263   :  { %v2807_v63 = vld [vmem:[#allocation2 + $0x6c] sm:$0x1]  ;;  %v7436_v23 = vsel %vm6464_vm12, %v5102_v3, %v3132_v29  ;;  %2749 = vst [vmem:[#allocation2 + $0x74] sm:$0x1] %v2748_v42  ;;  %v2615_v10 = vshrl.u32 %v2514_v35, 16  ;;  %v2618_v50 = vshll.u32 %v2514_v35, 16  ;;  %v2464_v51 = vadd.f32 %v2443_v48, %v2328_v19 }
 0x264   :  { %v5103_v56 = vrot.slane %v2827_v32, 9  ;;  %v2193_v38 = vadd.f32 %v2174_v18, %v2015_v62  ;;  %v2991_v53 = vrot.slane %v2989_v20, 4  ;;  %v2994_v31 = vrot.slane %v2992_v6, 5  ;;  %v5655_v3 = vld [vmem:[%s8009_s5 + $0x1b8] sm:$0xff]  ;;  %v5633_v62 = vld [vmem:[%s8009_s5 + $0x108] sm:$0xff]  ;;  %v5654_v35 = vld [vmem:[%s8009_s5 + $0x1b0] sm:$0xff] }
 0x265   :  { %v7443_v21 = vpack.c.b16 %v3343_v27, %v3342_v60  ;;  %v2617_v29 = vrot.slane %v2615_v10, 7  ;;  %v2483_v19 = vadd.f32 %v6991_v28, %v2464_v51  ;;  %v3136_v30 = vrot.slane %v2807_v63, 5  ;;  %v5663_v60 = vld [vmem:[%s8009_s5 + $0x1f8] sm:$0xff]  ;;  %4222 = vmatpush.bf16.msra.mxu3 %v5655_v3  ;;  %3902 = vmatpush.bf16.msrb.mxu1 %v5633_v62  ;;  %v5662_v10 = vld [vmem:[%s8009_s5 + $0x1f0] sm:$0xff] }
 0x266   :  { %v2998_v33 = vshll.u32 %v2807_v63, 16  ;;  %v2329_v14 = vadd.f32 %v2310_v37, %v2193_v38  ;;  %v8047_v59 = vunpack.c.l.b16 %v7436_v23  ;;  %v2995_v42 = vor.u32 %v2994_v31, %v2991_v53  ;;  %4358 = vmatpush.bf16.msra.mxu0 %v5663_v60  ;;  %v2750_v37 = vld [vmem:[#allocation2 + $0x78] sm:$0xf]  ;;  %v2753_v51 = vld [vmem:[#allocation2 + $0x7c] sm:$0x1]  ;;  %4045 = vmatpush.bf16.msra.mxu2 %v5646_v9 }
 0x267   :  { %3445 = vmatmul.bf16.gmra.mxu2 %v7443_v21  ;;  %v2620_v48 = vor.u32 %v2618_v50, %v2617_v29  ;;  %v2621_v20 = vrot.slane %v2617_v29, 4  ;;  %v2499_v6 = vmax.f32 %v2483_v19, 0.0  ;;  %v7467_v63 = vsel %vm6464_vm12, %v5103_v56, %v3136_v30 }
 0x268   :  { %v8046_v18 = vunpack.c.l.b16 %v7467_v63  ;;  %v2987_v50 = vsel %vm6171_vm9, %v7415_v22, %v7429_v39  ;;  %v2996_v54 = vrot.slane %v2995_v42, 4  ;;  %v8114_v38 = vunpack.c.l.b16 %v7243_v26  ;;  %v5645_v22 = vld [vmem:[%s8009_s5 + $0x168] sm:$0xff] }
 0x269   :  { %v8115_v56 = vunpack.c.l.b16 %v7306_v58  ;;  %v2751_v31 = vsel %vm5913_vm6, %v2620_v48, %v2750_v37  ;;  %v2754_v3 = vsel %vm5800_vm2, %v2621_v20, %v2753_v51  ;;  %v2515_v29 = vpack.c.bf16 %v2499_v6, %v2499_v6  ;;  %v7487_v19 = vld [vmem:[#allocation2 + $0x70] sm:$0xf]  ;;  %v5653_v26 = vld [vmem:[%s8009_s5 + $0x1a8] sm:$0xff]  ;;  %4223 = vmatpush.bf16.msra.mxu3 %v5654_v35  ;;  %v2176_v20 = vpop.f32.mrf.mxu2 }
 0x26a   :  { %v3000_v30 = vrot.slane %v2998_v33, 5  ;;  %2752 = vst [vmem:[#allocation2 + $0x78] sm:$0xf] %v2751_v31  ;;  %v2446_v58 = vpop.f32.mrf.mxu0  ;;  %v7499_v39 = vpack.c.b16 %v8046_v18, %v8047_v59  ;;  %v3003_v62 = vshrl.u32 %v7487_v19, 16  ;;  %v3006_v33 = vshll.u32 %v7487_v19, 16  ;;  %4359 = vmatpush.bf16.msra.mxu0 %v5662_v10  ;;  %4046 = vmatpush.bf16.msra.mxu2 %v5645_v22  ;;  %v5632_v18 = vld [vmem:[%s8009_s5 + $0x100] sm:$0xff] }
 0x26b   :  { %v7481_v53 = vpack.c.b16 %v8115_v56, %v8114_v38  ;;  %v3344_v9 = vunpack.c.l.b16 %v7487_v19  ;;  %v2828_v60 = vld [vmem:[#allocation2 + $0x70] sm:$0xe]  ;;  %2755 = vst [vmem:[#allocation2 + $0x7c] sm:$0x1] %v2754_v3  ;;  %v2623_v42 = vshrl.u32 %v2515_v29, 16  ;;  %v2465_v48 = vadd.f32 %v2446_v58, %v2329_v14  ;;  %v5661_v38 = vld [vmem:[%s8009_s5 + $0x1e8] sm:$0xff]  ;;  %v2312_v3 = vpop.f32.mrf.mxu3  ;;  %3903 = vmatpush.bf16.msrb.mxu1 %v5632_v18 }
 0x26c   :  { %8116 = vst [vmem:[#allocation8_spill] sm:$0xff] %v7499_v39  ;;  %v3001_v6 = vsel %vm6171_vm9, %v2996_v54, %v3000_v30  ;;  %v7506_v37 = vunpack.c.l.b16 %v2987_v50  ;;  %v7508_v51 = vld [vmem:[#allocation2 + $0x74] sm:$0x1]  ;;  %3591 = vmatmul.bf16.gmra.mxu3 %v7499_v39  ;;  %v2194_v35 = vadd.f32 %v2176_v20, %v7413_v61  ;;  %v3005_v56 = vrot.slane %v3003_v62, 4  ;;  %v5644_v58 = vld [vmem:[%s8009_s5 + $0x160] sm:$0xff] }
 0x26d   :  { %v3008_v31 = vrot.slane %v3006_v33, 5  ;;  %v3689_v14 = vpack.c.b16 %v3344_v9, %v3343_v27  ;;  %v2625_v50 = vrot.slane %v2623_v42, 7  ;;  %v2626_v54 = vshll.u32 %v2515_v29, 16  ;;  %4224 = vmatpush.bf16.msra.mxu3 %v5653_v26  ;;  %v5652_v27 = vld [vmem:[%s8009_s5 + $0x1a0] sm:$0xff] }
 0x26e   :  { %v2484_v10 = vadd.f32 %v6991_v28, %v2465_v48  ;;  %v7520_v30 = vunpack.c.l.b16 %v3001_v6  ;;  %v2330_v61 = vadd.f32 %v2312_v3, %v2194_v35  ;;  %v5104_v62 = vrot.slane %v2828_v60, 9  ;;  %4360 = vmatpush.bf16.msra.mxu0 %v5661_v38  ;;  %v5660_v60 = vld [vmem:[%s8009_s5 + $0x1e0] sm:$0xff]  ;;  %v5643_v35 = vld [vmem:[%s8009_s5 + $0x158] sm:$0xff]  ;;  %4047 = vmatpush.bf16.msra.mxu2 %v5644_v58 }
 0x26f   :  { %3781 = vmatmul.bf16.gmra.mxu0 %v3689_v14  ;;  %v3140_v11 = vrot.slane %v7508_v51, 5  ;;  %v3009_v33 = vor.u32 %v3008_v31, %v3005_v56  ;;  %v2628_v29 = vor.u32 %v2626_v54, %v2625_v50  ;;  %v2629_v42 = vrot.slane %v2625_v50, 4  ;;  %v2756_v6 = vld [vmem:[#allocation2 + $0x80] sm:$0xf]  ;;  %v2759_v26 = vld [vmem:[#allocation2 + $0x84] sm:$0x1] }
 0x270   :  { %v2500_v48 = vmax.f32 %v2484_v10, 0.0  ;;  %v7531_v22 = vpack.c.b16 %v7520_v30, %v7506_v37  ;;  %v3012_v3 = vshll.u32 %v7508_v51, 16  ;;  %v5651_v10 = vld [vmem:[%s8009_s5 + $0x198] sm:$0xff] }
 0x271   :  { %v2757_v31 = vsel %vm5913_vm6, %v2628_v29, %v2756_v6  ;;  %v2760_v38 = vsel %vm5800_vm2, %v2629_v42, %v2759_v26  ;;  %v7546_v50 = vld [vmem:[#allocation2 + $0x78] sm:$0xf]  ;;  %v7558_v26 = vsel %vm6464_vm12, %v5104_v62, %v3140_v11  ;;  %4225 = vmatpush.bf16.msra.mxu3 %v5652_v27 }
 0x272   :  { %v2516_v14 = vpack.c.bf16 %v2500_v48, %v2500_v48  ;;  %v2829_v54 = vld [vmem:[#allocation2 + $0x78] sm:$0xe]  ;;  %2758 = vst [vmem:[#allocation2 + $0x80] sm:$0xf] %v2757_v31  ;;  %3300 = vmatmul.bf16.gmra.mxu1 %v7531_v22  ;;  %v2448_v56 = vpop.f32.mrf.mxu0  ;;  %v3017_v29 = vshrl.u32 %v7546_v50, 16  ;;  %v3020_v6 = vshll.u32 %v7546_v50, 16  ;;  %v3345_v42 = vunpack.c.l.b16 %v7546_v50  ;;  %4361 = vmatpush.bf16.msra.mxu0 %v5660_v60 }
 0x273   :  { %v2809_v48 = vld [vmem:[#allocation2 + $0x7c] sm:$0x1]  ;;  %2761 = vst [vmem:[#allocation2 + $0x84] sm:$0x1] %v2760_v38  ;;  %v2466_v58 = vadd.f32 %v2448_v56, %v2330_v61  ;;  %v5105_v32 = vrot.slane %v2829_v54, 9  ;;  %v3010_v31 = vrot.slane %v3009_v33, 4  ;;  %4048 = vmatpush.bf16.msra.mxu2 %v5643_v35 }
 0x274   :  { %v2631_v51 = vshrl.u32 %v2516_v14, 16  ;;  %v3019_v59 = vrot.slane %v3017_v29, 4  ;;  %v3022_v57 = vrot.slane %v3020_v6, 5  ;;  %v7567_v20 = vpack.c.b16 %v3345_v42, %v3344_v9  ;;  %v5659_v61 = vld [vmem:[%s8009_s5 + $0x1d8] sm:$0xff]  ;;  %v5642_v56 = vld [vmem:[%s8009_s5 + $0x150] sm:$0xff] }
 0x275   :  { %v3144_v62 = vrot.slane %v2809_v48, 5  ;;  %v2634_v33 = vshll.u32 %v2516_v14, 16  ;;  %v2485_v27 = vadd.f32 %v6991_v28, %v2466_v58  ;;  %v3026_v60 = vshll.u32 %v2809_v48, 16  ;;  %4226 = vmatpush.bf16.msra.mxu3 %v5651_v10  ;;  %v5650_v28 = vld [vmem:[%s8009_s5 + $0x190] sm:$0xff]  ;;  %v2762_v29 = vld [vmem:[#allocation2 + $0x88] sm:$0xf] }
 0x276   :  { %8117 = vst [vmem:[#allocation13_spill] sm:$0xff] %v7567_v20  ;;  %v2633_v11 = vrot.slane %v2631_v51, 7  ;;  %v8050_v9 = vunpack.c.l.b16 %v7558_v26  ;;  %v3014_v38 = vrot.slane %v3012_v3, 5  ;;  %v3023_v54 = vor.u32 %v3022_v57, %v3019_v59  ;;  %4362 = vmatpush.bf16.msra.mxu0 %v5659_v61  ;;  %v2765_v3 = vld [vmem:[#allocation2 + $0x8c] sm:$0x1] }
 0x277   :  { %3450 = vmatmul.bf16.gmra.mxu2 %v7567_v20  ;;  %v7579_v19 = vsel %vm6464_vm12, %v5105_v32, %v3144_v62  ;;  %v2501_v6 = vmax.f32 %v2485_v27, 0.0  ;;  %v5658_v32 = vld [vmem:[%s8009_s5 + $0x1d0] sm:$0xff]  ;;  %v3627_v48 = vshll.u32 %v7329_v24, 16  ;;  %v3028_v10 = vrot.slane %v3026_v60, 5 }
 0x278   :  { %v2636_v35 = vor.u32 %v2634_v33, %v2633_v11  ;;  %v2637_v14 = vrot.slane %v2633_v11, 4  ;;  %v8049_v18 = vunpack.c.l.b16 %v7579_v19  ;;  %v3015_v57 = vsel %vm6171_vm9, %v3010_v31, %v3014_v38  ;;  %4049 = vmatpush.bf16.msra.mxu2 %v5642_v56  ;;  %v5641_v31 = vld [vmem:[%s8009_s5 + $0x148] sm:$0xff]  ;;  %v7607_v33 = vld [vmem:[#allocation2 + $0x44] sm:$0x1] }
 0x279   :  { %v3024_v59 = vrot.slane %v3023_v54, 4  ;;  %v2517_v62 = vpack.c.bf16 %v2501_v6, %v2501_v6  ;;  %v7602_v11 = vld [vmem:[#allocation2 + $0x80] sm:$0xf]  ;;  %4227 = vmatpush.bf16.msra.mxu3 %v5650_v28  ;;  %v5649_v56 = vld [vmem:[%s8009_s5 + $0x188] sm:$0xff] }
 0x27a   :  { %v2763_v51 = vsel %vm5913_vm6, %v2636_v35, %v2762_v29  ;;  %v2766_v58 = vsel %vm5800_vm2, %v2637_v14, %v2765_v3  ;;  %v7600_v61 = vpack.c.b16 %v8049_v18, %v8050_v9  ;;  %v3031_v27 = vshrl.u32 %v7602_v11, 16  ;;  %4363 = vmatpush.bf16.msra.mxu0 %v5658_v32  ;;  %v5657_v29 = vld [vmem:[%s8009_s5 + $0x1c8] sm:$0xff]  ;;  %v2822_v6 = vld [vmem:[#allocation2 + $0x40] sm:$0xe] }
 0x27b   :  { %2764 = vst [vmem:[#allocation2 + $0x88] sm:$0xf] %v2763_v51  ;;  %v3034_v60 = vshll.u32 %v7602_v11, 16  ;;  %v8052_v38 = vunpack.c.l.b16 %v7602_v11  ;;  %v3029_v54 = vsel %vm6171_vm9, %v3024_v59, %v3028_v10  ;;  %v2639_v35 = vshrl.u32 %v2517_v62, 16  ;;  %v2810_v10 = vld [vmem:[#allocation2 + $0x84] sm:$0x1] }
 0x27c   :  { %8118 = vst [vmem:[#allocation7_spill] sm:$0xff] %v7600_v61  ;;  %v7617_v14 = vunpack.c.l.b16 %v3029_v54  ;;  %3596 = vmatmul.bf16.gmra.mxu3 %v7600_v61  ;;  %v3033_v3 = vrot.slane %v3031_v27, 4  ;;  %v7627_v59 = vunpack.c.l.b16 %v3015_v57  ;;  %v8119_v32 = vshrl.u32 %v7329_v24, 16  ;;  %4050 = vmatpush.bf16.msra.mxu2 %v5641_v31  ;;  %v5640_v27 = vld [vmem:[%s8009_s5 + $0x140] sm:$0xff] }
 0x27d   :  { %2767 = vst [vmem:[#allocation2 + $0x8c] sm:$0x1] %v2766_v58  ;;  %v3036_v51 = vrot.slane %v3034_v60, 5  ;;  %v3690_v28 = vpack.c.b16 %v8052_v38, %v3345_v42  ;;  %v2830_v58 = vld [vmem:[#allocation2 + $0x80] sm:$0xe]  ;;  %v3629_v18 = vrot.slane %v3627_v48, 5  ;;  %4228 = vmatpush.bf16.msra.mxu3 %v5649_v56 }
 0x27e   :  { %v3626_v54 = vrot.slane %v8119_v32, 4  ;;  %v2641_v9 = vrot.slane %v2639_v35, 7  ;;  %v2642_v39 = vshll.u32 %v2517_v62, 16  ;;  %v7636_v50 = vpack.c.b16 %v7617_v14, %v7627_v59  ;;  %v5648_v42 = vld [vmem:[%s8009_s5 + $0x180] sm:$0xff]  ;;  %4364 = vmatpush.bf16.msra.mxu0 %v5657_v29  ;;  %v2768_v32 = vld [vmem:[#allocation2 + $0x90] sm:$0xf] }
 0x27f   :  { %3786 = vmatmul.bf16.gmra.mxu0 %v3690_v28  ;;  %v5236_v57 = vrot.slane %v2822_v6, 9  ;;  %v3657_v48 = vrot.slane %v7607_v33, 5  ;;  %v5106_v31 = vrot.slane %v2830_v58, 9  ;;  %v3148_v35 = vrot.slane %v2810_v10, 5  ;;  %v5656_v28 = vld [vmem:[%s8009_s5 + $0x1c0] sm:$0xff] }
 0x280   :  { %v2644_v60 = vor.u32 %v2642_v39, %v2641_v9  ;;  %v2645_v62 = vrot.slane %v2641_v9, 4  ;;  %v2771_v38 = vld [vmem:[#allocation2 + $0x94] sm:$0x1]  ;;  %v3037_v61 = vor.u32 %v3036_v51, %v3033_v3  ;;  %v3040_v56 = vshll.u32 %v2810_v10, 16  ;;  %4051 = vmatpush.bf16.msra.mxu2 %v5640_v27  ;;  %v7651_v51 = vld [vmem:[#allocation2 + $0x4c] sm:$0x1] }
 0x281   :  { %v3630_v9 = vor.u32 %v3629_v18, %v3626_v54  ;;  %v3633_v29 = vshll.u32 %v7607_v33, 16  ;;  %4229 = vmatpush.bf16.msra.mxu3 %v5648_v42  ;;  %v7655_v15 = vsel %vm6464_vm12, %v5106_v31, %v3148_v35  ;;  %v7662_v18 = vsel %vm6464_vm12, %v5236_v57, %v3657_v48  ;;  %v2823_v42 = vld [vmem:[#allocation2 + $0x48] sm:$0xe] }
 0x282   :  { %v2769_v44 = vsel %vm5913_vm6, %v2644_v60, %v2768_v32  ;;  %v2772_v6 = vsel %vm5800_vm2, %v2645_v62, %v2771_v38  ;;  %v2791_v1 = vld [vmem:[#allocation2 + $0x88] sm:$0xf]  ;;  %3305 = vmatmul.bf16.gmra.mxu1 %v7636_v50  ;;  %4365 = vmatpush.bf16.msra.mxu0 %v5656_v28  ;;  %v8120_v10 = vunpack.c.l.b16 %v7602_v11  ;;  %v3038_v62 = vrot.slane %v3037_v61, 4 }
 0x283   :  { %v2831_v39 = vld [vmem:[#allocation2 + $0x88] sm:$0xe]  ;;  %2770 = vst [vmem:[#allocation2 + $0x90] sm:$0xf] %v2769_v44  ;;  %v3045_v58 = vshrl.u32 %v2791_v1, 16  ;;  %v3048_v36 = vshll.u32 %v2791_v1, 16  ;;  %v3347_v20 = vunpack.c.l.b16 %v2791_v1  ;;  %v3492_v57 = vunpack.c.l.b16 %v7655_v15 }
 0x284   :  { %v2811_v3 = vld [vmem:[#allocation2 + $0x8c] sm:$0x1]  ;;  %2773 = vst [vmem:[#allocation2 + $0x94] sm:$0x1] %v2772_v6  ;;  %v5107_v45 = vrot.slane %v2831_v39, 9  ;;  %v5671_v44 = vld [vmem:[%s8009_s5 + $0x238] sm:$0xff]  ;;  %v8121_v32 = vunpack.c.l.b16 %v7384_v16  ;;  %v8122_v6 = vunpack.c.l.b16 %v7436_v23 }
 0x285   :  { %v3152_v38 = vrot.slane %v2811_v3, 5  ;;  %v3047_v1 = vrot.slane %v3045_v58, 4  ;;  %v3050_v33 = vrot.slane %v3048_v36, 5  ;;  %v7666_v54 = vpack.c.b16 %v3347_v20, %v8120_v10  ;;  %4494 = vmatpush.bf16.msra.mxu1 %v5671_v44 }
 0x286   :  { %v3054_v27 = vshll.u32 %v2811_v3, 16  ;;  %v3631_v31 = vrot.slane %v3630_v9, 4  ;;  %v3635_v35 = vrot.slane %v3633_v29, 5  ;;  %v3042_v48 = vrot.slane %v3040_v56, 5 }
 0x287   :  { %v7670_v60 = vsel %vm6464_vm12, %v5107_v45, %v3152_v38  ;;  %3455 = vmatmul.bf16.gmra.mxu2 %v7666_v54  ;;  %v3051_v11 = vor.u32 %v3050_v33, %v3047_v1  ;;  %v7681_v39 = vpack.c.b16 %v8122_v6, %v8121_v32  ;;  %v5382_v61 = vrot.slane %v2823_v42, 9 }
 0x288   :  { %v8059_v36 = vunpack.c.l.b16 %v7670_v60  ;;  %v3636_v28 = vsel %vm6171_vm9, %v3631_v31, %v3635_v35  ;;  %v4143_v9 = vrot.slane %v7651_v51, 5  ;;  %v3056_v3 = vrot.slane %v3054_v27, 5 }
 0x289   :  { %v3052_v58 = vrot.slane %v3051_v11, 4  ;;  %v7688_v56 = vunpack.c.l.b16 %v3636_v28  ;;  %v3043_v16 = vsel %vm6171_vm9, %v3038_v62, %v3042_v48  ;;  %v3978_v1 = vunpack.c.l.b16 %v7662_v18  ;;  %v5670_v48 = vld [vmem:[%s8009_s5 + $0x230] sm:$0xff] }
 0x28a   :  { %v7686_v29 = vpack.c.b16 %v8059_v36, %v3492_v57  ;;  %v7690_v15 = vld [vmem:[#allocation2 + $0x90] sm:$0xf]  ;;  %v4144_v38 = vsel %vm6464_vm12, %v5382_v61, %v4143_v9  ;;  %v3836_v10 = vpack.c.b16 %v7506_v37, %v7407_v43  ;;  %v7709_v42 = vunpack.c.l.b16 %v3043_v16  ;;  %4495 = vmatpush.bf16.msra.mxu1 %v5670_v48 }
 0x28b   :  { %v8058_v23 = vunpack.c.l.b16 %v7690_v15  ;;  %v3057_v45 = vsel %vm6171_vm9, %v3052_v58, %v3056_v3  ;;  %v3835_v33 = vpack.c.b16 %v7688_v56, %v7355_v8  ;;  %v4440_v62 = vunpack.c.l.b16 %v4144_v38 }
 0x28c   :  { %v7699_v44 = vunpack.c.l.b16 %v3057_v45  ;;  %3601 = vmatmul.bf16.gmra.mxu3 %v7686_v29  ;;  %v8124_v11 = vunpack.c.l.b16 %v7558_v26  ;;  %v3837_v6 = vpack.c.b16 %v7627_v59, %v7520_v30  ;;  %v8125_v16 = vpack.c.b16 %v7201_v40, %v7118_v55 }
 0x28d   :  { %v3691_v27 = vpack.c.b16 %v8058_v23, %v3347_v20  ;;  %v7717_v35 = vpack.c.b16 %v4440_v62, %v3978_v1  ;;  %v8123_v20 = vunpack.c.l.b16 %v7467_v63  ;;  %v8126_v38 = vunpack.c.l.b16 %v7579_v19 }
 0x28e   :  { %v7713_v31 = vpack.c.b16 %v7699_v44, %v7709_v42  ;;  %v3638_v55 = vshrl.u32 %v7690_v15, 16  ;;  %v8130_v18 = vunpack.c.l.b16 %v7329_v24  ;;  %v5666_v24 = vld [vmem:[%s8009_s5 + $0x210] sm:$0xff] }
 0x28f   :  { %3791 = vmatmul.bf16.gmra.mxu0 %v3691_v27  ;;  %v7727_v28 = vpack.c.b16 %v8124_v11, %v8123_v20  ;;  %v3641_v11 = vshll.u32 %v7690_v15, 16 }
 0x290   :  { %v3640_v19 = vrot.slane %v3638_v55, 4  ;;  %v5668_v55 = vld [vmem:[%s8009_s5 + $0x220] sm:$0xff] }
 0x292   :  { %3310 = vmatmul.bf16.gmra.mxu1 %v7713_v31 }
 0x297   :  { %4052 = vmatmul.bf16.vlgmr.msra.gmra.mxu2 %v7158_v12  ;;  %v5669_v12 = vld [vmem:[%s8009_s5 + $0x228] sm:$0xff] }
 0x298   :  { %4496 = vmatpush.bf16.msra.mxu1 %v5669_v12  ;;  %v7759_v12 = vld [vmem:[#allocation2 + $0x9c] sm:$0x1] }
 0x299   :  { %v3421_v32 = vpop.f32.mrf.mxu2 }
 0x29b   :  { %v7734_v3 = vpop.f32.mrf.mxu0 }
 0x29c   :  { %4230 = vmatmul.bf16.vlgmr.msra.gmra.mxu3 %v7161_v41  ;;  %v3276_v61 = vpop.f32.mrf.mxu1  ;;  %4497 = vmatpush.bf16.msra.mxu1 %v5668_v55 }
 0x29d   :  { %v3422_v9 = vadd.f32 %v3421_v32, %v3276_v61  ;;  %v2812_v32 = vld [vmem:[#allocation2 + $0x94] sm:$0x1]  ;;  %v2832_v61 = vld [vmem:[#allocation2 + $0x90] sm:$0xe] }
 0x29f   :  { %4366 = vmatmul.bf16.vlgmr.msra.gmra.mxu0 %v7214_v47  ;;  %v3567_v58 = vpop.f32.mrf.mxu3  ;;  %v7746_v47 = vpack.c.b16 %v3492_v57, %v8126_v38  ;;  %v4147_v38 = vrot.slane %v7759_v12, 5 }
 0x2a0   :  { %v7736_v63 = vadd.f32 %v3567_v58, %v3422_v9  ;;  %v3643_v9 = vrot.slane %v3641_v11, 5  ;;  %v3647_v11 = vshll.u32 %v2812_v32, 16 }
 0x2a1   :  { %v3423_v26 = vpop.f32.mrf.mxu2 }
 0x2a2   :  { %3904 = vmatmul.bf16.vlgmr.msrb.gmra.mxu1 %v8125_v16  ;;  %v3661_v16 = vrot.slane %v2812_v32, 5  ;;  %v3649_v40 = vrot.slane %v3647_v11, 5 }
 0x2a3   :  { %v7751_v20 = vpop.f32.mrf.mxu0 }
 0x2a4   :  { %v3278_v45 = vpop.f32.mrf.mxu1 }
 0x2a5   :  { %v3424_v41 = vadd.f32 %v3423_v26, %v3278_v45  ;;  %v5237_v26 = vrot.slane %v2832_v61, 9 }
 0x2a7   :  { %4057 = vmatmul.bf16.gmra.mxu2 %v7421_v0  ;;  %v3569_v27 = vpop.f32.mrf.mxu3 }
 0x2a8   :  { %v7749_v62 = vadd.f32 %v3569_v27, %v3424_v41  ;;  %v2833_v41 = vld [vmem:[#allocation2 + $0x98] sm:$0xe] }
 0x2a9   :  { %v3426_v48 = vpop.f32.mrf.mxu2 }
 0x2ab   :  { %v7775_v23 = vpop.f32.mrf.mxu0 }
 0x2ac   :  { %4235 = vmatmul.bf16.gmra.mxu3 %v7234_v49  ;;  %v8127_v49 = vpack.c.b16 %v7254_v4, %v7203_v34 }
 0x2af   :  { %4371 = vmatmul.bf16.gmra.mxu0 %v7280_v2  ;;  %v3281_v57 = vpop.f32.mrf.mxu1  ;;  %v3572_v0 = vpop.f32.mrf.mxu3  ;;  %v2783_v2 = vld [vmem:[#allocation2 + $0x48] sm:$0xf] }
 0x2b0   :  { %v3427_v58 = vadd.f32 %v3426_v48, %v3281_v57  ;;  %v7772_v48 = vsel %vm6464_vm12, %v5237_v26, %v3661_v16  ;;  %v5383_v57 = vrot.slane %v2833_v41, 9  ;;  %v4110_v4 = vshrl.u32 %v2783_v2, 16 }
 0x2b1   :  { %v3428_v45 = vpop.f32.mrf.mxu2  ;;  %v3979_v61 = vunpack.c.l.b16 %v7772_v48 }
 0x2b2   :  { %v7762_v27 = vadd.f32 %v3572_v0, %v3427_v58  ;;  %3909 = vmatmul.bf16.gmra.mxu1 %v8127_v49  ;;  %v3644_v0 = vor.u32 %v3643_v9, %v3640_v19  ;;  %v4148_v34 = vsel %vm6464_vm12, %v5383_v57, %v4147_v38  ;;  %v4113_v58 = vshll.u32 %v2783_v2, 16 }
 0x2b3   :  { %v4441_v49 = vunpack.c.l.b16 %v4148_v34  ;;  %v4112_v25 = vrot.slane %v4110_v4, 4  ;;  %v3764_v34 = vpop.f32.mrf.mxu0 }
 0x2b4   :  { %v3645_v36 = vrot.slane %v3644_v0, 4  ;;  %v4115_v38 = vrot.slane %v4113_v58, 5  ;;  %v4119_v0 = vshll.u32 %v7651_v51, 16  ;;  %v8129_v51 = vunpack.c.l.b16 %v7321_v7 }
 0x2b5   :  { %v7782_v32 = vpack.c.b16 %v4441_v49, %v3979_v61 }
 0x2b6   :  { %v3650_v19 = vsel %vm6171_vm9, %v3645_v36, %v3649_v40  ;;  %v4116_v11 = vor.u32 %v4115_v38, %v4112_v25  ;;  %v4121_v58 = vrot.slane %v4119_v0, 5 }
 0x2b7   :  { %4062 = vmatmul.bf16.gmra.mxu2 %v7481_v53  ;;  %v3283_v26 = vpop.f32.mrf.mxu1  ;;  %v3574_v16 = vpop.f32.mrf.mxu3  ;;  %v7786_v55 = vunpack.c.l.b16 %v3650_v19  ;;  %v4168_v19 = vunpack.c.l.b16 %v2783_v2 }
 0x2b8   :  { %v3429_v41 = vadd.f32 %v3428_v45, %v3283_v26  ;;  %v4117_v4 = vrot.slane %v4116_v11, 4 }
 0x2b9   :  { %v3431_v9 = vpop.f32.mrf.mxu2  ;;  %v3839_v53 = vpack.c.b16 %v7786_v55, %v7699_v44 }
 0x2ba   :  { %v3610_v57 = vadd.f32 %v3574_v16, %v3429_v41  ;;  %v8128_v16 = vpack.c.b16 %v7346_v46, %v7275_v17  ;;  %v4122_v41 = vsel %vm6171_vm9, %v4117_v4, %v4121_v58  ;;  %v7807_v17 = vadd.f32 %v7734_v3, %v7736_v63 }
 0x2bb   :  { %v3767_v46 = vpop.f32.mrf.mxu0  ;;  %v4304_v11 = vunpack.c.l.b16 %v4122_v41 }
 0x2bc   :  { %4240 = vmatmul.bf16.gmra.mxu3 %v7308_v52  ;;  %v5667_v52 = vld [vmem:[%s8009_s5 + $0x218] sm:$0xff] }
 0x2bd   :  { %4498 = vmatpush.bf16.msra.mxu1 %v5667_v52 }
 0x2bf   :  { %4376 = vmatmul.bf16.gmra.mxu0 %v7361_v5  ;;  %v3286_v45 = vpop.f32.mrf.mxu1  ;;  %v3577_v49 = vpop.f32.mrf.mxu3  ;;  %v3983_v5 = vpack.c.b16 %v3978_v1, %v8129_v51  ;;  %v4170_v1 = vpack.c.b16 %v4168_v19, %v8130_v18 }
 0x2c0   :  { %v3432_v36 = vadd.f32 %v3431_v9, %v3286_v45  ;;  %v4306_v45 = vpack.c.b16 %v4304_v11, %v7688_v56 }
 0x2c1   :  { %v3433_v40 = vpop.f32.mrf.mxu2  ;;  %4499 = vmatpush.bf16.msra.mxu1 %v5666_v24  ;;  %v4133_v24 = vshll.u32 %v7759_v12, 16 }
 0x2c2   :  { %v3611_v26 = vadd.f32 %v3577_v49, %v3432_v36  ;;  %3914 = vmatmul.bf16.gmra.mxu1 %v8128_v16  ;;  %v7814_v36 = vadd.f32 %v7751_v20, %v7749_v62  ;;  %v7825_v62 = vadd.f32 %v7775_v23, %v7762_v27  ;;  %v5665_v23 = vld [vmem:[%s8009_s5 + $0x208] sm:$0xff] }
 0x2c3   :  { %v3769_v4 = vpop.f32.mrf.mxu0 }
 0x2c5   :  { %4500 = vmatpush.bf16.msra.mxu1 %v5665_v23 }
 0x2c7   :  { %4067 = vmatmul.bf16.gmra.mxu2 %v3983_v5  ;;  %v3288_v9 = vpop.f32.mrf.mxu1  ;;  %v3579_v25 = vpop.f32.mrf.mxu3 }
 0x2c8   :  { %v3434_v38 = vadd.f32 %v3433_v40, %v3288_v9  ;;  %v7838_v9 = vadd.f32 %v3767_v46, %v3611_v26  ;;  %v5664_v26 = vld [vmem:[%s8009_s5 + $0x200] sm:$0xff] }
 0x2c9   :  { %v3436_v0 = vpop.f32.mrf.mxu2  ;;  %4501 = vmatpush.bf16.msra.mxu1 %v5664_v26 }
 0x2ca   :  { %v3612_v7 = vadd.f32 %v3579_v25, %v3434_v38  ;;  %v8131_v38 = vld [vmem:[#allocation13_spill] sm:$0xff] }
 0x2cb   :  { %v3772_v5 = vpop.f32.mrf.mxu0 }
 0x2cc   :  { %4245 = vmatmul.bf16.gmra.mxu3 %v4170_v1 }
 0x2cf   :  { %4381 = vmatmul.bf16.gmra.mxu0 %v4306_v45  ;;  %v3291_v49 = vpop.f32.mrf.mxu1  ;;  %v3582_v2 = vpop.f32.mrf.mxu3 }
 0x2d0   :  { %v3437_v3 = vadd.f32 %v3436_v0, %v3291_v49 }
 0x2d1   :  { %v3438_v63 = vpop.f32.mrf.mxu2 }
 0x2d2   :  { %v3613_v40 = vadd.f32 %v3582_v2, %v3437_v3  ;;  %3919 = vmatmul.bf16.gmra.mxu1 %v3835_v33  ;;  %v7829_v33 = vadd.f32 %v3764_v34, %v3610_v57 }
 0x2d3   :  { %v3774_v27 = vpop.f32.mrf.mxu0 }
 0x2d4   :  { %v7851_v49 = vadd.f32 %v3772_v5, %v3613_v40  ;;  %v4135_v5 = vrot.slane %v4133_v24, 5 }
 0x2d7   :  { %4072 = vmatmul.bf16.gmra.mxu2 %v7681_v39  ;;  %v3293_v58 = vpop.f32.mrf.mxu1  ;;  %v3584_v16 = vpop.f32.mrf.mxu3 }
 0x2d8   :  { %v3439_v20 = vadd.f32 %v3438_v63, %v3293_v58 }
 0x2d9   :  { %v3441_v52 = vpop.f32.mrf.mxu2 }
 0x2da   :  { %v3614_v51 = vadd.f32 %v3584_v16, %v3439_v20 }
 0x2db   :  { %v3777_v11 = vpop.f32.mrf.mxu0 }
 0x2dc   :  { %4250 = vmatmul.bf16.gmra.mxu3 %v7443_v21 }
 0x2df   :  { %4386 = vmatmul.bf16.gmra.mxu0 %v7531_v22  ;;  %v3296_v8 = vpop.f32.mrf.mxu1  ;;  %v3587_v56 = vpop.f32.mrf.mxu3 }
 0x2e0   :  { %v3442_v41 = vadd.f32 %v3441_v52, %v3296_v8 }
 0x2e1   :  { %v3443_v39 = vpop.f32.mrf.mxu2 }
 0x2e2   :  { %v3615_v19 = vadd.f32 %v3587_v56, %v3442_v41  ;;  %3924 = vmatmul.bf16.gmra.mxu1 %v3836_v10  ;;  %v7842_v10 = vadd.f32 %v3769_v4, %v3612_v7  ;;  %v8132_v56 = vpack.c.b16 %v7709_v42, %v7617_v14  ;;  %v8134_v42 = vunpack.c.l.b16 %v7690_v15 }
 0x2e3   :  { %v3779_v30 = vpop.f32.mrf.mxu0 }
 0x2e7   :  { %4077 = vmatmul.bf16.gmra.mxu2 %v7727_v28  ;;  %v3298_v21 = vpop.f32.mrf.mxu1  ;;  %v3589_v22 = vpop.f32.mrf.mxu3  ;;  %v2793_v28 = vld [vmem:[#allocation2 + $0x98] sm:$0xf] }
 0x2e8   :  { %v3444_v57 = vadd.f32 %v3443_v39, %v3298_v21  ;;  %v4124_v46 = vshrl.u32 %v2793_v28, 16 }
 0x2ea   :  { %v3446_v34 = vpop.f32.mrf.mxu2  ;;  %v3616_v25 = vadd.f32 %v3589_v22, %v3444_v57  ;;  %v4126_v63 = vrot.slane %v4124_v46, 4 }
 0x2ec   :  { %4255 = vmatmul.bf16.gmra.mxu3 %v8131_v38  ;;  %v3782_v41 = vpop.f32.mrf.mxu0  ;;  %v7872_v38 = vadd.f32 %v3779_v30, %v3616_v25 }
 0x2ef   :  { %4391 = vmatmul.bf16.gmra.mxu0 %v7636_v50  ;;  %v3301_v43 = vpop.f32.mrf.mxu1  ;;  %v3592_v37 = vpop.f32.mrf.mxu3  ;;  %v4127_v50 = vshll.u32 %v2793_v28, 16 }
 0x2f0   :  { %v3447_v0 = vadd.f32 %v3446_v34, %v3301_v43 }
 0x2f1   :  { %v4129_v4 = vrot.slane %v4127_v50, 5 }
 0x2f2   :  { %v3448_v18 = vpop.f32.mrf.mxu2  ;;  %v3617_v1 = vadd.f32 %v3592_v37, %v3447_v0  ;;  %3929 = vmatmul.bf16.gmra.mxu1 %v3837_v6 }
 0x2f3   :  { %v4130_v6 = vor.u32 %v4129_v4, %v4126_v63  ;;  %v8135_v63 = vld [vmem:[#allocation9_spill] sm:$0xff] }
 0x2f4   :  { %v3784_v48 = vpop.f32.mrf.mxu0  ;;  %v7877_v15 = vadd.f32 %v3782_v41, %v3617_v1 }
 0x2f5   :  { %v4131_v52 = vrot.slane %v4130_v6, 4 }
 0x2f7   :  { %4082 = vmatmul.bf16.gmra.mxu2 %v7746_v47  ;;  %v3303_v7 = vpop.f32.mrf.mxu1  ;;  %v3594_v45 = vpop.f32.mrf.mxu3  ;;  %v7856_v47 = vadd.f32 %v3774_v27, %v3614_v51  ;;  %v4169_v51 = vunpack.c.l.b16 %v2793_v28  ;;  %v7867_v27 = vadd.f32 %v3777_v11, %v3615_v19 }
 0x2f8   :  { %v3449_v2 = vadd.f32 %v3448_v18, %v3303_v7 }
 0x2f9   :  { %v4171_v34 = vpack.c.b16 %v4169_v51, %v8134_v42  ;;  %v8137_v42 = vld [vmem:[#allocation5_spill] sm:$0xff] }
 0x2fa   :  { %v3451_v3 = vpop.f32.mrf.mxu2  ;;  %v3618_v59 = vadd.f32 %v3594_v45, %v3449_v2 }
 0x2fc   :  { %4260 = vmatmul.bf16.gmra.mxu3 %v7666_v54  ;;  %v8133_v54 = vunpack.c.l.b16 %v7670_v60  ;;  %v3787_v18 = vpop.f32.mrf.mxu0  ;;  %v7879_v45 = vadd.f32 %v3784_v48, %v3618_v59 }
 0x2fe   :  { %v3987_v12 = vpack.c.b16 %v3979_v61, %v8133_v54 }
 0x2ff   :  { %4396 = vmatmul.bf16.gmra.mxu0 %v7713_v31  ;;  %v3306_v58 = vpop.f32.mrf.mxu1  ;;  %v3597_v16 = vpop.f32.mrf.mxu3  ;;  %v4136_v31 = vsel %vm6171_vm9, %v4131_v52, %v4135_v5  ;;  %v8136_v5 = vld [vmem:[#allocation11_spill] sm:$0xff] }
 0x300   :  { %v3452_v20 = vadd.f32 %v3451_v3, %v3306_v58  ;;  %v4305_v22 = vunpack.c.l.b16 %v4136_v31 }
 0x302   :  { %v3453_v40 = vpop.f32.mrf.mxu2  ;;  %v3619_v8 = vadd.f32 %v3597_v16, %v3452_v20  ;;  %3934 = vmatmul.bf16.gmra.mxu1 %v8132_v56  ;;  %v4307_v60 = vpack.c.b16 %v4305_v22, %v7786_v55 }
 0x304   :  { %v3789_v2 = vpop.f32.mrf.mxu0  ;;  %v3809_v1 = vadd.f32 %v3787_v18, %v3619_v8 }
 0x307   :  { %4087 = vmatmul.bf16.gmra.mxu2 %v3987_v12  ;;  %v3308_v39 = vpop.f32.mrf.mxu1  ;;  %v3599_v23 = vpop.f32.mrf.mxu3 }
 0x308   :  { %v3454_v21 = vadd.f32 %v3453_v40, %v3308_v39 }
 0x30a   :  { %v3456_v57 = vpop.f32.mrf.mxu2  ;;  %v3620_v14 = vadd.f32 %v3599_v23, %v3454_v21 }
 0x30c   :  { %4265 = vmatmul.bf16.gmra.mxu3 %v4171_v34  ;;  %v3792_v24 = vpop.f32.mrf.mxu0  ;;  %v3810_v40 = vadd.f32 %v3789_v2, %v3620_v14 }
 0x30f   :  { %4401 = vmatmul.bf16.gmra.mxu0 %v4307_v60  ;;  %v3311_v13 = vpop.f32.mrf.mxu1  ;;  %v3602_v61 = vpop.f32.mrf.mxu3 }
 0x310   :  { %v3457_v43 = vadd.f32 %v3456_v57, %v3311_v13 }
 0x312   :  { %v3458_v37 = vpop.f32.mrf.mxu2  ;;  %v3621_v19 = vadd.f32 %v3602_v61, %v3457_v43  ;;  %3939 = vmatmul.bf16.gmra.mxu1 %v3839_v53 }
 0x314   :  { %v3794_v41 = vpop.f32.mrf.mxu0  ;;  %v3811_v31 = vadd.f32 %v3792_v24, %v3621_v19 }
 0x317   :  { %v3313_v11 = vpop.f32.mrf.mxu1  ;;  %v3604_v0 = vpop.f32.mrf.mxu3 }
 0x318   :  { %v3459_v28 = vadd.f32 %v3458_v37, %v3313_v11 }
 0x31a   :  { %v4053_v26 = vpop.f32.mrf.mxu2  ;;  %v3622_v46 = vadd.f32 %v3604_v0, %v3459_v28 }
 0x31c   :  { %v3812_v21 = vadd.f32 %v3794_v41, %v3622_v46  ;;  %v4367_v22 = vpop.f32.mrf.mxu0 }
 0x31f   :  { %v3905_v50 = vpop.f32.mrf.mxu1  ;;  %v4231_v7 = vpop.f32.mrf.mxu3 }
 0x320   :  { %v3945_v25 = vadd.f32 %v3905_v50, %v7807_v17  ;;  %v8138_v50 = vld [vmem:[#allocation8_spill] sm:$0xff] }
 0x322   :  { %v4093_v3 = vadd.f32 %v4053_v26, %v3945_v25  ;;  %4502 = vmatmul.bf16.vlgmr.msra.gmra.mxu1 %v8135_v63  ;;  %v4055_v44 = vpop.f32.mrf.mxu2 }
 0x324   :  { %v4271_v55 = vadd.f32 %v4231_v7, %v4093_v3 }
 0x326   :  { %v4407_v61 = vadd.f32 %v4367_v22, %v4271_v55 }
 0x327   :  { %v3907_v53 = vpop.f32.mrf.mxu1  ;;  %v4233_v4 = vpop.f32.mrf.mxu3 }
 0x328   :  { %v3946_v30 = vadd.f32 %v3907_v53, %v7814_v36 }
 0x32a   :  { %v4094_v6 = vadd.f32 %v4055_v44, %v3946_v30  ;;  %v4058_v16 = vpop.f32.mrf.mxu2 }
 0x32c   :  { %v4272_v58 = vadd.f32 %v4233_v4, %v4094_v6 }
 0x32f   :  { %v3910_v20 = vpop.f32.mrf.mxu1  ;;  %v4236_v59 = vpop.f32.mrf.mxu3 }
 0x330   :  { %v3947_v17 = vadd.f32 %v3910_v20, %v7825_v62  ;;  %v4578_v20 = vld [vmem:[%s8012_s2] sm:$0xff] }
 0x332   :  { %v4095_v52 = vadd.f32 %v4058_v16, %v3947_v17  ;;  %4507 = vmatmul.bf16.gmra.mxu1 %v8136_v5  ;;  %v4060_v54 = vpop.f32.mrf.mxu2  ;;  %v4579_v17 = vld [vmem:[%s8012_s2 + $0x8] sm:$0xff] }
 0x334   :  { %v4273_v56 = vadd.f32 %v4236_v59, %v4095_v52 }
 0x337   :  { %v3912_v12 = vpop.f32.mrf.mxu1  ;;  %v4238_v36 = vpop.f32.mrf.mxu3 }
 0x338   :  { %v3948_v8 = vadd.f32 %v3912_v12, %v7829_v33  ;;  %v4369_v33 = vpop.f32.mrf.mxu0 }
 0x339   :  { %v4408_v19 = vadd.f32 %v4369_v33, %v4272_v58 }
 0x33a   :  { %v4096_v51 = vadd.f32 %v4060_v54, %v3948_v8  ;;  %v4063_v14 = vpop.f32.mrf.mxu2 }
 0x33c   :  { %v4274_v39 = vadd.f32 %v4238_v36, %v4096_v51 }
 0x33f   :  { %v3915_v23 = vpop.f32.mrf.mxu1  ;;  %v4241_v34 = vpop.f32.mrf.mxu3 }
 0x340   :  { %v3949_v57 = vadd.f32 %v3915_v23, %v7838_v9  ;;  %v4372_v9 = vpop.f32.mrf.mxu0 }
 0x341   :  { %v4409_v18 = vadd.f32 %v4372_v9, %v4273_v56 }
 0x342   :  { %v4097_v62 = vadd.f32 %v4063_v14, %v3949_v57  ;;  %4512 = vmatmul.bf16.gmra.mxu1 %v8137_v42 }
 0x344   :  { %v4275_v60 = vadd.f32 %v4241_v34, %v4097_v62 }
 0x347   :  { %v3917_v48 = vpop.f32.mrf.mxu1  ;;  %v4243_v41 = vpop.f32.mrf.mxu3 }
 0x348   :  { %v7890_v13 = vadd.f32 %v3917_v48, %v7842_v10  ;;  %v4374_v28 = vpop.f32.mrf.mxu0 }
 0x349   :  { %v4410_v46 = vadd.f32 %v4374_v28, %v4274_v39  ;;  %v4580_v39 = vld [vmem:[%s8012_s2 + $0x10] sm:$0xff] }
 0x34f   :  { %v3920_v43 = vpop.f32.mrf.mxu1  ;;  %v4246_v14 = vpop.f32.mrf.mxu3 }
 0x350   :  { %v7893_v37 = vadd.f32 %v3920_v43, %v7851_v49  ;;  %v4377_v49 = vpop.f32.mrf.mxu0 }
 0x352   :  { %4517 = vmatmul.bf16.gmra.mxu1 %v7717_v35  ;;  %v4411_v35 = vadd.f32 %v4377_v49, %v4275_v60  ;;  %v4581_v60 = vld [vmem:[%s8012_s2 + $0x18] sm:$0xff] }
 0x357   :  { %v3922_v11 = vpop.f32.mrf.mxu1 }
 0x358   :  { %v7897_v0 = vadd.f32 %v3922_v11, %v7856_v47  ;;  %v8139_v47 = vld [vmem:[#allocation7_spill] sm:$0xff]  ;;  %v4379_v51 = vpop.f32.mrf.mxu0 }
 0x35f   :  { %v3925_v26 = vpop.f32.mrf.mxu1 }
 0x360   :  { %v7900_v10 = vadd.f32 %v3925_v26, %v7867_v27  ;;  %v4248_v26 = vpop.f32.mrf.mxu3 }
 0x362   :  { %4522 = vmatmul.bf16.gmra.mxu1 %v8138_v50 }
 0x367   :  { %v3927_v7 = vpop.f32.mrf.mxu1 }
 0x368   :  { %v7904_v25 = vadd.f32 %v3927_v7, %v7872_v38 }
 0x36f   :  { %v3930_v2 = vpop.f32.mrf.mxu1 }
 0x370   :  { %v7907_v3 = vadd.f32 %v3930_v2, %v7877_v15 }
 0x372   :  { %4527 = vmatmul.bf16.gmra.mxu1 %v8139_v47 }
 0x377   :  { %v3932_v63 = vpop.f32.mrf.mxu1 }
 0x378   :  { %v7911_v44 = vadd.f32 %v3932_v63, %v7879_v45  ;;  %v4559_v45 = vld [vmem:[%s8011_s6] sm:$0x1] }
 0x379   :  { %v4560_v24 = vunpack.c.l.bf16 %v4559_v45 }
 0x37b   :  { %v7926_v16 = vperm.slane %v4560_v24, 0 }
 0x37f   :  { %v3935_v27 = vpop.f32.mrf.mxu1 }
 0x380   :  { %v7913_v55 = vadd.f32 %v3935_v27, %v3809_v1 }
 0x382   :  { %4532 = vmatmul.bf16.gmra.mxu1 %v7686_v29 }
 0x387   :  { %v3937_v53 = vpop.f32.mrf.mxu1 }
 0x388   :  { %v7916_v4 = vadd.f32 %v3937_v53, %v3810_v40  ;;  %v4065_v40 = vpop.f32.mrf.mxu2 }
 0x38f   :  { %v3940_v38 = vpop.f32.mrf.mxu1 }
 0x390   :  { %v7918_v30 = vadd.f32 %v3940_v38, %v3811_v31 }
 0x392   :  { %4537 = vmatmul.bf16.gmra.mxu1 %v7782_v32 }
 0x397   :  { %v3942_v15 = vpop.f32.mrf.mxu1 }
 0x398   :  { %v7921_v6 = vadd.f32 %v3942_v15, %v3812_v21  ;;  %v4068_v21 = vpop.f32.mrf.mxu2 }
 0x399   :  { %v4099_v47 = vadd.f32 %v4068_v21, %v7893_v37  ;;  %v4585_v21 = vld [vmem:[%s8012_s2 + $0x38] sm:$0xff] }
 0x39b   :  { %v4277_v45 = vadd.f32 %v4246_v14, %v4099_v47  ;;  %v4587_v47 = vld [vmem:[%s8012_s2 + $0x48] sm:$0xff] }
 0x39f   :  { %v4503_v1 = vpop.f32.mrf.mxu1 }
 0x3a0   :  { %v4543_v58 = vadd.f32 %v4503_v1, %v4407_v61  ;;  %v4382_v61 = vpop.f32.mrf.mxu0  ;;  %v4070_v43 = vpop.f32.mrf.mxu2 }
 0x3a1   :  { %v4251_v1 = vpop.f32.mrf.mxu3 }
 0x3a2   :  { %v4562_v29 = vadd.f32 %v7926_v16, %v4543_v58 }
 0x3a4   :  { %v4594_v52 = vsub.f32 %v4562_v29, %v4578_v20  ;;  %v4100_v29 = vadd.f32 %v4070_v43, %v7897_v0  ;;  %v4586_v43 = vld [vmem:[%s8012_s2 + $0x40] sm:$0xff] }
 0x3a6   :  { %v4610_v54 = vmul.f32 %v4594_v52, %v4594_v52 }
 0x3a7   :  { %v4505_v59 = vpop.f32.mrf.mxu1 }
 0x3a8   :  { %v4544_v32 = vadd.f32 %v4505_v59, %v4408_v19  ;;  %v4098_v19 = vadd.f32 %v4065_v40, %v7890_v13  ;;  %v4384_v2 = vpop.f32.mrf.mxu0  ;;  %v4073_v53 = vpop.f32.mrf.mxu2  ;;  %v4413_v59 = vadd.f32 %v4382_v61, %v4277_v45 }
 0x3aa   :  { %v4563_v5 = vadd.f32 %v7926_v16, %v4544_v32  ;;  %v4276_v50 = vadd.f32 %v4243_v41, %v4098_v19 }
 0x3ac   :  { %v4595_v56 = vsub.f32 %v4563_v5, %v4579_v17  ;;  %v4412_v27 = vadd.f32 %v4379_v51, %v4276_v50  ;;  %v4584_v5 = vld [vmem:[%s8012_s2 + $0x30] sm:$0xff] }
 0x3ae   :  { %v4611_v12 = vmul.f32 %v4595_v56, %v4595_v56  ;;  %v4278_v56 = vadd.f32 %v4248_v26, %v4100_v29 }
 0x3af   :  { %v4508_v31 = vpop.f32.mrf.mxu1 }
 0x3b0   :  { %v4626_v8 = vadd.f32 %v4611_v12, %v4610_v54  ;;  %v4545_v36 = vadd.f32 %v4508_v31, %v4409_v18  ;;  %v4387_v37 = vpop.f32.mrf.mxu0  ;;  %v4075_v52 = vpop.f32.mrf.mxu2  ;;  %v4101_v31 = vadd.f32 %v4073_v53, %v7900_v10  ;;  %v4414_v0 = vadd.f32 %v4384_v2, %v4278_v56 }
 0x3b1   :  { %v4253_v12 = vpop.f32.mrf.mxu3 }
 0x3b2   :  { %v4564_v23 = vadd.f32 %v7926_v16, %v4545_v36 }
 0x3b4   :  { %v4596_v22 = vsub.f32 %v4564_v23, %v4580_v39 }
 0x3b6   :  { %v4612_v57 = vmul.f32 %v4596_v22, %v4596_v22  ;;  %v4279_v22 = vadd.f32 %v4251_v1, %v4101_v31 }
 0x3b7   :  { %v4510_v62 = vpop.f32.mrf.mxu1 }
 0x3b8   :  { %v4627_v42 = vadd.f32 %v4626_v8, %v4612_v57  ;;  %v4546_v34 = vadd.f32 %v4510_v62, %v4410_v46  ;;  %v4582_v46 = vld [vmem:[%s8012_s2 + $0x20] sm:$0xff]  ;;  %v4389_v23 = vpop.f32.mrf.mxu0  ;;  %v4078_v14 = vpop.f32.mrf.mxu2 }
 0x3b9   :  { %v4256_v10 = vpop.f32.mrf.mxu3  ;;  %v4103_v26 = vadd.f32 %v4078_v14, %v7907_v3 }
 0x3ba   :  { %v4565_v48 = vadd.f32 %v7926_v16, %v4546_v34 }
 0x3bc   :  { %v4597_v33 = vsub.f32 %v4565_v48, %v4581_v60  ;;  %v4415_v60 = vadd.f32 %v4387_v37, %v4279_v22 }
 0x3be   :  { %v4613_v9 = vmul.f32 %v4597_v33, %v4597_v33 }
 0x3bf   :  { %v4513_v11 = vpop.f32.mrf.mxu1 }
 0x3c0   :  { %v4628_v18 = vadd.f32 %v4627_v42, %v4613_v9  ;;  %v4547_v28 = vadd.f32 %v4513_v11, %v4411_v35  ;;  %v4583_v35 = vld [vmem:[%s8012_s2 + $0x28] sm:$0xff]  ;;  %v4102_v42 = vadd.f32 %v4075_v52, %v7904_v25  ;;  %v4392_v11 = vpop.f32.mrf.mxu0 }
 0x3c1   :  { %v4258_v2 = vpop.f32.mrf.mxu3 }
 0x3c2   :  { %v4566_v7 = vadd.f32 %v7926_v16, %v4547_v28  ;;  %v4280_v19 = vadd.f32 %v4253_v12, %v4102_v42  ;;  %v4080_v28 = vpop.f32.mrf.mxu2 }
 0x3c4   :  { %v4598_v49 = vsub.f32 %v4566_v7, %v4582_v46  ;;  %v4416_v25 = vadd.f32 %v4389_v23, %v4280_v19  ;;  %v4591_v19 = vld [vmem:[%s8012_s2 + $0x68] sm:$0xff] }
 0x3c6   :  { %v4614_v63 = vmul.f32 %v4598_v49, %v4598_v49 }
 0x3c7   :  { %v4515_v13 = vpop.f32.mrf.mxu1 }
 0x3c8   :  { %v4629_v38 = vadd.f32 %v4628_v18, %v4614_v63  ;;  %v4548_v15 = vadd.f32 %v4515_v13, %v4412_v27  ;;  %v4281_v63 = vadd.f32 %v4256_v10, %v4103_v26  ;;  %v4394_v13 = vpop.f32.mrf.mxu0 }
 0x3ca   :  { %v4567_v24 = vadd.f32 %v7926_v16, %v4548_v15  ;;  %v4083_v3 = vpop.f32.mrf.mxu2 }
 0x3cc   :  { %v4599_v58 = vsub.f32 %v4567_v24, %v4583_v35  ;;  %v4417_v35 = vadd.f32 %v4392_v11, %v4281_v63 }
 0x3ce   :  { %v4615_v20 = vmul.f32 %v4599_v58, %v4599_v58  ;;  %v4588_v58 = vld [vmem:[%s8012_s2 + $0x50] sm:$0xff] }
 0x3cf   :  { %v4518_v32 = vpop.f32.mrf.mxu1 }
 0x3d0   :  { %v4630_v40 = vadd.f32 %v4629_v38, %v4615_v20  ;;  %v4549_v17 = vadd.f32 %v4518_v32, %v4413_v59  ;;  %v4104_v38 = vadd.f32 %v4080_v28, %v7911_v44  ;;  %v4261_v59 = vpop.f32.mrf.mxu3  ;;  %v4105_v32 = vadd.f32 %v4083_v3, %v7913_v55  ;;  %v4397_v44 = vpop.f32.mrf.mxu0 }
 0x3d2   :  { %v4568_v41 = vadd.f32 %v7926_v16, %v4549_v17  ;;  %v4282_v29 = vadd.f32 %v4258_v2, %v4104_v38  ;;  %v4283_v12 = vadd.f32 %v4261_v59, %v4105_v32 }
 0x3d4   :  { %v4600_v54 = vsub.f32 %v4568_v41, %v4584_v5  ;;  %v4418_v17 = vadd.f32 %v4394_v13, %v4282_v29  ;;  %v4085_v41 = vpop.f32.mrf.mxu2  ;;  %v4419_v55 = vadd.f32 %v4397_v44, %v4283_v12 }
 0x3d6   :  { %v4616_v8 = vmul.f32 %v4600_v54, %v4600_v54  ;;  %v4589_v54 = vld [vmem:[%s8012_s2 + $0x58] sm:$0xff] }
 0x3d7   :  { %v4520_v36 = vpop.f32.mrf.mxu1 }
 0x3d8   :  { %v4631_v51 = vadd.f32 %v4630_v40, %v4616_v8  ;;  %v4550_v39 = vadd.f32 %v4520_v36, %v4414_v0  ;;  %v4263_v0 = vpop.f32.mrf.mxu3  ;;  %v4106_v36 = vadd.f32 %v4085_v41, %v7916_v4  ;;  %v4399_v22 = vpop.f32.mrf.mxu0 }
 0x3da   :  { %v4569_v57 = vadd.f32 %v7926_v16, %v4550_v39  ;;  %v4284_v14 = vadd.f32 %v4263_v0, %v4106_v36 }
 0x3dc   :  { %v4601_v62 = vsub.f32 %v4569_v57, %v4585_v21  ;;  %v4590_v57 = vld [vmem:[%s8012_s2 + $0x60] sm:$0xff]  ;;  %v4088_v42 = vpop.f32.mrf.mxu2 }
 0x3de   :  { %v4617_v34 = vmul.f32 %v4601_v62, %v4601_v62 }
 0x3df   :  { %v4523_v48 = vpop.f32.mrf.mxu1 }
 0x3e0   :  { %v4632_v61 = vadd.f32 %v4631_v51, %v4617_v34  ;;  %v4551_v33 = vadd.f32 %v4523_v48, %v4415_v60  ;;  %v4107_v60 = vadd.f32 %v4088_v42, %v7918_v30  ;;  %v4420_v48 = vadd.f32 %v4399_v22, %v4284_v14  ;;  %v4266_v4 = vpop.f32.mrf.mxu3 }
 0x3e2   :  { %v4570_v9 = vadd.f32 %v7926_v16, %v4551_v33 }
 0x3e4   :  { %v4602_v18 = vsub.f32 %v4570_v9, %v4586_v43  ;;  %v4285_v9 = vadd.f32 %v4266_v4, %v4107_v60  ;;  %v4090_v26 = vpop.f32.mrf.mxu2 }
 0x3e6   :  { %v4618_v46 = vmul.f32 %v4602_v18, %v4602_v18  ;;  %v4402_v18 = vpop.f32.mrf.mxu0 }
 0x3e7   :  { %v4525_v50 = vpop.f32.mrf.mxu1  ;;  %v4421_v30 = vadd.f32 %v4402_v18, %v4285_v9 }
 0x3e8   :  { %v4633_v7 = vadd.f32 %v4632_v61, %v4618_v46  ;;  %v4552_v49 = vadd.f32 %v4525_v50, %v4416_v25  ;;  %v4108_v46 = vadd.f32 %v4090_v26, %v7921_v6  ;;  %v4268_v2 = vpop.f32.mrf.mxu3 }
 0x3ea   :  { %v4571_v27 = vadd.f32 %v7926_v16, %v4552_v49  ;;  %v4286_v63 = vadd.f32 %v4268_v2, %v4108_v46 }
 0x3ec   :  { %v4603_v53 = vsub.f32 %v4571_v27, %v4587_v47  ;;  %v4592_v47 = vld [vmem:[%s8012_s2 + $0x70] sm:$0xff] }
 0x3ee   :  { %v4619_v15 = vmul.f32 %v4603_v53, %v4603_v53  ;;  %v4404_v13 = vpop.f32.mrf.mxu0 }
 0x3ef   :  { %v4528_v45 = vpop.f32.mrf.mxu1 }
 0x3f0   :  { %v4634_v24 = vadd.f32 %v4633_v7, %v4619_v15  ;;  %v4553_v1 = vadd.f32 %v4528_v45, %v4417_v35  ;;  %v4422_v15 = vadd.f32 %v4404_v13, %v4286_v63  ;;  %v4593_v45 = vld [vmem:[%s8012_s2 + $0x78] sm:$0xff] }
 0x3f2   :  { %v4572_v20 = vadd.f32 %v7926_v16, %v4553_v1 }
 0x3f4   :  { %v4604_v37 = vsub.f32 %v4572_v20, %v4588_v58 }
 0x3f6   :  { %v4620_v40 = vmul.f32 %v4604_v37, %v4604_v37 }
 0x3f7   :  { %v4530_v52 = vpop.f32.mrf.mxu1 }
 0x3f8   :  { %v4635_v5 = vadd.f32 %v4634_v24, %v4620_v40  ;;  %v4554_v56 = vadd.f32 %v4530_v52, %v4418_v17 }
 0x3fa   :  { %v4573_v31 = vadd.f32 %v7926_v16, %v4554_v56 }
 0x3fc   :  { %v4605_v8 = vsub.f32 %v4573_v31, %v4589_v54 }
 0x3fe   :  { %v4621_v51 = vmul.f32 %v4605_v8, %v4605_v8 }
 0x3ff   :  { %v4533_v39 = vpop.f32.mrf.mxu1 }
 0x400   :  { %v4636_v23 = vadd.f32 %v4635_v5, %v4621_v51  ;;  %v4555_v21 = vadd.f32 %v4533_v39, %v4419_v55 }
 0x402   :  { %v4574_v62 = vadd.f32 %v7926_v16, %v4555_v21 }
 0x404   :  { %v4606_v34 = vsub.f32 %v4574_v62, %v4590_v57 }
 0x406   :  { %v4622_v10 = vmul.f32 %v4606_v34, %v4606_v34 }
 0x407   :  { %v4535_v61 = vpop.f32.mrf.mxu1 }
 0x408   :  { %v4637_v33 = vadd.f32 %v4636_v23, %v4622_v10  ;;  %v4556_v43 = vadd.f32 %v4535_v61, %v4420_v48 }
 0x40a   :  { %v4575_v11 = vadd.f32 %v7926_v16, %v4556_v43 }
 0x40c   :  { %v4607_v28 = vsub.f32 %v4575_v11, %v4591_v19 }
 0x40e   :  { %v4623_v25 = vmul.f32 %v4607_v28, %v4607_v28 }
 0x40f   :  { %v4538_v50 = vpop.f32.mrf.mxu1 }
 0x410   :  { %v4557_v7 = vadd.f32 %v4538_v50, %v4421_v30  ;;  %v4638_v49 = vadd.f32 %v4637_v33, %v4623_v25 }
 0x412   :  { %v4576_v27 = vadd.f32 %v7926_v16, %v4557_v7 }
 0x414   :  { %v4608_v53 = vsub.f32 %v4576_v27, %v4592_v47 }
 0x416   :  { %v4624_v38 = vmul.f32 %v4608_v53, %v4608_v53 }
 0x417   :  { %v4540_v35 = vpop.f32.mrf.mxu1 }
 0x418   :  { %v4558_v3 = vadd.f32 %v4540_v35, %v4422_v15  ;;  %v4639_v6 = vadd.f32 %v4638_v49, %v4624_v38 }
 0x41a   :  { %v4577_v24 = vadd.f32 %v7926_v16, %v4558_v3 }
 0x41c   :  { %v4609_v1 = vsub.f32 %v4577_v24, %v4593_v45 }
 0x41e   :  { %v4625_v58 = vmul.f32 %v4609_v1, %v4609_v1 }
 0x420   :  { %v4640_v29 = vadd.f32 %v4639_v6, %v4625_v58 }
 0x422   :  { %4641 = vadd.xlane.f32.xlu1 %v4640_v29 }
 0x495   :  { %v4642_v20 = vpop.xlane.xlu1 %4641 }
 0x496   :  { %v4643_v59 = vrot.slane %v4642_v20, 4 }
 0x498   :  { %v4644_v37 = vadd.f32 %v4643_v59, %v4642_v20 }
 0x49a   :  { %v4645_v32 = vrot.slane %v4644_v37, 2 }
 0x49c   :  { %v4646_v40 = vadd.f32 %v4645_v32, %v4644_v37 }
 0x49e   :  { %v4647_v17 = vrot.slane %v4646_v40, 1 }
 0x4a0   :  { %v4648_v44 = vadd.f32 %v4647_v17, %v4646_v40 }
 0x4a2   :  { %5727 = vpush %v4648_v44 }
 0x4d3   :  { %s5728_s10 = spop %5727 }
 0x4d4   :  { %v4650_v52 = vstv %s5728_s10 }
 0x4d5   :  { %4651 = vst [vmem:[%s8013_s7] sm:$0xff] %v4650_v52 }

// kernel: _forward_impl.2
= control target key start
LH: loop header
LB: loop body
LE: loop exit
PB: predicated region body
PF: predicated region fallthrough
CT: control target
= control target key end

     0   :  { %s8632_s24 = smov 0   ;;  %s11928_s0 = inlined_call_operand.vmem [shape: bf16[2,16,16,128], index: 0, kind: input, shape index: {}]   ;;  %s11929_s1 = inlined_call_operand.vmem [shape: f32[2,16,16,1], index: 1, kind: input, shape index: {}]   ;;  %s11930_s2 = inlined_call_operand.vmem [shape: f32[2,16,16,128], index: 2, kind: input, shape index: {}]   ;;  %s11931_s3 = inlined_call_operand.vmem [shape: bf16[3,3,128,128], index: 3, kind: input, shape index: {}]   ;;  %s11932_s4 = inlined_call_operand.vmem [shape: bf16[1,128], index: 4, kind: input, shape index: {}]   ;;  %s11933_s5 = inlined_call_operand.vmem [shape: bf16[3,3,128,128], index: 5, kind: input, shape index: {}]   ;;  %s11934_s6 = inlined_call_operand.vmem [shape: bf16[1,128], index: 6, kind: input, shape index: {}]   ;;  %s11935_s7 = inlined_call_operand.vmem [shape: f32[2,8,128], index: 7, kind: output, shape index: {}]  }
   0x1 LB: > { %s7228_s25 = sadd.s32 4294967295, %s8588_s24   ;;  %p7232_p0 = scmp.ge.s32.totalorder %s8588_s24, 1  ;;  %s8588_s24 = sphi %s8632_s24, %s17_s24  }
   0x2   : > { %p257_p1 = scmp.lt.s32.totalorder %s8588_s24, 3 }
   0x4   : > { %p258_p2 = pnand %p7232_p0, %p257_p1 }
   0x6   : > { %261 = sbr.rel (%p258_p2) target bundleno = 1849 (0x739), region = 48 }
   0xb   : > { %p298_p3 = scmp.lt.s32.totalorder %s7228_s25, 1  ;;  %v8590_v0 = vmov 0   ;;  %vm894_vm0 = vsmask.f32 7938  ;;  %vm837_vm1 = vcmask 1040384   ;;  %v12034_v49 = vmov 0 }
   0xc   : > { %8546 = vset.pattern.permute.xlu2 %v8590_v0  ;;  %832 = vst [vmem:[#allocation2 + $0x8] sm:$0x1] %v8590_v0  ;;  %8545 = vset.pattern.permute.xlu1 %v8590_v0  ;;  %vm8657_vm2 = vmand %vm837_vm1, %vm894_vm0  ;;  %vm838_vm3 = vsmask.f32 256  ;;  %v843_v46 = vld [vmem:[#allocation2 + $0xc] sm:$0x1] }
   0xd   : > { %834 = vst [vmem:[#allocation2 + $0xcc] sm:$0xf] %v8590_v0  ;;  %8544 = vset.pattern.permute.xlu0 %v8590_v0  ;;  %s12371_s25 = smov (!%p298_p3, %s7228_s25), 1  ;;  %vm8683_vm4 = vmand %vm837_vm1, %vm838_vm3  ;;  %vm1273_vm5 = vcmask 1043456   ;;  %vm950_vm7 = vsmask.f32 4368 }
   0xe   : > { %835 = vst [vmem:[#allocation2 + $0xd0] sm:$0xf] %v8590_v0  ;;  %s8255_s26 = sshll.u32 %s12371_s25, 8  ;;  %v12035_v49 = vsel %vm8683_vm4, 4294967295, %v12034_v49  ;;  %v844_v51 = vsel %vm8683_vm4, 0, %v843_v46  ;;  %s8254_s23 = sshll.u32 %s12371_s25, 7  ;;  %vm8787_vm6 = vmand %vm1273_vm5, %vm894_vm0 }
   0xf   : > { %836 = vst [vmem:[#allocation2 + $0xd4] sm:$0x1] %v8590_v0  ;;  %s8648_s29 = scalar_lea.vmem %s11929_s1, %s8255_s26  ;;  %s8736_s10 = scalar_lea.vmem %s11928_s0, %s8254_s23  ;;  %vm1459_vm8 = vsmask.f32 3328  ;;  %vm1460_vm9 = vsmask.f32 7440  ;;  %vm8822_vm11 = vmor %vm838_vm3, %vm950_vm7 }
  0x10   : > { %830 = vst [vmem:[#allocation2] sm:$0xf] %v8590_v0  ;;  %v366_v1 = vld [vmem:[%s8648_s29 + $0x80] sm:$0xff]  ;;  %v364_v2 = vld [vmem:[%s8648_s29 + $0x70] sm:$0xff]  ;;  %v367_v7 = vld [vmem:[%s8648_s29 + $0x88] sm:$0xff]  ;;  %vm1894_vm12 = vcmask 1042432  }
  0x11   : > { %831 = vst [vmem:[#allocation2 + $0x4] sm:$0xf] %v8590_v0  ;;  %v350_v3 = vld [vmem:[%s8648_s29] sm:$0xff]  ;;  %v398_v4 = vpack.c.bf16 %v366_v1, %v366_v1  ;;  %v396_v5 = vpack.c.bf16 %v364_v2, %v364_v2  ;;  %v365_v8 = vld [vmem:[%s8648_s29 + $0x78] sm:$0xff]  ;;  %v351_v11 = vld [vmem:[%s8648_s29 + $0x8] sm:$0xff]  ;;  %v399_v13 = vpack.c.bf16 %v367_v7, %v367_v7  ;;  %vm1895_vm13 = vcmask 1046532  }
  0x12   : > { %v382_v6 = vpack.c.bf16 %v350_v3, %v350_v3  ;;  %v397_v14 = vpack.c.bf16 %v365_v8, %v365_v8  ;;  %v383_v15 = vpack.c.bf16 %v351_v11, %v351_v11  ;;  %v369_v16 = vld [vmem:[%s8648_s29 + $0x98] sm:$0xff]  ;;  %v368_v17 = vld [vmem:[%s8648_s29 + $0x90] sm:$0xff]  ;;  %v370_v22 = vld [vmem:[%s8648_s29 + $0xa0] sm:$0xff]  ;;  %12036 = vst [vmem:[#allocation3_spill] sm:$0xff] %v12035_v49 }
  0x13   : > { %560 = vperm.xlu1 %8545, %v398_v4   ;;  %542 = vperm.xlu0 %8544, %v396_v5   ;;  %v352_v18 = vld [vmem:[%s8648_s29 + $0x10] sm:$0xff]  ;;  %v401_v19 = vpack.c.bf16 %v369_v16, %v369_v16  ;;  %v400_v20 = vpack.c.bf16 %v368_v17, %v368_v17  ;;  %v353_v23 = vld [vmem:[%s8648_s29 + $0x18] sm:$0xff]  ;;  %v371_v24 = vld [vmem:[%s8648_s29 + $0xa8] sm:$0xff]  ;;  %v402_v25 = vpack.c.bf16 %v370_v22, %v370_v22 }
  0x14   : > { %416 = vperm.xlu2 %8546, %v382_v6   ;;  %v384_v21 = vpack.c.bf16 %v352_v18, %v352_v18  ;;  %v385_v26 = vpack.c.bf16 %v353_v23, %v353_v23  ;;  %v403_v27 = vpack.c.bf16 %v371_v24, %v371_v24  ;;  %v355_v28 = vld [vmem:[%s8648_s29 + $0x28] sm:$0xff]  ;;  %v354_v29 = vld [vmem:[%s8648_s29 + $0x20] sm:$0xff]  ;;  %v372_v30 = vld [vmem:[%s8648_s29 + $0xb0] sm:$0xff]  ;;  %845 = vst [vmem:[#allocation2 + $0xc] sm:$0x1] %v844_v51 }
  0x15   : > { %v387_v31 = vpack.c.bf16 %v355_v28, %v355_v28  ;;  %v386_v32 = vpack.c.bf16 %v354_v29, %v354_v29  ;;  %v404_v33 = vpack.c.bf16 %v372_v30, %v372_v30  ;;  %v356_v34 = vld [vmem:[%s8648_s29 + $0x30] sm:$0xff]  ;;  %v373_v35 = vld [vmem:[%s8648_s29 + $0xb8] sm:$0xff]  ;;  %v375_v40 = vld [vmem:[%s8648_s29 + $0xc8] sm:$0xff] }
  0x16   : > { %v947_v10 = vld [vmem:[#allocation2 + $0xd4] sm:$0x1]  ;;  %v357_v36 = vld [vmem:[%s8648_s29 + $0x38] sm:$0xff]  ;;  %v388_v37 = vpack.c.bf16 %v356_v34, %v356_v34  ;;  %v405_v38 = vpack.c.bf16 %v373_v35, %v373_v35  ;;  %v374_v41 = vld [vmem:[%s8648_s29 + $0xc0] sm:$0xff]  ;;  %v407_v43 = vpack.c.bf16 %v375_v40, %v375_v40 }
  0x17   : > { %v948_v12 = vsel %vm8657_vm2, 0, %v947_v10  ;;  %v389_v39 = vpack.c.bf16 %v357_v36, %v357_v36  ;;  %v358_v42 = vld [vmem:[%s8648_s29 + $0x40] sm:$0xff]  ;;  %v406_v44 = vpack.c.bf16 %v374_v41, %v374_v41  ;;  %v376_v47 = vld [vmem:[%s8648_s29 + $0xd0] sm:$0xff]  ;;  %v359_v48 = vld [vmem:[%s8648_s29 + $0x48] sm:$0xff] }
  0x18   : > { %949 = vst [vmem:[#allocation2 + $0xd4] sm:$0x1] %v948_v12  ;;  %v390_v45 = vpack.c.bf16 %v358_v42, %v358_v42  ;;  %v377_v50 = vld [vmem:[%s8648_s29 + $0xd8] sm:$0xff]  ;;  %v408_v52 = vpack.c.bf16 %v376_v47, %v376_v47  ;;  %v391_v53 = vpack.c.bf16 %v359_v48, %v359_v48  ;;  %v360_v56 = vld [vmem:[%s8648_s29 + $0x50] sm:$0xff]  ;;  %v378_v57 = vld [vmem:[%s8648_s29 + $0xe0] sm:$0xff] }
  0x19   : > { %v409_v54 = vpack.c.bf16 %v377_v50, %v377_v50  ;;  %v361_v55 = vld [vmem:[%s8648_s29 + $0x58] sm:$0xff]  ;;  %v392_v59 = vpack.c.bf16 %v360_v56, %v360_v56  ;;  %v410_v60 = vpack.c.bf16 %v378_v57, %v378_v57  ;;  %v362_v61 = vld [vmem:[%s8648_s29 + $0x60] sm:$0xff]  ;;  %v379_v62 = vld [vmem:[%s8648_s29 + $0xe8] sm:$0xff] }
  0x1a   : > { %v393_v58 = vpack.c.bf16 %v361_v55, %v361_v55  ;;  %v363_v63 = vld [vmem:[%s8648_s29 + $0x68] sm:$0xff]  ;;  %v8282_v0 = vld [vmem:[%s11931_s3 + $0x38] sm:$0xff]  ;;  %v394_v1 = vpack.c.bf16 %v362_v61, %v362_v61  ;;  %v411_v2 = vpack.c.bf16 %v379_v62, %v379_v62  ;;  %v8281_v4 = vld [vmem:[%s11931_s3 + $0x30] sm:$0xff] }
  0x1b   : > { %569 = vperm.xlu1 %8545, %v399_v13   ;;  %551 = vperm.xlu0 %8544, %v397_v14   ;;  %v395_v3 = vpack.c.bf16 %v363_v63, %v363_v63  ;;  %v381_v5 = vld [vmem:[%s8648_s29 + $0xf8] sm:$0xff]  ;;  %v380_v6 = vld [vmem:[%s8648_s29 + $0xf0] sm:$0xff]  ;;  %v8280_v10 = vld [vmem:[%s11931_s3 + $0x28] sm:$0xff] }
  0x1c   : > { %425 = vperm.xlu2 %8546, %v383_v15   ;;  %2371 = vmatpush.bf16.msra.mxu1 %v8282_v0  ;;  %v899_v7 = vld [vmem:[#allocation2 + $0x14] sm:$0x1]  ;;  %v8290_v8 = vld [vmem:[%s11931_s3 + $0x78] sm:$0xff]  ;;  %v413_v11 = vpack.c.bf16 %v381_v5, %v381_v5  ;;  %v412_v12 = vpack.c.bf16 %v380_v6, %v380_v6  ;;  %v8279_v15 = vld [vmem:[%s11931_s3 + $0x20] sm:$0xff] }
  0x1d   : > { %8524 = vmatpush.bf16.msra.mxu3 %v8282_v0  ;;  %v900_v13 = vsel %vm8657_vm2, 0, %v899_v7  ;;  %2154 = vmatpush.bf16.msra.mxu0 %v8290_v8  ;;  %v8289_v14 = vld [vmem:[%s11931_s3 + $0x70] sm:$0xff]  ;;  %v8288_v16 = vld [vmem:[%s11931_s3 + $0x68] sm:$0xff]  ;;  %v8278_v17 = vld [vmem:[%s11931_s3 + $0x18] sm:$0xff] }
  0x1e   : > { %901 = vst [vmem:[#allocation2 + $0x14] sm:$0x1] %v900_v13  ;;  %8516 = vmatpush.bf16.msra.mxu2 %v8290_v8  ;;  %v846_v18 = vld [vmem:[#allocation2 + $0x18] sm:$0x1]  ;;  %v8287_v22 = vld [vmem:[%s11931_s3 + $0x60] sm:$0xff]  ;;  %v8277_v23 = vld [vmem:[%s11931_s3 + $0x10] sm:$0xff] }
  0x1f   : > { %v864_v24 = vld [vmem:[#allocation2 + $0x60] sm:$0x1]  ;;  %v8286_v36 = vld [vmem:[%s11931_s3 + $0x58] sm:$0xff]  ;;  %v920_v41 = vld [vmem:[#allocation2 + $0x68] sm:$0x1]  ;;  %v12037_v8 = vmov 0 }
  0x20   : > { %2372 = vmatpush.bf16.msra.mxu1 %v8281_v4  ;;  %v921_v42 = vsel %vm8657_vm2, 0, %v920_v41  ;;  %v929_v48 = vld [vmem:[#allocation2 + $0x8c] sm:$0x1]  ;;  %v923_v55 = vld [vmem:[#allocation2 + $0x74] sm:$0x1]  ;;  %v8783_v6 = vld [vmem:[%s8736_s10 + $0x38] sm:$0xff]  }
  0x21   : > { %8525 = vmatpush.bf16.msra.mxu3 %v8281_v4  ;;  %2155 = vmatpush.bf16.msra.mxu0 %v8289_v14  ;;  %922 = vst [vmem:[#allocation2 + $0x68] sm:$0x1] %v921_v42  ;;  %v8284_v61 = vld [vmem:[%s11931_s3 + $0x48] sm:$0xff]  ;;  %v1388_v62 = vld [vmem:[#allocation2 + $0x4] sm:$0xf]  ;;  %v12038_v8 = vsel %vm8787_vm6, 4294967295, %v12037_v8  ;;  %vm8806_vm10 = vmor %vm1459_vm8, %vm1460_vm9  ;;  %v8468_v42 = vunpack.c.h.bf16 %v8783_v6 }
  0x22   : > { %8517 = vmatpush.bf16.msra.mxu2 %v8289_v14  ;;  %v1275_v0 = vld [vmem:[#allocation2 + $0xc] sm:$0xf]  ;;  %12039 = vst [vmem:[#allocation4_spill] sm:$0xff] %v12038_v8  ;;  %vm9381_vm14 = vmor %vm1894_vm12, %vm1895_vm13 }
  0x23   : > { %587 = vperm.xlu1 %8545, %v401_v19   ;;  %578 = vperm.xlu0 %8544, %v400_v20   ;;  %v847_v19 = vsel %vm8683_vm4, 0, %v846_v18  ;;  %v8591_v20 = vmov 839922192   ;;  %v8780_v5 = vld [vmem:[%s8736_s10 + $0x8] sm:$0xff]  }
  0x24   : > { %434 = vperm.xlu2 %8546, %v384_v21   ;;  %2373 = vmatpush.bf16.msra.mxu1 %v8280_v10  ;;  %v420_v21 = vunpack.c.l.s4 %v8591_v20  ;;  %848 = vst [vmem:[#allocation2 + $0x18] sm:$0x1] %v847_v19  ;;  %v8443_v18 = vunpack.c.l.bf16 %v8780_v5  ;;  %v8467_v19 = vunpack.c.l.bf16 %v8783_v6  ;;  %v926_v20 = vld [vmem:[#allocation2 + $0x80] sm:$0x1] }
  0x25   : > { %8526 = vmatpush.bf16.msra.mxu3 %v8280_v10  ;;  %2156 = vmatpush.bf16.msra.mxu0 %v8288_v16  ;;  %v1279_v41 = vld [vmem:[#allocation2 + $0x14] sm:$0x1] }
  0x26   : > { %8518 = vmatpush.bf16.msra.mxu2 %v8288_v16  ;;  %v8745_v29 = vunpack.c.0.s8 %v420_v21  ;;  %v8283_v16 = vld [vmem:[%s11931_s3 + $0x40] sm:$0xff]  ;;  %v870_v21 = vld [vmem:[#allocation2 + $0x78] sm:$0x1] }
  0x28   : > { %2374 = vmatpush.bf16.msra.mxu1 %v8279_v15 }
  0x29   : > { %8527 = vmatpush.bf16.msra.mxu3 %v8279_v15  ;;  %2157 = vmatpush.bf16.msra.mxu0 %v8287_v22  ;;  %v8796_v15 = vld [vmem:[%s8736_s10 + $0x40] sm:$0xff]  }
  0x2a   : > { %8519 = vmatpush.bf16.msra.mxu2 %v8287_v22 }
  0x2b   : > { %596 = vperm.xlu1 %8545, %v402_v25   ;;  %443 = vperm.xlu0 %8544, %v385_v26   ;;  %v840_v25 = vld [vmem:[#allocation2] sm:$0x1] }
  0x2c   : > { %605 = vperm.xlu2 %8546, %v403_v27   ;;  %2375 = vmatpush.bf16.msra.mxu1 %v8278_v17  ;;  %v8739_v26 = vld [vmem:[%s8736_s10] sm:$0xff]   ;;  %v865_v27 = vsel %vm8683_vm4, 0, %v864_v24  ;;  %v841_v28 = vsel %vm8683_vm4, 0, %v840_v25 }
  0x2d   : > { %8528 = vmatpush.bf16.msra.mxu3 %v8278_v17  ;;  %866 = vst [vmem:[#allocation2 + $0x60] sm:$0x1] %v865_v27  ;;  %2158 = vmatpush.bf16.msra.mxu0 %v8286_v36  ;;  %v8440_v47 = vunpack.c.h.bf16 %v8739_v26  ;;  %v12040_v27 = vmov 0 }
  0x2e   : > { %842 = vst [vmem:[#allocation2] sm:$0x1] %v841_v28  ;;  %8520 = vmatpush.bf16.msra.mxu2 %v8286_v36  ;;  %v12041_v27 = vsel %vm8806_vm10, 4294967295, %v12040_v27  ;;  %v871_v28 = vsel %vm8683_vm4, 0, %v870_v21  ;;  %v8471_v36 = vunpack.c.l.bf16 %v8796_v15  ;;  %v855_v21 = vld [vmem:[#allocation2 + $0x3c] sm:$0x1] }
  0x2f   : > { %12042 = vst [vmem:[#allocation5_spill] sm:$0xff] %v12041_v27 }
  0x30   : > { %2376 = vmatpush.bf16.msra.mxu1 %v8277_v23  ;;  %872 = vst [vmem:[#allocation2 + $0x78] sm:$0x1] %v871_v28  ;;  %v1282_v28 = vld [vmem:[#allocation2 + $0x18] sm:$0xf] }
  0x31   : > { %8529 = vmatpush.bf16.msra.mxu3 %v8277_v23 }
  0x33   : > { %461 = vperm.xlu1 %8545, %v387_v31   ;;  %452 = vperm.xlu0 %8544, %v386_v32   ;;  %v867_v31 = vld [vmem:[#allocation2 + $0x6c] sm:$0x1]  ;;  %v8439_v32 = vunpack.c.l.bf16 %v8739_v26  ;;  %v927_v26 = vsel %vm8657_vm2, 0, %v926_v20 }
  0x34   : > { %614 = vperm.xlu2 %8546, %v404_v33   ;;  %v868_v34 = vsel %vm8683_vm4, 0, %v867_v31  ;;  %928 = vst [vmem:[#allocation2 + $0x80] sm:$0x1] %v927_v26 }
  0x35   : > { %869 = vst [vmem:[#allocation2 + $0x6c] sm:$0x1] %v868_v34  ;;  %v1387_v50 = vld [vmem:[#allocation2] sm:$0xf] }
  0x36   : > { %v8257_v56 = vld [vmem:[#allocation2] sm:$0xff]  ;;  %v1463_v57 = vshrl.u32 %v1387_v50, 16  ;;  %v1466_v63 = vshll.u32 %v1387_v50, 16 }
  0x38   : > { %v1468_v7 = vrot.slane %v1466_v63, 5 }
  0x3b   : > { %470 = vperm.xlu1 %8545, %v388_v37   ;;  %623 = vperm.xlu0 %8544, %v405_v38   ;;  %v8276_v37 = vld [vmem:[%s11931_s3 + $0x8] sm:$0xff] }
  0x3c   : > { %479 = vperm.xlu2 %8546, %v389_v39   ;;  %v896_v38 = vld [vmem:[#allocation2 + $0x8] sm:$0x1]  ;;  %2377 = vmatpush.bf16.msra.mxu1 %v8276_v37 }
  0x3d   : > { %v897_v39 = vsel %vm8657_vm2, 0, %v896_v38  ;;  %8530 = vmatpush.bf16.msra.mxu3 %v8276_v37  ;;  %v8815_v37 = vld [vmem:[%s8736_s10 + $0x50] sm:$0xff]  }
  0x3e   : > { %898 = vst [vmem:[#allocation2 + $0x8] sm:$0x1] %v897_v39  ;;  %v876_v38 = vld [vmem:[#allocation2 + $0x90] sm:$0x1]  ;;  %v8818_v39 = vld [vmem:[%s8736_s10 + $0x48] sm:$0xff]  }
  0x43   : > { %641 = vperm.xlu1 %8545, %v407_v43   ;;  %632 = vperm.xlu0 %8544, %v406_v44   ;;  %v8285_v44 = vld [vmem:[%s11931_s3 + $0x50] sm:$0xff] }
  0x44   : > { %488 = vperm.xlu2 %8546, %v390_v45   ;;  %v8275_v45 = vld [vmem:[%s11931_s3] sm:$0xff]  ;;  %2159 = vmatpush.bf16.msra.mxu0 %v8285_v44 }
  0x45   : > { %2378 = vmatpush.bf16.msra.mxu1 %v8275_v45  ;;  %8531 = vmatpush.bf16.msra.mxu3 %v8275_v45  ;;  %v1423_v10 = vld [vmem:[#allocation2 + $0x8] sm:$0x1] }
  0x46   : > { %8521 = vmatpush.bf16.msra.mxu2 %v8285_v44 }
  0x48   : > { %2379 = vmatmul.bf16.vlgmr.msra.gmra.mxu1 %v8257_v56  ;;  %2160 = vmatpush.bf16.msra.mxu0 %v8284_v61 }
  0x4a   : > { %8522 = vmatpush.bf16.msra.mxu2 %v8284_v61 }
  0x4b   : > { %650 = vperm.xlu1 %8545, %v408_v52   ;;  %497 = vperm.xlu0 %8544, %v391_v53  }
  0x4c   : > { %659 = vperm.xlu2 %8546, %v409_v54   ;;  %v930_v54 = vsel %vm8657_vm2, 0, %v929_v48  ;;  %2161 = vmatpush.bf16.msra.mxu0 %v8283_v16 }
  0x4d   : > { %931 = vst [vmem:[#allocation2 + $0x8c] sm:$0x1] %v930_v54 }
  0x4e   : > { %8523 = vmatpush.bf16.msra.mxu2 %v8283_v16 }
  0x53   : > { %515 = vperm.xlu1 %8545, %v393_v58   ;;  %506 = vperm.xlu0 %8544, %v392_v59  }
  0x54   : > { %668 = vperm.xlu2 %8546, %v410_v60   ;;  %v924_v60 = vsel %vm8657_vm2, 0, %v923_v55 }
  0x55   : > { %925 = vst [vmem:[#allocation2 + $0x74] sm:$0x1] %v924_v60  ;;  %v8475_v60 = vunpack.c.l.bf16 %v8818_v39 }
  0x5b   : > { %524 = vperm.xlu1 %8545, %v394_v1   ;;  %677 = vperm.xlu0 %8544, %v411_v2   ;;  %v1465_v1 = vrot.slane %v1463_v57, 4  ;;  %v1472_v2 = vshll.u32 %v1388_v62, 16 }
  0x5c   : > { %533 = vperm.xlu2 %8546, %v395_v3  }
  0x5d   : > { %v1469_v22 = vor.u32 %v1468_v7, %v1465_v1  ;;  %v902_v1 = vld [vmem:[#allocation2 + $0x20] sm:$0x1] }
  0x5e   : > { %v903_v20 = vsel %vm8657_vm2, 0, %v902_v1 }
  0x5f   : > { %904 = vst [vmem:[#allocation2 + $0x20] sm:$0x1] %v903_v20 }
  0x63   : > { %695 = vperm.xlu1 %8545, %v413_v11   ;;  %686 = vperm.xlu0 %8544, %v412_v12   ;;  %v8791_v11 = vrot.slane %v1472_v2, 5  ;;  %v1476_v12 = vshrl.u32 %v1388_v62, 16 }
  0x65   : > { %v1478_v31 = vrot.slane %v1476_v12, 4  ;;  %v8850_v12 = vld [vmem:[%s8736_s10 + $0x18] sm:$0xff]  }
  0x67   : > { %v1479_v45 = vor.u32 %v1478_v31, %v8791_v11 }
  0x69   : > { %v1480_v54 = vrot.slane %v1479_v45, 4 }
  0x6e   : > { %v417_v30 = vpop.permute.xlu2 %416 }
  0x6f   : > { %v422_v33 = vperm.slane %v417_v30, %v8745_v29  ;;  %v1470_v30 = vrot.slane %v1469_v22, 4 }
  0x71   : > { %v734_v35 = vunpack.c.l.bf16 %v422_v33  ;;  %v1475_v44 = vsel %vm8806_vm10, %v1470_v30, %v8791_v11  ;;  %v8847_v11 = vld [vmem:[%s8736_s10 + $0x58] sm:$0xff]  }
  0x73   : > { %v766_v40 = vmul.f32 %v8439_v32, %v734_v35  ;;  %v1482_v32 = vshll.u32 %v1423_v10, 16 }
  0x75   : > { %v798_v43 = vpack.c.bf16 %v766_v40, %v766_v40  ;;  %v12043_v40 = vmov 0  ;;  %v1484_v50 = vrot.slane %v1482_v32, 5  ;;  %v8483_v32 = vunpack.c.l.bf16 %v8847_v11 }
  0x76   : > { %v426_v46 = vpop.permute.xlu2 %425  ;;  %v12044_v40 = vsel %vm8822_vm11, 4294967295, %v12043_v40 }
  0x77   : > { %v953_v51 = vshrl.u32 %v798_v43, 16  ;;  %v956_v52 = vshll.u32 %v798_v43, 16  ;;  %v431_v53 = vperm.slane %v426_v46, %v8745_v29  ;;  %12045 = vst [vmem:[#allocation6_spill] sm:$0xff] %v12044_v40  ;;  %v877_v43 = vsel %vm8683_vm4, 0, %v876_v38 }
  0x78   : > { %878 = vst [vmem:[#allocation2 + $0x90] sm:$0x1] %v877_v43  ;;  %v1485_v2 = vsel %vm8806_vm10, %v1480_v54, %v1484_v50  ;;  %v8452_v38 = vunpack.c.h.bf16 %v8850_v12  ;;  %v8879_v54 = vld [vmem:[%s8736_s10 + $0x10] sm:$0xff]  }
  0x79   : > { %v8771_v58 = vrot.slane %v953_v51, 7  ;;  %v735_v59 = vunpack.c.l.bf16 %v431_v53  ;;  %v8480_v51 = vunpack.c.h.bf16 %v8815_v37  ;;  %v8476_v53 = vunpack.c.h.bf16 %v8818_v39 }
  0x7b   : > { %v958_v3 = vor.u32 %v956_v52, %v8771_v58  ;;  %v767_v4 = vmul.f32 %v8440_v47, %v735_v59  ;;  %v959_v33 = vrot.slane %v8771_v58, 4  ;;  %v8472_v52 = vunpack.c.h.bf16 %v8796_v15 }
  0x7d   : > { %v1276_v13 = vsel %vm8787_vm6, %v958_v3, %v1275_v0  ;;  %v799_v14 = vpack.c.bf16 %v767_v4, %v767_v4  ;;  %v873_v0 = vld [vmem:[#allocation2 + $0x84] sm:$0x1]  ;;  %v2042_v3 = vunpack.c.l.b16 %v1475_v44  ;;  %v8444_v44 = vunpack.c.h.bf16 %v8780_v5 }
  0x7e   : > { %1277 = vst [vmem:[#allocation2 + $0xc] sm:$0xf] %v1276_v13  ;;  %v435_v17 = vpop.permute.xlu2 %434  ;;  %v2043_v13 = vunpack.c.l.b16 %v1485_v2 }
  0x7f   : > { %v961_v23 = vshrl.u32 %v799_v14, 16  ;;  %v964_v24 = vshll.u32 %v799_v14, 16  ;;  %v440_v25 = vperm.slane %v435_v17, %v8745_v29  ;;  %v908_v17 = vld [vmem:[#allocation2 + $0x38] sm:$0x1] }
  0x80   : > { %v2074_v26 = vpack.c.b16 %v2043_v13, %v2042_v3  ;;  %v905_v13 = vld [vmem:[#allocation2 + $0x2c] sm:$0x1] }
  0x81   : > { %v963_v34 = vrot.slane %v961_v23, 7  ;;  %v736_v35 = vunpack.c.l.bf16 %v440_v25  ;;  %v8861_v25 = vld [vmem:[%s8736_s10 + $0x20] sm:$0xff]  }
  0x82   : > { %2162 = vmatmul.bf16.vlgmr.msra.gmra.mxu0 %v2074_v26  ;;  %v8455_v45 = vunpack.c.l.bf16 %v8861_v25 }
  0x83   : > { %v966_v46 = vor.u32 %v964_v24, %v963_v34  ;;  %v968_v47 = vrot.slane %v963_v34, 4  ;;  %v768_v48 = vmul.f32 %v8443_v18, %v736_v35  ;;  %v874_v18 = vsel %vm8683_vm4, 0, %v873_v0 }
  0x84   : > { %v909_v24 = vsel %vm8657_vm2, 0, %v908_v17  ;;  %875 = vst [vmem:[#allocation2 + $0x84] sm:$0x1] %v874_v18 }
  0x85   : > { %v967_v55 = vsel %vm8822_vm11, %v959_v33, %v966_v46  ;;  %v1280_v56 = vsel %vm8683_vm4, %v968_v47, %v1279_v41  ;;  %v800_v57 = vpack.c.bf16 %v768_v48, %v768_v48  ;;  %v561_v58 = vpop.permute.xlu1 %560  ;;  %v543_v59 = vpop.permute.xlu0 %542  ;;  %910 = vst [vmem:[#allocation2 + $0x38] sm:$0x1] %v909_v24  ;;  %v856_v33 = vsel %vm8683_vm4, 0, %v855_v21 }
  0x86   : > { %1278 = vst [vmem:[#allocation2 + $0x10] sm:$0xf] %v967_v55  ;;  %v566_v61 = vperm.slane %v561_v58, %v8745_v29  ;;  %v548_v62 = vperm.slane %v543_v59, %v8745_v29  ;;  %v606_v63 = vpop.permute.xlu2 %605  ;;  %v8479_v41 = vunpack.c.l.bf16 %v8815_v37  ;;  %v906_v21 = vsel %vm8657_vm2, 0, %v905_v13 }
  0x87   : > { %1281 = vst [vmem:[#allocation2 + $0x14] sm:$0x1] %v1280_v56  ;;  %v970_v4 = vshrl.u32 %v800_v57, 16  ;;  %v973_v7 = vshll.u32 %v800_v57, 16  ;;  %v611_v10 = vperm.slane %v606_v63, %v8745_v29 }
  0x88   : > { %v750_v14 = vunpack.c.l.bf16 %v566_v61  ;;  %v748_v16 = vunpack.c.l.bf16 %v548_v62  ;;  %857 = vst [vmem:[#allocation2 + $0x3c] sm:$0x1] %v856_v33 }
  0x89   : > { %v8856_v22 = vrot.slane %v970_v4, 7  ;;  %v755_v23 = vunpack.c.l.bf16 %v611_v10  ;;  %v1324_v4 = vld [vmem:[#allocation2 + $0x60] sm:$0xf]  ;;  %907 = vst [vmem:[#allocation2 + $0x2c] sm:$0x1] %v906_v21 }
  0x8a   : > { %v782_v30 = vmul.f32 %v8471_v36, %v750_v14  ;;  %v780_v31 = vmul.f32 %v8467_v19, %v748_v16  ;;  %v8871_v36 = vld [vmem:[#allocation2 + $0xc] sm:$0xf]  ;;  %v8448_v14 = vunpack.c.h.bf16 %v8879_v54  ;;  %v1335_v21 = vld [vmem:[#allocation2 + $0x74] sm:$0x1] }
  0x8b   : > { %v975_v34 = vor.u32 %v973_v7, %v8856_v22  ;;  %v787_v35 = vmul.f32 %v8480_v51, %v755_v23  ;;  %v976_v46 = vrot.slane %v8856_v22, 4  ;;  %v1487_v56 = vshrl.u32 %v8871_v36, 16  ;;  %v1331_v16 = vld [vmem:[#allocation2 + $0x6c] sm:$0xf]  ;;  %v849_v23 = vld [vmem:[#allocation2 + $0x24] sm:$0x1] }
  0x8c   : > { %v814_v43 = vpack.c.bf16 %v782_v30, %v782_v30  ;;  %v812_v19 = vpack.c.bf16 %v780_v31, %v780_v31  ;;  %v1349_v31 = vld [vmem:[#allocation2 + $0x8c] sm:$0x1] }
  0x8d   : > { %v1283_v47 = vsel %vm8787_vm6, %v975_v34, %v1282_v28  ;;  %v819_v48 = vpack.c.bf16 %v787_v35, %v787_v35  ;;  %v570_v50 = vpop.permute.xlu1 %569  ;;  %v552_v51 = vpop.permute.xlu0 %551  ;;  %v8258_v55 = vld [vmem:[#allocation2 + $0xc] sm:$0xff] }
  0x8e   : > { %1284 = vst [vmem:[#allocation2 + $0x18] sm:$0xf] %v1283_v47  ;;  %v1089_v57 = vshrl.u32 %v814_v43, 16  ;;  %v1092_v58 = vshll.u32 %v814_v43, 16  ;;  %v1072_v59 = vshrl.u32 %v812_v19, 16  ;;  %v1075_v61 = vshll.u32 %v812_v19, 16  ;;  %v615_v62 = vpop.permute.xlu2 %614  ;;  %2384 = vmatmul.bf16.gmra.mxu1 %v8258_v55 }
  0x8f   : > { %v1131_v63 = vshrl.u32 %v819_v48, 16  ;;  %v1134_v0 = vshll.u32 %v819_v48, 16  ;;  %v575_v1 = vperm.slane %v570_v50, %v8745_v29  ;;  %v557_v2 = vperm.slane %v552_v51, %v8745_v29  ;;  %v938_v19 = vld [vmem:[#allocation2 + $0xb0] sm:$0x1] }
  0x90   : > { %v8884_v3 = vrot.slane %v1089_v57, 7  ;;  %v8886_v7 = vrot.slane %v1072_v59, 7  ;;  %v620_v10 = vperm.slane %v615_v62, %v8745_v29  ;;  %v850_v51 = vsel %vm8683_vm4, 0, %v849_v23  ;;  %v1328_v23 = vld [vmem:[#allocation2 + $0x68] sm:$0x1] }
  0x91   : > { %v1133_v17 = vrot.slane %v1131_v63, 7  ;;  %v751_v18 = vunpack.c.l.bf16 %v575_v1  ;;  %v749_v20 = vunpack.c.l.bf16 %v557_v2  ;;  %v8447_v57 = vunpack.c.l.bf16 %v8879_v54  ;;  %851 = vst [vmem:[#allocation2 + $0x24] sm:$0x1] %v850_v51 }
  0x92   : > { %v1094_v24 = vor.u32 %v1092_v58, %v8884_v3  ;;  %v1095_v26 = vrot.slane %v8884_v3, 4  ;;  %v1077_v28 = vor.u32 %v1075_v61, %v8886_v7  ;;  %v1078_v30 = vrot.slane %v8886_v7, 4 }
  0x93   : > { %v8896_v33 = vor.u32 %v1134_v0, %v1133_v17  ;;  %v1138_v34 = vrot.slane %v1133_v17, 4  ;;  %v783_v35 = vmul.f32 %v8472_v52, %v751_v18  ;;  %v781_v43 = vmul.f32 %v8468_v42, %v749_v20  ;;  %v8918_v0 = vld [vmem:[%s8736_s10 + $0x68] sm:$0xff]  }
  0x94   : > { %v1332_v47 = vsel %vm8787_vm6, %v1094_v24, %v1331_v16  ;;  %v1325_v48 = vsel %vm8787_vm6, %v1077_v28, %v1324_v4  ;;  %v756_v50 = vunpack.c.l.bf16 %v620_v10  ;;  %v939_v63 = vsel %vm8657_vm2, 0, %v938_v19 }
  0x95   : > { %1333 = vst [vmem:[#allocation2 + $0x6c] sm:$0xf] %v1332_v47  ;;  %v1350_v15 = vsel %vm8683_vm4, %v1138_v34, %v1349_v31  ;;  %v815_v52 = vpack.c.bf16 %v783_v35, %v783_v35  ;;  %v813_v55 = vpack.c.bf16 %v781_v43, %v781_v43  ;;  %v588_v6 = vpop.permute.xlu1 %587  ;;  %v579_v42 = vpop.permute.xlu0 %578  ;;  %v8492_v18 = vunpack.c.h.bf16 %v8918_v0 }
  0x96   : > { %1326 = vst [vmem:[#allocation2 + $0x60] sm:$0xf] %v1325_v48  ;;  %v788_v58 = vmul.f32 %v8483_v32, %v756_v50  ;;  %v593_v59 = vperm.slane %v588_v6, %v8745_v29  ;;  %v584_v61 = vperm.slane %v579_v42, %v8745_v29  ;;  %v480_v62 = vpop.permute.xlu2 %479  ;;  %v8451_v20 = vunpack.c.l.bf16 %v8850_v12  ;;  %v8314_v12 = vld [vmem:[%s11931_s3 + $0x138] sm:$0xff] }
  0x97   : > { %1351 = vst [vmem:[#allocation2 + $0x8c] sm:$0x1] %v1350_v15  ;;  %v1097_v1 = vshrl.u32 %v815_v52, 16  ;;  %v1100_v2 = vshll.u32 %v815_v52, 16  ;;  %v1080_v3 = vshrl.u32 %v813_v55, 16  ;;  %v1083_v4 = vshll.u32 %v813_v55, 16  ;;  %3004 = vmatpush.bf16.msrb.mxu0 %v8314_v12 }
  0x98   : > { %v820_v7 = vpack.c.bf16 %v788_v58, %v788_v58  ;;  %v753_v10 = vunpack.c.l.bf16 %v593_v59  ;;  %v752_v13 = vunpack.c.l.bf16 %v584_v61  ;;  %v485_v32 = vperm.slane %v480_v62, %v8745_v29  ;;  %940 = vst [vmem:[#allocation2 + $0xb0] sm:$0x1] %v939_v63  ;;  %v852_v58 = vld [vmem:[#allocation2 + $0x30] sm:$0x1] }
  0x99   : > { %v1099_v16 = vrot.slane %v1097_v1, 7  ;;  %v1082_v17 = vrot.slane %v1080_v3, 7 }
  0x9a   : > { %v1140_v24 = vshrl.u32 %v820_v7, 16  ;;  %v1143_v28 = vshll.u32 %v820_v7, 16  ;;  %v785_v31 = vmul.f32 %v8476_v53, %v753_v10  ;;  %v784_v34 = vmul.f32 %v8475_v60, %v752_v13  ;;  %v1352_v60 = vld [vmem:[#allocation2 + $0x90] sm:$0xf]  ;;  %v1342_v7 = vld [vmem:[#allocation2 + $0x80] sm:$0x1] }
  0x9b   : > { %v1102_v35 = vor.u32 %v1100_v2, %v1099_v16  ;;  %v1104_v43 = vrot.slane %v1099_v16, 4  ;;  %v1085_v19 = vor.u32 %v1083_v4, %v1082_v17  ;;  %v1087_v47 = vrot.slane %v1082_v17, 4  ;;  %v1338_v16 = vld [vmem:[#allocation2 + $0x78] sm:$0xf] }
  0x9c   : > { %v8927_v48 = vrot.slane %v1140_v24, 7  ;;  %v817_v50 = vpack.c.bf16 %v785_v31, %v785_v31  ;;  %v816_v51 = vpack.c.bf16 %v784_v34, %v784_v34  ;;  %v741_v15 = vunpack.c.l.bf16 %v485_v32 }
  0x9d   : > { %v1103_v52 = vsel %vm8822_vm11, %v1095_v26, %v1102_v35  ;;  %v1336_v55 = vsel %vm8683_vm4, %v1104_v43, %v1335_v21  ;;  %v1086_v53 = vsel %vm8822_vm11, %v1078_v30, %v1085_v19  ;;  %v1329_v39 = vsel %vm8683_vm4, %v1087_v47, %v1328_v23  ;;  %v597_v6 = vpop.permute.xlu1 %596  ;;  %v444_v42 = vpop.permute.xlu0 %443  ;;  %v932_v35 = vld [vmem:[#allocation2 + $0x98] sm:$0x1] }
  0x9e   : > { %1334 = vst [vmem:[#allocation2 + $0x70] sm:$0xf] %v1103_v52  ;;  %v1145_v59 = vor.u32 %v1143_v28, %v8927_v48  ;;  %v1146_v61 = vrot.slane %v8927_v48, 4  ;;  %v1114_v62 = vshrl.u32 %v817_v50, 16  ;;  %v1117_v26 = vshll.u32 %v817_v50, 16  ;;  %v489_v63 = vpop.permute.xlu2 %488 }
  0x9f   : > { %1337 = vst [vmem:[#allocation2 + $0x74] sm:$0x1] %v1336_v55  ;;  %v1106_v1 = vshrl.u32 %v816_v51, 16  ;;  %v1109_v2 = vshll.u32 %v816_v51, 16  ;;  %v773_v30 = vmul.f32 %v8452_v38, %v741_v15  ;;  %v602_v3 = vperm.slane %v597_v6, %v8745_v29 }
  0xa0   : > { %1327 = vst [vmem:[#allocation2 + $0x64] sm:$0xf] %v1086_v53  ;;  %v1353_v4 = vsel %vm8787_vm6, %v1145_v59, %v1352_v60  ;;  %v1116_v10 = vrot.slane %v1114_v62, 7  ;;  %v449_v13 = vperm.slane %v444_v42, %v8745_v29  ;;  %v494_v32 = vperm.slane %v489_v63, %v8745_v29 }
  0xa1   : > { %1330 = vst [vmem:[#allocation2 + $0x68] sm:$0x1] %v1329_v39  ;;  %v1108_v17 = vrot.slane %v1106_v1, 7  ;;  %v805_v21 = vpack.c.bf16 %v773_v30, %v773_v30  ;;  %v754_v23 = vunpack.c.l.bf16 %v602_v3  ;;  %v853_v38 = vsel %vm8683_vm4, 0, %v852_v58  ;;  %v885_v30 = vld [vmem:[#allocation2 + $0xb4] sm:$0x1] }
  0xa2   : > { %1354 = vst [vmem:[#allocation2 + $0x90] sm:$0xf] %v1353_v4  ;;  %v1119_v24 = vor.u32 %v1117_v26, %v1116_v10  ;;  %v1121_v28 = vrot.slane %v1116_v10, 4  ;;  %v737_v31 = vunpack.c.l.bf16 %v449_v13  ;;  %v742_v34 = vunpack.c.l.bf16 %v494_v32 }
  0xa3   : > { %v1111_v43 = vor.u32 %v1109_v2, %v1108_v17  ;;  %v1112_v19 = vrot.slane %v1108_v17, 4  ;;  %v1012_v47 = vshrl.u32 %v805_v21, 16  ;;  %v1015_v50 = vshll.u32 %v805_v21, 16  ;;  %854 = vst [vmem:[#allocation2 + $0x30] sm:$0x1] %v853_v38 }
  0xa4   : > { %v1343_v51 = vsel %vm8683_vm4, %v1121_v28, %v1342_v7  ;;  %v786_v15 = vmul.f32 %v8479_v41, %v754_v23  ;;  %v769_v52 = vmul.f32 %v8444_v44, %v737_v31  ;;  %v774_v55 = vmul.f32 %v8455_v45, %v742_v34  ;;  %v1300_v41 = vld [vmem:[#allocation2 + $0x38] sm:$0x1]  ;;  %v1345_v28 = vld [vmem:[#allocation2 + $0x84] sm:$0xf]  ;;  %v1286_v31 = vld [vmem:[#allocation2 + $0x20] sm:$0x1] }
  0xa5   : > { %1344 = vst [vmem:[#allocation2 + $0x80] sm:$0x1] %v1343_v51  ;;  %v1120_v53 = vsel %vm8822_vm11, %v1112_v19, %v1119_v24  ;;  %v1339_v39 = vsel %vm8787_vm6, %v1111_v43, %v1338_v16  ;;  %v1014_v60 = vrot.slane %v1012_v47, 7  ;;  %v462_v6 = vpop.permute.xlu1 %461  ;;  %v453_v42 = vpop.permute.xlu0 %452  ;;  %v933_v37 = vsel %vm8657_vm2, 0, %v932_v35 }
  0xa6   : > { %1340 = vst [vmem:[#allocation2 + $0x78] sm:$0xf] %v1339_v39  ;;  %v818_v5 = vpack.c.bf16 %v786_v15, %v786_v15  ;;  %v801_v44 = vpack.c.bf16 %v769_v52, %v769_v52  ;;  %v806_v58 = vpack.c.bf16 %v774_v55, %v774_v55  ;;  %v467_v45 = vperm.slane %v462_v6, %v8745_v29  ;;  %v660_v59 = vpop.permute.xlu2 %659  ;;  %v1303_v52 = vld [vmem:[#allocation2 + $0x3c] sm:$0xf] }
  0xa7   : > { %1341 = vst [vmem:[#allocation2 + $0x7c] sm:$0xf] %v1120_v53  ;;  %v8963_v62 = vor.u32 %v1015_v50, %v1014_v60  ;;  %v1019_v26 = vrot.slane %v1014_v60, 4  ;;  %v458_v63 = vperm.slane %v453_v42, %v8745_v29  ;;  %v665_v1 = vperm.slane %v660_v59, %v8745_v29  ;;  %v8265_v2 = vld [vmem:[#allocation2 + $0x60] sm:$0xff] }
  0xa8   : > { %v1123_v3 = vshrl.u32 %v818_v5, 16  ;;  %v1126_v4 = vshll.u32 %v818_v5, 16  ;;  %v978_v7 = vshrl.u32 %v801_v44, 16  ;;  %v981_v10 = vshll.u32 %v801_v44, 16  ;;  %934 = vst [vmem:[#allocation2 + $0x98] sm:$0x1] %v933_v37  ;;  %2419 = vmatmul.bf16.vlgmr.msra.gmra.mxu3 %v8265_v2 }
  0xa9   : > { %v1301_v13 = vsel %vm8683_vm4, %v1019_v26, %v1300_v41  ;;  %v1021_v32 = vshrl.u32 %v806_v58, 16  ;;  %v1024_v16 = vshll.u32 %v806_v58, 16  ;;  %v739_v17 = vunpack.c.l.bf16 %v467_v45  ;;  %v8298_v5 = vld [vmem:[%s11931_s3 + $0xb8] sm:$0xff] }
  0xaa   : > { %1302 = vst [vmem:[#allocation2 + $0x38] sm:$0x1] %v1301_v13  ;;  %v1125_v21 = vrot.slane %v1123_v3, 7  ;;  %v980_v23 = vrot.slane %v978_v7, 7  ;;  %v738_v38 = vunpack.c.l.bf16 %v458_v63  ;;  %v761_v24 = vunpack.c.l.bf16 %v665_v1  ;;  %2589 = vmatpush.bf16.msrb.mxu2 %v8298_v5 }
  0xab   : > { %v8969_v34 = vrot.slane %v1021_v32, 7  ;;  %v771_v35 = vmul.f32 %v8448_v14, %v739_v17  ;;  %v8484_v43 = vunpack.c.h.bf16 %v8847_v11  ;;  %v886_v19 = vsel %vm8683_vm4, 0, %v885_v30  ;;  %v8981_v11 = vld [vmem:[%s8736_s10 + $0x70] sm:$0xff]  }
  0xac   : > { %v1128_v47 = vor.u32 %v1126_v4, %v1125_v21  ;;  %v1129_v50 = vrot.slane %v1125_v21, 4  ;;  %v983_v51 = vor.u32 %v981_v10, %v980_v23  ;;  %v985_v15 = vrot.slane %v980_v23, 4  ;;  %887 = vst [vmem:[#allocation2 + $0xb4] sm:$0x1] %v886_v19  ;;  %v1293_v4 = vld [vmem:[#allocation2 + $0x2c] sm:$0x1] }
  0xad   : > { %v1026_v55 = vor.u32 %v1024_v16, %v8969_v34  ;;  %v1027_v53 = vrot.slane %v8969_v34, 4  ;;  %v803_v39 = vpack.c.bf16 %v771_v35, %v771_v35  ;;  %v770_v60 = vmul.f32 %v8447_v57, %v738_v38  ;;  %v471_v14 = vpop.permute.xlu1 %470  ;;  %v624_v6 = vpop.permute.xlu0 %623  ;;  %v1289_v23 = vld [vmem:[#allocation2 + $0x24] sm:$0xf]  ;;  %v1390_v35 = vld [vmem:[#allocation2 + $0x10] sm:$0xf] }
  0xae   : > { %v1137_v42 = vsel %vm8822_vm11, %v1129_v50, %v8896_v33  ;;  %v1346_v37 = vsel %vm8787_vm6, %v1128_v47, %v1345_v28  ;;  %v984_v41 = vsel %vm8822_vm11, %v976_v46, %v983_v51  ;;  %v1287_v54 = vsel %vm8683_vm4, %v985_v15, %v1286_v31  ;;  %v669_v57 = vpop.permute.xlu2 %668  ;;  %v8306_v33 = vld [vmem:[%s11931_s3 + $0xf8] sm:$0xff] }
  0xaf   : > { %1347 = vst [vmem:[#allocation2 + $0x84] sm:$0xf] %v1346_v37  ;;  %v1304_v44 = vsel %vm8787_vm6, %v1026_v55, %v1303_v52  ;;  %v995_v22 = vshrl.u32 %v803_v39, 16  ;;  %v998_v58 = vshll.u32 %v803_v39, 16  ;;  %v802_v45 = vpack.c.bf16 %v770_v60, %v770_v60  ;;  %2814 = vmatpush.bf16.msrb.mxu3 %v8306_v33  ;;  %v1424_v55 = vld [vmem:[#allocation2 + $0x14] sm:$0x1] }
  0xb0   : > { %1348 = vst [vmem:[#allocation2 + $0x88] sm:$0xf] %v1137_v42  ;;  %v793_v46 = vmul.f32 %v8492_v18, %v761_v24  ;;  %v476_v59 = vperm.slane %v471_v14, %v8745_v29  ;;  %v629_v26 = vperm.slane %v624_v6, %v8745_v29  ;;  %v8495_v63 = vunpack.c.l.bf16 %v8981_v11  ;;  %v1370_v60 = vld [vmem:[#allocation2 + $0xb0] sm:$0x1]  ;;  %v9024_v42 = vld [vmem:[#allocation2 + $0x60] sm:$0xf] }
  0xb1   : > { %1285 = vst [vmem:[#allocation2 + $0x1c] sm:$0xf] %v984_v41  ;;  %v997_v1 = vrot.slane %v995_v22, 7  ;;  %v987_v2 = vshrl.u32 %v802_v45, 16  ;;  %v990_v30 = vshll.u32 %v802_v45, 16  ;;  %v674_v3 = vperm.slane %v669_v57, %v8745_v29  ;;  %v8266_v37 = vld [vmem:[#allocation2 + $0x6c] sm:$0xff] }
  0xb2   : > { %1288 = vst [vmem:[#allocation2 + $0x20] sm:$0x1] %v1287_v54  ;;  %v825_v7 = vpack.c.bf16 %v793_v46, %v793_v46  ;;  %v740_v10 = vunpack.c.l.bf16 %v476_v59  ;;  %v757_v13 = vunpack.c.l.bf16 %v629_v26  ;;  %v9010_v18 = vrot.slane %v1487_v56, 4  ;;  %v1296_v46 = vld [vmem:[#allocation2 + $0x30] sm:$0xf] }
  0xb3   : > { %1305 = vst [vmem:[#allocation2 + $0x3c] sm:$0xf] %v1304_v44  ;;  %v1000_v32 = vor.u32 %v998_v58, %v997_v1  ;;  %v1002_v16 = vrot.slane %v997_v1, 4  ;;  %v989_v17 = vrot.slane %v987_v2, 7  ;;  %v762_v21 = vunpack.c.l.bf16 %v674_v3 }
  0xb4   : > { %v1182_v38 = vshrl.u32 %v825_v7, 16  ;;  %v1185_v24 = vshll.u32 %v825_v7, 16  ;;  %v772_v28 = vmul.f32 %v8451_v20, %v740_v10  ;;  %v789_v31 = vmul.f32 %v8484_v43, %v757_v13  ;;  %v1356_v10 = vld [vmem:[#allocation2 + $0x98] sm:$0x1]  ;;  %v1373_v13 = vld [vmem:[#allocation2 + $0xb4] sm:$0xf] }
  0xb5   : > { %v1294_v19 = vsel %vm8683_vm4, %v1002_v16, %v1293_v4  ;;  %v992_v47 = vor.u32 %v990_v30, %v989_v17  ;;  %v993_v50 = vrot.slane %v989_v17, 4  ;;  %v794_v56 = vmul.f32 %v8495_v63, %v762_v21 }
  0xb6   : > { %1295 = vst [vmem:[#allocation2 + $0x2c] sm:$0x1] %v1294_v19  ;;  %v1184_v51 = vrot.slane %v1182_v38, 7  ;;  %v804_v15 = vpack.c.bf16 %v772_v28, %v772_v28  ;;  %v821_v52 = vpack.c.bf16 %v789_v31, %v789_v31  ;;  %v1490_v39 = vshll.u32 %v8871_v36, 16 }
  0xb7   : > { %v1001_v20 = vsel %vm8822_vm11, %v993_v50, %v1000_v32  ;;  %v1290_v43 = vsel %vm8787_vm6, %v992_v47, %v1289_v23  ;;  %v826_v14 = vpack.c.bf16 %v794_v56, %v794_v56  ;;  %v1496_v6 = vshll.u32 %v1390_v35, 16  ;;  %v1431_v47 = vld [vmem:[#allocation2 + $0x68] sm:$0x1] }
  0xb8   : > { %1291 = vst [vmem:[#allocation2 + $0x24] sm:$0xf] %v1290_v43  ;;  %v9026_v41 = vor.u32 %v1185_v24, %v1184_v51  ;;  %v1189_v36 = vrot.slane %v1184_v51, 4  ;;  %v1004_v54 = vshrl.u32 %v804_v15, 16  ;;  %v1007_v57 = vshll.u32 %v804_v15, 16  ;;  %v8259_v5 = vld [vmem:[#allocation2 + $0x18] sm:$0xff]  ;;  %2424 = vmatmul.bf16.gmra.mxu3 %v8266_v37  ;;  %v642_v24 = vpop.permute.xlu1 %641 }
  0xb9   : > { %1292 = vst [vmem:[#allocation2 + $0x28] sm:$0xf] %v1001_v20  ;;  %v1148_v33 = vshrl.u32 %v821_v52, 16  ;;  %v1151_v44 = vshll.u32 %v821_v52, 16  ;;  %v1191_v22 = vshrl.u32 %v826_v14, 16  ;;  %v1194_v58 = vshll.u32 %v826_v14, 16  ;;  %2389 = vmatmul.bf16.gmra.mxu1 %v8259_v5 }
  0xba   : > { %v1371_v45 = vsel %vm8683_vm4, %v1189_v36, %v1370_v60  ;;  %v1006_v59 = vrot.slane %v1004_v54, 7  ;;  %v1492_v26 = vrot.slane %v1490_v39, 5  ;;  %v1498_v63 = vrot.slane %v1496_v6, 5  ;;  %v935_v15 = vld [vmem:[#allocation2 + $0xa4] sm:$0x1] }
  0xbb   : > { %1372 = vst [vmem:[#allocation2 + $0xb0] sm:$0x1] %v1371_v45  ;;  %v1150_v1 = vrot.slane %v1148_v33, 7  ;;  %v9030_v2 = vrot.slane %v1191_v22, 7  ;;  %v1500_v30 = vshrl.u32 %v1390_v35, 16  ;;  %v1506_v3 = vshll.u32 %v1424_v55, 16  ;;  %v633_v55 = vpop.permute.xlu0 %632 }
  0xbc   : > { %v1009_v4 = vor.u32 %v1007_v57, %v1006_v59  ;;  %v1010_v7 = vrot.slane %v1006_v59, 4  ;;  %v1493_v32 = vor.u32 %v1492_v26, %v9010_v18  ;;  %v1655_v16 = vshrl.u32 %v9024_v42, 16  ;;  %v1404_v18 = vld [vmem:[#allocation2 + $0x64] sm:$0xf]  ;;  %v879_v43 = vld [vmem:[#allocation2 + $0x9c] sm:$0x1] }
  0xbd   : > { %v1153_v17 = vor.u32 %v1151_v44, %v1150_v1  ;;  %v1155_v21 = vrot.slane %v1150_v1, 4  ;;  %v1196_v23 = vor.u32 %v1194_v58, %v9030_v2  ;;  %v1197_v38 = vrot.slane %v9030_v2, 4  ;;  %v8512_v52 = vld [vmem:[%s8736_s10 + $0x60] sm:$0xff]   ;;  %v917_v37 = vld [vmem:[#allocation2 + $0x5c] sm:$0x1]  ;;  %v534_v58 = vpop.permute.xlu2 %533  ;;  %v9057_v45 = vld [vmem:[%s8736_s10 + $0x30] sm:$0xff]  }
  0xbe   : > { %v1018_v28 = vsel %vm8822_vm11, %v1010_v7, %v8963_v62  ;;  %v1297_v31 = vsel %vm8787_vm6, %v1009_v4, %v1296_v46  ;;  %v1494_v35 = vrot.slane %v1493_v32, 4  ;;  %v1502_v19 = vrot.slane %v1500_v30, 4  ;;  %v882_v7 = vld [vmem:[#allocation2 + $0xa8] sm:$0x1] }
  0xbf   : > { %1298 = vst [vmem:[#allocation2 + $0x30] sm:$0xf] %v1297_v31  ;;  %v1154_v50 = vsel %vm8822_vm11, %v1146_v61, %v1153_v17  ;;  %v1357_v56 = vsel %vm8683_vm4, %v1155_v21, %v1356_v10  ;;  %v1374_v51 = vsel %vm8787_vm6, %v1196_v23, %v1373_v13  ;;  %v1508_v62 = vrot.slane %v1506_v3, 5  ;;  %v911_v17 = vld [vmem:[#allocation2 + $0x44] sm:$0x1] }
  0xc0   : > { %1299 = vst [vmem:[#allocation2 + $0x34] sm:$0xf] %v1018_v28  ;;  %v1499_v39 = vsel %vm8806_vm10, %v1494_v35, %v1498_v63  ;;  %v1503_v12 = vor.u32 %v1502_v19, %v1498_v63  ;;  %v1657_v20 = vrot.slane %v1655_v16, 4  ;;  %v1658_v48 = vshll.u32 %v9024_v42, 16  ;;  %v651_v31 = vpop.permute.xlu1 %650  ;;  %v8297_v35 = vld [vmem:[%s11931_s3 + $0xb0] sm:$0xff] }
  0xc1   : > { %1355 = vst [vmem:[#allocation2 + $0x94] sm:$0xf] %v1154_v50  ;;  %v2044_v61 = vunpack.c.l.b16 %v1499_v39  ;;  %v1664_v60 = vshll.u32 %v1404_v18, 16  ;;  %v1668_v14 = vshrl.u32 %v1404_v18, 16  ;;  %v1674_v6 = vshll.u32 %v1431_v47, 16  ;;  %v8305_v19 = vld [vmem:[%s11931_s3 + $0xf0] sm:$0xff]  ;;  %2590 = vmatpush.bf16.msrb.mxu2 %v8297_v35 }
  0xc2   : > { %1358 = vst [vmem:[#allocation2 + $0x98] sm:$0x1] %v1357_v56  ;;  %v1504_v36 = vrot.slane %v1503_v12, 4  ;;  %v1660_v54 = vrot.slane %v1658_v48, 5  ;;  %v936_v57 = vsel %vm8657_vm2, 0, %v935_v15  ;;  %v8488_v5 = vunpack.c.h.bf16 %v8512_v52  ;;  %v8267_v39 = vld [vmem:[#allocation2 + $0x78] sm:$0xff]  ;;  %2815 = vmatpush.bf16.msrb.mxu3 %v8305_v19 }
  0xc3   : > { %1375 = vst [vmem:[#allocation2 + $0xb4] sm:$0xf] %v1374_v51  ;;  %v1666_v33 = vrot.slane %v1664_v60, 5  ;;  %v1670_v44 = vrot.slane %v1668_v14, 4  ;;  %v1676_v22 = vrot.slane %v1674_v6, 5  ;;  %v647_v42 = vperm.slane %v642_v24, %v8745_v29 }
  0xc4   : > { %v1509_v46 = vsel %vm8806_vm10, %v1504_v36, %v1508_v62  ;;  %v1661_v59 = vor.u32 %v1660_v54, %v1657_v20  ;;  %937 = vst [vmem:[#allocation2 + $0xa4] sm:$0x1] %v936_v57  ;;  %v880_v26 = vsel %vm8683_vm4, 0, %v879_v43  ;;  %v8487_v63 = vunpack.c.l.bf16 %v8512_v52  ;;  %v9099_v35 = vld [vmem:[#allocation2 + $0x20] sm:$0x1] }
  0xc5   : > { %v2045_v1 = vunpack.c.l.b16 %v1509_v46  ;;  %v1671_v30 = vor.u32 %v1670_v44, %v1666_v33  ;;  %v759_v3 = vunpack.c.l.bf16 %v647_v42  ;;  %881 = vst [vmem:[#allocation2 + $0x9c] sm:$0x1] %v880_v26  ;;  %v638_v4 = vperm.slane %v633_v55, %v8745_v29  ;;  %v498_v55 = vpop.permute.xlu0 %497  ;;  %v9415_v40 = vld [vmem:[#allocation2 + $0xb0] sm:$0x1] }
  0xc6   : > { %v1662_v10 = vrot.slane %v1661_v59, 4  ;;  %v918_v13 = vsel %vm8657_vm2, 0, %v917_v37  ;;  %v8464_v32 = vunpack.c.h.bf16 %v9057_v45  ;;  %v539_v16 = vperm.slane %v534_v58, %v8745_v29 }
  0xc7   : > { %v9068_v21 = vpack.c.b16 %v2045_v1, %v2044_v61  ;;  %v1672_v23 = vrot.slane %v1671_v30, 4  ;;  %v791_v24 = vmul.f32 %v8488_v5, %v759_v3  ;;  %v758_v28 = vunpack.c.l.bf16 %v638_v4  ;;  %919 = vst [vmem:[#allocation2 + $0x5c] sm:$0x1] %v918_v13  ;;  %v1391_v61 = vld [vmem:[#allocation2 + $0x18] sm:$0xf]  ;;  %v8260_v4 = vld [vmem:[#allocation2 + $0x24] sm:$0xff] }
  0xc8   : > { %v1667_v18 = vsel %vm8806_vm10, %v1662_v10, %v1666_v33  ;;  %v747_v47 = vunpack.c.l.bf16 %v539_v16  ;;  %v883_v50 = vsel %vm8683_vm4, 0, %v882_v7  ;;  %v8491_v56 = vunpack.c.l.bf16 %v8918_v0  ;;  %2429 = vmatmul.bf16.gmra.mxu3 %v8267_v39  ;;  %v8313_v7 = vld [vmem:[%s11931_s3 + $0x130] sm:$0xff]  ;;  %v1405_v39 = vld [vmem:[#allocation2 + $0x6c] sm:$0xf] }
  0xc9   : > { %2167 = vmatmul.bf16.gmra.mxu0 %v9068_v21  ;;  %v1677_v51 = vsel %vm8806_vm10, %v1672_v23, %v1676_v22  ;;  %v2058_v62 = vunpack.c.l.b16 %v1667_v18  ;;  %v823_v15 = vpack.c.bf16 %v791_v24, %v791_v24  ;;  %v790_v52 = vmul.f32 %v8487_v63, %v758_v28  ;;  %884 = vst [vmem:[#allocation2 + $0xa8] sm:$0x1] %v883_v50  ;;  %v9092_v63 = vld [vmem:[#allocation2 + $0x1c] sm:$0xf] }
  0xca   : > { %v2059_v12 = vunpack.c.l.b16 %v1677_v51  ;;  %v779_v20 = vmul.f32 %v8464_v32, %v747_v47  ;;  %v656_v48 = vperm.slane %v651_v31, %v8745_v29  ;;  %v912_v43 = vsel %vm8657_vm2, 0, %v911_v17  ;;  %2394 = vmatmul.bf16.gmra.mxu1 %v8260_v4  ;;  %3005 = vmatpush.bf16.msrb.mxu0 %v8313_v7  ;;  %v914_v4 = vld [vmem:[#allocation2 + $0x50] sm:$0x1] }
  0xcb   : > { %v1165_v0 = vshrl.u32 %v823_v15, 16  ;;  %v1168_v60 = vshll.u32 %v823_v15, 16  ;;  %v822_v14 = vpack.c.bf16 %v790_v52, %v790_v52  ;;  %913 = vst [vmem:[#allocation2 + $0x44] sm:$0x1] %v912_v43  ;;  %v8456_v6 = vunpack.c.h.bf16 %v8861_v25  ;;  %v1363_v42 = vld [vmem:[#allocation2 + $0xa4] sm:$0x1] }
  0xcc   : > { %v9088_v37 = vpack.c.b16 %v2059_v12, %v2058_v62  ;;  %v811_v36 = vpack.c.bf16 %v779_v20, %v779_v20  ;;  %v760_v54 = vunpack.c.l.bf16 %v656_v48  ;;  %v503_v57 = vperm.slane %v498_v55, %v8745_v29  ;;  %v1359_v10 = vld [vmem:[#allocation2 + $0x9c] sm:$0xf] }
  0xcd   : > { %v1167_v5 = vrot.slane %v1165_v0, 7  ;;  %v1157_v33 = vshrl.u32 %v822_v14, 16  ;;  %v1160_v44 = vshll.u32 %v822_v14, 16  ;;  %v1511_v22 = vshrl.u32 %v1391_v61, 16 }
  0xce   : > { %12046 = vst [vmem:[#allocation7_spill] sm:$0xff] %v9088_v37  ;;  %2202 = vmatmul.bf16.vlgmr.msra.gmra.mxu2 %v9088_v37  ;;  %v1063_v58 = vshrl.u32 %v811_v36, 16  ;;  %v1066_v46 = vshll.u32 %v811_v36, 16  ;;  %v792_v59 = vmul.f32 %v8491_v56, %v760_v54  ;;  %v743_v26 = vunpack.c.l.bf16 %v503_v57  ;;  %v1321_v31 = vld [vmem:[#allocation2 + $0x5c] sm:$0x1]  ;;  %v9114_v54 = vpop.permute.xlu0 %506 }
  0xcf   : > { %v1170_v25 = vor.u32 %v1168_v60, %v1167_v5  ;;  %v1172_v1 = vrot.slane %v1167_v5, 4  ;;  %v1159_v30 = vrot.slane %v1157_v33, 7  ;;  %v1513_v3 = vrot.slane %v1511_v22, 4  ;;  %v1406_v36 = vld [vmem:[#allocation2 + $0x70] sm:$0xf] }
  0xd0   : > { %v1065_v13 = vrot.slane %v1063_v58, 7  ;;  %v824_v32 = vpack.c.bf16 %v792_v59, %v792_v59  ;;  %v775_v16 = vmul.f32 %v8456_v6, %v743_v26  ;;  %v1514_v17 = vshll.u32 %v1391_v61, 16  ;;  %v1366_v15 = vld [vmem:[#allocation2 + $0xa8] sm:$0xf]  ;;  %v9111_v61 = vpop.permute.xlu1 %515 }
  0xd1   : > { %v1364_v23 = vsel %vm8683_vm4, %v1172_v1, %v1363_v42  ;;  %v1162_v24 = vor.u32 %v1160_v44, %v1159_v30  ;;  %v1163_v28 = vrot.slane %v1159_v30, 4  ;;  %v1520_v19 = vshll.u32 %v9092_v63, 16 }
  0xd2   : > { %1365 = vst [vmem:[#allocation2 + $0xa4] sm:$0x1] %v1364_v23  ;;  %v9102_v18 = vor.u32 %v1066_v46, %v1065_v13  ;;  %v1070_v47 = vrot.slane %v1065_v13, 4  ;;  %v1174_v50 = vshrl.u32 %v824_v32, 16  ;;  %v1177_v56 = vshll.u32 %v824_v32, 16 }
  0xd3   : > { %v1171_v51 = vsel %vm8822_vm11, %v1163_v28, %v1170_v25  ;;  %v1360_v62 = vsel %vm8787_vm6, %v1162_v24, %v1359_v10  ;;  %v807_v52 = vpack.c.bf16 %v775_v16, %v775_v16  ;;  %v1516_v55 = vrot.slane %v1514_v17, 5  ;;  %v1432_v46 = vld [vmem:[#allocation2 + $0x74] sm:$0x1]  ;;  %v1307_v1 = vld [vmem:[#allocation2 + $0x44] sm:$0x1]  ;;  %v8505_v28 = vld [vmem:[%s8736_s10 + $0x28] sm:$0xff]  }
  0xd4   : > { %1361 = vst [vmem:[#allocation2 + $0x9c] sm:$0xf] %v1360_v62  ;;  %v1322_v12 = vsel %vm8683_vm4, %v1070_v47, %v1321_v31  ;;  %v1176_v20 = vrot.slane %v1174_v50, 7  ;;  %v1522_v48 = vrot.slane %v1520_v19, 5  ;;  %v1524_v43 = vshrl.u32 %v9092_v63, 16  ;;  %v8268_v16 = vld [vmem:[#allocation2 + $0x84] sm:$0xff] }
  0xd5   : > { %1362 = vst [vmem:[#allocation2 + $0xa0] sm:$0xf] %v1171_v51  ;;  %v1029_v0 = vshrl.u32 %v807_v52, 16  ;;  %v1032_v60 = vshll.u32 %v807_v52, 16  ;;  %v1517_v14 = vor.u32 %v1516_v55, %v1513_v3  ;;  %v1530_v6 = vshll.u32 %v9099_v35, 16 }
  0xd6   : > { %1323 = vst [vmem:[#allocation2 + $0x5c] sm:$0x1] %v1322_v12  ;;  %v1179_v57 = vor.u32 %v1177_v56, %v1176_v20  ;;  %v1180_v5 = vrot.slane %v1176_v20, 4  ;;  %v1526_v33 = vrot.slane %v1524_v43, 4  ;;  %v1679_v44 = vshrl.u32 %v1405_v39, 16 }
  0xd7   : > { %v1031_v22 = vrot.slane %v1029_v0, 7  ;;  %v1518_v42 = vrot.slane %v1517_v14, 4  ;;  %v1532_v58 = vrot.slane %v1530_v6, 5  ;;  %v1682_v59 = vshll.u32 %v1405_v39, 16  ;;  %v858_v56 = vld [vmem:[#allocation2 + $0x48] sm:$0x1] }
  0xd8   : > { %v1188_v26 = vsel %vm8822_vm11, %v1180_v5, %v9026_v41  ;;  %v1367_v25 = vsel %vm8787_vm6, %v1179_v57, %v1366_v15  ;;  %v1527_v30 = vor.u32 %v1526_v33, %v1522_v48  ;;  %v1681_v3 = vrot.slane %v1679_v44, 4  ;;  %v861_v51 = vld [vmem:[#allocation2 + $0x54] sm:$0x1]  ;;  %2434 = vmatmul.bf16.gmra.mxu3 %v8268_v16  ;;  %v941_v20 = vld [vmem:[#allocation2 + $0xbc] sm:$0x1]  ;;  %v525_v14 = vpop.permute.xlu1 %524  ;;  %v8296_v6 = vld [vmem:[%s11931_s3 + $0xa8] sm:$0xff]  ;;  %v678_v44 = vpop.permute.xlu0 %677 }
  0xd9   : > { %1368 = vst [vmem:[#allocation2 + $0xa8] sm:$0xf] %v1367_v25  ;;  %v1034_v7 = vor.u32 %v1032_v60, %v1031_v22  ;;  %v1036_v10 = vrot.slane %v1031_v22, 4  ;;  %v1523_v13 = vsel %vm8806_vm10, %v1518_v42, %v1522_v48  ;;  %v1684_v32 = vrot.slane %v1682_v59, 5  ;;  %v1393_v22 = vld [vmem:[#allocation2 + $0x24] sm:$0xf]  ;;  %2591 = vmatpush.bf16.msrb.mxu2 %v8296_v6 }
  0xda   : > { %1369 = vst [vmem:[#allocation2 + $0xac] sm:$0xf] %v1188_v26  ;;  %v1528_v17 = vrot.slane %v1527_v30, 4  ;;  %v2046_v23 = vunpack.c.l.b16 %v1523_v13  ;;  %v1688_v41 = vshll.u32 %v1406_v36, 16  ;;  %v1692_v24 = vshrl.u32 %v1406_v36, 16  ;;  %v8304_v36 = vld [vmem:[%s11931_s3 + $0xe8] sm:$0xff] }
  0xdb   : > { %v1035_v31 = vsel %vm8822_vm11, %v1027_v53, %v1034_v7  ;;  %v1308_v19 = vsel %vm8683_vm4, %v1036_v10, %v1307_v1  ;;  %v1685_v47 = vor.u32 %v1684_v32, %v1681_v3  ;;  %v1698_v50 = vshll.u32 %v1432_v46, 16  ;;  %2816 = vmatpush.bf16.msrb.mxu3 %v8304_v36  ;;  %v9158_v30 = vld [vmem:[#allocation2 + $0x28] sm:$0xf] }
  0xdc   : > { %1306 = vst [vmem:[#allocation2 + $0x40] sm:$0xf] %v1035_v31  ;;  %v1533_v62 = vsel %vm8806_vm10, %v1528_v17, %v1532_v58  ;;  %v1690_v15 = vrot.slane %v1688_v41, 5  ;;  %v1694_v52 = vrot.slane %v1692_v24, 4  ;;  %v915_v34 = vsel %vm8657_vm2, 0, %v914_v4 }
  0xdd   : > { %1309 = vst [vmem:[#allocation2 + $0x44] sm:$0x1] %v1308_v19  ;;  %v2047_v55 = vunpack.c.l.b16 %v1533_v62  ;;  %v1686_v53 = vrot.slane %v1685_v47, 4  ;;  %v1700_v39 = vrot.slane %v1698_v50, 5  ;;  %v8460_v12 = vunpack.c.h.bf16 %v8505_v28  ;;  %v9166_v19 = vld [vmem:[#allocation2 + $0x2c] sm:$0x1] }
  0xde   : > { %v1695_v48 = vor.u32 %v1694_v52, %v1690_v15  ;;  %916 = vst [vmem:[#allocation2 + $0x50] sm:$0x1] %v915_v34  ;;  %v521_v43 = vperm.slane %v9111_v61, %v8745_v29  ;;  %v859_v0 = vsel %vm8683_vm4, 0, %v858_v56  ;;  %v8459_v60 = vunpack.c.l.bf16 %v8505_v28  ;;  %v9168_v50 = vld [vmem:[#allocation2 + $0x30] sm:$0xff]  ;;  %v8312_v56 = vld [vmem:[%s11931_s3 + $0x128] sm:$0xff] }
  0xdf   : > { %v9144_v57 = vpack.c.b16 %v2047_v55, %v2046_v23  ;;  %v1691_v5 = vsel %vm8806_vm10, %v1686_v53, %v1690_v15  ;;  %860 = vst [vmem:[#allocation2 + $0x48] sm:$0x1] %v859_v0  ;;  %v512_v61 = vperm.slane %v9114_v54, %v8745_v29  ;;  %v862_v33 = vsel %vm8683_vm4, 0, %v861_v51  ;;  %2399 = vmatmul.bf16.gmra.mxu1 %v9168_v50 }
  0xe0   : > { %v1696_v42 = vrot.slane %v1695_v48, 4  ;;  %v2060_v58 = vunpack.c.l.b16 %v1691_v5  ;;  %v745_v46 = vunpack.c.l.bf16 %v521_v43  ;;  %863 = vst [vmem:[#allocation2 + $0x54] sm:$0x1] %v862_v33  ;;  %v8463_v59 = vunpack.c.l.bf16 %v9057_v45  ;;  %3006 = vmatpush.bf16.msrb.mxu0 %v8312_v56  ;;  %v8295_v56 = vld [vmem:[%s11931_s3 + $0xa0] sm:$0xff] }
  0xe1   : > { %2172 = vmatmul.bf16.gmra.mxu0 %v9144_v57  ;;  %v744_v26 = vunpack.c.l.bf16 %v512_v61  ;;  %v530_v25 = vperm.slane %v525_v14, %v8745_v29  ;;  %v942_v54 = vsel %vm8657_vm2, 0, %v941_v20  ;;  %v8496_v1 = vunpack.c.h.bf16 %v8981_v11  ;;  %2592 = vmatpush.bf16.msrb.mxu2 %v8295_v56  ;;  %v1409_v56 = vld [vmem:[#allocation2 + $0x84] sm:$0xf] }
  0xe2   : > { %v1701_v3 = vsel %vm8806_vm10, %v1696_v42, %v1700_v39  ;;  %v777_v4 = vmul.f32 %v8460_v12, %v745_v46  ;;  %943 = vst [vmem:[#allocation2 + $0xbc] sm:$0x1] %v942_v54  ;;  %v683_v45 = vperm.slane %v678_v44, %v8745_v29  ;;  %v1535_v7 = vshrl.u32 %v1393_v22, 16 }
  0xe3   : > { %v2061_v10 = vunpack.c.l.b16 %v1701_v3  ;;  %v776_v13 = vmul.f32 %v8459_v60, %v744_v26  ;;  %v746_v32 = vunpack.c.l.bf16 %v530_v25  ;;  %v1538_v16 = vshll.u32 %v1393_v22, 16  ;;  %v1407_v26 = vld [vmem:[#allocation2 + $0x78] sm:$0xf]  ;;  %v1408_v25 = vld [vmem:[#allocation2 + $0x7c] sm:$0xf] }
  0xe4   : > { %v809_v17 = vpack.c.bf16 %v777_v4, %v777_v4  ;;  %v763_v23 = vunpack.c.l.bf16 %v683_v45  ;;  %v1537_v41 = vrot.slane %v1535_v7, 4  ;;  %v1544_v24 = vshll.u32 %v9158_v30, 16  ;;  %v1433_v7 = vld [vmem:[#allocation2 + $0x80] sm:$0x1] }
  0xe5   : > { %v9164_v11 = vpack.c.b16 %v2061_v10, %v2060_v58  ;;  %v808_v28 = vpack.c.bf16 %v776_v13, %v776_v13  ;;  %v778_v31 = vmul.f32 %v8463_v59, %v746_v32  ;;  %v1540_v47 = vrot.slane %v1538_v16, 5  ;;  %v1314_v0 = vld [vmem:[#allocation2 + $0x50] sm:$0x1] }
  0xe6   : > { %v1046_v51 = vshrl.u32 %v809_v17, 16  ;;  %v1049_v62 = vshll.u32 %v809_v17, 16  ;;  %v795_v15 = vmul.f32 %v8496_v1, %v763_v23  ;;  %v1546_v52 = vrot.slane %v1544_v24, 5  ;;  %v1310_v33 = vld [vmem:[#allocation2 + $0x48] sm:$0xf] }
  0xe7   : > { %2207 = vmatmul.bf16.gmra.mxu2 %v9164_v11  ;;  %v1038_v34 = vshrl.u32 %v808_v28, 16  ;;  %v1041_v55 = vshll.u32 %v808_v28, 16  ;;  %v810_v53 = vpack.c.bf16 %v778_v31, %v778_v31  ;;  %v1541_v39 = vor.u32 %v1540_v47, %v1537_v41  ;;  %v1317_v1 = vld [vmem:[#allocation2 + $0x54] sm:$0xf]  ;;  %v944_v23 = vld [vmem:[#allocation2 + $0xc8] sm:$0x1] }
  0xe8   : > { %v1048_v12 = vrot.slane %v1046_v51, 7  ;;  %v827_v20 = vpack.c.bf16 %v795_v15, %v795_v15  ;;  %v1548_v48 = vshrl.u32 %v9158_v30, 16  ;;  %v1554_v43 = vshll.u32 %v9166_v19, 16  ;;  %v9186_v47 = vld [vmem:[%s8736_s10 + $0x78] sm:$0xff]   ;;  %v8303_v51 = vld [vmem:[%s11931_s3 + $0xe0] sm:$0xff]  ;;  %s11769_s10 = scalar_lea.vmem %s11930_s2, %s8255_s26  ;;  %s7239_s26 = sshll.u32 %s12371_s25, 3 }
  0xe9   : > { %v1040_v60 = vrot.slane %v1038_v34, 7  ;;  %v1055_v14 = vshrl.u32 %v810_v53, 16  ;;  %v1058_v6 = vshll.u32 %v810_v53, 16  ;;  %v1542_v36 = vrot.slane %v1541_v39, 4  ;;  %v1377_v17 = vld [vmem:[#allocation2 + $0xbc] sm:$0x1]  ;;  %2817 = vmatpush.bf16.msrb.mxu3 %v8303_v51  ;;  %s316_s8 = scalar_lea.vmem %s11935_s7, %s7239_s26 }
  0xea   : > { %v1051_v5 = vor.u32 %v1049_v62, %v1048_v12  ;;  %v1053_v61 = vrot.slane %v1048_v12, 4  ;;  %v1199_v44 = vshrl.u32 %v827_v20, 16  ;;  %v1202_v22 = vshll.u32 %v827_v20, 16  ;;  %v8311_v53 = vld [vmem:[%s11931_s3 + $0x120] sm:$0xff] }
  0xeb   : > { %v1043_v42 = vor.u32 %v1041_v55, %v1040_v60  ;;  %v1044_v58 = vrot.slane %v1040_v60, 4  ;;  %v1057_v46 = vrot.slane %v1055_v14, 7  ;;  %v1547_v59 = vsel %vm8806_vm10, %v1542_v36, %v1546_v52  ;;  %v8269_v55 = vld [vmem:[#allocation2 + $0x90] sm:$0xff]  ;;  %v687_v36 = vpop.permute.xlu0 %686  ;;  %3007 = vmatpush.bf16.msrb.mxu0 %v8311_v53 }
  0xec   : > { %v1315_v54 = vsel %vm8683_vm4, %v1053_v61, %v1314_v0  ;;  %v1201_v3 = vrot.slane %v1199_v44, 7  ;;  %v1550_v4 = vrot.slane %v1548_v48, 4  ;;  %v1556_v45 = vrot.slane %v1554_v43, 5  ;;  %v888_v48 = vld [vmem:[#allocation2 + $0xc0] sm:$0x1]  ;;  %2439 = vmatmul.bf16.gmra.mxu3 %v8269_v55 }
  0xed   : > { %1316 = vst [vmem:[#allocation2 + $0x50] sm:$0x1] %v1315_v54  ;;  %v1052_v10 = vsel %vm8822_vm11, %v1044_v58, %v1051_v5  ;;  %v1311_v13 = vsel %vm8787_vm6, %v1043_v42, %v1310_v33  ;;  %v1060_v32 = vor.u32 %v1058_v6, %v1057_v46  ;;  %v1061_v16 = vrot.slane %v1057_v46, 4  ;;  %v696_v6 = vpop.permute.xlu1 %695  ;;  %v1395_v33 = vld [vmem:[#allocation2 + $0x30] sm:$0xf] }
  0xee   : > { %1312 = vst [vmem:[#allocation2 + $0x48] sm:$0xf] %v1311_v13  ;;  %v1204_v41 = vor.u32 %v1202_v22, %v1201_v3  ;;  %v1206_v24 = vrot.slane %v1201_v3, 4  ;;  %v1551_v28 = vor.u32 %v1550_v4, %v1546_v52  ;;  %v2048_v31 = vunpack.c.l.b16 %v1547_v59  ;;  %v9213_v46 = vld [vmem:[#allocation2 + $0x34] sm:$0xf] }
  0xef   : > { %1313 = vst [vmem:[#allocation2 + $0x4c] sm:$0xf] %v1052_v10  ;;  %v1069_v62 = vsel %vm8822_vm11, %v1061_v16, %v9102_v18  ;;  %v1318_v15 = vsel %vm8787_vm6, %v1060_v32, %v1317_v1  ;;  %v1703_v52 = vshrl.u32 %v1407_v26, 16  ;;  %v1706_v34 = vshll.u32 %v1407_v26, 16  ;;  %v9224_v13 = vld [vmem:[#allocation2 + $0x38] sm:$0x1] }
  0xf0   : > { %1319 = vst [vmem:[#allocation2 + $0x54] sm:$0xf] %v1318_v15  ;;  %v1205_v39 = vsel %vm8822_vm11, %v1197_v38, %v1204_v41  ;;  %v1378_v12 = vsel %vm8683_vm4, %v1206_v24, %v1377_v17  ;;  %v1552_v18 = vrot.slane %v1551_v28, 4  ;;  %v1712_v20 = vshll.u32 %v1408_v25, 16 }
  0xf1   : > { %1320 = vst [vmem:[#allocation2 + $0x58] sm:$0xf] %v1069_v62  ;;  %v1705_v43 = vrot.slane %v1703_v52, 4  ;;  %v1708_v0 = vrot.slane %v1706_v34, 5  ;;  %v1716_v60 = vshrl.u32 %v1408_v25, 16  ;;  %v1722_v14 = vshll.u32 %v1433_v7, 16 }
  0xf2   : > { %1376 = vst [vmem:[#allocation2 + $0xb8] sm:$0xf] %v1205_v39  ;;  %v1557_v2 = vsel %vm8806_vm10, %v1552_v18, %v1556_v45  ;;  %v1714_v38 = vrot.slane %v1712_v20, 5  ;;  %v945_v5 = vsel %vm8657_vm2, 0, %v944_v23  ;;  %v8500_v61 = vunpack.c.h.bf16 %v9186_v47  ;;  %v9222_v45 = vld [vmem:[#allocation2 + $0x3c] sm:$0xff] }
  0xf3   : > { %1379 = vst [vmem:[#allocation2 + $0xbc] sm:$0x1] %v1378_v12  ;;  %v2049_v44 = vunpack.c.l.b16 %v1557_v2  ;;  %v1709_v22 = vor.u32 %v1708_v0, %v1705_v43  ;;  %v1718_v42 = vrot.slane %v1716_v60, 4  ;;  %v1724_v58 = vrot.slane %v1722_v14, 5  ;;  %2404 = vmatmul.bf16.gmra.mxu1 %v9222_v45  ;;  %v9235_v20 = vld [vmem:[#allocation2 + $0x88] sm:$0xf] }
  0xf4   : > { %946 = vst [vmem:[#allocation2 + $0xc8] sm:$0x1] %v945_v5  ;;  %v701_v59 = vperm.slane %v696_v6, %v8745_v29  ;;  %v889_v26 = vsel %vm8683_vm4, 0, %v888_v48  ;;  %v8499_v25 = vunpack.c.l.bf16 %v9186_v47  ;;  %v692_v9 = vperm.slane %v687_v36, %v8745_v29  ;;  %v1434_v36 = vld [vmem:[#allocation2 + $0x8c] sm:$0x1] }
  0xf5   : > { %v9220_v54 = vpack.c.b16 %v2049_v44, %v2048_v31  ;;  %v1710_v1 = vrot.slane %v1709_v22, 4  ;;  %v1719_v3 = vor.u32 %v1718_v42, %v1714_v38  ;;  %890 = vst [vmem:[#allocation2 + $0xc0] sm:$0x1] %v889_v26  ;;  %v1559_v4 = vshrl.u32 %v1395_v33, 16  ;;  %v8302_v26 = vld [vmem:[%s11931_s3 + $0xd8] sm:$0xff] }
  0xf6   : > { %v765_v7 = vunpack.c.l.bf16 %v701_v59  ;;  %v764_v10 = vunpack.c.l.bf16 %v692_v9  ;;  %v1562_v32 = vshll.u32 %v1395_v33, 16  ;;  %v1568_v16 = vshll.u32 %v9213_v46, 16  ;;  %v8294_v59 = vld [vmem:[%s11931_s3 + $0x98] sm:$0xff]  ;;  %2818 = vmatpush.bf16.msrb.mxu3 %v8302_v26 }
  0xf7   : > { %2177 = vmatmul.bf16.gmra.mxu0 %v9220_v54  ;;  %v1715_v29 = vsel %vm8806_vm10, %v1710_v1, %v1714_v38  ;;  %v1720_v17 = vrot.slane %v1719_v3, 4  ;;  %v1561_v23 = vrot.slane %v1559_v4, 4  ;;  %v1572_v41 = vshrl.u32 %v9213_v46, 16  ;;  %2593 = vmatpush.bf16.msrb.mxu2 %v8294_v59 }
  0xf8   : > { %v2062_v24 = vunpack.c.l.b16 %v1715_v29  ;;  %v797_v28 = vmul.f32 %v8500_v61, %v765_v7  ;;  %v796_v31 = vmul.f32 %v8499_v25, %v764_v10  ;;  %v1564_v47 = vrot.slane %v1562_v32, 5  ;;  %v8270_v7 = vld [vmem:[#allocation2 + $0x9c] sm:$0xff] }
  0xf9   : > { %v1725_v51 = vsel %vm8806_vm10, %v1720_v17, %v1724_v58  ;;  %v1570_v62 = vrot.slane %v1568_v16, 5  ;;  %v1574_v15 = vrot.slane %v1572_v41, 4  ;;  %v1578_v52 = vshll.u32 %v9224_v13, 16  ;;  %v8322_v10 = vld [vmem:[%s11931_s3 + $0x178] sm:$0xff] }
  0xfa   : > { %v2063_v34 = vunpack.c.l.b16 %v1725_v51  ;;  %v829_v55 = vpack.c.bf16 %v797_v28, %v797_v28  ;;  %v828_v53 = vpack.c.bf16 %v796_v31, %v796_v31  ;;  %v1565_v39 = vor.u32 %v1564_v47, %v1561_v23  ;;  %v1397_v23 = vld [vmem:[#allocation2 + $0x3c] sm:$0xf]  ;;  %3194 = vmatpush.bf16.msrb.mxu1 %v8322_v10  ;;  %v8321_v51 = vld [vmem:[%s11931_s3 + $0x170] sm:$0xff] }
  0xfb   : > { %v1575_v12 = vor.u32 %v1574_v15, %v1570_v62  ;;  %v1580_v18 = vrot.slane %v1578_v52, 5  ;;  %v1727_v48 = vshrl.u32 %v1409_v56, 16  ;;  %v1730_v43 = vshll.u32 %v1409_v56, 16  ;;  %v1384_v2 = vld [vmem:[#allocation2 + $0xc8] sm:$0x1]  ;;  %v8310_v41 = vld [vmem:[%s11931_s3 + $0x118] sm:$0xff] }
  0xfc   : > { %v9237_v0 = vpack.c.b16 %v2063_v34, %v2062_v24  ;;  %v1216_v60 = vshrl.u32 %v829_v55, 16  ;;  %v1219_v14 = vshll.u32 %v829_v55, 16  ;;  %v1208_v6 = vshrl.u32 %v828_v53, 16  ;;  %v1380_v25 = vld [vmem:[#allocation2 + $0xc0] sm:$0xf]  ;;  %2444 = vmatmul.bf16.gmra.mxu3 %v8270_v7  ;;  %3008 = vmatpush.bf16.msrb.mxu0 %v8310_v41 }
  0xfd   : > { %v1211_v38 = vshll.u32 %v828_v53, 16  ;;  %v1566_v5 = vrot.slane %v1565_v39, 4  ;;  %v1576_v61 = vrot.slane %v1575_v12, 4  ;;  %v1729_v33 = vrot.slane %v1727_v48, 4  ;;  %v9258_v56 = vld [vmem:[#allocation2 + $0x40] sm:$0xf] }
  0xfe   : > { %2212 = vmatmul.bf16.gmra.mxu2 %v9237_v0  ;;  %v1218_v44 = vrot.slane %v1216_v60, 7  ;;  %v1210_v22 = vrot.slane %v1208_v6, 7  ;;  %v1732_v42 = vrot.slane %v1730_v43, 5  ;;  %v1736_v58 = vshll.u32 %v9235_v20, 16  ;;  %v9269_v55 = vld [vmem:[#allocation2 + $0x44] sm:$0x1]  ;;  %3195 = vmatpush.bf16.msrb.mxu1 %v8321_v51 }
  0xff   : > { %v1571_v9 = vsel %vm8806_vm10, %v1566_v5, %v1570_v62  ;;  %v1581_v1 = vsel %vm8806_vm10, %v1576_v61, %v1580_v18  ;;  %v1740_v3 = vshrl.u32 %v9235_v20, 16  ;;  %v1746_v4 = vshll.u32 %v1434_v36, 16  ;;  %v9271_v12 = vld [vmem:[#allocation2 + $0x94] sm:$0xf]  ;;  %v9295_v41 = vld [vmem:[#allocation2 + $0x98] sm:$0x1] }
 0x100   : > { %v1221_v32 = vor.u32 %v1219_v14, %v1218_v44  ;;  %v1223_v16 = vrot.slane %v1218_v44, 4  ;;  %v1213_v29 = vor.u32 %v1211_v38, %v1210_v22  ;;  %v1214_v17 = vrot.slane %v1210_v22, 4  ;;  %v8320_v38 = vld [vmem:[%s11931_s3 + $0x168] sm:$0xff]  ;;  %v1411_v22 = vld [vmem:[#allocation2 + $0x90] sm:$0xf] }
 0x101   : > { %v2050_v24 = vunpack.c.l.b16 %v1571_v9  ;;  %v2051_v28 = vunpack.c.l.b16 %v1581_v1  ;;  %v1733_v31 = vor.u32 %v1732_v42, %v1729_v33  ;;  %v1738_v47 = vrot.slane %v1736_v58, 5  ;;  %v1399_v1 = vld [vmem:[#allocation2 + $0x48] sm:$0xf] }
 0x102   : > { %v1385_v62 = vsel %vm8683_vm4, %v1223_v16, %v1384_v2  ;;  %v1222_v15 = vsel %vm8822_vm11, %v1214_v17, %v1221_v32  ;;  %v1381_v52 = vsel %vm8787_vm6, %v1213_v29, %v1380_v25  ;;  %v1742_v34 = vrot.slane %v1740_v3, 4  ;;  %v9279_v2 = vld [vmem:[#allocation2 + $0x48] sm:$0xff]  ;;  %3196 = vmatpush.bf16.msrb.mxu1 %v8320_v38 }
 0x103   : > { %1386 = vst [vmem:[#allocation2 + $0xc8] sm:$0x1] %v1385_v62  ;;  %v1734_v53 = vrot.slane %v1733_v31, 4  ;;  %v1583_v39 = vshrl.u32 %v1397_v23, 16  ;;  %v1586_v48 = vshll.u32 %v1397_v23, 16  ;;  %v1592_v43 = vshll.u32 %v9258_v56, 16  ;;  %2409 = vmatmul.bf16.gmra.mxu1 %v9279_v2 }
 0x104   : > { %1382 = vst [vmem:[#allocation2 + $0xc0] sm:$0xf] %v1381_v52  ;;  %v1743_v18 = vor.u32 %v1742_v34, %v1738_v47  ;;  %v1596_v60 = vshrl.u32 %v9258_v56, 16  ;;  %v9275_v14 = vpack.c.b16 %v2051_v28, %v2050_v24  ;;  %v1748_v36 = vrot.slane %v1746_v4, 5  ;;  %v9293_v17 = vld [vmem:[#allocation2 + $0x4c] sm:$0xf] }
 0x105   : > { %1383 = vst [vmem:[#allocation2 + $0xc4] sm:$0xf] %v1222_v15  ;;  %v1739_v6 = vsel %vm8806_vm10, %v1734_v53, %v1738_v47  ;;  %v1585_v61 = vrot.slane %v1583_v39, 4  ;;  %v1588_v33 = vrot.slane %v1586_v48, 5  ;;  %v1594_v44 = vrot.slane %v1592_v43, 5  ;;  %v8293_v48 = vld [vmem:[%s11931_s3 + $0x90] sm:$0xff] }
 0x106   : > { %v1744_v5 = vrot.slane %v1743_v18, 4  ;;  %v1598_v42 = vrot.slane %v1596_v60, 4  ;;  %v1602_v58 = vshll.u32 %v9269_v55, 16  ;;  %v2064_v26 = vunpack.c.l.b16 %v1739_v6  ;;  %v8301_v43 = vld [vmem:[%s11931_s3 + $0xd0] sm:$0xff]  ;;  %v8319_v60 = vld [vmem:[%s11931_s3 + $0x160] sm:$0xff]  ;;  %v8271_v38 = vld [vmem:[#allocation2 + $0xa8] sm:$0xff]  ;;  %2594 = vmatpush.bf16.msrb.mxu2 %v8293_v48 }
 0x107   : > { %2182 = vmatmul.bf16.gmra.mxu0 %v9275_v14  ;;  %v1760_v25 = vshll.u32 %v9271_v12, 16  ;;  %v1764_v9 = vshrl.u32 %v9271_v12, 16  ;;  %v1751_v7 = vshrl.u32 %v1411_v22, 16  ;;  %v1754_v10 = vshll.u32 %v1411_v22, 16  ;;  %v1413_v22 = vld [vmem:[#allocation2 + $0x9c] sm:$0xf]  ;;  %2819 = vmatpush.bf16.msrb.mxu3 %v8301_v43 }
 0x108   : > { %v1749_v59 = vsel %vm8806_vm10, %v1744_v5, %v1748_v36  ;;  %v1599_v4 = vor.u32 %v1598_v42, %v1594_v44  ;;  %v1589_v32 = vor.u32 %v1588_v33, %v1585_v61  ;;  %v1607_v24 = vshrl.u32 %v1399_v1, 16  ;;  %v8309_v5 = vld [vmem:[%s11931_s3 + $0x110] sm:$0xff]  ;;  %3197 = vmatpush.bf16.msrb.mxu1 %v8319_v60 }
 0x109   : > { %v2065_v3 = vunpack.c.l.b16 %v1749_v59  ;;  %v9291_v16 = vrot.slane %v1760_v25, 5  ;;  %v1766_v29 = vrot.slane %v1764_v9, 4  ;;  %v1604_v31 = vrot.slane %v1602_v58, 5  ;;  %v9320_v25 = vld [vmem:[#allocation2 + $0xa0] sm:$0xf]  ;;  %v8318_v9 = vld [vmem:[%s11931_s3 + $0x158] sm:$0xff]  ;;  %3009 = vmatpush.bf16.msrb.mxu0 %v8309_v5 }
 0x10a   : > { %v1600_v23 = vrot.slane %v1599_v4, 4  ;;  %v1610_v47 = vshll.u32 %v1399_v1, 16  ;;  %v1753_v51 = vrot.slane %v1751_v7, 4  ;;  %v1756_v62 = vrot.slane %v1754_v10, 5 }
 0x10b   : > { %v9297_v28 = vpack.c.b16 %v2065_v3, %v2064_v26  ;;  %v1767_v15 = vor.u32 %v1766_v29, %v9291_v16  ;;  %v1616_v52 = vshll.u32 %v9293_v17, 16  ;;  %v1590_v34 = vrot.slane %v1589_v32, 4 }
 0x10c   : > { %v1605_v53 = vsel %vm8806_vm10, %v1600_v23, %v1604_v31  ;;  %v1770_v39 = vshll.u32 %v9295_v41, 16  ;;  %v1620_v18 = vshrl.u32 %v9293_v17, 16  ;;  %v1609_v6 = vrot.slane %v1607_v24, 4  ;;  %2449 = vmatmul.bf16.gmra.mxu3 %v8271_v38  ;;  %3198 = vmatpush.bf16.msrb.mxu1 %v8318_v9 }
 0x10d   : > { %v1612_v36 = vrot.slane %v1610_v47, 5  ;;  %v1595_v61 = vsel %vm8806_vm10, %v1590_v34, %v1594_v44  ;;  %v1618_v33 = vrot.slane %v1616_v52, 5  ;;  %v2053_v42 = vunpack.c.l.b16 %v1605_v53  ;;  %v9325_v44 = vld [vmem:[#allocation2 + $0x50] sm:$0x1] }
 0x10e   : > { %2217 = vmatmul.bf16.gmra.mxu2 %v9297_v28  ;;  %v1757_v58 = vor.u32 %v1756_v62, %v1753_v51  ;;  %v1768_v59 = vrot.slane %v1767_v15, 4  ;;  %v1622_v26 = vrot.slane %v1620_v18, 4  ;;  %v1772_v1 = vrot.slane %v1770_v39, 5  ;;  %v9333_v51 = vld [vmem:[#allocation2 + $0x54] sm:$0xff] }
 0x10f   : > { %v2052_v3 = vunpack.c.l.b16 %v1595_v61  ;;  %v1613_v4 = vor.u32 %v1612_v36, %v1609_v6  ;;  %v1775_v7 = vshrl.u32 %v1413_v22, 16  ;;  %v1778_v10 = vshll.u32 %v1413_v22, 16  ;;  %v8317_v62 = vld [vmem:[%s11931_s3 + $0x150] sm:$0xff]  ;;  %v8316_v36 = vld [vmem:[%s11931_s3 + $0x148] sm:$0xff]  ;;  %v9349_v61 = vld [vmem:[#allocation2 + $0x58] sm:$0xf] }
 0x110   : > { %v1623_v32 = vor.u32 %v1622_v26, %v1618_v33  ;;  %v1784_v29 = vshll.u32 %v9320_v25, 16  ;;  %v1788_v23 = vshrl.u32 %v9320_v25, 16  ;;  %v1758_v31 = vrot.slane %v1757_v58, 4  ;;  %v1401_v6 = vld [vmem:[#allocation2 + $0x54] sm:$0xf]  ;;  %3199 = vmatpush.bf16.msrb.mxu1 %v8317_v62 }
 0x111   : > { %v9329_v24 = vpack.c.b16 %v2053_v42, %v2052_v3  ;;  %v1773_v47 = vsel %vm8806_vm10, %v1768_v59, %v1772_v1  ;;  %v1626_v15 = vshll.u32 %v9325_v44, 16  ;;  %v1614_v34 = vrot.slane %v1613_v4, 4  ;;  %v9353_v22 = vld [vmem:[#allocation2 + $0xa4] sm:$0x1] }
 0x112   : > { %v1763_v52 = vsel %vm8806_vm10, %v1758_v31, %v9291_v16  ;;  %v1777_v53 = vrot.slane %v1775_v7, 4  ;;  %v1780_v39 = vrot.slane %v1778_v10, 5  ;;  %v2067_v18 = vunpack.c.l.b16 %v1773_v47  ;;  %v1442_v7 = vld [vmem:[#allocation2 + $0xc] sm:$0xe] }
 0x113   : > { %12047 = vst [vmem:[#allocation8_spill] sm:$0xff] %v9329_v24  ;;  %2414 = vmatmul.bf16.gmra.mxu1 %v9333_v51  ;;  %v1624_v48 = vrot.slane %v1623_v32, 4  ;;  %v9344_v43 = vrot.slane %v1784_v29, 5  ;;  %v1790_v60 = vrot.slane %v1788_v23, 4  ;;  %v2066_v38 = vunpack.c.l.b16 %v1763_v52  ;;  %v8292_v32 = vld [vmem:[%s11931_s3 + $0x88] sm:$0xff]  ;;  %v8315_v23 = vld [vmem:[%s11931_s3 + $0x140] sm:$0xff] }
 0x114   : > { %v1628_v5 = vrot.slane %v1626_v15, 5  ;;  %v1619_v16 = vsel %vm8806_vm10, %v1614_v34, %v1618_v33  ;;  %v1781_v42 = vor.u32 %v1780_v39, %v1777_v53  ;;  %v1631_v58 = vshrl.u32 %v1401_v6, 16  ;;  %3200 = vmatpush.bf16.msrb.mxu1 %v8316_v36  ;;  %v8300_v29 = vld [vmem:[%s11931_s3 + $0xc8] sm:$0xff]  ;;  %v9373_v15 = vld [vmem:[#allocation2 + $0xb4] sm:$0xff]  ;;  %2595 = vmatpush.bf16.msrb.mxu2 %v8292_v32  ;;  %v2163_v36 = vpop.f32.mrf.mxu0 }
 0x115   : > { %v9355_v59 = vpack.c.b16 %v2067_v18, %v2066_v38  ;;  %v1791_v9 = vor.u32 %v1790_v60, %v9344_v43  ;;  %v1634_v1 = vshll.u32 %v1401_v6, 16  ;;  %v1640_v3 = vshll.u32 %v9349_v61, 16  ;;  %12048 = vst [vmem:[#allocation9_spill] sm:$0xff] %v9373_v15  ;;  %v8308_v52 = vld [vmem:[%s11931_s3 + $0x108] sm:$0xff]  ;;  %v2380_v18 = vpop.f32.mrf.mxu1  ;;  %2820 = vmatpush.bf16.msrb.mxu3 %v8300_v29  ;;  %v8547_v60 = vld [vmem:[#allocation2 + $0x10] sm:$0xf] }
 0x116   : > { %v1629_v26 = vsel %vm8806_vm10, %v1624_v48, %v1628_v5  ;;  %v1644_v4 = vshrl.u32 %v9349_v61, 16  ;;  %v2054_v33 = vunpack.c.l.b16 %v1619_v16  ;;  %v1794_v10 = vshll.u32 %v9353_v22, 16  ;;  %v1415_v39 = vld [vmem:[#allocation2 + $0xa8] sm:$0xf]  ;;  %3010 = vmatpush.bf16.msrb.mxu0 %v8308_v52 }
 0x117   : > { %2187 = vmatmul.bf16.gmra.mxu0 %v9329_v24  ;;  %v2055_v31 = vunpack.c.l.b16 %v1629_v26  ;;  %v1782_v47 = vrot.slane %v1781_v42, 4  ;;  %v1633_v62 = vrot.slane %v1631_v58, 4  ;;  %v1792_v34 = vrot.slane %v1791_v9, 4  ;;  %v8548_v42 = vld [vmem:[#allocation2 + $0x14] sm:$0x1] }
 0x118   : > { %v1636_v53 = vrot.slane %v1634_v1, 5  ;;  %v7241_v48 = vrot.slane %v1442_v7, 9  ;;  %v1906_v6 = vrot.slane %v8547_v60, 5  ;;  %v1642_v38 = vrot.slane %v1640_v3, 5  ;;  %3201 = vmatpush.bf16.msrb.mxu1 %v8315_v23  ;;  %v9387_v1 = vld [vmem:[#allocation2 + $0xac] sm:$0xf] }
 0x119   : > { %v1646_v5 = vrot.slane %v1644_v4, 4  ;;  %v12049_v16 = vmov 0  ;;  %v1909_v58 = vrot.slane %v8548_v42, 5  ;;  %v9385_v26 = vadd.f32 %v2380_v18, %v2163_v36  ;;  %v8307_v7 = vld [vmem:[%s11931_s3 + $0x100] sm:$0xff]  ;;  %v9401_v60 = vld [vmem:[#allocation2 + $0x5c] sm:$0x1] }
 0x11a   : > { %v12050_v16 = vsel %vm9381_vm14, 4294967295, %v12049_v16  ;;  %v1796_v9 = vrot.slane %v1794_v10, 5  ;;  %v1907_v3 = vsel %vm9381_vm14, %v7241_v48, %v1906_v6  ;;  %v1908_v4 = vrot.slane %v1906_v6, 4  ;;  %3011 = vmatpush.bf16.msrb.mxu0 %v8307_v7  ;;  %v1443_v7 = vld [vmem:[#allocation2 + $0x18] sm:$0xe] }
 0x11b   : > { %12051 = vst [vmem:[#allocation10_spill] sm:$0xff] %v12050_v16  ;;  %v9394_v32 = vpack.c.b16 %v2055_v31, %v2054_v33  ;;  %v1787_v29 = vsel %vm8806_vm10, %v1782_v47, %v9344_v43  ;;  %v1799_v23 = vshrl.u32 %v1415_v39, 16  ;;  %v2479_v18 = vunpack.c.l.b16 %v1907_v3 }
 0x11c   : > { %2454 = vmatmul.bf16.gmra.mxu3 %v9373_v15  ;;  %v1797_v10 = vsel %vm8806_vm10, %v1792_v34, %v1796_v9  ;;  %v1637_v48 = vor.u32 %v1636_v53, %v1633_v62  ;;  %v1802_v6 = vshll.u32 %v1415_v39, 16  ;;  %v1910_v52 = vsel %vm9381_vm14, %v1908_v4, %v1909_v58 }
 0x11d   : > { %12052 = vst [vmem:[#allocation11_spill] sm:$0xff] %v9394_v32  ;;  %v1647_v36 = vor.u32 %v1646_v5, %v1642_v38  ;;  %v1808_v33 = vshll.u32 %v9387_v1, 16  ;;  %v1812_v31 = vshrl.u32 %v9387_v1, 16  ;;  %v2480_v42 = vunpack.c.l.b16 %v1910_v52 }
 0x11e   : > { %2222 = vmatmul.bf16.gmra.mxu2 %v9355_v59  ;;  %v1650_v43 = vshll.u32 %v9401_v60, 16  ;;  %v1801_v47 = vrot.slane %v1799_v23, 4  ;;  %v2068_v9 = vunpack.c.l.b16 %v1787_v29  ;;  %v2069_v62 = vunpack.c.l.b16 %v1797_v10 }
 0x11f   : > { %v9409_v34 = vpack.c.b16 %v2480_v42, %v2479_v18  ;;  %v1804_v53 = vrot.slane %v1802_v6, 5  ;;  %v1913_v39 = vrot.slane %v9092_v63, 5  ;;  %v1638_v58 = vrot.slane %v1637_v48, 4  ;;  %v8291_v48 = vld [vmem:[%s11931_s3 + $0x80] sm:$0xff] }
 0x120   : > { %v1648_v5 = vrot.slane %v1647_v36, 4  ;;  %v1810_v3 = vrot.slane %v1808_v33, 5  ;;  %v1814_v4 = vrot.slane %v1812_v31, 4  ;;  %v1652_v52 = vrot.slane %v1650_v43, 5  ;;  %v8299_v6 = vld [vmem:[%s11931_s3 + $0xc0] sm:$0xff]  ;;  %2596 = vmatpush.bf16.msrb.mxu2 %v8291_v48 }
 0x121   : > { %v9413_v49 = vpack.c.b16 %v2069_v62, %v2068_v9  ;;  %v1805_v23 = vor.u32 %v1804_v53, %v1801_v47  ;;  %v1915_v18 = vrot.slane %v1913_v39, 4  ;;  %v1643_v29 = vsel %vm8806_vm10, %v1638_v58, %v1642_v38  ;;  %v9432_v9 = vpop.f32.mrf.mxu1  ;;  %2821 = vmatpush.bf16.msrb.mxu3 %v8299_v6  ;;  %v9436_v58 = vld [vmem:[#allocation2 + $0xb8] sm:$0xf]  ;;  %v1417_v48 = vld [vmem:[#allocation2 + $0xb4] sm:$0xf] }
 0x122   : > { %v1653_v63 = vsel %vm8806_vm10, %v1648_v5, %v1652_v52  ;;  %v1815_v10 = vor.u32 %v1814_v4, %v1810_v3  ;;  %v7242_v36 = vrot.slane %v1443_v7, 9  ;;  %v1916_v33 = vrot.slane %v9099_v35, 5  ;;  %v8549_v4 = vld [vmem:[#allocation2 + $0xc] sm:$0xff] }
 0x123   : > { %3202 = vmatmul.bf16.vlgmr.msrb.gmra.mxu1 %v9409_v34  ;;  %12053 = vst [vmem:[#allocation12_spill] sm:$0xff] %v9413_v49  ;;  %v1818_v31 = vshll.u32 %v9415_v40, 16  ;;  %v2056_v42 = vunpack.c.l.b16 %v1643_v29  ;;  %v2057_v43 = vunpack.c.l.b16 %v1653_v63  ;;  %v1806_v47 = vrot.slane %v1805_v23, 4 }
 0x124   : > { %v1917_v62 = vsel %vm9381_vm14, %v1915_v18, %v1916_v33  ;;  %v1816_v53 = vrot.slane %v1815_v10, 4  ;;  %v1914_v35 = vsel %vm9381_vm14, %v7242_v36, %v1913_v39  ;;  %v1832_v18 = vshll.u32 %v9436_v58, 16 }
 0x125   : > { %v1820_v5 = vrot.slane %v1818_v31, 5  ;;  %v2482_v52 = vunpack.c.l.b16 %v1917_v62  ;;  %v9440_v7 = vpack.c.b16 %v2057_v43, %v2056_v42  ;;  %v1811_v23 = vsel %vm8806_vm10, %v1806_v47, %v1810_v3 }
 0x126   : > { %v1836_v63 = vshrl.u32 %v9436_v58, 16  ;;  %v2481_v10 = vunpack.c.l.b16 %v1914_v35  ;;  %v2070_v36 = vunpack.c.l.b16 %v1811_v23  ;;  %v1920_v31 = vrot.slane %v9158_v30, 5  ;;  %v8330_v30 = vld [vmem:[%s11931_s3 + $0x1b8] sm:$0xff] }
 0x127   : > { %2192 = vmatmul.bf16.gmra.mxu0 %v9394_v32  ;;  %12054 = vst [vmem:[#allocation13_spill] sm:$0xff] %v9440_v7  ;;  %v1821_v29 = vsel %vm8806_vm10, %v1816_v53, %v1820_v5  ;;  %v1823_v3 = vshrl.u32 %v1417_v48, 16  ;;  %v1826_v42 = vshll.u32 %v1417_v48, 16  ;;  %v1834_v43 = vrot.slane %v1832_v18, 5  ;;  %v1444_v53 = vld [vmem:[#allocation2 + $0x24] sm:$0xe]  ;;  %3419 = vmatpush.bf16.msra.mxu2 %v8330_v30 }
 0x128   : > { %v9449_v39 = vpack.c.b16 %v2482_v52, %v2481_v10  ;;  %v2071_v33 = vunpack.c.l.b16 %v1821_v29  ;;  %v1838_v47 = vrot.slane %v1836_v63, 4  ;;  %v9457_v5 = vld [vmem:[#allocation2 + $0xbc] sm:$0x1]  ;;  %v1922_v52 = vrot.slane %v1920_v31, 4 }
 0x129   : > { %v2385_v62 = vpop.f32.mrf.mxu1  ;;  %v1825_v10 = vrot.slane %v1823_v3, 4  ;;  %v1828_v23 = vrot.slane %v1826_v42, 5  ;;  %v8338_v18 = vld [vmem:[%s11931_s3 + $0x1f8] sm:$0xff]  ;;  %v7243_v63 = vrot.slane %v1444_v53, 9  ;;  %v1923_v48 = vrot.slane %v9166_v19, 5 }
 0x12a   : > { %v9455_v35 = vpack.c.b16 %v2071_v33, %v2070_v36  ;;  %v1839_v29 = vor.u32 %v1838_v47, %v1834_v43  ;;  %v8346_v36 = vld [vmem:[%s11931_s3 + $0x238] sm:$0xff]  ;;  %v1842_v33 = vshll.u32 %v9457_v5, 16  ;;  %3609 = vmatpush.bf16.msra.mxu3 %v8338_v18 }
 0x12b   : > { %v9430_v38 = vpop.f32.mrf.mxu3  ;;  %v1924_v42 = vsel %vm9381_vm14, %v1922_v52, %v1923_v48  ;;  %v1829_v47 = vor.u32 %v1828_v23, %v1825_v10  ;;  %3799 = vmatpush.bf16.msra.mxu0 %v8346_v36  ;;  %v1921_v53 = vsel %vm9381_vm14, %v7243_v63, %v1920_v31  ;;  %v1927_v48 = vrot.slane %v9213_v46, 5 }
 0x12c   : > { %2822 = vmatmul.bf16.vlgmr.msrb.gmra.mxu3 %v8549_v4  ;;  %12056 = vst [vmem:[#allocation15_spill] sm:$0xff] %v9455_v35  ;;  %v9459_v4 = vpop.f32.mrf.mxu0  ;;  %v1840_v8 = vrot.slane %v1839_v29, 4  ;;  %v1844_v19 = vrot.slane %v1842_v33, 5  ;;  %v2483_v18 = vunpack.c.l.b16 %v1921_v53 }
 0x12e   : > { %2227 = vmatmul.bf16.gmra.mxu2 %v9413_v49  ;;  %v1830_v49 = vrot.slane %v1829_v47, 4  ;;  %v1845_v30 = vsel %vm8806_vm10, %v1840_v8, %v1844_v19  ;;  %v8551_v8 = vld [vmem:[#allocation2 + $0x4] sm:$0xf] }
 0x12f   : > { %v2073_v63 = vunpack.c.l.b16 %v1845_v30  ;;  %v1899_v33 = vrot.slane %v8551_v8, 5  ;;  %v8552_v30 = vld [vmem:[#allocation2 + $0x8] sm:$0x1] }
 0x130   : > { %v1835_v10 = vsel %vm8806_vm10, %v1830_v49, %v1834_v43  ;;  %v1441_v49 = vld [vmem:[#allocation2] sm:$0xe]  ;;  %v1929_v43 = vrot.slane %v1927_v48, 4  ;;  %v1902_v46 = vrot.slane %v8552_v30, 5 }
 0x131   : > { %v9482_v15 = vpop.f32.mrf.mxu1  ;;  %v2072_v36 = vunpack.c.l.b16 %v1835_v10  ;;  %v7240_v53 = vrot.slane %v1441_v49, 9  ;;  %v1901_v19 = vrot.slane %v1899_v33, 4 }
 0x133   : > { %v9451_v6 = vpop.f32.mrf.mxu3  ;;  %3207 = vmatmul.bf16.gmra.mxu1 %v9449_v39  ;;  %v9497_v47 = vpack.c.b16 %v2073_v63, %v2072_v36  ;;  %v1900_v8 = vsel %vm9381_vm14, %v7240_v53, %v1899_v33  ;;  %v1934_v33 = vrot.slane %v9258_v56, 5 }
 0x134   : > { %12055 = vst [vmem:[#allocation14_spill] sm:$0xff] %v9451_v6  ;;  %v9479_v6 = vld [vmem:[#allocation2 + $0x18] sm:$0xff] }
 0x135   : > { %12057 = vst [vmem:[#allocation16_spill] sm:$0xff] %v9479_v6 }
 0x137   : > { %2197 = vmatmul.bf16.gmra.mxu0 %v9440_v7 }
 0x13b   : > { %v9473_v3 = vpop.f32.mrf.mxu3 }
 0x13c   : > { %2827 = vmatmul.bf16.gmra.mxu3 %v9479_v6 }
 0x13e   : > { %2232 = vmatmul.bf16.gmra.mxu2 %v9455_v35  ;;  %v2484_v35 = vunpack.c.l.b16 %v1924_v42  ;;  %v1445_v42 = vld [vmem:[#allocation2 + $0x30] sm:$0xe] }
 0x140   : > { %v9491_v23 = vpack.c.b16 %v2484_v35, %v2483_v18  ;;  %v1930_v35 = vrot.slane %v9224_v13, 5  ;;  %v1903_v13 = vsel %vm9381_vm14, %v1901_v19, %v1902_v46  ;;  %v1936_v19 = vrot.slane %v1934_v33, 4  ;;  %v1446_v46 = vld [vmem:[#allocation2 + $0x3c] sm:$0xe] }
 0x143   : > { %v9493_v29 = vpop.f32.mrf.mxu3  ;;  %3212 = vmatmul.bf16.gmra.mxu1 %v9491_v23 }
 0x146   : > { %v2168_v52 = vpop.f32.mrf.mxu0 }
 0x147   : > { %3012 = vmatmul.bf16.vlgmr.msrb.gmra.mxu0 %v9068_v21  ;;  %v9489_v31 = vadd.f32 %v2385_v62, %v2168_v52  ;;  %v2390_v21 = vpop.f32.mrf.mxu1  ;;  %v7244_v62 = vrot.slane %v1445_v42, 9  ;;  %v1931_v52 = vsel %vm9381_vm14, %v1929_v43, %v1930_v35  ;;  %v9514_v42 = vld [vmem:[#allocation2 + $0x24] sm:$0xff]  ;;  %v2477_v43 = vunpack.c.l.b16 %v1900_v8 }
 0x148   : > { %12058 = vst [vmem:[#allocation17_spill] sm:$0xff] %v9514_v42  ;;  %v2486_v49 = vunpack.c.l.b16 %v1931_v52  ;;  %v2478_v35 = vunpack.c.l.b16 %v1903_v13  ;;  %v1937_v8 = vrot.slane %v9269_v55, 5  ;;  %v8345_v55 = vld [vmem:[%s11931_s3 + $0x230] sm:$0xff] }
 0x149   : > { %v1928_v36 = vsel %vm9381_vm14, %v7244_v62, %v1927_v48  ;;  %3800 = vmatpush.bf16.msra.mxu0 %v8345_v55 }
 0x14a   : > { %v2485_v30 = vunpack.c.l.b16 %v1928_v36  ;;  %v2509_v53 = vpack.c.b16 %v2478_v35, %v2477_v43  ;;  %v8337_v36 = vld [vmem:[%s11931_s3 + $0x1f0] sm:$0xff] }
 0x14b   : > { %v9501_v18 = vpop.f32.mrf.mxu3  ;;  %3610 = vmatpush.bf16.msra.mxu3 %v8337_v36 }
 0x14c   : > { %2832 = vmatmul.bf16.gmra.mxu3 %v9514_v42 }
 0x14e   : > { %2237 = vmatmul.bf16.gmra.mxu2 %v9497_v47  ;;  %v9517_v6 = vpop.f32.mrf.mxu0 }
 0x14f   : > { %v2392_v48 = vpop.f32.mrf.mxu1 }
 0x151   : > { %v2203_v10 = vpop.f32.mrf.mxu2 }
 0x152   : > { %v9506_v63 = vadd.f32 %v9430_v38, %v2203_v10  ;;  %v9520_v38 = vpack.c.b16 %v2486_v49, %v2485_v30  ;;  %v8329_v10 = vld [vmem:[%s11931_s3 + $0x1b0] sm:$0xff]  ;;  %v7245_v49 = vrot.slane %v1446_v46, 9  ;;  %v1938_v30 = vsel %vm9381_vm14, %v1936_v19, %v1937_v8 }
 0x153   : > { %v9522_v62 = vpop.f32.mrf.mxu3  ;;  %3420 = vmatpush.bf16.msra.mxu2 %v8329_v10 }
 0x154   : > { %12059 = vst [vmem:[#allocation18_spill] sm:$0xff] %v9520_v38  ;;  %3217 = vmatmul.bf16.gmra.mxu1 %v9520_v38  ;;  %v1935_v35 = vsel %vm9381_vm14, %v7245_v49, %v1934_v33  ;;  %v1941_v33 = vrot.slane %v9293_v17, 5 }
 0x157   : > { %3017 = vmatmul.bf16.gmra.mxu0 %v9144_v57  ;;  %v2395_v43 = vpop.f32.mrf.mxu1 }
 0x159   : > { %v9535_v56 = vpop.f32.mrf.mxu2 }
 0x15a   : > { %12060 = vst [vmem:[#allocation19_spill] sm:$0xff] %v9535_v56 }
 0x15c   : > { %2837 = vmatmul.bf16.gmra.mxu3 %v9168_v50  ;;  %v1447_v50 = vld [vmem:[#allocation2 + $0x48] sm:$0xe] }
 0x15d   : > { %v7246_v55 = vrot.slane %v1447_v50, 9 }
 0x15e   : > { %2597 = vmatmul.bf16.vlgmr.msrb.gmra.mxu2 %v2509_v53  ;;  %v2173_v52 = vpop.f32.mrf.mxu0  ;;  %v9541_v53 = vpop.f32.mrf.mxu3 }
 0x15f   : > { %v9533_v13 = vadd.f32 %v2390_v21, %v2173_v52  ;;  %v2488_v21 = vunpack.c.l.b16 %v1938_v30  ;;  %v2487_v52 = vunpack.c.l.b16 %v1935_v35  ;;  %v2397_v30 = vpop.f32.mrf.mxu1  ;;  %v1943_v35 = vrot.slane %v1941_v33, 4 }
 0x161   : > { %v9550_v19 = vpack.c.b16 %v2488_v21, %v2487_v52  ;;  %v1942_v52 = vsel %vm9381_vm14, %v7246_v55, %v1941_v33 }
 0x163   : > { %12061 = vst [vmem:[#allocation20_spill] sm:$0xff] %v9550_v19 }
 0x164   : > { %3222 = vmatmul.bf16.gmra.mxu1 %v9550_v19 }
 0x166   : > { %v2175_v10 = vpop.f32.mrf.mxu0  ;;  %v9557_v49 = vpop.f32.mrf.mxu3 }
 0x167   : > { %3022 = vmatmul.bf16.gmra.mxu0 %v9220_v54  ;;  %v9548_v46 = vadd.f32 %v2392_v48, %v2175_v10  ;;  %v1944_v48 = vrot.slane %v9325_v44, 5  ;;  %v2400_v44 = vpop.f32.mrf.mxu1 }
 0x169   : > { %v1945_v21 = vsel %vm9381_vm14, %v1943_v35, %v1944_v48  ;;  %v1948_v48 = vrot.slane %v9349_v61, 5 }
 0x16a   : > { %v2208_v36 = vpop.f32.mrf.mxu2  ;;  %v2490_v10 = vunpack.c.l.b16 %v1945_v21 }
 0x16b   : > { %v9555_v8 = vadd.f32 %v9473_v3, %v2208_v36  ;;  %v1950_v55 = vrot.slane %v1948_v48, 4 }
 0x16c   : > { %2842 = vmatmul.bf16.gmra.mxu3 %v9222_v45 }
 0x16d   : > { %12062 = vst [vmem:[#allocation21_spill] sm:$0xff] %v9555_v8 }
 0x16e   : > { %2602 = vmatmul.bf16.gmra.mxu2 %v9409_v34  ;;  %v2489_v34 = vunpack.c.l.b16 %v1942_v52  ;;  %v1951_v52 = vrot.slane %v9401_v60, 5 }
 0x16f   : > { %v9571_v50 = vpop.f32.mrf.mxu3 }
 0x170   : > { %v9574_v35 = vpack.c.b16 %v2490_v10, %v2489_v34  ;;  %v2402_v10 = vpop.f32.mrf.mxu1 }
 0x172   : > { %v2210_v17 = vpop.f32.mrf.mxu2 }
 0x173   : > { %v9566_v3 = vadd.f32 %v9493_v29, %v2210_v17  ;;  %v1448_v29 = vld [vmem:[#allocation2 + $0x54] sm:$0xe]  ;;  %v8336_v17 = vld [vmem:[%s11931_s3 + $0x1e8] sm:$0xff] }
 0x174   : > { %v2178_v36 = vpop.f32.mrf.mxu0  ;;  %3227 = vmatmul.bf16.gmra.mxu1 %v9574_v35  ;;  %v7247_v61 = vrot.slane %v1448_v29, 9  ;;  %3611 = vmatpush.bf16.msra.mxu3 %v8336_v17 }
 0x175   : > { %12063 = vst [vmem:[#allocation22_spill] sm:$0xff] %v9566_v3  ;;  %v9569_v8 = vadd.f32 %v2395_v43, %v2178_v36  ;;  %v8328_v43 = vld [vmem:[%s11931_s3 + $0x1a8] sm:$0xff] }
 0x176   : > { %3421 = vmatpush.bf16.msra.mxu2 %v8328_v43  ;;  %v8344_v3 = vld [vmem:[%s11931_s3 + $0x228] sm:$0xff] }
 0x177   : > { %3027 = vmatmul.bf16.gmra.mxu0 %v9275_v14  ;;  %v9580_v21 = vpop.f32.mrf.mxu3 }
 0x178   : > { %3801 = vmatpush.bf16.msra.mxu0 %v8344_v3 }
 0x17c   : > { %v2180_v33 = vpop.f32.mrf.mxu0  ;;  %2847 = vmatmul.bf16.gmra.mxu3 %v9279_v2  ;;  %v2405_v2 = vpop.f32.mrf.mxu1 }
 0x17d   : > { %v9578_v45 = vadd.f32 %v2397_v30, %v2180_v33  ;;  %v1952_v30 = vsel %vm9381_vm14, %v1950_v55, %v1951_v52  ;;  %v1949_v33 = vsel %vm9381_vm14, %v7247_v61, %v1948_v48  ;;  %v8554_v52 = vld [vmem:[#allocation2 + $0x64] sm:$0xf] }
 0x17e   : > { %2607 = vmatmul.bf16.gmra.mxu2 %v9449_v39  ;;  %v2492_v60 = vunpack.c.l.b16 %v1952_v30  ;;  %v2491_v17 = vunpack.c.l.b16 %v1949_v33  ;;  %v1955_v48 = vrot.slane %v8554_v52, 5 }
 0x17f   : > { %v9603_v55 = vpop.f32.mrf.mxu3 }
 0x180   : > { %v1957_v3 = vrot.slane %v1955_v48, 4 }
 0x181   : > { %v2213_v36 = vpop.f32.mrf.mxu2 }
 0x182   : > { %v9593_v34 = vadd.f32 %v9501_v18, %v2213_v36  ;;  %v9606_v18 = vpack.c.b16 %v2492_v60, %v2491_v17  ;;  %v8555_v60 = vld [vmem:[#allocation2 + $0x68] sm:$0x1] }
 0x183   : > { %v1958_v17 = vrot.slane %v8555_v60, 5 }
 0x184   : > { %12064 = vst [vmem:[#allocation23_spill] sm:$0xff] %v9593_v34  ;;  %v2183_v29 = vpop.f32.mrf.mxu0  ;;  %3232 = vmatmul.bf16.gmra.mxu1 %v9606_v18 }
 0x185   : > { %v9601_v43 = vadd.f32 %v2400_v44, %v2183_v29  ;;  %v1449_v29 = vld [vmem:[#allocation2 + $0x60] sm:$0xe]  ;;  %v1959_v52 = vsel %vm9381_vm14, %v1957_v3, %v1958_v17 }
 0x186   : > { %v7248_v34 = vrot.slane %v1449_v29, 9  ;;  %v8556_v29 = vld [vmem:[#allocation2 + $0x70] sm:$0xf] }
 0x187   : > { %3032 = vmatmul.bf16.gmra.mxu0 %v9329_v24  ;;  %v9614_v33 = vpop.f32.mrf.mxu3 }
 0x189   : > { %v2215_v61 = vpop.f32.mrf.mxu2 }
 0x18a   : > { %v9610_v36 = vadd.f32 %v9522_v62, %v2215_v61  ;;  %v1956_v61 = vsel %vm9381_vm14, %v7248_v34, %v1955_v48  ;;  %v1450_v34 = vld [vmem:[#allocation2 + $0x6c] sm:$0xe] }
 0x18b   : > { %v2493_v24 = vunpack.c.l.b16 %v1956_v61  ;;  %v7249_v17 = vrot.slane %v1450_v34, 9 }
 0x18c   : > { %12065 = vst [vmem:[#allocation24_spill] sm:$0xff] %v9610_v36  ;;  %v2185_v30 = vpop.f32.mrf.mxu0  ;;  %2852 = vmatmul.bf16.gmra.mxu3 %v9333_v51 }
 0x18d   : > { %v9612_v44 = vadd.f32 %v2402_v10, %v2185_v30  ;;  %v2494_v10 = vunpack.c.l.b16 %v1959_v52  ;;  %v2407_v30 = vpop.f32.mrf.mxu1 }
 0x18e   : > { %2612 = vmatmul.bf16.gmra.mxu2 %v9491_v23 }
 0x18f   : > { %v9627_v60 = vpop.f32.mrf.mxu3  ;;  %v9630_v3 = vpack.c.b16 %v2494_v10, %v2493_v24  ;;  %v8327_v10 = vld [vmem:[%s11931_s3 + $0x1a0] sm:$0xff] }
 0x190   : > { %3422 = vmatpush.bf16.msra.mxu2 %v8327_v10 }
 0x191   : > { %v2218_v42 = vpop.f32.mrf.mxu2 }
 0x192   : > { %v9620_v62 = vadd.f32 %v9541_v53, %v2218_v42  ;;  %v1962_v42 = vrot.slane %v8556_v29, 5 }
 0x194   : > { %12066 = vst [vmem:[#allocation25_spill] sm:$0xff] %v9620_v62  ;;  %v2188_v36 = vpop.f32.mrf.mxu0  ;;  %3237 = vmatmul.bf16.gmra.mxu1 %v9630_v3  ;;  %v1963_v29 = vsel %vm9381_vm14, %v7249_v17, %v1962_v42 }
 0x195   : > { %v9625_v56 = vadd.f32 %v2405_v2, %v2188_v36  ;;  %v1964_v36 = vrot.slane %v1962_v42, 4  ;;  %v8557_v2 = vld [vmem:[#allocation2 + $0x74] sm:$0x1]  ;;  %v2410_v24 = vpop.f32.mrf.mxu1  ;;  %v2495_v10 = vunpack.c.l.b16 %v1963_v29  ;;  %v1451_v29 = vld [vmem:[#allocation2 + $0x78] sm:$0xe] }
 0x196   : > { %v1965_v52 = vrot.slane %v8557_v2, 5  ;;  %v9657_v2 = vld [vmem:[#allocation2 + $0x60] sm:$0xff] }
 0x197   : > { %3037 = vmatmul.bf16.gmra.mxu0 %v9394_v32  ;;  %v9638_v62 = vpop.f32.mrf.mxu3  ;;  %12069 = vst [vmem:[#allocation28_spill] sm:$0xff] %v9657_v2 }
 0x199   : > { %v2220_v53 = vpop.f32.mrf.mxu2 }
 0x19a   : > { %v9634_v51 = vadd.f32 %v9557_v49, %v2220_v53  ;;  %v8335_v49 = vld [vmem:[%s11931_s3 + $0x1e0] sm:$0xff] }
 0x19b   : > { %3612 = vmatpush.bf16.msra.mxu3 %v8335_v49 }
 0x19c   : > { %12067 = vst [vmem:[#allocation26_spill] sm:$0xff] %v9634_v51  ;;  %v2190_v48 = vpop.f32.mrf.mxu0  ;;  %2857 = vmatmul.bf16.gmra.mxu3 %v9657_v2 }
 0x19d   : > { %v9636_v61 = vadd.f32 %v2407_v30, %v2190_v48  ;;  %v1966_v30 = vsel %vm9381_vm14, %v1964_v36, %v1965_v52  ;;  %v8343_v48 = vld [vmem:[%s11931_s3 + $0x220] sm:$0xff]  ;;  %v2412_v36 = vpop.f32.mrf.mxu1  ;;  %v8559_v52 = vld [vmem:[#allocation2 + $0x7c] sm:$0xf] }
 0x19e   : > { %2617 = vmatmul.bf16.gmra.mxu2 %v9520_v38  ;;  %v2496_v49 = vunpack.c.l.b16 %v1966_v30  ;;  %3802 = vmatpush.bf16.msra.mxu0 %v8343_v48 }
 0x19f   : > { %v9662_v17 = vpop.f32.mrf.mxu3 }
 0x1a1   : > { %v2223_v53 = vpop.f32.mrf.mxu2 }
 0x1a2   : > { %v9652_v34 = vadd.f32 %v9571_v50, %v2223_v53  ;;  %v9665_v50 = vpack.c.b16 %v2496_v49, %v2495_v10  ;;  %v1969_v53 = vrot.slane %v8559_v52, 5  ;;  %v7250_v10 = vrot.slane %v1451_v29, 9  ;;  %v8560_v49 = vld [vmem:[#allocation2 + $0x80] sm:$0x1] }
 0x1a4   : > { %12068 = vst [vmem:[#allocation27_spill] sm:$0xff] %v9652_v34  ;;  %v2193_v51 = vpop.f32.mrf.mxu0  ;;  %3242 = vmatmul.bf16.gmra.mxu1 %v9665_v50  ;;  %v1971_v48 = vrot.slane %v1969_v53, 4 }
 0x1a5   : > { %v9660_v42 = vadd.f32 %v2410_v24, %v2193_v51  ;;  %v2415_v38 = vpop.f32.mrf.mxu1 }
 0x1a7   : > { %3042 = vmatmul.bf16.gmra.mxu0 %v9440_v7  ;;  %v9673_v24 = vpop.f32.mrf.mxu3  ;;  %v1972_v7 = vrot.slane %v8560_v49, 5 }
 0x1a9   : > { %v2225_v34 = vpop.f32.mrf.mxu2  ;;  %v1973_v52 = vsel %vm9381_vm14, %v1971_v48, %v1972_v7  ;;  %v1452_v48 = vld [vmem:[#allocation2 + $0x84] sm:$0xe] }
 0x1aa   : > { %v9669_v2 = vadd.f32 %v9580_v21, %v2225_v34  ;;  %v1970_v34 = vsel %vm9381_vm14, %v7250_v10, %v1969_v53 }
 0x1ab   : > { %v2497_v49 = vunpack.c.l.b16 %v1970_v34 }
 0x1ac   : > { %12070 = vst [vmem:[#allocation29_spill] sm:$0xff] %v9669_v2  ;;  %v2195_v30 = vpop.f32.mrf.mxu0 }
 0x1ad   : > { %v9671_v51 = vadd.f32 %v2412_v36, %v2195_v30  ;;  %v9683_v36 = vld [vmem:[#allocation2 + $0x6c] sm:$0xff]  ;;  %v2498_v30 = vunpack.c.l.b16 %v1973_v52  ;;  %v2417_v10 = vpop.f32.mrf.mxu1 }
 0x1ae   : > { %2622 = vmatmul.bf16.gmra.mxu2 %v9550_v19  ;;  %12072 = vst [vmem:[#allocation31_spill] sm:$0xff] %v9683_v36  ;;  %2862 = vmatmul.bf16.gmra.mxu3 %v9683_v36 }
 0x1af   : > { %v9688_v19 = vpop.f32.mrf.mxu3  ;;  %v9691_v7 = vpack.c.b16 %v2498_v30, %v2497_v49  ;;  %v7251_v49 = vrot.slane %v1452_v48, 9  ;;  %v8342_v48 = vld [vmem:[%s11931_s3 + $0x218] sm:$0xff] }
 0x1b0   : > { %3803 = vmatpush.bf16.msra.mxu0 %v8342_v48  ;;  %v1986_v48 = vrot.slane %v9295_v41, 5 }
 0x1b1   : > { %v2228_v32 = vpop.f32.mrf.mxu2 }
 0x1b2   : > { %v9679_v21 = vadd.f32 %v9603_v55, %v2228_v32  ;;  %v1976_v32 = vrot.slane %v9235_v20, 5  ;;  %v8326_v20 = vld [vmem:[%s11931_s3 + $0x198] sm:$0xff] }
 0x1b3   : > { %3423 = vmatpush.bf16.msra.mxu2 %v8326_v20 }
 0x1b4   : > { %12071 = vst [vmem:[#allocation30_spill] sm:$0xff] %v9679_v21  ;;  %v2198_v2 = vpop.f32.mrf.mxu0  ;;  %3247 = vmatmul.bf16.gmra.mxu1 %v9691_v7 }
 0x1b5   : > { %v9686_v29 = vadd.f32 %v2415_v38, %v2198_v2  ;;  %v1978_v38 = vrot.slane %v1976_v32, 4  ;;  %v8562_v2 = vld [vmem:[#allocation2 + $0x8c] sm:$0x1] }
 0x1b6   : > { %v1979_v34 = vrot.slane %v8562_v2, 5  ;;  %v1977_v2 = vsel %vm9381_vm14, %v7251_v49, %v1976_v32  ;;  %v1983_v32 = vrot.slane %v9271_v12, 5 }
 0x1b7   : > { %3047 = vmatmul.bf16.gmra.mxu0 %v9088_v37  ;;  %v9701_v30 = vpop.f32.mrf.mxu3  ;;  %v2499_v20 = vunpack.c.l.b16 %v1977_v2 }
 0x1b9   : > { %v2230_v55 = vpop.f32.mrf.mxu2 }
 0x1ba   : > { %v9696_v53 = vadd.f32 %v9614_v33, %v2230_v55  ;;  %v8334_v33 = vld [vmem:[%s11931_s3 + $0x1d8] sm:$0xff]  ;;  %v1980_v55 = vsel %vm9381_vm14, %v1978_v38, %v1979_v34 }
 0x1bb   : > { %3613 = vmatpush.bf16.msra.mxu3 %v8334_v33  ;;  %v2500_v21 = vunpack.c.l.b16 %v1980_v55  ;;  %v1985_v55 = vrot.slane %v1983_v32, 4 }
 0x1bc   : > { %12073 = vst [vmem:[#allocation32_spill] sm:$0xff] %v9696_v53  ;;  %v2200_v52 = vpop.f32.mrf.mxu0  ;;  %v9716_v53 = vld [vmem:[#allocation2 + $0x78] sm:$0xff] }
 0x1bd   : > { %v9698_v36 = vadd.f32 %v2417_v10, %v2200_v52  ;;  %12074 = vst [vmem:[#allocation33_spill] sm:$0xff] %v9716_v53  ;;  %v1987_v12 = vsel %vm9381_vm14, %v1985_v55, %v1986_v48 }
 0x1be   : > { %2627 = vmatmul.bf16.gmra.mxu2 %v9574_v35  ;;  %2867 = vmatmul.bf16.gmra.mxu3 %v9716_v53 }
 0x1bf   : > { %v9724_v38 = vpop.f32.mrf.mxu3 }
 0x1c1   : > { %v2233_v10 = vpop.f32.mrf.mxu2 }
 0x1c2   : > { %v9712_v52 = vadd.f32 %v9627_v60, %v2233_v10  ;;  %v9727_v60 = vpack.c.b16 %v2500_v21, %v2499_v20  ;;  %v1453_v10 = vld [vmem:[#allocation2 + $0x90] sm:$0xe] }
 0x1c3   : > { %v7252_v21 = vrot.slane %v1453_v10, 9 }
 0x1c4   : > { %v9719_v37 = vpop.f32.mrf.mxu0  ;;  %3252 = vmatmul.bf16.gmra.mxu1 %v9727_v60 }
 0x1c5   : > { %12075 = vst [vmem:[#allocation34_spill] sm:$0xff] %v9719_v37  ;;  %v2502_v37 = vunpack.c.l.b16 %v1987_v12 }
 0x1c7   : > { %3052 = vmatmul.bf16.gmra.mxu0 %v9164_v11  ;;  %v9737_v2 = vpop.f32.mrf.mxu3 }
 0x1c9   : > { %v2235_v34 = vpop.f32.mrf.mxu2 }
 0x1ca   : > { %v9732_v33 = vadd.f32 %v9638_v62, %v2235_v34  ;;  %v1984_v62 = vsel %vm9381_vm14, %v7252_v21, %v1983_v32  ;;  %v9747_v34 = vpop.f32.mrf.mxu1  ;;  %v1454_v21 = vld [vmem:[#allocation2 + $0x9c] sm:$0xe] }
 0x1cb   : > { %12078 = vst [vmem:[#allocation37_spill] sm:$0xff] %v9747_v34  ;;  %v2501_v41 = vunpack.c.l.b16 %v1984_v62  ;;  %v9783_v34 = vld [vmem:[#allocation2 + $0x90] sm:$0xff] }
 0x1cc   : > { %12076 = vst [vmem:[#allocation35_spill] sm:$0xff] %v9732_v33  ;;  %v9734_v49 = vpop.f32.mrf.mxu0 }
 0x1cd   : > { %12077 = vst [vmem:[#allocation36_spill] sm:$0xff] %v9734_v49  ;;  %v9749_v49 = vld [vmem:[#allocation2 + $0x84] sm:$0xff]  ;;  %v9757_v55 = vpack.c.b16 %v2502_v37, %v2501_v41  ;;  %v8325_v37 = vld [vmem:[%s11931_s3 + $0x190] sm:$0xff]  ;;  %v1993_v41 = vrot.slane %v9353_v22, 5 }
 0x1ce   : > { %2632 = vmatmul.bf16.gmra.mxu2 %v9606_v18  ;;  %12079 = vst [vmem:[#allocation38_spill] sm:$0xff] %v9749_v49  ;;  %2872 = vmatmul.bf16.gmra.mxu3 %v9749_v49 }
 0x1cf   : > { %v9754_v10 = vpop.f32.mrf.mxu3  ;;  %3424 = vmatpush.bf16.msra.mxu2 %v8325_v37  ;;  %12084 = vst [vmem:[#allocation43_spill] sm:$0xff] %v9783_v34 }
 0x1d1   : > { %v2238_v20 = vpop.f32.mrf.mxu2 }
 0x1d2   : > { %v9743_v53 = vadd.f32 %v9662_v17, %v2238_v20  ;;  %v1990_v17 = vrot.slane %v9320_v25, 5  ;;  %v9766_v49 = vpop.f32.mrf.mxu1  ;;  %v8333_v25 = vld [vmem:[%s11931_s3 + $0x1d0] sm:$0xff] }
 0x1d3   : > { %12083 = vst [vmem:[#allocation42_spill] sm:$0xff] %v9766_v49  ;;  %3614 = vmatpush.bf16.msra.mxu3 %v8333_v25  ;;  %v1997_v25 = vrot.slane %v9387_v1, 5 }
 0x1d4   : > { %v9752_v33 = vpop.f32.mrf.mxu0  ;;  %3257 = vmatmul.bf16.gmra.mxu1 %v9757_v55  ;;  %v1992_v12 = vrot.slane %v1990_v17, 4 }
 0x1d5   : > { %12080 = vst [vmem:[#allocation39_spill] sm:$0xff] %v9752_v33 }
 0x1d7   : > { %3057 = vmatmul.bf16.gmra.mxu0 %v9237_v0  ;;  %v9769_v62 = vpop.f32.mrf.mxu3 }
 0x1d9   : > { %v2240_v48 = vpop.f32.mrf.mxu2 }
 0x1da   : > { %v9762_v32 = vadd.f32 %v9673_v24, %v2240_v48  ;;  %v7253_v24 = vrot.slane %v1454_v21, 9  ;;  %v1994_v48 = vsel %vm9381_vm14, %v1992_v12, %v1993_v41  ;;  %v8380_v12 = vld [vmem:[%s11933_s5 + $0x78] sm:$0xff]  ;;  %v9799_v37 = vpop.f32.mrf.mxu1 }
 0x1db   : > { %5212 = vmatpush.bf16.msra.mxu1 %v8380_v12 }
 0x1dc   : > { %12081 = vst [vmem:[#allocation40_spill] sm:$0xff] %v9762_v32  ;;  %v9764_v20 = vpop.f32.mrf.mxu0  ;;  %v1991_v49 = vsel %vm9381_vm14, %v7253_v24, %v1990_v17  ;;  %v2504_v32 = vunpack.c.l.b16 %v1994_v48 }
 0x1dd   : > { %12082 = vst [vmem:[#allocation41_spill] sm:$0xff] %v9764_v20 }
 0x1de   : > { %2637 = vmatmul.bf16.gmra.mxu2 %v9630_v3  ;;  %2877 = vmatmul.bf16.gmra.mxu3 %v9783_v34 }
 0x1df   : > { %v9797_v17 = vpop.f32.mrf.mxu3 }
 0x1e1   : > { %v2598_v20 = vpop.f32.mrf.mxu2 }
 0x1e2   : > { %v2678_v33 = vadd.f32 %v2598_v20, %v9385_v26  ;;  %v8341_v26 = vld [vmem:[%s11931_s3 + $0x210] sm:$0xff]  ;;  %v2503_v20 = vunpack.c.l.b16 %v1991_v49  ;;  %v1455_v49 = vld [vmem:[#allocation2 + $0xa8] sm:$0xe] }
 0x1e3   : > { %3804 = vmatpush.bf16.msra.mxu0 %v8341_v26  ;;  %v1999_v26 = vrot.slane %v1997_v25, 4 }
 0x1e4   : > { %v9787_v21 = vadd.f32 %v9688_v19, %v2678_v33  ;;  %v9789_v22 = vpop.f32.mrf.mxu0  ;;  %v9802_v19 = vpack.c.b16 %v2504_v32, %v2503_v20  ;;  %v2383_v33 = vadd.f32 %v9432_v9, %v9459_v4  ;;  %v7254_v20 = vrot.slane %v1455_v49, 9  ;;  %v9819_v4 = vpop.f32.mrf.mxu1 }
 0x1e5   : > { %12085 = vst [vmem:[#allocation44_spill] sm:$0xff] %v9789_v22  ;;  %v2000_v9 = vrot.slane %v9415_v40, 5 }
 0x1e6   : > { %3262 = vmatmul.bf16.gmra.mxu1 %v9802_v19  ;;  %12087 = vst [vmem:[#allocation46_spill] sm:$0xff] %v9819_v4 }
 0x1e7   : > { %3062 = vmatmul.bf16.gmra.mxu0 %v9297_v28  ;;  %v9814_v32 = vpop.f32.mrf.mxu3  ;;  %v2001_v1 = vsel %vm9381_vm14, %v1999_v26, %v2000_v9 }
 0x1e9   : > { %v2600_v24 = vpop.f32.mrf.mxu2 }
 0x1ea   : > { %v2679_v41 = vadd.f32 %v2600_v24, %v2383_v33 }
 0x1ec   : > { %v9809_v48 = vadd.f32 %v9701_v30, %v2679_v41  ;;  %v9811_v12 = vpop.f32.mrf.mxu0  ;;  %v1998_v30 = vsel %vm9381_vm14, %v7254_v20, %v1997_v25  ;;  %v9824_v41 = vld [vmem:[#allocation2 + $0x9c] sm:$0xff]  ;;  %v2004_v25 = vrot.slane %v9436_v58, 5  ;;  %v8332_v58 = vld [vmem:[%s11931_s3 + $0x1c8] sm:$0xff] }
 0x1ed   : > { %12086 = vst [vmem:[#allocation45_spill] sm:$0xff] %v9811_v12  ;;  %v2506_v12 = vunpack.c.l.b16 %v2001_v1  ;;  %v2505_v34 = vunpack.c.l.b16 %v1998_v30  ;;  %3615 = vmatpush.bf16.msra.mxu3 %v8332_v58 }
 0x1ee   : > { %2642 = vmatmul.bf16.gmra.mxu2 %v9665_v50  ;;  %12088 = vst [vmem:[#allocation47_spill] sm:$0xff] %v9824_v41  ;;  %2882 = vmatmul.bf16.gmra.mxu3 %v9824_v41  ;;  %v2006_v30 = vrot.slane %v2004_v25, 4  ;;  %v1456_v41 = vld [vmem:[#allocation2 + $0xb4] sm:$0xe] }
 0x1ef   : > { %v9832_v26 = vpop.f32.mrf.mxu3  ;;  %v9835_v9 = vpack.c.b16 %v2506_v12, %v2505_v34 }
 0x1f1   : > { %v2603_v33 = vpop.f32.mrf.mxu2 }
 0x1f2   : > { %v2680_v24 = vadd.f32 %v2603_v33, %v9489_v31  ;;  %v2388_v31 = vadd.f32 %v9482_v15, %v9517_v6  ;;  %v8324_v15 = vld [vmem:[%s11931_s3 + $0x188] sm:$0xff]  ;;  %v2007_v6 = vrot.slane %v9457_v5, 5 }
 0x1f3   : > { %3425 = vmatpush.bf16.msra.mxu2 %v8324_v15  ;;  %v1420_v15 = vld [vmem:[#allocation2 + $0xc4] sm:$0xf] }
 0x1f4   : > { %v9828_v49 = vadd.f32 %v9724_v38, %v2680_v24  ;;  %v9830_v40 = vpop.f32.mrf.mxu0  ;;  %v9841_v38 = vpop.f32.mrf.mxu1  ;;  %v2008_v12 = vsel %vm9381_vm14, %v2006_v30, %v2007_v6 }
 0x1f5   : > { %12089 = vst [vmem:[#allocation48_spill] sm:$0xff] %v9830_v40  ;;  %v2508_v40 = vunpack.c.l.b16 %v2008_v12 }
 0x1f6   : > { %3267 = vmatmul.bf16.gmra.mxu1 %v9835_v9  ;;  %12090 = vst [vmem:[#allocation49_spill] sm:$0xff] %v9841_v38 }
 0x1f7   : > { %3067 = vmatmul.bf16.gmra.mxu0 %v9355_v59  ;;  %v9849_v34 = vpop.f32.mrf.mxu3 }
 0x1f9   : > { %v2605_v20 = vpop.f32.mrf.mxu2 }
 0x1fa   : > { %v2681_v1 = vadd.f32 %v2605_v20, %v2388_v31 }
 0x1fc   : > { %v9844_v33 = vadd.f32 %v9737_v2, %v2681_v1  ;;  %v9846_v24 = vpop.f32.mrf.mxu0  ;;  %v7255_v2 = vrot.slane %v1456_v41, 9  ;;  %v8379_v41 = vld [vmem:[%s11933_s5 + $0x70] sm:$0xff]  ;;  %v9877_v30 = vpop.f32.mrf.mxu1 }
 0x1fd   : > { %12091 = vst [vmem:[#allocation50_spill] sm:$0xff] %v9846_v24  ;;  %v9863_v24 = vld [vmem:[#allocation2 + $0xa8] sm:$0xff]  ;;  %5213 = vmatpush.bf16.msra.mxu1 %v8379_v41 }
 0x1fe   : > { %2647 = vmatmul.bf16.gmra.mxu2 %v9691_v7  ;;  %v2005_v1 = vsel %vm9381_vm14, %v7255_v2, %v2004_v25  ;;  %12092 = vst [vmem:[#allocation51_spill] sm:$0xff] %v9863_v24  ;;  %2887 = vmatmul.bf16.gmra.mxu3 %v9863_v24  ;;  %v2739_v2 = vrot.slane %v1420_v15, 5  ;;  %v1457_v24 = vld [vmem:[#allocation2 + $0xc0] sm:$0xe] }
 0x1ff   : > { %12095 = vst [vmem:[#allocation54_spill] sm:$0xff] %v9877_v30  ;;  %v2507_v25 = vunpack.c.l.b16 %v2005_v1  ;;  %v9879_v58 = vpop.f32.mrf.mxu3 }
 0x201   : > { %v2608_v31 = vpop.f32.mrf.mxu2  ;;  %v9882_v6 = vpack.c.b16 %v2508_v40, %v2507_v25  ;;  %v7448_v40 = vrot.slane %v1457_v24, 9 }
 0x202   : > { %v2682_v20 = vadd.f32 %v2608_v31, %v9533_v13  ;;  %v8340_v13 = vld [vmem:[%s11931_s3 + $0x208] sm:$0xff] }
 0x203   : > { %3805 = vmatpush.bf16.msra.mxu0 %v8340_v13 }
 0x204   : > { %v9867_v38 = vadd.f32 %v9754_v10, %v2682_v20  ;;  %v9869_v5 = vpop.f32.mrf.mxu0  ;;  %v12096_v10 = vld [vmem:[#allocation12_spill] sm:$0xff]  ;;  %v9886_v20 = vld [vmem:[#allocation2 + $0xc8] sm:$0x1]  ;;  %v9897_v30 = vpop.f32.mrf.mxu1 }
 0x205   : > { %12094 = vst [vmem:[#allocation53_spill] sm:$0xff] %v9869_v5  ;;  %v2741_v5 = vrot.slane %v2739_v2, 4  ;;  %v2742_v25 = vrot.slane %v9886_v20, 5 }
 0x206   : > { %12093 = vst [vmem:[#allocation52_spill] sm:$0xff] %v9867_v38  ;;  %3272 = vmatmul.bf16.gmra.mxu1 %v9882_v6 }
 0x207   : > { %3072 = vmatmul.bf16.gmra.mxu0 %v12096_v10  ;;  %v9894_v13 = vpop.f32.mrf.mxu3  ;;  %12099 = vst [vmem:[#allocation56_spill] sm:$0xff] %v9897_v30  ;;  %v12102_v30 = vld [vmem:[#allocation15_spill] sm:$0xff] }
 0x209   : > { %v2610_v12 = vpop.f32.mrf.mxu2 }
 0x20a   : > { %v2683_v31 = vadd.f32 %v2610_v12, %v9548_v46  ;;  %v2743_v46 = vsel %vm9381_vm14, %v2741_v5, %v2742_v25 }
 0x20c   : > { %v9889_v1 = vadd.f32 %v9769_v62, %v2683_v31  ;;  %v9891_v41 = vpop.f32.mrf.mxu0  ;;  %v2740_v62 = vsel %vm9381_vm14, %v7448_v40, %v2739_v2  ;;  %v12100_v31 = vld [vmem:[#allocation9_spill] sm:$0xff]  ;;  %v9915_v25 = vpop.f32.mrf.mxu1  ;;  %v1419_v40 = vld [vmem:[#allocation2 + $0xc0] sm:$0xf] }
 0x20d   : > { %12098 = vst [vmem:[#allocation55_spill] sm:$0xff] %v9891_v41  ;;  %v3143_v41 = vunpack.c.l.b16 %v2743_v46  ;;  %v3142_v38 = vunpack.c.l.b16 %v2740_v62  ;;  %v2720_v46 = vshll.u32 %v1420_v15, 16  ;;  %v2724_v62 = vshrl.u32 %v1420_v15, 16 }
 0x20e   : > { %12097 = vst [vmem:[#allocation12_spill] sm:$0xff] %v9889_v1  ;;  %2652 = vmatmul.bf16.gmra.mxu2 %v9727_v60  ;;  %2892 = vmatmul.bf16.gmra.mxu3 %v12100_v31  ;;  %v8323_v31 = vld [vmem:[%s11931_s3 + $0x180] sm:$0xff] }
 0x20f   : > { %v9910_v4 = vpop.f32.mrf.mxu3  ;;  %v9913_v5 = vpack.c.b16 %v3143_v41, %v3142_v38  ;;  %12104 = vst [vmem:[#allocation57_spill] sm:$0xff] %v9915_v25  ;;  %v2711_v38 = vshrl.u32 %v1419_v40, 16  ;;  %v2714_v41 = vshll.u32 %v1419_v40, 16  ;;  %3426 = vmatpush.bf16.msra.mxu2 %v8323_v31  ;;  %v8378_v25 = vld [vmem:[%s11933_s5 + $0x68] sm:$0xff] }
 0x210   : > { %5214 = vmatpush.bf16.msra.mxu1 %v8378_v25 }
 0x211   : > { %v2613_v12 = vpop.f32.mrf.mxu2  ;;  %12103 = vst [vmem:[#allocation15_spill] sm:$0xff] %v9913_v5 }
 0x212   : > { %v2684_v22 = vadd.f32 %v2613_v12, %v9569_v8 }
 0x214   : > { %v9906_v1 = vadd.f32 %v9797_v17, %v2684_v22  ;;  %v9908_v24 = vpop.f32.mrf.mxu0 }
 0x215   : > { %12101 = vst [vmem:[#allocation9_spill] sm:$0xff] %v9908_v24  ;;  %v2716_v24 = vrot.slane %v2714_v41, 5 }
 0x216   : > { %3277 = vmatmul.bf16.gmra.mxu1 %v9913_v5  ;;  %v2726_v5 = vrot.slane %v2724_v62, 4 }
 0x217   : > { %3077 = vmatmul.bf16.gmra.mxu0 %v12102_v30  ;;  %v9925_v12 = vpop.f32.mrf.mxu3 }
 0x219   : > { %v2615_v8 = vpop.f32.mrf.mxu2 }
 0x21a   : > { %v2685_v2 = vadd.f32 %v2615_v8, %v9578_v45  ;;  %v8331_v45 = vld [vmem:[%s11931_s3 + $0x1c0] sm:$0xff]  ;;  %v2722_v8 = vrot.slane %v2720_v46, 5 }
 0x21b   : > { %3616 = vmatpush.bf16.msra.mxu3 %v8331_v45  ;;  %v8339_v46 = vld [vmem:[%s11931_s3 + $0x200] sm:$0xff] }
 0x21c   : > { %v9920_v22 = vadd.f32 %v9814_v32, %v2685_v2  ;;  %v9922_v17 = vpop.f32.mrf.mxu0  ;;  %v8273_v2 = vld [vmem:[#allocation2 + $0xc0] sm:$0xff]  ;;  %v2727_v45 = vor.u32 %v2726_v5, %v2722_v8  ;;  %3806 = vmatpush.bf16.msra.mxu0 %v8339_v46 }
 0x21d   : > { %12105 = vst [vmem:[#allocation58_spill] sm:$0xff] %v9922_v17  ;;  %v2713_v17 = vrot.slane %v2711_v38, 4 }
 0x21e   : > { %2657 = vmatmul.bf16.gmra.mxu2 %v9757_v55  ;;  %2897 = vmatmul.bf16.gmra.mxu3 %v8273_v2  ;;  %v2728_v62 = vrot.slane %v2727_v45, 4 }
 0x21f   : > { %v2717_v31 = vor.u32 %v2716_v24, %v2713_v17 }
 0x221   : > { %v2618_v32 = vpop.f32.mrf.mxu2  ;;  %v2718_v41 = vrot.slane %v2717_v31, 4 }
 0x222   : > { %v2686_v16 = vadd.f32 %v2618_v32, %v9601_v43  ;;  %v2858_v43 = vpop.f32.mrf.mxu3 }
 0x223   : > { %v2723_v24 = vsel %vm8806_vm10, %v2718_v41, %v2722_v8 }
 0x224   : > { %v9935_v15 = vadd.f32 %v9832_v26, %v2686_v16  ;;  %v9937_v40 = vpop.f32.mrf.mxu0  ;;  %v2730_v16 = vshll.u32 %v9886_v20, 16  ;;  %v2952_v17 = vunpack.c.l.b16 %v2723_v24 }
 0x225   : > { %12106 = vst [vmem:[#allocation59_spill] sm:$0xff] %v9937_v40 }
 0x226   : > { %v2732_v40 = vrot.slane %v2730_v16, 5 }
 0x227   : > { %3082 = vmatmul.bf16.gmra.mxu0 %v9497_v47 }
 0x228   : > { %v2733_v5 = vsel %vm8806_vm10, %v2728_v62, %v2732_v40 }
 0x229   : > { %v2620_v26 = vpop.f32.mrf.mxu2 }
 0x22a   : > { %v2687_v38 = vadd.f32 %v2620_v26, %v9612_v44  ;;  %v2860_v20 = vpop.f32.mrf.mxu3  ;;  %v2953_v44 = vunpack.c.l.b16 %v2733_v5 }
 0x22c   : > { %v9949_v32 = vadd.f32 %v9849_v34, %v2687_v38  ;;  %v9951_v2 = vpop.f32.mrf.mxu0  ;;  %v9965_v45 = vpack.c.b16 %v2953_v44, %v2952_v17 }
 0x22e   : > { %2662 = vmatmul.bf16.gmra.mxu2 %v9802_v19  ;;  %3617 = vmatmul.bf16.vlgmr.msra.gmra.mxu3 %v9144_v57 }
 0x231   : > { %v2623_v25 = vpop.f32.mrf.mxu2 }
 0x232   : > { %v2688_v46 = vadd.f32 %v2623_v25, %v9625_v56  ;;  %v2863_v16 = vpop.f32.mrf.mxu3 }
 0x234   : > { %v9961_v34 = vadd.f32 %v9879_v58, %v2688_v46  ;;  %v9963_v31 = vpop.f32.mrf.mxu0 }
 0x237   : > { %3087 = vmatmul.bf16.gmra.mxu0 %v9965_v45 }
 0x239   : > { %v2625_v8 = vpop.f32.mrf.mxu2 }
 0x23a   : > { %v2689_v40 = vadd.f32 %v2625_v8, %v9636_v61  ;;  %v2865_v57 = vpop.f32.mrf.mxu3  ;;  %v8377_v61 = vld [vmem:[%s11933_s5 + $0x60] sm:$0xff] }
 0x23b   : > { %5215 = vmatpush.bf16.msra.mxu1 %v8377_v61 }
 0x23c   : > { %v9970_v26 = vadd.f32 %v9894_v13, %v2689_v40  ;;  %v9972_v38 = vpop.f32.mrf.mxu0 }
 0x23d   : > { %12107 = vst [vmem:[#allocation60_spill] sm:$0xff] %v9972_v38 }
 0x23e   : > { %2667 = vmatmul.bf16.gmra.mxu2 %v9835_v9  ;;  %3622 = vmatmul.bf16.gmra.mxu3 %v9220_v54 }
 0x241   : > { %v2628_v56 = vpop.f32.mrf.mxu2 }
 0x242   : > { %v2690_v58 = vadd.f32 %v2628_v56, %v9660_v42  ;;  %v2868_v13 = vpop.f32.mrf.mxu3  ;;  %v12112_v56 = vld [vmem:[#allocation16_spill] sm:$0xff] }
 0x244   : > { %v9978_v41 = vadd.f32 %v9910_v4, %v2690_v58  ;;  %v9980_v62 = vpop.f32.mrf.mxu0 }
 0x245   : > { %12108 = vst [vmem:[#allocation61_spill] sm:$0xff] %v9980_v62 }
 0x247   : > { %3807 = vmatmul.bf16.vlgmr.msra.gmra.mxu0 %v9449_v39 }
 0x249   : > { %v2630_v24 = vpop.f32.mrf.mxu2 }
 0x24a   : > { %v2691_v5 = vadd.f32 %v2630_v24, %v9671_v51  ;;  %v2870_v4 = vpop.f32.mrf.mxu3 }
 0x24c   : > { %v9988_v42 = vadd.f32 %v9925_v12, %v2691_v5  ;;  %v9990_v54 = vpop.f32.mrf.mxu0  ;;  %v12117_v5 = vld [vmem:[#allocation19_spill] sm:$0xff] }
 0x24d   : > { %12109 = vst [vmem:[#allocation62_spill] sm:$0xff] %v9990_v54 }
 0x24e   : > { %2672 = vmatmul.bf16.gmra.mxu2 %v9882_v6  ;;  %3627 = vmatmul.bf16.gmra.mxu3 %v9275_v14 }
 0x251   : > { %v2633_v25 = vpop.f32.mrf.mxu2 }
 0x252   : > { %v2692_v17 = vadd.f32 %v2633_v25, %v9686_v29  ;;  %v2873_v39 = vpop.f32.mrf.mxu3  ;;  %v12118_v25 = vld [vmem:[#allocation14_spill] sm:$0xff] }
 0x254   : > { %v9995_v44 = vadd.f32 %v2858_v43, %v2692_v17  ;;  %v9997_v46 = vpop.f32.mrf.mxu0  ;;  %v12113_v43 = vld [vmem:[#allocation8_spill] sm:$0xff]  ;;  %v2423_v17 = vadd.f32 %v12118_v25, %v12117_v5 }
 0x255   : > { %12110 = vst [vmem:[#allocation63_spill] sm:$0xff] %v9997_v46  ;;  %v12126_v5 = vld [vmem:[#allocation20_spill] sm:$0xff] }
 0x257   : > { %3812 = vmatmul.bf16.gmra.mxu0 %v9491_v23  ;;  %v8376_v23 = vld [vmem:[%s11933_s5 + $0x58] sm:$0xff] }
 0x258   : > { %5216 = vmatpush.bf16.msra.mxu1 %v8376_v23 }
 0x259   : > { %v2635_v51 = vpop.f32.mrf.mxu2 }
 0x25a   : > { %v2693_v12 = vadd.f32 %v2635_v51, %v9698_v36  ;;  %v2875_v58 = vpop.f32.mrf.mxu3 }
 0x25c   : > { %v10001_v8 = vadd.f32 %v2860_v20, %v2693_v12  ;;  %v10003_v40 = vpop.f32.mrf.mxu0  ;;  %v12116_v20 = vld [vmem:[#allocation18_spill] sm:$0xff] }
 0x25d   : > { %12111 = vst [vmem:[#allocation64_spill] sm:$0xff] %v10003_v40  ;;  %v12123_v40 = vld [vmem:[#allocation11_spill] sm:$0xff] }
 0x25e   : > { %3427 = vmatmul.bf16.vlgmr.msra.gmra.mxu2 %v12112_v56  ;;  %3632 = vmatmul.bf16.gmra.mxu3 %v12113_v43  ;;  %v12122_v43 = vld [vmem:[#allocation21_spill] sm:$0xff] }
 0x261   : > { %v2638_v29 = vpop.f32.mrf.mxu2 }
 0x262   : > { %v2694_v14 = vadd.f32 %v2638_v29, %v9506_v63  ;;  %v2878_v36 = vpop.f32.mrf.mxu3 }
 0x264   : > { %v10008_v61 = vadd.f32 %v2863_v16, %v2694_v14  ;;  %v10010_v24 = vpop.f32.mrf.mxu0  ;;  %v12121_v16 = vld [vmem:[#allocation17_spill] sm:$0xff] }
 0x265   : > { %12115 = vst [vmem:[#allocation8_spill] sm:$0xff] %v10010_v24 }
 0x266   : > { %12114 = vst [vmem:[#allocation16_spill] sm:$0xff] %v10008_v61 }
 0x267   : > { %3817 = vmatmul.bf16.gmra.mxu0 %v12116_v20 }
 0x269   : > { %v2640_v51 = vpop.f32.mrf.mxu2 }
 0x26a   : > { %v2695_v12 = vadd.f32 %v2640_v51, %v2423_v17  ;;  %v2880_v29 = vpop.f32.mrf.mxu3 }
 0x26c   : > { %v10018_v63 = vadd.f32 %v2865_v57, %v2695_v12  ;;  %v10020_v56 = vpop.f32.mrf.mxu0  ;;  %v12127_v57 = vld [vmem:[#allocation22_spill] sm:$0xff] }
 0x26d   : > { %12120 = vst [vmem:[#allocation19_spill] sm:$0xff] %v10020_v56 }
 0x26e   : > { %12119 = vst [vmem:[#allocation18_spill] sm:$0xff] %v10018_v63  ;;  %3432 = vmatmul.bf16.gmra.mxu2 %v12121_v16  ;;  %3637 = vmatmul.bf16.gmra.mxu3 %v12123_v40  ;;  %v8568_v16 = vld [vmem:[#allocation2 + $0x30] sm:$0xff] }
 0x271   : > { %v2643_v14 = vpop.f32.mrf.mxu2 }
 0x272   : > { %v2696_v24 = vadd.f32 %v2643_v14, %v12122_v43  ;;  %v2883_v46 = vpop.f32.mrf.mxu3  ;;  %v12130_v43 = vld [vmem:[#allocation23_spill] sm:$0xff] }
 0x274   : > { %v10025_v23 = vadd.f32 %v2868_v13, %v2696_v24  ;;  %v10027_v20 = vpop.f32.mrf.mxu0  ;;  %v12131_v13 = vld [vmem:[#allocation13_spill] sm:$0xff] }
 0x275   : > { %12125 = vst [vmem:[#allocation17_spill] sm:$0xff] %v10027_v20 }
 0x276   : > { %12124 = vst [vmem:[#allocation14_spill] sm:$0xff] %v10025_v23 }
 0x277   : > { %3822 = vmatmul.bf16.gmra.mxu0 %v12126_v5  ;;  %v8375_v5 = vld [vmem:[%s11933_s5 + $0x50] sm:$0xff] }
 0x278   : > { %5217 = vmatpush.bf16.msra.mxu1 %v8375_v5 }
 0x279   : > { %v2645_v25 = vpop.f32.mrf.mxu2 }
 0x27a   : > { %v2697_v17 = vadd.f32 %v2645_v25, %v12127_v57  ;;  %v2885_v56 = vpop.f32.mrf.mxu3  ;;  %v12134_v57 = vld [vmem:[#allocation24_spill] sm:$0xff] }
 0x27c   : > { %v10031_v51 = vadd.f32 %v2870_v4, %v2697_v17  ;;  %v10033_v12 = vpop.f32.mrf.mxu0 }
 0x27d   : > { %12129 = vst [vmem:[#allocation11_spill] sm:$0xff] %v10033_v12 }
 0x27e   : > { %12128 = vst [vmem:[#allocation21_spill] sm:$0xff] %v10031_v51  ;;  %3437 = vmatmul.bf16.gmra.mxu2 %v8568_v16  ;;  %3642 = vmatmul.bf16.gmra.mxu3 %v12131_v13  ;;  %v10050_v13 = vpop.f32.mrf.mxu1  ;;  %v8570_v51 = vld [vmem:[#allocation2 + $0x48] sm:$0xff] }
 0x281   : > { %v2648_v14 = vpop.f32.mrf.mxu2 }
 0x282   : > { %v2698_v40 = vadd.f32 %v2648_v14, %v12130_v43  ;;  %v2888_v4 = vpop.f32.mrf.mxu3  ;;  %v8569_v43 = vld [vmem:[#allocation2 + $0x3c] sm:$0xff] }
 0x284   : > { %v10037_v24 = vadd.f32 %v2873_v39, %v2698_v40  ;;  %v10039_v20 = vpop.f32.mrf.mxu0 }
 0x285   : > { %12133 = vst [vmem:[#allocation22_spill] sm:$0xff] %v10039_v20  ;;  %v12137_v20 = vld [vmem:[#allocation25_spill] sm:$0xff] }
 0x286   : > { %12132 = vst [vmem:[#allocation20_spill] sm:$0xff] %v10037_v24  ;;  %v12138_v24 = vld [vmem:[#allocation7_spill] sm:$0xff] }
 0x287   : > { %3827 = vmatmul.bf16.gmra.mxu0 %v9574_v35 }
 0x289   : > { %v2650_v25 = vpop.f32.mrf.mxu2 }
 0x28a   : > { %v2699_v17 = vadd.f32 %v2650_v25, %v12134_v57  ;;  %v2890_v39 = vpop.f32.mrf.mxu3  ;;  %v12141_v57 = vld [vmem:[#allocation26_spill] sm:$0xff] }
 0x28c   : > { %v10046_v16 = vadd.f32 %v2875_v58, %v2699_v17  ;;  %v10048_v14 = vpop.f32.mrf.mxu0 }
 0x28d   : > { %12136 = vst [vmem:[#allocation13_spill] sm:$0xff] %v10048_v14  ;;  %v10060_v14 = vpop.f32.mrf.mxu1 }
 0x28e   : > { %12135 = vst [vmem:[#allocation23_spill] sm:$0xff] %v10046_v16  ;;  %3442 = vmatmul.bf16.gmra.mxu2 %v8569_v43  ;;  %3647 = vmatmul.bf16.gmra.mxu3 %v12138_v24  ;;  %v12144_v24 = vld [vmem:[#allocation27_spill] sm:$0xff] }
 0x291   : > { %v2653_v40 = vpop.f32.mrf.mxu2 }
 0x292   : > { %v2700_v12 = vadd.f32 %v2653_v40, %v12137_v20  ;;  %v2893_v25 = vpop.f32.mrf.mxu3 }
 0x294   : > { %v10054_v5 = vadd.f32 %v2878_v36, %v2700_v12  ;;  %v10056_v35 = vpop.f32.mrf.mxu0 }
 0x295   : > { %12140 = vst [vmem:[#allocation25_spill] sm:$0xff] %v10056_v35 }
 0x296   : > { %12139 = vst [vmem:[#allocation24_spill] sm:$0xff] %v10054_v5 }
 0x297   : > { %3832 = vmatmul.bf16.gmra.mxu0 %v9606_v18 }
 0x299   : > { %v2655_v58 = vpop.f32.mrf.mxu2 }
 0x29a   : > { %v2701_v17 = vadd.f32 %v2655_v58, %v12141_v57  ;;  %v2895_v12 = vpop.f32.mrf.mxu3  ;;  %v8374_v58 = vld [vmem:[%s11933_s5 + $0x48] sm:$0xff] }
 0x29b   : > { %5218 = vmatpush.bf16.msra.mxu1 %v8374_v58  ;;  %v12147_v57 = vld [vmem:[#allocation29_spill] sm:$0xff] }
 0x29c   : > { %v10062_v43 = vadd.f32 %v2880_v29, %v2701_v17  ;;  %v10064_v16 = vpop.f32.mrf.mxu0  ;;  %v10075_v29 = vpop.f32.mrf.mxu1 }
 0x29d   : > { %12143 = vst [vmem:[#allocation26_spill] sm:$0xff] %v10064_v16  ;;  %v12150_v16 = vld [vmem:[#allocation30_spill] sm:$0xff] }
 0x29e   : > { %12142 = vst [vmem:[#allocation7_spill] sm:$0xff] %v10062_v43  ;;  %3447 = vmatmul.bf16.gmra.mxu2 %v8570_v51  ;;  %3652 = vmatmul.bf16.gmra.mxu3 %v9164_v11 }
 0x2a1   : > { %v2658_v20 = vpop.f32.mrf.mxu2 }
 0x2a2   : > { %v2702_v36 = vadd.f32 %v2658_v20, %v12144_v24  ;;  %v2898_v11 = vpop.f32.mrf.mxu3 }
 0x2a4   : > { %v10068_v40 = vadd.f32 %v2883_v46, %v2702_v36  ;;  %v10070_v18 = vpop.f32.mrf.mxu0  ;;  %v8571_v46 = vld [vmem:[#allocation2 + $0x54] sm:$0xff]  ;;  %v10083_v36 = vpop.f32.mrf.mxu1 }
 0x2a5   : > { %12146 = vst [vmem:[#allocation65_spill] sm:$0xff] %v10070_v18 }
 0x2a6   : > { %12145 = vst [vmem:[#allocation27_spill] sm:$0xff] %v10068_v40  ;;  %v12156_v40 = vld [vmem:[#allocation28_spill] sm:$0xff] }
 0x2a7   : > { %3837 = vmatmul.bf16.gmra.mxu0 %v9630_v3 }
 0x2a9   : > { %v2660_v51 = vpop.f32.mrf.mxu2 }
 0x2aa   : > { %v2703_v17 = vadd.f32 %v2660_v51, %v12147_v57 }
 0x2ac   : > { %v10079_v20 = vadd.f32 %v2885_v56, %v2703_v17  ;;  %v10081_v24 = vpop.f32.mrf.mxu0  ;;  %v2900_v56 = vpop.f32.mrf.mxu3  ;;  %v12153_v17 = vld [vmem:[#allocation32_spill] sm:$0xff] }
 0x2ad   : > { %12149 = vst [vmem:[#allocation66_spill] sm:$0xff] %v10081_v24  ;;  %v10092_v57 = vpop.f32.mrf.mxu1 }
 0x2ae   : > { %12148 = vst [vmem:[#allocation29_spill] sm:$0xff] %v10079_v20  ;;  %3452 = vmatmul.bf16.gmra.mxu2 %v8571_v46  ;;  %3657 = vmatmul.bf16.gmra.mxu3 %v9237_v0 }
 0x2b1   : > { %v2663_v18 = vpop.f32.mrf.mxu2 }
 0x2b2   : > { %v2704_v35 = vadd.f32 %v2663_v18, %v12150_v16 }
 0x2b4   : > { %v10087_v58 = vadd.f32 %v2888_v4, %v2704_v35  ;;  %v10089_v3 = vpop.f32.mrf.mxu0  ;;  %v3618_v0 = vpop.f32.mrf.mxu3 }
 0x2b5   : > { %12152 = vst [vmem:[#allocation67_spill] sm:$0xff] %v10089_v3  ;;  %v10102_v35 = vpop.f32.mrf.mxu1 }
 0x2b6   : > { %12151 = vst [vmem:[#allocation30_spill] sm:$0xff] %v10087_v58 }
 0x2b7   : > { %3842 = vmatmul.bf16.gmra.mxu0 %v9665_v50 }
 0x2b9   : > { %v2665_v51 = vpop.f32.mrf.mxu2 }
 0x2ba   : > { %v2705_v24 = vadd.f32 %v2665_v51, %v12153_v17 }
 0x2bc   : > { %v10095_v46 = vadd.f32 %v2890_v39, %v2705_v24  ;;  %v10097_v20 = vpop.f32.mrf.mxu0  ;;  %v12158_v39 = vld [vmem:[#allocation35_spill] sm:$0xff]  ;;  %v3620_v17 = vpop.f32.mrf.mxu3 }
 0x2bd   : > { %12155 = vst [vmem:[#allocation68_spill] sm:$0xff] %v10097_v20  ;;  %v10110_v3 = vpop.f32.mrf.mxu1 }
 0x2be   : > { %12154 = vst [vmem:[#allocation32_spill] sm:$0xff] %v10095_v46  ;;  %3457 = vmatmul.bf16.gmra.mxu2 %v12156_v40  ;;  %3662 = vmatmul.bf16.gmra.mxu3 %v9297_v28  ;;  %v12160_v46 = vld [vmem:[#allocation31_spill] sm:$0xff] }
 0x2c1   : > { %v2668_v16 = vpop.f32.mrf.mxu2 }
 0x2c2   : > { %v2706_v4 = vadd.f32 %v2668_v16, %v9712_v52 }
 0x2c4   : > { %v10104_v50 = vadd.f32 %v2893_v25, %v2706_v4  ;;  %v3808_v18 = vpop.f32.mrf.mxu0 }
 0x2c5   : > { %v10125_v4 = vpop.f32.mrf.mxu1 }
 0x2c6   : > { %12157 = vst [vmem:[#allocation28_spill] sm:$0xff] %v10104_v50 }
 0x2c7   : > { %3847 = vmatmul.bf16.gmra.mxu0 %v9691_v7  ;;  %v8373_v7 = vld [vmem:[%s11933_s5 + $0x40] sm:$0xff]  ;;  %12162 = vst [vmem:[#allocation69_spill] sm:$0xff] %v10125_v4 }
 0x2c8   : > { %5219 = vmatpush.bf16.msra.mxu1 %v8373_v7  ;;  %v12167_v7 = vld [vmem:[#allocation37_spill] sm:$0xff] }
 0x2c9   : > { %v2670_v51 = vpop.f32.mrf.mxu2 }
 0x2ca   : > { %v2707_v24 = vadd.f32 %v2670_v51, %v12158_v39  ;;  %v12163_v51 = vld [vmem:[#allocation40_spill] sm:$0xff] }
 0x2cc   : > { %v10108_v20 = vadd.f32 %v2895_v12, %v2707_v24  ;;  %v3810_v40 = vpop.f32.mrf.mxu0  ;;  %v10122_v12 = vpop.f32.mrf.mxu3 }
 0x2ce   : > { %12159 = vst [vmem:[#allocation35_spill] sm:$0xff] %v10108_v20  ;;  %3462 = vmatmul.bf16.gmra.mxu2 %v12160_v46  ;;  %3667 = vmatmul.bf16.gmra.mxu3 %v9355_v59  ;;  %v12165_v59 = vld [vmem:[#allocation34_spill] sm:$0xff] }
 0x2d1   : > { %v2673_v52 = vpop.f32.mrf.mxu2 }
 0x2d2   : > { %v2708_v28 = vadd.f32 %v2673_v52, %v9743_v53  ;;  %v3920_v52 = vld [vmem:[%s11932_s4] sm:$0x1] }
 0x2d3   : > { %v3921_v20 = vunpack.c.l.bf16 %v3920_v52 }
 0x2d4   : > { %v10115_v25 = vadd.f32 %v2898_v11, %v2708_v28  ;;  %v10117_v16 = vpop.f32.mrf.mxu0  ;;  %v3093_v11 = vadd.f32 %v12165_v59, %v9787_v21  ;;  %v12166_v28 = vld [vmem:[#allocation33_spill] sm:$0xff] }
 0x2d6   : > { %12161 = vst [vmem:[#allocation31_spill] sm:$0xff] %v10115_v25  ;;  %v3283_v25 = vadd.f32 %v12167_v7, %v3093_v11  ;;  %v8388_v11 = vld [vmem:[%s11933_s5 + $0xb8] sm:$0xff] }
 0x2d7   : > { %3852 = vmatmul.bf16.gmra.mxu0 %v9727_v60  ;;  %v10138_v60 = vpop.f32.mrf.mxu3  ;;  %5647 = vmatpush.bf16.msrb.mxu3 %v8388_v11  ;;  %v10169_v11 = vld [vmem:[#allocation2 + $0x4] sm:$0xf] }
 0x2d9   : > { %v2675_v46 = vpop.f32.mrf.mxu2 }
 0x2da   : > { %v2709_v53 = vadd.f32 %v2675_v46, %v12163_v51  ;;  %v10141_v46 = vpop.f32.mrf.mxu1  ;;  %v10144_v51 = vperm.slane %v3921_v20, 0  ;;  %v12170_v20 = vld [vmem:[#allocation42_spill] sm:$0xff] }
 0x2db   : > { %12168 = vst [vmem:[#allocation34_spill] sm:$0xff] %v10141_v46  ;;  %v4339_v46 = vld [vmem:[#allocation2 + $0xc] sm:$0xf] }
 0x2dc   : > { %v10128_v39 = vadd.f32 %v2900_v56, %v2709_v53  ;;  %v10132_v24 = vpop.f32.mrf.mxu0  ;;  %v12169_v53 = vld [vmem:[#allocation36_spill] sm:$0xff] }
 0x2dd   : > { %v3094_v59 = vadd.f32 %v12169_v53, %v9809_v48 }
 0x2de   : > { %12164 = vst [vmem:[#allocation40_spill] sm:$0xff] %v10128_v39  ;;  %3467 = vmatmul.bf16.gmra.mxu2 %v12166_v28  ;;  %3672 = vmatmul.bf16.gmra.mxu3 %v12096_v10  ;;  %v8372_v28 = vld [vmem:[%s11933_s5 + $0x38] sm:$0xff] }
 0x2df   : > { %5429 = vmatpush.bf16.msrb.mxu2 %v8372_v28  ;;  %v3284_v48 = vadd.f32 %v12170_v20, %v3094_v59  ;;  %v12173_v28 = vld [vmem:[#allocation38_spill] sm:$0xff]  ;;  %v4451_v59 = vld [vmem:[#allocation2] sm:$0xf]  ;;  %v10173_v20 = vld [vmem:[#allocation2 + $0x8] sm:$0x1] }
 0x2e1   : > { %v3428_v50 = vpop.f32.mrf.mxu2 }
 0x2e2   : > { %v3508_v56 = vadd.f32 %v3428_v50, %v3283_v25  ;;  %v10156_v50 = vpop.f32.mrf.mxu3  ;;  %v10163_v58 = vpop.f32.mrf.mxu1 }
 0x2e3   : > { %12172 = vst [vmem:[#allocation33_spill] sm:$0xff] %v10163_v58 }
 0x2e4   : > { %v3698_v21 = vadd.f32 %v3618_v0, %v3508_v56  ;;  %v10148_v39 = vpop.f32.mrf.mxu0  ;;  %v12171_v56 = vld [vmem:[#allocation39_spill] sm:$0xff] }
 0x2e5   : > { %v3095_v53 = vadd.f32 %v12171_v56, %v9828_v49  ;;  %v4524_v49 = vshrl.u32 %v4451_v59, 16  ;;  %v4543_v56 = vshll.u32 %v10173_v20, 16 }
 0x2e6   : > { %v3888_v52 = vadd.f32 %v3808_v18, %v3698_v21 }
 0x2e7   : > { %3857 = vmatmul.bf16.gmra.mxu0 %v9757_v55  ;;  %v4545_v61 = vrot.slane %v4543_v56, 5 }
 0x2e8   : > { %v3923_v10 = vadd.f32 %v10144_v51, %v3888_v52  ;;  %v3285_v52 = vadd.f32 %v9799_v37, %v3095_v53  ;;  %v8396_v37 = vld [vmem:[%s11933_s5 + $0xf8] sm:$0xff] }
 0x2e9   : > { %v3430_v0 = vpop.f32.mrf.mxu2  ;;  %5872 = vmatpush.bf16.msrb.mxu0 %v8396_v37 }
 0x2ea   : > { %v3955_v25 = vmax.f32 %v3923_v10, 0.0  ;;  %v3509_v7 = vadd.f32 %v3430_v0, %v3284_v48  ;;  %v10171_v10 = vpop.f32.mrf.mxu3  ;;  %v4527_v48 = vshll.u32 %v4451_v59, 16  ;;  %v4533_v0 = vshll.u32 %v10169_v11, 16 }
 0x2ec   : > { %v3987_v43 = vpack.c.bf16 %v3955_v25, %v3955_v25  ;;  %v3699_v18 = vadd.f32 %v3620_v17, %v3509_v7  ;;  %v10165_v21 = vpop.f32.mrf.mxu0  ;;  %v4537_v17 = vshrl.u32 %v10169_v11, 16  ;;  %v4535_v23 = vrot.slane %v4533_v0, 5 }
 0x2ee   : > { %v4020_v5 = vshrl.u32 %v3987_v43, 16  ;;  %v3889_v55 = vadd.f32 %v3810_v40, %v3699_v18  ;;  %3472 = vmatmul.bf16.gmra.mxu2 %v12173_v28  ;;  %v4023_v7 = vshll.u32 %v3987_v43, 16  ;;  %v4526_v18 = vrot.slane %v4524_v49, 4  ;;  %3677 = vmatmul.bf16.gmra.mxu3 %v12102_v30 }
 0x2ef   : > { %v4529_v28 = vrot.slane %v4527_v48, 5  ;;  %v4539_v58 = vrot.slane %v4537_v17, 4 }
 0x2f0   : > { %v4022_v25 = vrot.slane %v4020_v5, 7  ;;  %v3924_v40 = vadd.f32 %v10144_v51, %v3889_v55  ;;  %v12174_v5 = vld [vmem:[#allocation41_spill] sm:$0xff] }
 0x2f1   : > { %v3433_v53 = vpop.f32.mrf.mxu2  ;;  %v3096_v43 = vadd.f32 %v12174_v5, %v9844_v33  ;;  %v4530_v55 = vor.u32 %v4529_v28, %v4526_v18  ;;  %v4540_v62 = vor.u32 %v4539_v58, %v4535_v23  ;;  %v8404_v33 = vld [vmem:[%s11933_s5 + $0x138] sm:$0xff] }
 0x2f2   : > { %v4025_v59 = vor.u32 %v4023_v7, %v4022_v25  ;;  %v3956_v54 = vmax.f32 %v3924_v40, 0.0  ;;  %v3510_v63 = vadd.f32 %v3433_v53, %v3285_v52  ;;  %v10193_v7 = vpop.f32.mrf.mxu1  ;;  %v10196_v40 = vpop.f32.mrf.mxu3  ;;  %6062 = vmatpush.bf16.msrb.mxu1 %v8404_v33 }
 0x2f3   : > { %v4531_v52 = vrot.slane %v4530_v55, 4  ;;  %v4541_v17 = vrot.slane %v4540_v62, 4  ;;  %12176 = vst [vmem:[#allocation37_spill] sm:$0xff] %v10193_v7  ;;  %v4343_v55 = vld [vmem:[#allocation2 + $0x14] sm:$0x1] }
 0x2f4   : > { %v4340_v38 = vsel %vm8787_vm6, %v4025_v59, %v4339_v46  ;;  %v3988_v49 = vpack.c.bf16 %v3956_v54, %v3956_v54  ;;  %v3700_v48 = vadd.f32 %v10122_v12, %v3510_v63  ;;  %v10188_v0 = vpop.f32.mrf.mxu0  ;;  %v12177_v54 = vld [vmem:[#allocation46_spill] sm:$0xff]  ;;  %v4350_v7 = vld [vmem:[#allocation2 + $0x20] sm:$0x1] }
 0x2f5   : > { %4341 = vst [vmem:[#allocation2 + $0xc] sm:$0xf] %v4340_v38  ;;  %v3286_v56 = vadd.f32 %v12177_v54, %v3096_v43  ;;  %v4536_v63 = vsel %vm8806_vm10, %v4531_v52, %v4535_v23  ;;  %v4546_v38 = vsel %vm8806_vm10, %v4541_v17, %v4545_v61  ;;  %v12178_v23 = vld [vmem:[#allocation52_spill] sm:$0xff] }
 0x2f6   : > { %v4028_v58 = vshrl.u32 %v3988_v49, 16  ;;  %v3890_v30 = vadd.f32 %v10117_v16, %v3700_v48  ;;  %v4031_v46 = vshll.u32 %v3988_v49, 16  ;;  %v5100_v37 = vunpack.c.l.b16 %v4536_v63  ;;  %v12179_v48 = vld [vmem:[#allocation44_spill] sm:$0xff] }
 0x2f7   : > { %3862 = vmatmul.bf16.gmra.mxu0 %v9802_v19  ;;  %v5101_v53 = vunpack.c.l.b16 %v4546_v38  ;;  %v4026_v16 = vrot.slane %v4022_v25, 4  ;;  %v3097_v52 = vadd.f32 %v12179_v48, %v12178_v23 }
 0x2f8   : > { %v4030_v62 = vrot.slane %v4028_v58, 7  ;;  %v3925_v12 = vadd.f32 %v10144_v51, %v3890_v30 }
 0x2f9   : > { %v3435_v18 = vpop.f32.mrf.mxu2  ;;  %v5132_v49 = vpack.c.b16 %v5101_v53, %v5100_v37  ;;  %v12184_v53 = vld [vmem:[#allocation49_spill] sm:$0xff] }
 0x2fa   : > { %v4033_v28 = vor.u32 %v4031_v46, %v4030_v62  ;;  %v4035_v59 = vrot.slane %v4030_v62, 4  ;;  %v3957_v5 = vmax.f32 %v3925_v12, 0.0  ;;  %v3511_v43 = vadd.f32 %v3435_v18, %v3286_v56  ;;  %v12182_v56 = vld [vmem:[#allocation43_spill] sm:$0xff]  ;;  %v10216_v63 = vpop.f32.mrf.mxu3  ;;  %v10218_v38 = vpop.f32.mrf.mxu1 }
 0x2fb   : > { %5220 = vmatmul.bf16.vlgmr.msra.gmra.mxu1 %v5132_v49  ;;  %12183 = vst [vmem:[#allocation36_spill] sm:$0xff] %v10218_v38 }
 0x2fc   : > { %v4034_v19 = vsel %vm8822_vm11, %v4026_v16, %v4033_v28  ;;  %v4344_v33 = vsel %vm8683_vm4, %v4035_v59, %v4343_v55  ;;  %v3989_v58 = vpack.c.bf16 %v3957_v5, %v3957_v5  ;;  %v3701_v30 = vadd.f32 %v10138_v60, %v3511_v43  ;;  %v10212_v25 = vpop.f32.mrf.mxu0  ;;  %v12185_v5 = vld [vmem:[#allocation12_spill] sm:$0xff]  ;;  %v12186_v43 = vld [vmem:[#allocation45_spill] sm:$0xff] }
 0x2fd   : > { %4342 = vst [vmem:[#allocation2 + $0x10] sm:$0xf] %v4034_v19  ;;  %v3287_v60 = vadd.f32 %v12184_v53, %v3097_v52  ;;  %v3098_v55 = vadd.f32 %v12186_v43, %v12185_v5  ;;  %v4453_v52 = vld [vmem:[#allocation2 + $0xc] sm:$0xf] }
 0x2fe   : > { %4345 = vst [vmem:[#allocation2 + $0x14] sm:$0x1] %v4344_v33  ;;  %v4037_v46 = vshrl.u32 %v3989_v58, 16  ;;  %v3891_v54 = vadd.f32 %v10132_v24, %v3701_v30  ;;  %3477 = vmatmul.bf16.gmra.mxu2 %v12182_v56  ;;  %v4040_v12 = vshll.u32 %v3989_v58, 16  ;;  %v4346_v24 = vld [vmem:[#allocation2 + $0x18] sm:$0xf]  ;;  %3682 = vmatmul.bf16.gmra.mxu3 %v9497_v47 }
 0x2ff   : > { %v4548_v47 = vshrl.u32 %v4453_v52, 16  ;;  %v4551_v53 = vshll.u32 %v4453_v52, 16 }
 0x300   : > { %v4039_v62 = vrot.slane %v4037_v46, 7  ;;  %v3926_v37 = vadd.f32 %v10144_v51, %v3891_v54  ;;  %v12187_v46 = vld [vmem:[#allocation54_spill] sm:$0xff] }
 0x301   : > { %v3438_v16 = vpop.f32.mrf.mxu2  ;;  %v3288_v54 = vadd.f32 %v12187_v46, %v3098_v55  ;;  %v4550_v5 = vrot.slane %v4548_v47, 4  ;;  %v4553_v55 = vrot.slane %v4551_v53, 5 }
 0x302   : > { %v4042_v18 = vor.u32 %v4040_v12, %v4039_v62  ;;  %v3958_v28 = vmax.f32 %v3926_v37, 0.0  ;;  %v3512_v59 = vadd.f32 %v3438_v16, %v3287_v60  ;;  %v10236_v12 = vpop.f32.mrf.mxu3  ;;  %v4043_v37 = vrot.slane %v4039_v62, 4 }
 0x304   : > { %v4347_v49 = vsel %vm8787_vm6, %v4042_v18, %v4346_v24  ;;  %v3990_v23 = vpack.c.bf16 %v3958_v28, %v3958_v28  ;;  %v3702_v48 = vadd.f32 %v10156_v50, %v3512_v59  ;;  %v10228_v19 = vpop.f32.mrf.mxu0  ;;  %v10230_v33 = vld [vmem:[#allocation2 + $0x10] sm:$0xf] }
 0x305   : > { %4348 = vst [vmem:[#allocation2 + $0x18] sm:$0xf] %v4347_v49  ;;  %v10234_v56 = vld [vmem:[#allocation2 + $0x14] sm:$0x1]  ;;  %v4557_v60 = vshll.u32 %v10230_v33, 16  ;;  %v4561_v16 = vshrl.u32 %v10230_v33, 16  ;;  %v10249_v49 = vpop.f32.mrf.mxu1 }
 0x306   : > { %v4045_v58 = vshrl.u32 %v3990_v23, 16  ;;  %v3892_v30 = vadd.f32 %v10148_v39, %v3702_v48  ;;  %v8371_v50 = vld [vmem:[%s11933_s5 + $0x30] sm:$0xff]  ;;  %v4048_v28 = vshll.u32 %v3990_v23, 16  ;;  %v12188_v23 = vld [vmem:[#allocation48_spill] sm:$0xff] }
 0x307   : > { %3867 = vmatmul.bf16.gmra.mxu0 %v9835_v9  ;;  %v8387_v39 = vld [vmem:[%s11933_s5 + $0xb0] sm:$0xff]  ;;  %5430 = vmatpush.bf16.msrb.mxu2 %v8371_v50  ;;  %v4559_v62 = vrot.slane %v4557_v60, 5  ;;  %v4563_v24 = vrot.slane %v4561_v16, 4  ;;  %v4567_v9 = vshll.u32 %v10234_v56, 16 }
 0x308   : > { %v4047_v18 = vrot.slane %v4045_v58, 7  ;;  %v3927_v59 = vadd.f32 %v10144_v51, %v3892_v30  ;;  %5648 = vmatpush.bf16.msrb.mxu3 %v8387_v39  ;;  %v3099_v58 = vadd.f32 %v12188_v23, %v9906_v1  ;;  %v4554_v30 = vor.u32 %v4553_v55, %v4550_v5  ;;  %v12189_v5 = vld [vmem:[#allocation47_spill] sm:$0xff] }
 0x309   : > { %v3440_v43 = vpop.f32.mrf.mxu2  ;;  %v4564_v47 = vor.u32 %v4563_v24, %v4559_v62 }
 0x30a   : > { %v4050_v48 = vor.u32 %v4048_v28, %v4047_v18  ;;  %v4052_v52 = vrot.slane %v4047_v18, 4  ;;  %v3959_v46 = vmax.f32 %v3927_v59, 0.0  ;;  %v3513_v38 = vadd.f32 %v3440_v43, %v3288_v54  ;;  %v10262_v43 = vpop.f32.mrf.mxu3 }
 0x30b   : > { %v4555_v18 = vrot.slane %v4554_v30, 4  ;;  %v4565_v54 = vrot.slane %v4564_v47, 4  ;;  %v4569_v28 = vrot.slane %v4567_v9, 5 }
 0x30c   : > { %v4051_v50 = vsel %vm8822_vm11, %v4043_v37, %v4050_v48  ;;  %v4351_v53 = vsel %vm8683_vm4, %v4052_v52, %v4350_v7  ;;  %v3991_v60 = vpack.c.bf16 %v3959_v46, %v3959_v46  ;;  %v3703_v16 = vadd.f32 %v10171_v10, %v3513_v38  ;;  %v10258_v39 = vpop.f32.mrf.mxu0  ;;  %v8395_v7 = vld [vmem:[%s11933_s5 + $0xf0] sm:$0xff]  ;;  %v12190_v37 = vld [vmem:[#allocation56_spill] sm:$0xff] }
 0x30d   : > { %4349 = vst [vmem:[#allocation2 + $0x1c] sm:$0xf] %v4051_v50  ;;  %v3289_v10 = vadd.f32 %v12190_v37, %v3099_v58  ;;  %v4560_v38 = vsel %vm8806_vm10, %v4555_v18, %v4559_v62  ;;  %v4570_v55 = vsel %vm8806_vm10, %v4565_v54, %v4569_v28  ;;  %5873 = vmatpush.bf16.msrb.mxu0 %v8395_v7  ;;  %v12191_v50 = vld [vmem:[#allocation50_spill] sm:$0xff]  ;;  %v10278_v62 = vpop.f32.mrf.mxu1 }
 0x30e   : > { %4352 = vst [vmem:[#allocation2 + $0x20] sm:$0x1] %v4351_v53  ;;  %v4054_v59 = vshrl.u32 %v3991_v60, 16  ;;  %v3893_v1 = vadd.f32 %v10165_v21, %v3703_v16  ;;  %3482 = vmatmul.bf16.gmra.mxu2 %v12189_v5  ;;  %v4057_v9 = vshll.u32 %v3991_v60, 16  ;;  %v5103_v48 = vunpack.c.l.b16 %v4570_v55  ;;  %v4353_v53 = vld [vmem:[#allocation2 + $0x24] sm:$0xf]  ;;  %3687 = vmatmul.bf16.gmra.mxu3 %v9965_v45 }
 0x30f   : > { %v5102_v46 = vunpack.c.l.b16 %v4560_v38  ;;  %v3100_v58 = vadd.f32 %v12191_v50, %v9920_v22  ;;  %v12193_v45 = vld [vmem:[#allocation57_spill] sm:$0xff] }
 0x310   : > { %v4056_v24 = vrot.slane %v4054_v59, 7  ;;  %v3928_v21 = vadd.f32 %v10144_v51, %v3893_v1  ;;  %v4455_v59 = vld [vmem:[#allocation2 + $0x18] sm:$0xf] }
 0x311   : > { %v3443_v52 = vpop.f32.mrf.mxu2  ;;  %v10275_v16 = vpack.c.b16 %v5103_v48, %v5102_v46  ;;  %v3290_v7 = vadd.f32 %v12193_v45, %v3100_v58  ;;  %v12194_v45 = vld [vmem:[#allocation53_spill] sm:$0xff] }
 0x312   : > { %v4059_v23 = vor.u32 %v4057_v9, %v4056_v24  ;;  %v3960_v30 = vmax.f32 %v3928_v21, 0.0  ;;  %v3514_v47 = vadd.f32 %v3443_v52, %v3289_v10  ;;  %v4572_v10 = vshrl.u32 %v4455_v59, 16  ;;  %v10295_v38 = vpop.f32.mrf.mxu3 }
 0x313   : > { %12192 = vst [vmem:[#allocation42_spill] sm:$0xff] %v10275_v16  ;;  %5225 = vmatmul.bf16.gmra.mxu1 %v10275_v16  ;;  %v4060_v55 = vrot.slane %v4056_v24, 4  ;;  %v4575_v9 = vshll.u32 %v4455_v59, 16  ;;  %v4357_v59 = vld [vmem:[#allocation2 + $0x2c] sm:$0x1]  ;;  %v3101_v16 = vadd.f32 %v12194_v45, %v9935_v15 }
 0x314   : > { %v4354_v60 = vsel %vm8787_vm6, %v4059_v23, %v4353_v53  ;;  %v3992_v18 = vpack.c.bf16 %v3960_v30, %v3960_v30  ;;  %v3704_v54 = vadd.f32 %v10196_v40, %v3514_v47  ;;  %v10283_v28 = vpop.f32.mrf.mxu0  ;;  %v10286_v22 = vld [vmem:[#allocation2 + $0x1c] sm:$0xf]  ;;  %v8403_v40 = vld [vmem:[%s11933_s5 + $0x130] sm:$0xff]  ;;  %v4574_v23 = vrot.slane %v4572_v10, 4 }
 0x315   : > { %4355 = vst [vmem:[#allocation2 + $0x24] sm:$0xf] %v4354_v60  ;;  %v10290_v37 = vld [vmem:[#allocation2 + $0x20] sm:$0x1]  ;;  %v4581_v21 = vshll.u32 %v10286_v22, 16  ;;  %v4585_v48 = vshrl.u32 %v10286_v22, 16  ;;  %6063 = vmatpush.bf16.msrb.mxu1 %v8403_v40 }
 0x316   : > { %v4062_v1 = vshrl.u32 %v3992_v18, 16  ;;  %v3894_v5 = vadd.f32 %v10188_v0, %v3704_v54  ;;  %v4065_v52 = vshll.u32 %v3992_v18, 16  ;;  %v4577_v47 = vrot.slane %v4575_v9, 5 }
 0x317   : > { %3872 = vmatmul.bf16.gmra.mxu0 %v9882_v6  ;;  %v4583_v50 = vrot.slane %v4581_v21, 5  ;;  %v4587_v58 = vrot.slane %v4585_v48, 4  ;;  %v4591_v53 = vshll.u32 %v10290_v37, 16 }
 0x318   : > { %v4064_v0 = vrot.slane %v4062_v1, 7  ;;  %v3929_v46 = vadd.f32 %v10144_v51, %v3894_v5  ;;  %v4578_v1 = vor.u32 %v4577_v47, %v4574_v23  ;;  %v12195_v23 = vld [vmem:[#allocation51_spill] sm:$0xff] }
 0x319   : > { %v3445_v30 = vpop.f32.mrf.mxu2  ;;  %v4588_v18 = vor.u32 %v4587_v58, %v4583_v50 }
 0x31a   : > { %v4067_v24 = vor.u32 %v4065_v52, %v4064_v0  ;;  %v4069_v60 = vrot.slane %v4064_v0, 4  ;;  %v3961_v6 = vmax.f32 %v3929_v46, 0.0  ;;  %v3515_v54 = vadd.f32 %v3445_v30, %v3290_v7  ;;  %v10311_v52 = vpop.f32.mrf.mxu1 }
 0x31b   : > { %v4579_v48 = vrot.slane %v4578_v1, 4  ;;  %v4589_v7 = vrot.slane %v4588_v18, 4  ;;  %v4593_v0 = vrot.slane %v4591_v53, 5  ;;  %v3291_v30 = vadd.f32 %v10050_v13, %v3101_v16  ;;  %v12196_v1 = vld [vmem:[#allocation55_spill] sm:$0xff]  ;;  %v4360_v13 = vld [vmem:[#allocation2 + $0x30] sm:$0xf] }
 0x31c   : > { %v4068_v5 = vsel %vm8822_vm11, %v4060_v55, %v4067_v24  ;;  %v4358_v10 = vsel %vm8683_vm4, %v4069_v60, %v4357_v59  ;;  %v3993_v40 = vpack.c.bf16 %v3961_v6, %v3961_v6  ;;  %v3705_v9 = vadd.f32 %v10216_v63, %v3515_v54  ;;  %v10309_v21 = vpop.f32.mrf.mxu0  ;;  %v10315_v55 = vpop.f32.mrf.mxu3 }
 0x31d   : > { %4356 = vst [vmem:[#allocation2 + $0x28] sm:$0xf] %v4068_v5  ;;  %v4584_v63 = vsel %vm8806_vm10, %v4579_v48, %v4583_v50  ;;  %v4594_v47 = vsel %vm8806_vm10, %v4589_v7, %v4593_v0  ;;  %v3102_v18 = vadd.f32 %v12196_v1, %v9949_v32 }
 0x31e   : > { %4359 = vst [vmem:[#allocation2 + $0x2c] sm:$0x1] %v4358_v10  ;;  %v4071_v15 = vshrl.u32 %v3993_v40, 16  ;;  %v3895_v46 = vadd.f32 %v10212_v25, %v3705_v9  ;;  %3487 = vmatmul.bf16.gmra.mxu2 %v12195_v23  ;;  %v4074_v53 = vshll.u32 %v3993_v40, 16  ;;  %v5105_v60 = vunpack.c.l.b16 %v4594_v47  ;;  %v4457_v9 = vld [vmem:[#allocation2 + $0x24] sm:$0xf] }
 0x31f   : > { %v5104_v54 = vunpack.c.l.b16 %v4584_v63  ;;  %v3292_v0 = vadd.f32 %v10060_v14, %v3102_v18  ;;  %v12198_v63 = vld [vmem:[#allocation15_spill] sm:$0xff]  ;;  %v4599_v47 = vshll.u32 %v4457_v9, 16  ;;  %v8394_v14 = vld [vmem:[%s11933_s5 + $0xe8] sm:$0xff] }
 0x320   : > { %v4073_v58 = vrot.slane %v4071_v15, 7  ;;  %v3930_v24 = vadd.f32 %v10144_v51, %v3895_v46  ;;  %v4596_v46 = vshrl.u32 %v4457_v9, 16  ;;  %5874 = vmatpush.bf16.msrb.mxu0 %v8394_v14 }
 0x321   : > { %v3448_v6 = vpop.f32.mrf.mxu2  ;;  %v10325_v16 = vpack.c.b16 %v5105_v60, %v5104_v54 }
 0x322   : > { %v4076_v25 = vor.u32 %v4074_v53, %v4073_v58  ;;  %v3962_v59 = vmax.f32 %v3930_v24, 0.0  ;;  %v3516_v45 = vadd.f32 %v3448_v6, %v3291_v30  ;;  %v4077_v30 = vrot.slane %v4073_v58, 4  ;;  %v10353_v60 = vpop.f32.mrf.mxu1 }
 0x323   : > { %12197 = vst [vmem:[#allocation39_spill] sm:$0xff] %v10325_v16  ;;  %5230 = vmatmul.bf16.gmra.mxu1 %v10325_v16  ;;  %v4364_v16 = vld [vmem:[#allocation2 + $0x38] sm:$0x1] }
 0x324   : > { %v4361_v50 = vsel %vm8787_vm6, %v4076_v25, %v4360_v13  ;;  %v3994_v5 = vpack.c.bf16 %v3962_v59, %v3962_v59  ;;  %v3706_v10 = vadd.f32 %v10236_v12, %v3516_v45  ;;  %v10330_v40 = vpop.f32.mrf.mxu0  ;;  %v10333_v48 = vld [vmem:[#allocation2 + $0x28] sm:$0xf]  ;;  %v10339_v23 = vpop.f32.mrf.mxu3  ;;  %12199 = vst [vmem:[#allocation38_spill] sm:$0xff] %v10353_v60  ;;  %v4598_v25 = vrot.slane %v4596_v46, 4 }
 0x325   : > { %4362 = vst [vmem:[#allocation2 + $0x30] sm:$0xf] %v4361_v50  ;;  %v10337_v15 = vld [vmem:[#allocation2 + $0x2c] sm:$0x1]  ;;  %v4605_v53 = vshll.u32 %v10333_v48, 16  ;;  %v4609_v24 = vshrl.u32 %v10333_v48, 16 }
 0x326   : > { %v4079_v7 = vshrl.u32 %v3994_v5, 16  ;;  %v3896_v32 = vadd.f32 %v10228_v19, %v3706_v10  ;;  %v8370_v12 = vld [vmem:[%s11933_s5 + $0x28] sm:$0xff]  ;;  %v4082_v54 = vshll.u32 %v3994_v5, 16  ;;  %v4601_v45 = vrot.slane %v4599_v47, 5 }
 0x327   : > { %3877 = vmatmul.bf16.gmra.mxu0 %v12198_v63  ;;  %v8386_v19 = vld [vmem:[%s11933_s5 + $0xa8] sm:$0xff]  ;;  %5431 = vmatpush.bf16.msrb.mxu2 %v8370_v12  ;;  %v4607_v1 = vrot.slane %v4605_v53, 5  ;;  %v4611_v18 = vrot.slane %v4609_v24, 4  ;;  %v4615_v13 = vshll.u32 %v10337_v15, 16 }
 0x328   : > { %v4081_v6 = vrot.slane %v4079_v7, 7  ;;  %v3931_v58 = vadd.f32 %v10144_v51, %v3896_v32  ;;  %5649 = vmatpush.bf16.msrb.mxu3 %v8386_v19  ;;  %v12200_v7 = vld [vmem:[#allocation9_spill] sm:$0xff]  ;;  %v4602_v60 = vor.u32 %v4601_v45, %v4598_v25  ;;  %v12201_v25 = vld [vmem:[#allocation58_spill] sm:$0xff] }
 0x329   : > { %v3450_v59 = vpop.f32.mrf.mxu2  ;;  %v3103_v5 = vadd.f32 %v12200_v7, %v9961_v34  ;;  %v4612_v32 = vor.u32 %v4611_v18, %v4607_v1  ;;  %v4617_v19 = vrot.slane %v4615_v13, 5  ;;  %v10381_v45 = vld [vmem:[#allocation2 + $0xd4] sm:$0x1]  ;;  %v1458_v18 = vld [vmem:[#allocation2 + $0xcc] sm:$0xe] }
 0x32a   : > { %v4084_v50 = vor.u32 %v4082_v54, %v4081_v6  ;;  %v4086_v10 = vrot.slane %v4081_v6, 4  ;;  %v3963_v9 = vmax.f32 %v3931_v58, 0.0  ;;  %v3517_v63 = vadd.f32 %v3450_v59, %v3292_v0  ;;  %v8572_v54 = vld [vmem:[#allocation2 + $0xb4] sm:$0xff] }
 0x32b   : > { %v4603_v14 = vrot.slane %v4602_v60, 4  ;;  %v4613_v0 = vrot.slane %v4612_v32, 4  ;;  %v3104_v59 = vadd.f32 %v12201_v25, %v9970_v26  ;;  %v8385_v26 = vld [vmem:[%s11933_s5 + $0xa0] sm:$0xff]  ;;  %v7597_v7 = vrot.slane %v1458_v18, 9 }
 0x32c   : > { %v4085_v46 = vsel %vm8822_vm11, %v4077_v30, %v4084_v50  ;;  %v4365_v12 = vsel %vm8683_vm4, %v4086_v10, %v4364_v16  ;;  %v3995_v47 = vpack.c.bf16 %v3963_v9, %v3963_v9  ;;  %v3707_v53 = vadd.f32 %v10262_v43, %v3517_v63  ;;  %v10364_v24 = vpop.f32.mrf.mxu0  ;;  %v8393_v30 = vld [vmem:[%s11933_s5 + $0xe0] sm:$0xff]  ;;  %v10370_v16 = vpop.f32.mrf.mxu3  ;;  %5650 = vmatpush.bf16.msrb.mxu3 %v8385_v26 }
 0x32d   : > { %4363 = vst [vmem:[#allocation2 + $0x34] sm:$0xf] %v4085_v46  ;;  %v3293_v43 = vadd.f32 %v10075_v29, %v3103_v5  ;;  %v4608_v58 = vsel %vm8806_vm10, %v4603_v14, %v4607_v1  ;;  %v4618_v60 = vsel %vm8806_vm10, %v4613_v0, %v4617_v19  ;;  %5875 = vmatpush.bf16.msrb.mxu0 %v8393_v30  ;;  %v8392_v1 = vld [vmem:[%s11933_s5 + $0xd8] sm:$0xff]  ;;  %v3347_v32 = vrot.slane %v10381_v45, 5  ;;  %v10394_v46 = vpop.f32.mrf.mxu1 }
 0x32e   : > { %4366 = vst [vmem:[#allocation2 + $0x38] sm:$0x1] %v4365_v12  ;;  %v4088_v6 = vshrl.u32 %v3995_v47, 16  ;;  %v3897_v34 = vadd.f32 %v10258_v39, %v3707_v53  ;;  %3492 = vmatmul.bf16.gmra.mxu2 %v8572_v54  ;;  %v10379_v39 = vld [vmem:[#allocation2 + $0xd0] sm:$0xf]  ;;  %v4091_v50 = vshll.u32 %v3995_v47, 16  ;;  %v5107_v29 = vunpack.c.l.b16 %v4618_v60 }
 0x32f   : > { %v5106_v63 = vunpack.c.l.b16 %v4608_v58  ;;  %v3344_v5 = vrot.slane %v10379_v39, 5  ;;  %12202 = vst [vmem:[#allocation41_spill] sm:$0xff] %v10394_v46  ;;  %v4367_v0 = vld [vmem:[#allocation2 + $0x3c] sm:$0xf] }
 0x330   : > { %v10383_v13 = vrot.slane %v4088_v6, 7  ;;  %v3932_v10 = vadd.f32 %v10144_v51, %v3897_v34 }
 0x331   : > { %v3453_v9 = vpop.f32.mrf.mxu2  ;;  %v10398_v19 = vpack.c.b16 %v5107_v29, %v5106_v63  ;;  %v3345_v34 = vsel %vm9381_vm14, %v7597_v7, %v3344_v5  ;;  %v3346_v54 = vrot.slane %v3344_v5, 4  ;;  %5876 = vmatpush.bf16.msrb.mxu0 %v8392_v1  ;;  %v4459_v29 = vld [vmem:[#allocation2 + $0x30] sm:$0xf] }
 0x332   : > { %v4093_v12 = vor.u32 %v4091_v50, %v10383_v13  ;;  %v3964_v47 = vmax.f32 %v3932_v10, 0.0  ;;  %v3518_v53 = vadd.f32 %v3453_v9, %v3293_v43  ;;  %v4094_v14 = vrot.slane %v10383_v13, 4  ;;  %v12205_v50 = vld [vmem:[#allocation59_spill] sm:$0xff] }
 0x333   : > { %12203 = vst [vmem:[#allocation4_spill] sm:$0xff] %v10398_v19  ;;  %v3747_v18 = vunpack.c.l.b16 %v3345_v34  ;;  %5235 = vmatmul.bf16.gmra.mxu1 %v10398_v19  ;;  %v3294_v43 = vadd.f32 %v10083_v36, %v3104_v59  ;;  %v3348_v13 = vsel %vm9381_vm14, %v3346_v54, %v3347_v32  ;;  %v3105_v10 = vadd.f32 %v12205_v50, %v9978_v41  ;;  %v8402_v36 = vld [vmem:[%s11933_s5 + $0x128] sm:$0xff]  ;;  %v8391_v59 = vld [vmem:[%s11933_s5 + $0xd0] sm:$0xff] }
 0x334   : > { %v4368_v30 = vsel %vm8787_vm6, %v4093_v12, %v4367_v0  ;;  %v3996_v58 = vpack.c.bf16 %v3964_v47, %v3964_v47  ;;  %v3708_v60 = vadd.f32 %v10295_v38, %v3518_v53  ;;  %v10405_v25 = vpop.f32.mrf.mxu0  ;;  %v10413_v26 = vld [vmem:[#allocation2 + $0x34] sm:$0xf]  ;;  %v3748_v7 = vunpack.c.l.b16 %v3348_v13  ;;  %v10424_v5 = vpop.f32.mrf.mxu3  ;;  %6064 = vmatpush.bf16.msrb.mxu1 %v8402_v36  ;;  %v891_v54 = vld [vmem:[#allocation2 + $0xcc] sm:$0x1] }
 0x335   : > { %4369 = vst [vmem:[#allocation2 + $0x3c] sm:$0xf] %v4368_v30  ;;  %v10416_v1 = vld [vmem:[#allocation2 + $0x38] sm:$0x1]  ;;  %v4620_v41 = vshrl.u32 %v4459_v29, 16  ;;  %v4623_v32 = vshll.u32 %v4459_v29, 16  ;;  %5877 = vmatpush.bf16.msrb.mxu0 %v8391_v59 }
 0x336   : > { %v4096_v9 = vshrl.u32 %v3996_v58, 16  ;;  %v4099_v38 = vshll.u32 %v3996_v58, 16  ;;  %v3898_v63 = vadd.f32 %v10283_v28, %v3708_v60  ;;  %v4629_v12 = vshll.u32 %v10413_v26, 16  ;;  %v8384_v30 = vld [vmem:[%s11933_s5 + $0x98] sm:$0xff]  ;;  %v8383_v36 = vld [vmem:[%s11933_s5 + $0x90] sm:$0xff] }
 0x337   : > { %v4633_v47 = vshrl.u32 %v10413_v26, 16  ;;  %v3749_v0 = vpack.c.b16 %v3748_v7, %v3747_v18  ;;  %v4639_v34 = vshll.u32 %v10416_v1, 16  ;;  %v4622_v60 = vrot.slane %v4620_v41, 4  ;;  %5651 = vmatpush.bf16.msrb.mxu3 %v8384_v30  ;;  %v4371_v59 = vld [vmem:[#allocation2 + $0x44] sm:$0x1] }
 0x338   : > { %v4098_v28 = vrot.slane %v4096_v9, 7  ;;  %v3933_v53 = vadd.f32 %v10144_v51, %v3898_v63  ;;  %v4625_v13 = vrot.slane %v4623_v32, 5  ;;  %v4631_v50 = vrot.slane %v4629_v12, 5  ;;  %v8390_v9 = vld [vmem:[%s11933_s5 + $0xc8] sm:$0xff] }
 0x339   : > { %v3455_v58 = vpop.f32.mrf.mxu2  ;;  %v4635_v29 = vrot.slane %v4633_v47, 4  ;;  %3882 = vmatmul.bf16.gmra.mxu0 %v3749_v0  ;;  %v4641_v32 = vrot.slane %v4639_v34, 5  ;;  %v892_v12 = vsel %vm8683_vm4, 0, %v891_v54  ;;  %v10441_v47 = vpop.f32.mrf.mxu1  ;;  %v3329_v54 = vshrl.u32 %v10379_v39, 16 }
 0x33a   : > { %v4101_v63 = vor.u32 %v4099_v38, %v4098_v28  ;;  %v4103_v18 = vrot.slane %v4098_v28, 4  ;;  %v3965_v7 = vmax.f32 %v3933_v53, 0.0  ;;  %v3519_v19 = vadd.f32 %v3455_v58, %v3294_v43  ;;  %893 = vst [vmem:[#allocation2 + $0xcc] sm:$0x1] %v892_v12  ;;  %5878 = vmatpush.bf16.msrb.mxu0 %v8390_v9 }
 0x33b   : > { %v4626_v46 = vor.u32 %v4625_v13, %v4622_v60  ;;  %v4636_v41 = vor.u32 %v4635_v29, %v4631_v50  ;;  %v3325_v58 = vshll.u32 %v10379_v39, 16  ;;  %v8573_v13 = vld [vmem:[#allocation2 + $0xc0] sm:$0xff]  ;;  %v3295_v29 = vadd.f32 %v10092_v57, %v3105_v10  ;;  %5652 = vmatpush.bf16.msrb.mxu3 %v8383_v36  ;;  %v8368_v36 = vld [vmem:[%s11933_s5 + $0x18] sm:$0xff] }
 0x33c   : > { %v4102_v38 = vsel %vm8822_vm11, %v4094_v14, %v4101_v63  ;;  %v4372_v43 = vsel %vm8683_vm4, %v4103_v18, %v4371_v59  ;;  %v3997_v28 = vpack.c.bf16 %v3965_v7, %v3965_v7  ;;  %v3709_v53 = vadd.f32 %v10315_v55, %v3519_v19  ;;  %v10448_v0 = vpop.f32.mrf.mxu0  ;;  %v8389_v57 = vld [vmem:[%s11933_s5 + $0xc0] sm:$0xff]  ;;  %v10470_v10 = vpop.f32.mrf.mxu3 }
 0x33d   : > { %4370 = vst [vmem:[#allocation2 + $0x40] sm:$0xf] %v4102_v38  ;;  %v4627_v30 = vrot.slane %v4626_v46, 4  ;;  %v4637_v34 = vrot.slane %v4636_v41, 4  ;;  %v3335_v55 = vshll.u32 %v10381_v45, 16  ;;  %v8369_v46 = vld [vmem:[%s11933_s5 + $0x20] sm:$0xff]  ;;  %v3106_v38 = vadd.f32 %v9951_v2, %v9988_v42 }
 0x33e   : > { %4373 = vst [vmem:[#allocation2 + $0x44] sm:$0x1] %v4372_v43  ;;  %v4105_v60 = vshrl.u32 %v3997_v28, 16  ;;  %v3899_v14 = vadd.f32 %v10309_v21, %v3709_v53  ;;  %3497 = vmatmul.bf16.gmra.mxu2 %v8573_v13  ;;  %v10462_v9 = vrot.slane %v3325_v58, 5  ;;  %v3331_v21 = vrot.slane %v3329_v54, 4  ;;  %v8382_v45 = vld [vmem:[%s11933_s5 + $0x88] sm:$0xff]  ;;  %5879 = vmatpush.bf16.msrb.mxu0 %v8389_v57 }
 0x33f   : > { %v4632_v19 = vsel %vm8806_vm10, %v4627_v30, %v4631_v50  ;;  %v4642_v39 = vsel %vm8806_vm10, %v4637_v34, %v4641_v32  ;;  %v4108_v18 = vshll.u32 %v3997_v28, 16  ;;  %5432 = vmatpush.bf16.msrb.mxu2 %v8369_v46  ;;  %v3337_v12 = vrot.slane %v3335_v55, 5  ;;  %5653 = vmatpush.bf16.msrb.mxu3 %v8382_v45  ;;  %v8381_v30 = vld [vmem:[%s11933_s5 + $0x80] sm:$0xff]  ;;  %v4374_v58 = vld [vmem:[#allocation2 + $0x48] sm:$0xf] }
 0x340   : > { %v10472_v63 = vrot.slane %v4105_v60, 7  ;;  %v3934_v50 = vadd.f32 %v10144_v51, %v3899_v14  ;;  %v5109_v7 = vunpack.c.l.b16 %v4642_v39  ;;  %v5108_v41 = vunpack.c.l.b16 %v4632_v19  ;;  %v4461_v57 = vld [vmem:[#allocation2 + $0x3c] sm:$0xf] }
 0x341   : > { %v3458_v59 = vpop.f32.mrf.mxu2  ;;  %v3332_v32 = vor.u32 %v3331_v21, %v10462_v9  ;;  %v1421_v60 = vld [vmem:[#allocation2 + $0xcc] sm:$0xf]  ;;  %v3296_v39 = vadd.f32 %v10102_v35, %v3106_v38  ;;  %v3107_v21 = vadd.f32 %v9963_v31, %v9995_v44  ;;  %v10502_v45 = vpop.f32.mrf.mxu1  ;;  %v4644_v31 = vshrl.u32 %v4461_v57, 16 }
 0x342   : > { %v4110_v43 = vor.u32 %v4108_v18, %v10472_v63  ;;  %v3966_v28 = vmax.f32 %v3934_v50, 0.0  ;;  %v3520_v53 = vadd.f32 %v3458_v59, %v3295_v29  ;;  %v4111_v34 = vrot.slane %v10472_v63, 4  ;;  %v10512_v38 = vld [vmem:[#allocation2 + $0xc] sm:$0xff] }
 0x343   : > { %v10486_v54 = vpack.c.b16 %v5109_v7, %v5108_v41  ;;  %v3333_v14 = vrot.slane %v3332_v32, 4  ;;  %v3316_v55 = vshrl.u32 %v1421_v60, 16  ;;  %5433 = vmatpush.bf16.msrb.mxu2 %v8368_v36  ;;  %v3319_v46 = vshll.u32 %v1421_v60, 16  ;;  %5654 = vmatpush.bf16.msrb.mxu3 %v8381_v30 }
 0x344   : > { %v4375_v2 = vsel %vm8787_vm6, %v4110_v43, %v4374_v58  ;;  %v3998_v42 = vpack.c.bf16 %v3966_v28, %v3966_v28  ;;  %v3710_v13 = vadd.f32 %v10339_v23, %v3520_v53  ;;  %v10491_v29 = vpop.f32.mrf.mxu0  ;;  %v8367_v23 = vld [vmem:[%s11933_s5 + $0x10] sm:$0xff]  ;;  %v10505_v36 = vld [vmem:[#allocation2 + $0x40] sm:$0xf]  ;;  %v4647_v44 = vshll.u32 %v4461_v57, 16  ;;  %v8366_v28 = vld [vmem:[%s11933_s5 + $0x8] sm:$0xff] }
 0x345   : > { %12206 = vst [vmem:[#allocation46_spill] sm:$0xff] %v10486_v54  ;;  %5240 = vmatmul.bf16.gmra.mxu1 %v10486_v54  ;;  %v3338_v19 = vsel %vm8806_vm10, %v3333_v14, %v3337_v12  ;;  %v3318_v7 = vrot.slane %v3316_v55, 4  ;;  %v3321_v59 = vrot.slane %v3319_v46, 5  ;;  %v10509_v41 = vld [vmem:[#allocation2 + $0x44] sm:$0x1]  ;;  %v4653_v43 = vshll.u32 %v10505_v36, 16 }
 0x346   : > { %4376 = vst [vmem:[#allocation2 + $0x48] sm:$0xf] %v4375_v2  ;;  %v4113_v63 = vshrl.u32 %v3998_v42, 16  ;;  %v4116_v18 = vshll.u32 %v3998_v42, 16  ;;  %v3900_v50 = vadd.f32 %v10330_v40, %v3710_v13  ;;  %v10507_v35 = vunpack.c.l.b16 %v3338_v19  ;;  %v10520_v2 = vpop.f32.mrf.mxu3  ;;  %v8274_v19 = vld [vmem:[#allocation2 + $0xcc] sm:$0xff] }
 0x347   : > { %v4657_v40 = vshrl.u32 %v10505_v36, 16  ;;  %5434 = vmatpush.bf16.msrb.mxu2 %v8367_v23  ;;  %v3322_v53 = vor.u32 %v3321_v59, %v3318_v7  ;;  %v4646_v58 = vrot.slane %v4644_v31, 4  ;;  %v4649_v60 = vrot.slane %v4647_v44, 5  ;;  %v4378_v57 = vld [vmem:[#allocation2 + $0x50] sm:$0x1] }
 0x348   : > { %v4115_v32 = vrot.slane %v4113_v63, 7  ;;  %v3935_v12 = vadd.f32 %v10144_v51, %v3900_v50  ;;  %v4663_v14 = vshll.u32 %v10509_v41, 16  ;;  %v4655_v50 = vrot.slane %v4653_v43, 5 }
 0x349   : > { %v3460_v30 = vpop.f32.mrf.mxu2  ;;  %5880 = vmatmul.bf16.vlgmr.msrb.gmra.mxu0 %v10512_v38  ;;  %v3323_v23 = vrot.slane %v3322_v53, 4  ;;  %v4650_v63 = vor.u32 %v4649_v60, %v4646_v58  ;;  %v4659_v54 = vrot.slane %v4657_v40, 4 }
 0x34a   : > { %v4118_v42 = vor.u32 %v4116_v18, %v4115_v32  ;;  %v4120_v13 = vrot.slane %v4115_v32, 4  ;;  %v3967_v55 = vmax.f32 %v3935_v12, 0.0  ;;  %v3521_v46 = vadd.f32 %v3460_v30, %v3296_v39  ;;  %v4505_v39 = vld [vmem:[#allocation2] sm:$0xe] }
 0x34b   : > { %5435 = vmatpush.bf16.msrb.mxu2 %v8366_v28  ;;  %v3328_v32 = vsel %vm8806_vm10, %v3323_v23, %v10462_v9  ;;  %v3297_v12 = vadd.f32 %v10110_v3, %v3107_v21  ;;  %v4651_v43 = vrot.slane %v4650_v63, 4  ;;  %v4660_v40 = vor.u32 %v4659_v54, %v4655_v50  ;;  %v8365_v28 = vld [vmem:[%s11933_s5] sm:$0xff] }
 0x34c   : > { %v4119_v7 = vsel %vm8822_vm11, %v4111_v34, %v4118_v42  ;;  %v4379_v59 = vsel %vm8683_vm4, %v4120_v13, %v4378_v57  ;;  %v3999_v31 = vpack.c.bf16 %v3967_v55, %v3967_v55  ;;  %v3711_v18 = vadd.f32 %v10370_v16, %v3521_v46  ;;  %v10528_v44 = vpop.f32.mrf.mxu0  ;;  %v10539_v13 = vpop.f32.mrf.mxu1 }
 0x34d   : > { %4377 = vst [vmem:[#allocation2 + $0x4c] sm:$0xf] %v4119_v7  ;;  %v3557_v53 = vunpack.c.l.b16 %v3328_v32  ;;  %v4665_v16 = vrot.slane %v4663_v14, 5  ;;  %v4661_v60 = vrot.slane %v4660_v40, 4  ;;  %v7746_v42 = vrot.slane %v4505_v39, 9 }
 0x34e   : > { %4380 = vst [vmem:[#allocation2 + $0x50] sm:$0x1] %v4379_v59  ;;  %v4122_v34 = vshrl.u32 %v3999_v31, 16  ;;  %v3901_v30 = vadd.f32 %v10364_v24, %v3711_v18  ;;  %3502 = vmatmul.bf16.gmra.mxu2 %v8274_v19  ;;  %v4125_v58 = vshll.u32 %v3999_v31, 16  ;;  %v4957_v9 = vrot.slane %v10169_v11, 5  ;;  %v12207_v11 = vld [vmem:[#allocation60_spill] sm:$0xff]  ;;  %v10557_v39 = vpop.f32.mrf.mxu3 }
 0x34f   : > { %v3559_v54 = vpack.c.b16 %v10507_v35, %v3557_v53  ;;  %v4656_v24 = vsel %vm8806_vm10, %v4651_v43, %v4655_v50  ;;  %5436 = vmatpush.bf16.msrb.mxu2 %v8365_v28  ;;  %v4666_v55 = vsel %vm8806_vm10, %v4661_v60, %v4665_v16  ;;  %v4960_v19 = vrot.slane %v10173_v20, 5  ;;  %v4381_v7 = vld [vmem:[#allocation2 + $0x54] sm:$0xf] }
 0x350   : > { %v10541_v3 = vrot.slane %v4122_v34, 7  ;;  %v3936_v21 = vadd.f32 %v10144_v51, %v3901_v30  ;;  %v4959_v46 = vrot.slane %v4957_v9, 4  ;;  %v3108_v57 = vadd.f32 %v12207_v11, %v10001_v8  ;;  %v12209_v34 = vld [vmem:[#allocation69_spill] sm:$0xff] }
 0x351   : > { %v3463_v14 = vpop.f32.mrf.mxu2  ;;  %3692 = vmatmul.bf16.gmra.mxu3 %v3559_v54  ;;  %v5110_v59 = vunpack.c.l.b16 %v4656_v24  ;;  %v5111_v31 = vunpack.c.l.b16 %v4666_v55  ;;  %v4958_v50 = vsel %vm9381_vm14, %v7746_v42, %v4957_v9  ;;  %v4463_v30 = vld [vmem:[#allocation2 + $0x48] sm:$0xf] }
 0x352   : > { %v4127_v23 = vor.u32 %v4125_v58, %v10541_v3  ;;  %v3968_v35 = vmax.f32 %v3936_v21, 0.0  ;;  %v3522_v63 = vadd.f32 %v3463_v14, %v3297_v12  ;;  %v4961_v18 = vsel %vm9381_vm14, %v4959_v46, %v4960_v19  ;;  %v10580_v46 = vld [vmem:[#allocation2 + $0x18] sm:$0xff] }
 0x353   : > { %v4128_v20 = vrot.slane %v10541_v3, 4  ;;  %v10565_v40 = vpack.c.b16 %v5111_v31, %v5110_v59  ;;  %v3298_v53 = vadd.f32 %v12209_v34, %v3108_v57  ;;  %v5535_v60 = vunpack.c.l.b16 %v4958_v50  ;;  %v12211_v34 = vld [vmem:[#allocation61_spill] sm:$0xff] }
 0x354   : > { %v4382_v8 = vsel %vm8787_vm6, %v4127_v23, %v4381_v7  ;;  %v4000_v32 = vpack.c.bf16 %v3968_v35, %v3968_v35  ;;  %v3712_v43 = vadd.f32 %v10424_v5, %v3522_v63  ;;  %v10563_v12 = vpop.f32.mrf.mxu0  ;;  %v10568_v16 = vld [vmem:[#allocation2 + $0x4c] sm:$0xf]  ;;  %v5536_v42 = vunpack.c.l.b16 %v4961_v18  ;;  %v8401_v5 = vld [vmem:[%s11933_s5 + $0x120] sm:$0xff]  ;;  %v10583_v7 = vpop.f32.mrf.mxu1 }
 0x355   : > { %4383 = vst [vmem:[#allocation2 + $0x54] sm:$0xf] %v4382_v8  ;;  %v10571_v9 = vld [vmem:[#allocation2 + $0x50] sm:$0x1]  ;;  %5245 = vmatmul.bf16.gmra.mxu1 %v10565_v40  ;;  %v4668_v3 = vshrl.u32 %v4463_v30, 16  ;;  %v4671_v54 = vshll.u32 %v4463_v30, 16 }
 0x356   : > { %12208 = vst [vmem:[#allocation52_spill] sm:$0xff] %v10565_v40  ;;  %v4130_v28 = vshrl.u32 %v4000_v32, 16  ;;  %v3902_v58 = vadd.f32 %v10405_v25, %v3712_v43  ;;  %v4677_v21 = vshll.u32 %v10568_v16, 16  ;;  %v4681_v24 = vshrl.u32 %v10568_v16, 16  ;;  %6065 = vmatpush.bf16.msrb.mxu1 %v8401_v5  ;;  %v8347_v8 = vld [vmem:[#allocation2] sm:$0xff] }
 0x357   : > { %v4133_v55 = vshll.u32 %v4000_v32, 16  ;;  %v4687_v19 = vshll.u32 %v10571_v9, 16  ;;  %v4670_v57 = vrot.slane %v4668_v3, 4  ;;  %v4673_v23 = vrot.slane %v4671_v54, 5  ;;  %v4385_v32 = vld [vmem:[#allocation2 + $0x5c] sm:$0x1] }
 0x358   : > { %v4132_v14 = vrot.slane %v4130_v28, 7  ;;  %v3937_v25 = vadd.f32 %v10144_v51, %v3902_v58  ;;  %v4679_v35 = vrot.slane %v4677_v21, 5  ;;  %v4683_v63 = vrot.slane %v4681_v24, 4  ;;  %v12210_v43 = vld [vmem:[#allocation16_spill] sm:$0xff] }
 0x359   : > { %v3465_v11 = vpop.f32.mrf.mxu2  ;;  %5885 = vmatmul.bf16.gmra.mxu0 %v10580_v46  ;;  %v3109_v30 = vadd.f32 %v12211_v34, %v12210_v43  ;;  %v4674_v28 = vor.u32 %v4673_v23, %v4670_v57  ;;  %v5567_v57 = vpack.c.b16 %v5536_v42, %v5535_v60  ;;  %v4506_v43 = vld [vmem:[#allocation2 + $0xc] sm:$0xe] }
 0x35a   : > { %v4135_v59 = vor.u32 %v4133_v55, %v4132_v14  ;;  %v4137_v31 = vrot.slane %v4132_v14, 4  ;;  %v3969_v50 = vmax.f32 %v3937_v25, 0.0  ;;  %v3523_v18 = vadd.f32 %v3465_v11, %v3298_v53  ;;  %v10595_v25 = vpop.f32.mrf.mxu3 }
 0x35b   : > { %v4684_v58 = vor.u32 %v4683_v63, %v4679_v35  ;;  %v4675_v53 = vrot.slane %v4674_v28, 4  ;;  %v4689_v55 = vrot.slane %v4687_v19, 5  ;;  %v12212_v63 = vld [vmem:[#allocation34_spill] sm:$0xff] }
 0x35c   : > { %v4136_v5 = vsel %vm8822_vm11, %v4128_v20, %v4135_v59  ;;  %v4386_v3 = vsel %vm8683_vm4, %v4137_v31, %v4385_v32  ;;  %v4001_v54 = vpack.c.bf16 %v3969_v50, %v3969_v50  ;;  %v3713_v21 = vadd.f32 %v10470_v10, %v3523_v18  ;;  %v10593_v24 = vpop.f32.mrf.mxu0 }
 0x35d   : > { %4384 = vst [vmem:[#allocation2 + $0x58] sm:$0xf] %v4136_v5  ;;  %v4685_v14 = vrot.slane %v4684_v58, 4  ;;  %v4964_v20 = vrot.slane %v10230_v33, 5  ;;  %v3299_v59 = vadd.f32 %v12212_v63, %v3109_v30  ;;  %v4680_v10 = vsel %vm8806_vm10, %v4675_v53, %v4679_v35  ;;  %v4388_v35 = vld [vmem:[#allocation2 + $0x60] sm:$0xf] }
 0x35e   : > { %4387 = vst [vmem:[#allocation2 + $0x5c] sm:$0x1] %v4386_v3  ;;  %v4139_v11 = vshrl.u32 %v4001_v54, 16  ;;  %v3903_v23 = vadd.f32 %v10448_v0, %v3713_v21  ;;  %5437 = vmatmul.bf16.vlgmr.msrb.gmra.mxu2 %v8347_v8  ;;  %v4142_v19 = vshll.u32 %v4001_v54, 16  ;;  %v5112_v42 = vunpack.c.l.b16 %v4680_v10  ;;  %v12213_v0 = vld [vmem:[#allocation18_spill] sm:$0xff]  ;;  %v10609_v21 = vpop.f32.mrf.mxu1 }
 0x35f   : > { %v4690_v31 = vsel %vm8806_vm10, %v4685_v14, %v4689_v55  ;;  %v12214_v8 = vld [vmem:[#allocation62_spill] sm:$0xff]  ;;  %v4966_v58 = vrot.slane %v4964_v20, 4  ;;  %v7747_v3 = vrot.slane %v4506_v43, 9  ;;  %v4967_v55 = vrot.slane %v10234_v56, 5 }
 0x360   : > { %v4141_v50 = vrot.slane %v4139_v11, 7  ;;  %v3938_v18 = vadd.f32 %v10144_v51, %v3903_v23  ;;  %v5113_v32 = vunpack.c.l.b16 %v4690_v31  ;;  %v3110_v34 = vadd.f32 %v12214_v8, %v12213_v0  ;;  %v12216_v23 = vld [vmem:[#allocation33_spill] sm:$0xff] }
 0x361   : > { %v3468_v60 = vpop.f32.mrf.mxu2  ;;  %5655 = vmatmul.bf16.vlgmr.msrb.gmra.mxu3 %v5567_v57  ;;  %v4965_v57 = vsel %vm9381_vm14, %v7747_v3, %v4964_v20 }
 0x362   : > { %v4144_v33 = vor.u32 %v4142_v19, %v4141_v50  ;;  %v3970_v30 = vmax.f32 %v3938_v18, 0.0  ;;  %v3524_v28 = vadd.f32 %v3468_v60, %v3299_v59  ;;  %v10607_v5 = vpack.c.b16 %v5113_v32, %v5112_v42  ;;  %v4465_v59 = vld [vmem:[#allocation2 + $0x54] sm:$0xf]  ;;  %v10628_v43 = vpop.f32.mrf.mxu3 }
 0x363   : > { %v3300_v63 = vadd.f32 %v12216_v23, %v3110_v34  ;;  %v4968_v18 = vsel %vm9381_vm14, %v4966_v58, %v4967_v55  ;;  %v4692_v56 = vshrl.u32 %v4465_v59, 16  ;;  %v4145_v32 = vrot.slane %v4141_v50, 4  ;;  %v10633_v34 = vld [vmem:[#allocation2 + $0x24] sm:$0xff] }
 0x364   : > { %12215 = vst [vmem:[#allocation44_spill] sm:$0xff] %v10607_v5  ;;  %v4389_v54 = vsel %vm8787_vm6, %v4144_v33, %v4388_v35  ;;  %v4002_v53 = vpack.c.bf16 %v3970_v30, %v3970_v30  ;;  %v3714_v14 = vadd.f32 %v10520_v2, %v3524_v28  ;;  %v10615_v11 = vpop.f32.mrf.mxu0  ;;  %v10620_v10 = vld [vmem:[#allocation2 + $0x58] sm:$0xf]  ;;  %v4695_v20 = vshll.u32 %v4465_v59, 16  ;;  %v4392_v23 = vld [vmem:[#allocation2 + $0x68] sm:$0x1] }
 0x365   : > { %4390 = vst [vmem:[#allocation2 + $0x60] sm:$0xf] %v4389_v54  ;;  %v10625_v2 = vld [vmem:[#allocation2 + $0x5c] sm:$0x1]  ;;  %5250 = vmatmul.bf16.gmra.mxu1 %v10607_v5  ;;  %v4701_v60 = vshll.u32 %v10620_v10, 16  ;;  %v4705_v42 = vshrl.u32 %v10620_v10, 16  ;;  %v5538_v59 = vunpack.c.l.b16 %v4968_v18 }
 0x366   : > { %v4147_v31 = vshrl.u32 %v4002_v53, 16  ;;  %v3904_v19 = vadd.f32 %v10491_v29, %v3714_v14  ;;  %v4150_v8 = vshll.u32 %v4002_v53, 16  ;;  %v4694_v33 = vrot.slane %v4692_v56, 4  ;;  %v12217_v53 = vld [vmem:[#allocation14_spill] sm:$0xff] }
 0x367   : > { %v4697_v28 = vrot.slane %v4695_v20, 5  ;;  %v4703_v58 = vrot.slane %v4701_v60, 5  ;;  %v4707_v50 = vrot.slane %v4705_v42, 4  ;;  %v4711_v35 = vshll.u32 %v10625_v2, 16 }
 0x368   : > { %v4149_v0 = vrot.slane %v4147_v31, 7  ;;  %v3939_v29 = vadd.f32 %v10144_v51, %v3904_v19  ;;  %v12218_v31 = vld [vmem:[#allocation63_spill] sm:$0xff] }
 0x369   : > { %v3470_v30 = vpop.f32.mrf.mxu2  ;;  %5890 = vmatmul.bf16.gmra.mxu0 %v10633_v34  ;;  %v3111_v19 = vadd.f32 %v12218_v31, %v12217_v53  ;;  %v4698_v5 = vor.u32 %v4697_v28, %v4694_v33  ;;  %v4708_v40 = vor.u32 %v4707_v50, %v4703_v58 }
 0x36a   : > { %v4152_v3 = vor.u32 %v4150_v8, %v4149_v0  ;;  %v4154_v54 = vrot.slane %v4149_v0, 4  ;;  %v3971_v14 = vmax.f32 %v3939_v29, 0.0  ;;  %v3525_v55 = vadd.f32 %v3470_v30, %v3300_v63  ;;  %v10646_v30 = vpop.f32.mrf.mxu1 }
 0x36b   : > { %v5537_v63 = vunpack.c.l.b16 %v4965_v57  ;;  %v4699_v8 = vrot.slane %v4698_v5, 4  ;;  %v4709_v18 = vrot.slane %v4708_v40, 4  ;;  %v4713_v29 = vrot.slane %v4711_v35, 5 }
 0x36c   : > { %v4153_v56 = vsel %vm8822_vm11, %v4145_v32, %v4152_v3  ;;  %v4393_v20 = vsel %vm8683_vm4, %v4154_v54, %v4392_v23  ;;  %v4003_v60 = vpack.c.bf16 %v3971_v14, %v3971_v14  ;;  %v3715_v42 = vadd.f32 %v10557_v39, %v3525_v55  ;;  %v10644_v0 = vpop.f32.mrf.mxu0  ;;  %v12220_v39 = vld [vmem:[#allocation37_spill] sm:$0xff]  ;;  %v4507_v14 = vld [vmem:[#allocation2 + $0x18] sm:$0xe] }
 0x36d   : > { %4391 = vst [vmem:[#allocation2 + $0x64] sm:$0xf] %v4153_v56  ;;  %v4971_v32 = vrot.slane %v10286_v22, 5  ;;  %v10651_v50 = vpack.c.b16 %v5538_v59, %v5537_v63  ;;  %v3301_v3 = vadd.f32 %v12220_v39, %v3111_v19  ;;  %v4704_v57 = vsel %vm8806_vm10, %v4699_v8, %v4703_v58  ;;  %v10661_v22 = vpop.f32.mrf.mxu3  ;;  %v12221_v23 = vld [vmem:[#allocation21_spill] sm:$0xff]  ;;  %v12222_v59 = vld [vmem:[#allocation64_spill] sm:$0xff] }
 0x36e   : > { %4394 = vst [vmem:[#allocation2 + $0x68] sm:$0x1] %v4393_v20  ;;  %v4156_v33 = vshrl.u32 %v4003_v60, 16  ;;  %v3905_v28 = vadd.f32 %v10528_v44, %v3715_v42  ;;  %5442 = vmatmul.bf16.gmra.mxu2 %v10512_v38  ;;  %v4714_v40 = vsel %vm8806_vm10, %v4709_v18, %v4713_v29  ;;  %v4159_v35 = vshll.u32 %v4003_v60, 16  ;;  %v4395_v20 = vld [vmem:[#allocation2 + $0x6c] sm:$0xf] }
 0x36f   : > { %12219 = vst [vmem:[#allocation6_spill] sm:$0xff] %v10651_v50  ;;  %v5115_v44 = vunpack.c.l.b16 %v4714_v40  ;;  %v5114_v55 = vunpack.c.l.b16 %v4704_v57  ;;  %v3112_v53 = vadd.f32 %v12222_v59, %v12221_v23  ;;  %v4973_v56 = vrot.slane %v4971_v32, 4  ;;  %v12224_v39 = vld [vmem:[#allocation36_spill] sm:$0xff] }
 0x370   : > { %v10658_v5 = vrot.slane %v4156_v33, 7  ;;  %v3940_v54 = vadd.f32 %v10144_v51, %v3905_v28  ;;  %v7748_v42 = vrot.slane %v4507_v14, 9  ;;  %v4974_v29 = vrot.slane %v10290_v37, 5  ;;  %v4467_v57 = vld [vmem:[#allocation2 + $0x60] sm:$0xf]  ;;  %v8400_v14 = vld [vmem:[%s11933_s5 + $0x118] sm:$0xff] }
 0x371   : > { %v3473_v38 = vpop.f32.mrf.mxu2  ;;  %5660 = vmatmul.bf16.gmra.mxu3 %v10651_v50  ;;  %v10667_v60 = vpack.c.b16 %v5115_v44, %v5114_v55  ;;  %v4716_v37 = vshrl.u32 %v4467_v57, 16  ;;  %6066 = vmatpush.bf16.msrb.mxu1 %v8400_v14  ;;  %v12227_v50 = vld [vmem:[#allocation8_spill] sm:$0xff] }
 0x372   : > { %v4161_v31 = vor.u32 %v4159_v35, %v10658_v5  ;;  %v3972_v58 = vmax.f32 %v3940_v54, 0.0  ;;  %v3526_v19 = vadd.f32 %v3473_v38, %v3301_v3  ;;  %v4972_v28 = vsel %vm9381_vm14, %v7748_v42, %v4971_v32 }
 0x373   : > { %12223 = vst [vmem:[#allocation3_spill] sm:$0xff] %v10667_v60  ;;  %v3302_v3 = vadd.f32 %v12224_v39, %v3112_v53  ;;  %v4975_v44 = vsel %vm9381_vm14, %v4973_v56, %v4974_v29  ;;  %v4162_v32 = vrot.slane %v10658_v5, 4  ;;  %v4719_v38 = vshll.u32 %v4467_v57, 16 }
 0x374   : > { %v4396_v63 = vsel %vm8787_vm6, %v4161_v31, %v4395_v20  ;;  %v4004_v8 = vpack.c.bf16 %v3972_v58, %v3972_v58  ;;  %v3716_v18 = vadd.f32 %v10595_v25, %v3526_v19  ;;  %v10673_v33 = vpop.f32.mrf.mxu0  ;;  %v10678_v40 = vld [vmem:[#allocation2 + $0x64] sm:$0xf]  ;;  %v10695_v58 = vld [vmem:[#allocation2 + $0x30] sm:$0xff]  ;;  %v4718_v19 = vrot.slane %v4716_v37, 4 }
 0x375   : > { %4397 = vst [vmem:[#allocation2 + $0x6c] sm:$0xf] %v4396_v63  ;;  %v10683_v25 = vld [vmem:[#allocation2 + $0x68] sm:$0x1]  ;;  %5255 = vmatmul.bf16.gmra.mxu1 %v10667_v60  ;;  %v4725_v55 = vshll.u32 %v10678_v40, 16  ;;  %v4729_v23 = vshrl.u32 %v10678_v40, 16  ;;  %v10699_v60 = vpop.f32.mrf.mxu3 }
 0x376   : > { %v4164_v35 = vshrl.u32 %v4004_v8, 16  ;;  %v3906_v54 = vadd.f32 %v10563_v12, %v3716_v18  ;;  %v10692_v12 = vpop.f32.mrf.mxu1  ;;  %v4167_v53 = vshll.u32 %v4004_v8, 16  ;;  %v4721_v20 = vrot.slane %v4719_v38, 5 }
 0x377   : > { %12225 = vst [vmem:[#allocation43_spill] sm:$0xff] %v10692_v12  ;;  %v4727_v5 = vrot.slane %v4725_v55, 5  ;;  %v4731_v42 = vrot.slane %v4729_v23, 4  ;;  %v4735_v63 = vshll.u32 %v10683_v25, 16  ;;  %v5540_v8 = vunpack.c.l.b16 %v4975_v44 }
 0x378   : > { %v4166_v59 = vrot.slane %v4164_v35, 7  ;;  %v3941_v31 = vadd.f32 %v10144_v51, %v3906_v54  ;;  %v4399_v35 = vld [vmem:[#allocation2 + $0x74] sm:$0x1]  ;;  %v12226_v54 = vld [vmem:[#allocation20_spill] sm:$0xff]  ;;  %v4722_v14 = vor.u32 %v4721_v20, %v4718_v19  ;;  %v5539_v44 = vunpack.c.l.b16 %v4972_v28 }
 0x379   : > { %v3475_v56 = vpop.f32.mrf.mxu2  ;;  %5895 = vmatmul.bf16.gmra.mxu0 %v10695_v58  ;;  %v3113_v37 = vadd.f32 %v12227_v50, %v12226_v54  ;;  %v4732_v12 = vor.u32 %v4731_v42, %v4727_v5 }
 0x37a   : > { %v4169_v18 = vor.u32 %v4167_v53, %v4166_v59  ;;  %v4171_v29 = vrot.slane %v4166_v59, 4  ;;  %v3973_v39 = vmax.f32 %v3941_v31, 0.0  ;;  %v3527_v57 = vadd.f32 %v3475_v56, %v3302_v3 }
 0x37b   : > { %v4723_v53 = vrot.slane %v4722_v14, 4  ;;  %v4733_v31 = vrot.slane %v4732_v12, 4  ;;  %v4737_v56 = vrot.slane %v4735_v63, 5  ;;  %v10713_v20 = vpack.c.b16 %v5540_v8, %v5539_v44  ;;  %v4402_v14 = vld [vmem:[#allocation2 + $0x78] sm:$0xf] }
 0x37c   : > { %v4170_v38 = vsel %vm8822_vm11, %v4162_v32, %v4169_v18  ;;  %v4400_v55 = vsel %vm8683_vm4, %v4171_v29, %v4399_v35  ;;  %v4005_v23 = vpack.c.bf16 %v3973_v39, %v3973_v39  ;;  %v3717_v3 = vadd.f32 %v10628_v43, %v3527_v57  ;;  %v10708_v59 = vpop.f32.mrf.mxu0  ;;  %v12229_v57 = vld [vmem:[#allocation23_spill] sm:$0xff] }
 0x37d   : > { %4398 = vst [vmem:[#allocation2 + $0x70] sm:$0xf] %v4170_v38  ;;  %v4978_v32 = vrot.slane %v10333_v48, 5  ;;  %v3303_v42 = vadd.f32 %v10249_v49, %v3113_v37  ;;  %v4728_v43 = vsel %vm8806_vm10, %v4723_v53, %v4727_v5  ;;  %v4738_v28 = vsel %vm8806_vm10, %v4733_v31, %v4737_v56  ;;  %v12230_v35 = vld [vmem:[#allocation19_spill] sm:$0xff] }
 0x37e   : > { %4401 = vst [vmem:[#allocation2 + $0x74] sm:$0x1] %v4400_v55  ;;  %v4173_v50 = vshrl.u32 %v4005_v23, 16  ;;  %v3907_v19 = vadd.f32 %v10593_v24, %v3717_v3  ;;  %5447 = vmatmul.bf16.gmra.mxu2 %v10580_v46  ;;  %v4176_v63 = vshll.u32 %v4005_v23, 16  ;;  %v10720_v18 = vpop.f32.mrf.mxu1  ;;  %v5117_v29 = vunpack.c.l.b16 %v4738_v28  ;;  %v4508_v46 = vld [vmem:[#allocation2 + $0x24] sm:$0xe] }
 0x37f   : > { %12228 = vst [vmem:[#allocation49_spill] sm:$0xff] %v10713_v20  ;;  %v5116_v48 = vunpack.c.l.b16 %v4728_v43  ;;  %v3114_v8 = vadd.f32 %v12230_v35, %v12229_v57  ;;  %v4980_v37 = vrot.slane %v4978_v32, 4  ;;  %v7749_v55 = vrot.slane %v4508_v46, 9  ;;  %v10750_v35 = vld [vmem:[#allocation2 + $0x3c] sm:$0xff] }
 0x380   : > { %v4175_v12 = vrot.slane %v4173_v50, 7  ;;  %v3942_v24 = vadd.f32 %v10144_v51, %v3907_v19  ;;  %v4981_v53 = vrot.slane %v10337_v15, 5  ;;  %v10736_v50 = vpop.f32.mrf.mxu3 }
 0x381   : > { %v3478_v39 = vpop.f32.mrf.mxu2  ;;  %5665 = vmatmul.bf16.gmra.mxu3 %v10713_v20  ;;  %v10726_v38 = vpack.c.b16 %v5117_v29, %v5116_v48  ;;  %v4979_v56 = vsel %vm9381_vm14, %v7749_v55, %v4978_v32  ;;  %v3304_v19 = vadd.f32 %v10278_v62, %v3114_v8 }
 0x382   : > { %v4178_v49 = vor.u32 %v4176_v63, %v4175_v12  ;;  %v3974_v5 = vmax.f32 %v3942_v24, 0.0  ;;  %v3528_v54 = vadd.f32 %v3478_v39, %v3303_v42  ;;  %v4469_v42 = vld [vmem:[#allocation2 + $0x6c] sm:$0xf]  ;;  %v4179_v29 = vrot.slane %v4175_v12, 4 }
 0x383   : > { %12231 = vst [vmem:[#allocation12_spill] sm:$0xff] %v10726_v38  ;;  %v4740_v24 = vshrl.u32 %v4469_v42, 16  ;;  %v4743_v32 = vshll.u32 %v4469_v42, 16  ;;  %v12232_v42 = vld [vmem:[#allocation24_spill] sm:$0xff] }
 0x384   : > { %v4403_v23 = vsel %vm8787_vm6, %v4178_v49, %v4402_v14  ;;  %v4006_v3 = vpack.c.bf16 %v3974_v5, %v3974_v5  ;;  %v3718_v44 = vadd.f32 %v10661_v22, %v3528_v54  ;;  %v10732_v31 = vpop.f32.mrf.mxu0  ;;  %v10739_v43 = vld [vmem:[#allocation2 + $0x70] sm:$0xf]  ;;  %v4982_v22 = vsel %vm9381_vm14, %v4980_v37, %v4981_v53 }
 0x385   : > { %4404 = vst [vmem:[#allocation2 + $0x78] sm:$0xf] %v4403_v23  ;;  %v10744_v15 = vld [vmem:[#allocation2 + $0x74] sm:$0x1]  ;;  %5260 = vmatmul.bf16.gmra.mxu1 %v10726_v38  ;;  %v4749_v46 = vshll.u32 %v10739_v43, 16  ;;  %v4753_v62 = vshrl.u32 %v10739_v43, 16  ;;  %v5542_v53 = vunpack.c.l.b16 %v4982_v22 }
 0x386   : > { %v4181_v28 = vshrl.u32 %v4006_v3, 16  ;;  %v3908_v63 = vadd.f32 %v10615_v11, %v3718_v44  ;;  %v4184_v48 = vshll.u32 %v4006_v3, 16  ;;  %v4742_v11 = vrot.slane %v4740_v24, 4  ;;  %v10753_v55 = vpop.f32.mrf.mxu1  ;;  %v4406_v3 = vld [vmem:[#allocation2 + $0x80] sm:$0x1] }
 0x387   : > { %v4745_v49 = vrot.slane %v4743_v32, 5  ;;  %v4751_v5 = vrot.slane %v4749_v46, 5  ;;  %v4755_v54 = vrot.slane %v4753_v62, 4  ;;  %v4759_v12 = vshll.u32 %v10744_v15, 16 }
 0x388   : > { %v4183_v39 = vrot.slane %v4181_v28, 7  ;;  %v3943_v57 = vadd.f32 %v10144_v51, %v3908_v63  ;;  %v12233_v28 = vld [vmem:[#allocation17_spill] sm:$0xff] }
 0x389   : > { %v3480_v8 = vpop.f32.mrf.mxu2  ;;  %5900 = vmatmul.bf16.gmra.mxu0 %v10750_v35  ;;  %v3115_v63 = vadd.f32 %v12233_v28, %v12232_v42  ;;  %v4746_v24 = vor.u32 %v4745_v49, %v4742_v11  ;;  %v4756_v38 = vor.u32 %v4755_v54, %v4751_v5  ;;  %v10770_v54 = vpop.f32.mrf.mxu3 }
 0x38a   : > { %v4186_v37 = vor.u32 %v4184_v48, %v4183_v39  ;;  %v4188_v14 = vrot.slane %v4183_v39, 4  ;;  %v3975_v23 = vmax.f32 %v3943_v57, 0.0  ;;  %v3529_v44 = vadd.f32 %v3480_v8, %v3304_v19 }
 0x38b   : > { %v5541_v19 = vunpack.c.l.b16 %v4979_v56  ;;  %v4747_v57 = vrot.slane %v4746_v24, 4  ;;  %v4757_v22 = vrot.slane %v4756_v38, 4  ;;  %v4761_v8 = vrot.slane %v4759_v12, 5 }
 0x38c   : > { %v4187_v32 = vsel %vm8822_vm11, %v4179_v29, %v4186_v37  ;;  %v4407_v46 = vsel %vm8683_vm4, %v4188_v14, %v4406_v3  ;;  %v4007_v62 = vpack.c.bf16 %v3975_v23, %v3975_v23  ;;  %v3719_v39 = vadd.f32 %v10699_v60, %v3529_v44  ;;  %v10763_v48 = vpop.f32.mrf.mxu0  ;;  %v4509_v14 = vld [vmem:[#allocation2 + $0x30] sm:$0xe]  ;;  %v12235_v44 = vld [vmem:[#allocation7_spill] sm:$0xff] }
 0x38d   : > { %4405 = vst [vmem:[#allocation2 + $0x7c] sm:$0xf] %v4187_v32  ;;  %v4985_v29 = vrot.slane %v10413_v26, 5  ;;  %v10768_v49 = vpack.c.b16 %v5542_v53, %v5541_v19  ;;  %v3305_v60 = vadd.f32 %v10311_v52, %v3115_v63  ;;  %v4752_v56 = vsel %vm8806_vm10, %v4747_v57, %v4751_v5  ;;  %v12236_v3 = vld [vmem:[#allocation11_spill] sm:$0xff]  ;;  %v4409_v32 = vld [vmem:[#allocation2 + $0x84] sm:$0xf] }
 0x38e   : > { %4408 = vst [vmem:[#allocation2 + $0x80] sm:$0x1] %v4407_v46  ;;  %v4190_v42 = vshrl.u32 %v4007_v62, 16  ;;  %v3909_v11 = vadd.f32 %v10644_v0, %v3719_v39  ;;  %5452 = vmatmul.bf16.gmra.mxu2 %v10633_v34  ;;  %v4762_v38 = vsel %vm8806_vm10, %v4757_v22, %v4761_v8  ;;  %v4193_v37 = vshll.u32 %v4007_v62, 16 }
 0x38f   : > { %12234 = vst [vmem:[#allocation45_spill] sm:$0xff] %v10768_v49  ;;  %v5119_v34 = vunpack.c.l.b16 %v4762_v38  ;;  %v5118_v23 = vunpack.c.l.b16 %v4752_v56  ;;  %v3116_v53 = vadd.f32 %v12236_v3, %v12235_v44  ;;  %v4987_v24 = vrot.slane %v4985_v29, 4  ;;  %v4471_v56 = vld [vmem:[#allocation2 + $0x78] sm:$0xf] }
 0x390   : > { %v10777_v12 = vrot.slane %v4190_v42, 7  ;;  %v3944_v0 = vadd.f32 %v10144_v51, %v3909_v11  ;;  %v10784_v28 = vpop.f32.mrf.mxu1  ;;  %v7750_v62 = vrot.slane %v4509_v14, 9  ;;  %v4988_v22 = vrot.slane %v10416_v1, 5  ;;  %v12238_v11 = vld [vmem:[#allocation38_spill] sm:$0xff] }
 0x391   : > { %v3483_v26 = vpop.f32.mrf.mxu2  ;;  %5670 = vmatmul.bf16.gmra.mxu3 %v10768_v49  ;;  %v10786_v46 = vpack.c.b16 %v5119_v34, %v5118_v23  ;;  %v4764_v1 = vshrl.u32 %v4471_v56, 16  ;;  %v8399_v14 = vld [vmem:[%s11933_s5 + $0x110] sm:$0xff] }
 0x392   : > { %v4195_v52 = vor.u32 %v4193_v37, %v10777_v12  ;;  %v3976_v5 = vmax.f32 %v3944_v0, 0.0  ;;  %v3530_v63 = vadd.f32 %v3483_v26, %v3305_v60  ;;  %v4986_v42 = vsel %vm9381_vm14, %v7750_v62, %v4985_v29  ;;  %6067 = vmatpush.bf16.msrb.mxu1 %v8399_v14 }
 0x393   : > { %12237 = vst [vmem:[#allocation54_spill] sm:$0xff] %v10786_v46  ;;  %v3306_v60 = vadd.f32 %v12238_v11, %v3116_v53  ;;  %v4989_v34 = vsel %vm9381_vm14, %v4987_v24, %v4988_v22  ;;  %v4196_v29 = vrot.slane %v10777_v12, 4  ;;  %v4767_v26 = vshll.u32 %v4471_v56, 16 }
 0x394   : > { %v4410_v39 = vsel %vm8787_vm6, %v4195_v52, %v4409_v32  ;;  %v4008_v19 = vpack.c.bf16 %v3976_v5, %v3976_v5  ;;  %v3720_v57 = vadd.f32 %v10736_v50, %v3530_v63  ;;  %v10792_v8 = vpop.f32.mrf.mxu0  ;;  %v10797_v38 = vld [vmem:[#allocation2 + $0x7c] sm:$0xf]  ;;  %v10812_v52 = vld [vmem:[#allocation2 + $0x48] sm:$0xff]  ;;  %v4766_v5 = vrot.slane %v4764_v1, 4  ;;  %v3678_v63 = vpop.f32.mrf.mxu3  ;;  %v12240_v1 = vld [vmem:[#allocation22_spill] sm:$0xff] }
 0x395   : > { %4411 = vst [vmem:[#allocation2 + $0x84] sm:$0xf] %v4410_v39  ;;  %v10802_v50 = vld [vmem:[#allocation2 + $0x80] sm:$0x1]  ;;  %5265 = vmatmul.bf16.gmra.mxu1 %v10786_v46  ;;  %v4773_v23 = vshll.u32 %v10797_v38, 16  ;;  %v4777_v44 = vshrl.u32 %v10797_v38, 16 }
 0x396   : > { %v4198_v37 = vshrl.u32 %v4008_v19, 16  ;;  %v3910_v0 = vadd.f32 %v10673_v33, %v3720_v57  ;;  %v4201_v3 = vshll.u32 %v4008_v19, 16  ;;  %v4769_v32 = vrot.slane %v4767_v26, 5  ;;  %v4413_v19 = vld [vmem:[#allocation2 + $0x8c] sm:$0x1]  ;;  %v12239_v46 = vld [vmem:[#allocation27_spill] sm:$0xff] }
 0x397   : > { %v4775_v62 = vrot.slane %v4773_v23, 5  ;;  %v4779_v12 = vrot.slane %v4777_v44, 4  ;;  %v4783_v39 = vshll.u32 %v10802_v50, 16  ;;  %v3117_v14 = vadd.f32 %v12240_v1, %v12239_v46 }
 0x398   : > { %v4200_v33 = vrot.slane %v4198_v37, 7  ;;  %v3945_v53 = vadd.f32 %v10144_v51, %v3910_v0  ;;  %v10815_v56 = vpop.f32.mrf.mxu1  ;;  %v5544_v0 = vunpack.c.l.b16 %v4989_v34  ;;  %v4770_v49 = vor.u32 %v4769_v32, %v4766_v5 }
 0x399   : > { %v3485_v24 = vpop.f32.mrf.mxu2  ;;  %5905 = vmatmul.bf16.gmra.mxu0 %v10812_v52  ;;  %v4780_v20 = vor.u32 %v4779_v12, %v4775_v62  ;;  %v12242_v12 = vld [vmem:[#allocation41_spill] sm:$0xff]  ;;  %v5027_v17 = vrot.slane %v10797_v38, 5 }
 0x39a   : > { %v4203_v57 = vor.u32 %v4201_v3, %v4200_v33  ;;  %v4205_v22 = vrot.slane %v4200_v33, 4  ;;  %v3977_v11 = vmax.f32 %v3945_v53, 0.0  ;;  %v3531_v37 = vadd.f32 %v3485_v24, %v3306_v60 }
 0x39b   : > { %v5543_v60 = vunpack.c.l.b16 %v4986_v42  ;;  %v4771_v53 = vrot.slane %v4770_v49, 4  ;;  %v4781_v34 = vrot.slane %v4780_v20, 4  ;;  %v4785_v24 = vrot.slane %v4783_v39, 5 }
 0x39c   : > { %v4204_v26 = vsel %vm8822_vm11, %v4196_v29, %v4203_v57  ;;  %v4414_v23 = vsel %vm8683_vm4, %v4205_v22, %v4413_v19  ;;  %v4009_v44 = vpack.c.bf16 %v3977_v11, %v3977_v11  ;;  %v3721_v33 = vadd.f32 %v10770_v54, %v3531_v37  ;;  %v10825_v3 = vpop.f32.mrf.mxu0  ;;  %v12243_v37 = vld [vmem:[#allocation29_spill] sm:$0xff] }
 0x39d   : > { %4412 = vst [vmem:[#allocation2 + $0x88] sm:$0xf] %v4204_v26  ;;  %v4992_v29 = vrot.slane %v10505_v36, 5  ;;  %v10830_v32 = vpack.c.b16 %v5544_v0, %v5543_v60  ;;  %v3307_v57 = vadd.f32 %v12242_v12, %v3117_v14  ;;  %v4776_v54 = vsel %vm8806_vm10, %v4771_v53, %v4775_v62  ;;  %v12244_v36 = vld [vmem:[#allocation13_spill] sm:$0xff] }
 0x39e   : > { %4415 = vst [vmem:[#allocation2 + $0x8c] sm:$0x1] %v4414_v23  ;;  %v4207_v46 = vshrl.u32 %v4009_v44, 16  ;;  %v3911_v5 = vadd.f32 %v10708_v59, %v3721_v33  ;;  %5457 = vmatmul.bf16.gmra.mxu2 %v10695_v58  ;;  %v4786_v49 = vsel %vm8806_vm10, %v4781_v34, %v4785_v24  ;;  %v4210_v42 = vshll.u32 %v4009_v44, 16  ;;  %v4510_v59 = vld [vmem:[#allocation2 + $0x3c] sm:$0xe]  ;;  %v3680_v33 = vpop.f32.mrf.mxu3 }
 0x39f   : > { %12241 = vst [vmem:[#allocation48_spill] sm:$0xff] %v10830_v32  ;;  %v5121_v22 = vunpack.c.l.b16 %v4786_v49  ;;  %v5120_v58 = vunpack.c.l.b16 %v4776_v54  ;;  %v3118_v19 = vadd.f32 %v12244_v36, %v12243_v37  ;;  %v4994_v26 = vrot.slane %v4992_v29, 4  ;;  %v4416_v23 = vld [vmem:[#allocation2 + $0x90] sm:$0xf]  ;;  %v4473_v54 = vld [vmem:[#allocation2 + $0x84] sm:$0xf] }
 0x3a0   : > { %v4209_v20 = vrot.slane %v4207_v46, 7  ;;  %v3946_v39 = vadd.f32 %v10144_v51, %v3911_v5  ;;  %v10841_v14 = vpop.f32.mrf.mxu1  ;;  %v7751_v60 = vrot.slane %v4510_v59, 9  ;;  %v4995_v46 = vrot.slane %v10509_v41, 5 }
 0x3a1   : > { %v3488_v11 = vpop.f32.mrf.mxu2  ;;  %5675 = vmatmul.bf16.gmra.mxu3 %v10830_v32  ;;  %v10843_v44 = vpack.c.b16 %v5121_v22, %v5120_v58  ;;  %v4788_v41 = vshrl.u32 %v4473_v54, 16 }
 0x3a2   : > { %v4212_v0 = vor.u32 %v4210_v42, %v4209_v20  ;;  %v3978_v1 = vmax.f32 %v3946_v39, 0.0  ;;  %v3532_v62 = vadd.f32 %v3488_v11, %v3307_v57  ;;  %v4993_v12 = vsel %vm9381_vm14, %v7751_v60, %v4992_v29 }
 0x3a3   : > { %12245 = vst [vmem:[#allocation47_spill] sm:$0xff] %v10843_v44  ;;  %v3308_v57 = vadd.f32 %v10441_v47, %v3118_v19  ;;  %v4996_v22 = vsel %vm9381_vm14, %v4994_v26, %v4995_v46  ;;  %v4213_v59 = vrot.slane %v4209_v20, 4  ;;  %v4791_v11 = vshll.u32 %v4473_v54, 16  ;;  %v10864_v19 = vld [vmem:[#allocation2 + $0x54] sm:$0xff] }
 0x3a4   : > { %v4417_v53 = vsel %vm8787_vm6, %v4212_v0, %v4416_v23  ;;  %v4010_v34 = vpack.c.bf16 %v3978_v1, %v3978_v1  ;;  %v3722_v24 = vadd.f32 %v3678_v63, %v3532_v62  ;;  %v10848_v5 = vpop.f32.mrf.mxu0  ;;  %v10853_v49 = vld [vmem:[#allocation2 + $0x88] sm:$0xf]  ;;  %v5546_v54 = vunpack.c.l.b16 %v4996_v22 }
 0x3a5   : > { %4418 = vst [vmem:[#allocation2 + $0x90] sm:$0xf] %v4417_v53  ;;  %v10858_v63 = vld [vmem:[#allocation2 + $0x8c] sm:$0x1]  ;;  %5270 = vmatmul.bf16.gmra.mxu1 %v10843_v44  ;;  %v4797_v29 = vshll.u32 %v10853_v49, 16  ;;  %v4801_v47 = vshrl.u32 %v10853_v49, 16 }
 0x3a6   : > { %v4215_v42 = vshrl.u32 %v4010_v34, 16  ;;  %v3912_v39 = vadd.f32 %v10732_v31, %v3722_v24  ;;  %v4218_v37 = vshll.u32 %v4010_v34, 16  ;;  %v4790_v31 = vrot.slane %v4788_v41, 4  ;;  %v4420_v34 = vld [vmem:[#allocation2 + $0x98] sm:$0x1] }
 0x3a7   : > { %v4793_v1 = vrot.slane %v4791_v11, 5  ;;  %v4799_v62 = vrot.slane %v4797_v29, 5  ;;  %v4803_v26 = vrot.slane %v4801_v47, 4  ;;  %v4807_v20 = vshll.u32 %v10858_v63, 16 }
 0x3a8   : > { %v4217_v58 = vrot.slane %v4215_v42, 7  ;;  %v3947_v36 = vadd.f32 %v10144_v51, %v3912_v39  ;;  %v10867_v24 = vpop.f32.mrf.mxu1  ;;  %v12247_v42 = vld [vmem:[#allocation30_spill] sm:$0xff]  ;;  %v12248_v39 = vld [vmem:[#allocation25_spill] sm:$0xff] }
 0x3a9   : > { %v3490_v0 = vpop.f32.mrf.mxu2  ;;  %12246 = vst [vmem:[#allocation56_spill] sm:$0xff] %v10867_v24  ;;  %5910 = vmatmul.bf16.gmra.mxu0 %v10864_v19  ;;  %v3119_v44 = vadd.f32 %v12248_v39, %v12247_v42  ;;  %v4794_v41 = vor.u32 %v4793_v1, %v4790_v31  ;;  %v4804_v32 = vor.u32 %v4803_v26, %v4799_v62  ;;  %v4809_v24 = vrot.slane %v4807_v20, 5  ;;  %v4423_v39 = vld [vmem:[#allocation2 + $0x9c] sm:$0xf] }
 0x3aa   : > { %v4220_v23 = vor.u32 %v4218_v37, %v4217_v58  ;;  %v4222_v60 = vrot.slane %v4217_v58, 4  ;;  %v3979_v53 = vmax.f32 %v3947_v36, 0.0  ;;  %v3533_v46 = vadd.f32 %v3490_v0, %v3308_v57  ;;  %v3683_v57 = vpop.f32.mrf.mxu3 }
 0x3ab   : > { %v5545_v37 = vunpack.c.l.b16 %v4993_v12  ;;  %v4795_v36 = vrot.slane %v4794_v41, 4  ;;  %v4805_v0 = vrot.slane %v4804_v32, 4 }
 0x3ac   : > { %v4221_v11 = vsel %vm8822_vm11, %v4213_v59, %v4220_v23  ;;  %v4421_v29 = vsel %vm8683_vm4, %v4222_v60, %v4420_v34  ;;  %v4011_v47 = vpack.c.bf16 %v3979_v53, %v3979_v53  ;;  %v3723_v58 = vadd.f32 %v3680_v33, %v3533_v46  ;;  %v10876_v22 = vpop.f32.mrf.mxu0  ;;  %v4511_v60 = vld [vmem:[#allocation2 + $0x48] sm:$0xe]  ;;  %v12250_v46 = vld [vmem:[#allocation26_spill] sm:$0xff] }
 0x3ad   : > { %4419 = vst [vmem:[#allocation2 + $0x94] sm:$0xf] %v4221_v11  ;;  %v4999_v59 = vrot.slane %v10568_v16, 5  ;;  %v10881_v1 = vpack.c.b16 %v5546_v54, %v5545_v37  ;;  %v3309_v33 = vadd.f32 %v10502_v45, %v3119_v44  ;;  %v4800_v12 = vsel %vm8806_vm10, %v4795_v36, %v4799_v62  ;;  %v12249_v16 = vld [vmem:[#allocation32_spill] sm:$0xff] }
 0x3ae   : > { %4422 = vst [vmem:[#allocation2 + $0x98] sm:$0x1] %v4421_v29  ;;  %v4224_v42 = vshrl.u32 %v4011_v47, 16  ;;  %v3913_v31 = vadd.f32 %v10763_v48, %v3723_v58  ;;  %5462 = vmatmul.bf16.gmra.mxu2 %v10750_v35  ;;  %v4810_v32 = vsel %vm8806_vm10, %v4805_v0, %v4809_v24  ;;  %v4227_v20 = vshll.u32 %v4011_v47, 16 }
 0x3af   : > { %v5123_v48 = vunpack.c.l.b16 %v4810_v32  ;;  %v5122_v53 = vunpack.c.l.b16 %v4800_v12  ;;  %v3120_v34 = vadd.f32 %v12250_v46, %v12249_v16  ;;  %v5001_v54 = vrot.slane %v4999_v59, 4  ;;  %v4475_v12 = vld [vmem:[#allocation2 + $0x90] sm:$0xf] }
 0x3b0   : > { %v10888_v26 = vrot.slane %v4224_v42, 7  ;;  %v3948_v23 = vadd.f32 %v10144_v51, %v3913_v31  ;;  %v10895_v62 = vpop.f32.mrf.mxu1  ;;  %v7752_v11 = vrot.slane %v4511_v60, 9  ;;  %v5002_v37 = vrot.slane %v10571_v9, 5  ;;  %v12252_v42 = vld [vmem:[#allocation28_spill] sm:$0xff]  ;;  %v12253_v31 = vld [vmem:[#allocation65_spill] sm:$0xff] }
 0x3b1   : > { %v3493_v35 = vpop.f32.mrf.mxu2  ;;  %5680 = vmatmul.bf16.gmra.mxu3 %v10881_v1  ;;  %v10897_v41 = vpack.c.b16 %v5123_v48, %v5122_v53  ;;  %v3310_v0 = vadd.f32 %v10539_v13, %v3120_v34  ;;  %v4812_v9 = vshrl.u32 %v4475_v12, 16  ;;  %v4815_v53 = vshll.u32 %v4475_v12, 16 }
 0x3b2   : > { %v4229_v45 = vor.u32 %v4227_v20, %v10888_v26  ;;  %v3980_v44 = vmax.f32 %v3948_v23, 0.0  ;;  %v3534_v24 = vadd.f32 %v3493_v35, %v3309_v33  ;;  %v5000_v36 = vsel %vm9381_vm14, %v7752_v11, %v4999_v59  ;;  %v8398_v59 = vld [vmem:[%s11933_s5 + $0x108] sm:$0xff]  ;;  %v3685_v60 = vpop.f32.mrf.mxu3 }
 0x3b3   : > { %12251 = vst [vmem:[#allocation50_spill] sm:$0xff] %v10897_v41  ;;  %v3121_v33 = vadd.f32 %v12253_v31, %v12252_v42  ;;  %v4230_v13 = vrot.slane %v10888_v26, 4  ;;  %6068 = vmatpush.bf16.msrb.mxu1 %v8398_v59  ;;  %v4817_v26 = vrot.slane %v4815_v53, 5 }
 0x3b4   : > { %v4424_v29 = vsel %vm8787_vm6, %v4229_v45, %v4423_v39  ;;  %v4012_v47 = vpack.c.bf16 %v3980_v44, %v3980_v44  ;;  %v3724_v58 = vadd.f32 %v3683_v57, %v3534_v24  ;;  %v10907_v32 = vld [vmem:[#allocation2 + $0x94] sm:$0xf]  ;;  %v5003_v57 = vsel %vm9381_vm14, %v5001_v54, %v5002_v37  ;;  %v10924_v44 = vld [vmem:[#allocation2 + $0x60] sm:$0xff] }
 0x3b5   : > { %4425 = vst [vmem:[#allocation2 + $0x9c] sm:$0xf] %v4424_v29  ;;  %v10912_v48 = vld [vmem:[#allocation2 + $0x98] sm:$0x1]  ;;  %5275 = vmatmul.bf16.gmra.mxu1 %v10897_v41  ;;  %v4825_v16 = vshrl.u32 %v10907_v32, 16  ;;  %v4814_v24 = vrot.slane %v4812_v9, 4 }
 0x3b6   : > { %v4232_v20 = vshrl.u32 %v4012_v47, 16  ;;  %v3914_v23 = vadd.f32 %v10792_v8, %v3724_v58  ;;  %v10919_v35 = vpop.f32.mrf.mxu0  ;;  %v4821_v8 = vshll.u32 %v10907_v32, 16  ;;  %v4235_v34 = vshll.u32 %v4012_v47, 16  ;;  %v4427_v47 = vld [vmem:[#allocation2 + $0xa4] sm:$0x1]  ;;  %v11124_v38 = vld [vmem:[#allocation2 + $0x90] sm:$0xff] }
 0x3b7   : > { %v4827_v11 = vrot.slane %v4825_v16, 4  ;;  %v4831_v29 = vshll.u32 %v10912_v48, 16  ;;  %v5006_v9 = vrot.slane %v10620_v10, 5  ;;  %v3311_v10 = vadd.f32 %v10583_v7, %v3121_v33  ;;  %12270 = vst [vmem:[#allocation69_spill] sm:$0xff] %v11124_v38 }
 0x3b8   : > { %v4234_v46 = vrot.slane %v4232_v20, 7  ;;  %v3949_v45 = vadd.f32 %v10144_v51, %v3914_v23  ;;  %v4823_v39 = vrot.slane %v4821_v8, 5  ;;  %v10927_v31 = vpop.f32.mrf.mxu1  ;;  %v5548_v20 = vunpack.c.l.b16 %v5003_v57 }
 0x3b9   : > { %v3495_v54 = vpop.f32.mrf.mxu2  ;;  %5915 = vmatmul.bf16.gmra.mxu0 %v10924_v44  ;;  %v4818_v23 = vor.u32 %v4817_v26, %v4814_v24 }
 0x3ba   : > { %v4237_v58 = vor.u32 %v4235_v34, %v4234_v46  ;;  %v4239_v37 = vrot.slane %v4234_v46, 4  ;;  %v3981_v42 = vmax.f32 %v3949_v45, 0.0  ;;  %v3535_v12 = vadd.f32 %v3495_v54, %v3310_v0 }
 0x3bb   : > { %v4828_v41 = vor.u32 %v4827_v11, %v4823_v39  ;;  %v5547_v46 = vunpack.c.l.b16 %v5000_v36  ;;  %v4819_v34 = vrot.slane %v4818_v23, 4  ;;  %v4833_v45 = vrot.slane %v4831_v29, 5 }
 0x3bc   : > { %v4238_v59 = vsel %vm8822_vm11, %v4230_v13, %v4237_v58  ;;  %v4428_v53 = vsel %vm8683_vm4, %v4239_v37, %v4427_v47  ;;  %v4013_v8 = vpack.c.bf16 %v3981_v42, %v3981_v42  ;;  %v3725_v16 = vadd.f32 %v3685_v60, %v3535_v12  ;;  %v3688_v58 = vpop.f32.mrf.mxu3  ;;  %v4512_v12 = vld [vmem:[#allocation2 + $0x54] sm:$0xe] }
 0x3bd   : > { %4426 = vst [vmem:[#allocation2 + $0xa0] sm:$0xf] %v4238_v59  ;;  %v4829_v0 = vrot.slane %v4828_v41, 4  ;;  %v10938_v24 = vpack.c.b16 %v5548_v20, %v5547_v46  ;;  %v4824_v13 = vsel %vm8806_vm10, %v4819_v34, %v4823_v39  ;;  %v5008_v41 = vrot.slane %v5006_v9, 4  ;;  %v4430_v20 = vld [vmem:[#allocation2 + $0xa8] sm:$0xf] }
 0x3be   : > { %4429 = vst [vmem:[#allocation2 + $0xa4] sm:$0x1] %v4428_v53  ;;  %v4241_v54 = vshrl.u32 %v4013_v8, 16  ;;  %v3915_v57 = vadd.f32 %v10825_v3, %v3725_v16  ;;  %5467 = vmatmul.bf16.gmra.mxu2 %v10812_v52  ;;  %v10944_v36 = vpop.f32.mrf.mxu0  ;;  %v4244_v11 = vshll.u32 %v4013_v8, 16  ;;  %v5124_v37 = vunpack.c.l.b16 %v4824_v13  ;;  %v12256_v59 = vld [vmem:[#allocation35_spill] sm:$0xff]  ;;  %v12257_v53 = vld [vmem:[#allocation66_spill] sm:$0xff] }
 0x3bf   : > { %12254 = vst [vmem:[#allocation57_spill] sm:$0xff] %v10938_v24  ;;  %v4834_v60 = vsel %vm8806_vm10, %v4829_v0, %v4833_v45  ;;  %v5009_v47 = vrot.slane %v10625_v2, 5  ;;  %v3122_v8 = vadd.f32 %v12257_v53, %v12256_v59  ;;  %v7753_v45 = vrot.slane %v4512_v12, 9 }
 0x3c0   : > { %v4243_v26 = vrot.slane %v4241_v54, 7  ;;  %v3950_v29 = vadd.f32 %v10144_v51, %v3915_v57  ;;  %v5125_v3 = vunpack.c.l.b16 %v4834_v60 }
 0x3c1   : > { %v3498_v52 = vpop.f32.mrf.mxu2  ;;  %5685 = vmatmul.bf16.gmra.mxu3 %v10938_v24  ;;  %v5010_v0 = vsel %vm9381_vm14, %v5008_v41, %v5009_v47  ;;  %v3312_v60 = vadd.f32 %v10609_v21, %v3122_v8  ;;  %v4477_v41 = vld [vmem:[#allocation2 + $0x9c] sm:$0xf] }
 0x3c2   : > { %v4246_v7 = vor.u32 %v4244_v11, %v4243_v26  ;;  %v3982_v33 = vmax.f32 %v3950_v29, 0.0  ;;  %v10948_v42 = vpop.f32.mrf.mxu1  ;;  %v3536_v39 = vadd.f32 %v3498_v52, %v3311_v10  ;;  %v10951_v23 = vpack.c.b16 %v5125_v3, %v5124_v37  ;;  %v12258_v29 = vld [vmem:[#allocation31_spill] sm:$0xff] }
 0x3c3   : > { %v5007_v10 = vsel %vm9381_vm14, %v7753_v45, %v5006_v9  ;;  %v5550_v13 = vunpack.c.l.b16 %v5010_v0  ;;  %v12259_v3 = vld [vmem:[#allocation67_spill] sm:$0xff]  ;;  %v4839_v9 = vshll.u32 %v4477_v41, 16  ;;  %v4247_v12 = vrot.slane %v4243_v26, 4  ;;  %v4434_v0 = vld [vmem:[#allocation2 + $0xb0] sm:$0x1] }
 0x3c4   : > { %12255 = vst [vmem:[#allocation53_spill] sm:$0xff] %v10951_v23  ;;  %v4431_v16 = vsel %vm8787_vm6, %v4246_v7, %v4430_v20  ;;  %v4014_v46 = vpack.c.bf16 %v3982_v33, %v3982_v33  ;;  %v3726_v34 = vadd.f32 %v3688_v58, %v3536_v39  ;;  %v3123_v58 = vadd.f32 %v12259_v3, %v12258_v29  ;;  %v10968_v52 = vld [vmem:[#allocation2 + $0xa0] sm:$0xf]  ;;  %v10973_v33 = vld [vmem:[#allocation2 + $0x6c] sm:$0xff]  ;;  %v3690_v45 = vpop.f32.mrf.mxu3 }
 0x3c5   : > { %4432 = vst [vmem:[#allocation2 + $0xa8] sm:$0xf] %v4431_v16  ;;  %5280 = vmatmul.bf16.gmra.mxu1 %v10951_v23  ;;  %v10970_v37 = vld [vmem:[#allocation2 + $0xa4] sm:$0x1]  ;;  %v4836_v39 = vshrl.u32 %v4477_v41, 16  ;;  %v4845_v21 = vshll.u32 %v10968_v52, 16 }
 0x3c6   : > { %v4249_v54 = vshrl.u32 %v4014_v46, 16  ;;  %v4252_v57 = vshll.u32 %v4014_v46, 16  ;;  %v3916_v2 = vadd.f32 %v10848_v5, %v3726_v34  ;;  %v10964_v11 = vpop.f32.mrf.mxu0  ;;  %v4849_v20 = vshrl.u32 %v10968_v52, 16 }
 0x3c7   : > { %v4855_v59 = vshll.u32 %v10970_v37, 16  ;;  %v4847_v26 = vrot.slane %v4845_v21, 5 }
 0x3c8   : > { %v4251_v7 = vrot.slane %v4249_v54, 7  ;;  %v3951_v5 = vadd.f32 %v10144_v51, %v3916_v2  ;;  %v4838_v54 = vrot.slane %v4836_v39, 4  ;;  %v4841_v2 = vrot.slane %v4839_v9, 5 }
 0x3c9   : > { %v3500_v47 = vpop.f32.mrf.mxu2  ;;  %5920 = vmatmul.bf16.gmra.mxu0 %v10973_v33  ;;  %v4851_v29 = vrot.slane %v4849_v20, 4  ;;  %v3313_v39 = vadd.f32 %v10646_v30, %v3123_v58  ;;  %v5013_v20 = vrot.slane %v10678_v40, 5 }
 0x3ca   : > { %v4254_v53 = vor.u32 %v4252_v57, %v4251_v7  ;;  %v4256_v8 = vrot.slane %v4251_v7, 4  ;;  %v3983_v16 = vmax.f32 %v3951_v5, 0.0  ;;  %v10978_v46 = vpop.f32.mrf.mxu1  ;;  %v3537_v34 = vadd.f32 %v3500_v47, %v3312_v60 }
 0x3cb   : > { %v4842_v5 = vor.u32 %v4841_v2, %v4838_v54  ;;  %v4852_v23 = vor.u32 %v4851_v29, %v4847_v26  ;;  %v5549_v47 = vunpack.c.l.b16 %v5007_v10  ;;  %v12261_v54 = vld [vmem:[#allocation68_spill] sm:$0xff]  ;;  %v4437_v29 = vld [vmem:[#allocation2 + $0xb4] sm:$0xf] }
 0x3cc   : > { %v4255_v3 = vsel %vm8822_vm11, %v4247_v12, %v4254_v53  ;;  %v4435_v41 = vsel %vm8683_vm4, %v4256_v8, %v4434_v0  ;;  %v4015_v57 = vpack.c.bf16 %v3983_v16, %v3983_v16  ;;  %v3727_v7 = vadd.f32 %v3690_v45, %v3537_v34  ;;  %v4479_v0 = vld [vmem:[#allocation2 + $0xa8] sm:$0xf]  ;;  %v12260_v45 = vld [vmem:[#allocation40_spill] sm:$0xff] }
 0x3cd   : > { %4433 = vst [vmem:[#allocation2 + $0xac] sm:$0xf] %v4255_v3  ;;  %v4843_v9 = vrot.slane %v4842_v5, 4  ;;  %v4853_v21 = vrot.slane %v4852_v23, 4  ;;  %v4857_v12 = vrot.slane %v4855_v59, 5  ;;  %v10993_v34 = vpack.c.b16 %v5550_v13, %v5549_v47 }
 0x3ce   : > { %4436 = vst [vmem:[#allocation2 + $0xb0] sm:$0x1] %v4435_v41  ;;  %v4258_v60 = vshrl.u32 %v4015_v57, 16  ;;  %v3917_v24 = vadd.f32 %v10876_v22, %v3727_v7  ;;  %5472 = vmatmul.bf16.gmra.mxu2 %v10864_v19  ;;  %v10989_v53 = vpop.f32.mrf.mxu0  ;;  %v4261_v16 = vshll.u32 %v4015_v57, 16  ;;  %v8397_v19 = vld [vmem:[%s11933_s5 + $0x100] sm:$0xff]  ;;  %v4860_v23 = vshrl.u32 %v4479_v0, 16 }
 0x3cf   : > { %v4848_v22 = vsel %vm8806_vm10, %v4843_v9, %v4847_v26  ;;  %v4858_v40 = vsel %vm8806_vm10, %v4853_v21, %v4857_v12  ;;  %v4863_v58 = vshll.u32 %v4479_v0, 16  ;;  %v3124_v2 = vadd.f32 %v12261_v54, %v12260_v45  ;;  %6069 = vmatpush.bf16.msrb.mxu1 %v8397_v19  ;;  %v4513_v57 = vld [vmem:[#allocation2 + $0x60] sm:$0xe] }
 0x3d0   : > { %v10991_v8 = vrot.slane %v4258_v60, 7  ;;  %v3952_v10 = vadd.f32 %v10144_v51, %v3917_v24  ;;  %v5126_v3 = vunpack.c.l.b16 %v4848_v22  ;;  %v5127_v41 = vunpack.c.l.b16 %v4858_v40  ;;  %v12263_v40 = vld [vmem:[#allocation43_spill] sm:$0xff] }
 0x3d1   : > { %v3503_v30 = vpop.f32.mrf.mxu2  ;;  %5690 = vmatmul.bf16.gmra.mxu3 %v10993_v34  ;;  %v5015_v26 = vrot.slane %v5013_v20, 4  ;;  %v5016_v7 = vrot.slane %v10683_v25, 5  ;;  %v4865_v21 = vrot.slane %v4863_v58, 5  ;;  %v7754_v22 = vrot.slane %v4513_v57, 9 }
 0x3d2   : > { %v4263_v59 = vor.u32 %v4261_v16, %v10991_v8  ;;  %v3984_v13 = vmax.f32 %v3952_v10, 0.0  ;;  %v3538_v24 = vadd.f32 %v3503_v30, %v3313_v39  ;;  %v11010_v47 = vpop.f32.mrf.mxu1  ;;  %v4862_v39 = vrot.slane %v4860_v23, 4 }
 0x3d3   : > { %v11014_v16 = vpack.c.b16 %v5127_v41, %v5126_v3  ;;  %v5017_v23 = vsel %vm9381_vm14, %v5015_v26, %v5016_v7  ;;  %v5014_v57 = vsel %vm9381_vm14, %v7754_v22, %v5013_v20 }
 0x3d4   : > { %v4438_v5 = vsel %vm8787_vm6, %v4263_v59, %v4437_v29  ;;  %v4016_v60 = vpack.c.bf16 %v3984_v13, %v3984_v13  ;;  %v11012_v9 = vld [vmem:[#allocation2 + $0xac] sm:$0xf]  ;;  %v3693_v12 = vpop.f32.mrf.mxu3  ;;  %v3314_v59 = vadd.f32 %v12263_v40, %v3124_v2  ;;  %v4264_v2 = vrot.slane %v10991_v8, 4 }
 0x3d5   : > { %4439 = vst [vmem:[#allocation2 + $0xb4] sm:$0xf] %v4438_v5  ;;  %v11016_v10 = vld [vmem:[#allocation2 + $0xb0] sm:$0x1]  ;;  %v4869_v0 = vshll.u32 %v11012_v9, 16  ;;  %v4873_v25 = vshrl.u32 %v11012_v9, 16  ;;  %v3728_v30 = vadd.f32 %v3693_v12, %v3538_v24  ;;  %5285 = vmatmul.bf16.gmra.mxu1 %v11014_v16  ;;  %v4866_v24 = vor.u32 %v4865_v21, %v4862_v39 }
 0x3d6   : > { %12262 = vst [vmem:[#allocation51_spill] sm:$0xff] %v11014_v16  ;;  %v4266_v19 = vshrl.u32 %v4016_v60, 16  ;;  %v11024_v58 = vpop.f32.mrf.mxu0  ;;  %v4879_v54 = vshll.u32 %v11016_v10, 16  ;;  %v4269_v3 = vshll.u32 %v4016_v60, 16  ;;  %v11028_v5 = vld [vmem:[#allocation2 + $0x78] sm:$0xff] }
 0x3d7   : > { %v4871_v13 = vrot.slane %v4869_v0, 5  ;;  %v4875_v45 = vrot.slane %v4873_v25, 4  ;;  %v3918_v41 = vadd.f32 %v10919_v35, %v3728_v30  ;;  %12264 = vst [vmem:[#allocation55_spill] sm:$0xff] %v11028_v5  ;;  %v4441_v60 = vld [vmem:[#allocation2 + $0xbc] sm:$0x1]  ;;  %v4867_v22 = vrot.slane %v4866_v24, 4 }
 0x3d8   : > { %v4268_v29 = vrot.slane %v4266_v19, 7  ;;  %v5552_v19 = vunpack.c.l.b16 %v5017_v23  ;;  %v4881_v30 = vrot.slane %v4879_v54, 5  ;;  %v5020_v24 = vrot.slane %v10739_v43, 5  ;;  %v4514_v43 = vld [vmem:[#allocation2 + $0x6c] sm:$0xe] }
 0x3d9   : > { %v3505_v12 = vpop.f32.mrf.mxu2  ;;  %v4876_v26 = vor.u32 %v4875_v45, %v4871_v13  ;;  %v3953_v0 = vadd.f32 %v10144_v51, %v3918_v41  ;;  %5925 = vmatmul.bf16.gmra.mxu0 %v11028_v5  ;;  %v4872_v41 = vsel %vm8806_vm10, %v4867_v22, %v4871_v13 }
 0x3da   : > { %v4271_v7 = vor.u32 %v4269_v3, %v4268_v29  ;;  %v4273_v40 = vrot.slane %v4268_v29, 4  ;;  %v3539_v25 = vadd.f32 %v3505_v12, %v3314_v59  ;;  %v11039_v21 = vpop.f32.mrf.mxu1  ;;  %v5551_v29 = vunpack.c.l.b16 %v5014_v57 }
 0x3db   : > { %v4877_v35 = vrot.slane %v4876_v26, 4  ;;  %v3985_v20 = vmax.f32 %v3953_v0, 0.0 }
 0x3dc   : > { %v4272_v39 = vsel %vm8822_vm11, %v4264_v2, %v4271_v7  ;;  %v4442_v8 = vsel %vm8683_vm4, %v4273_v40, %v4441_v60  ;;  %v3695_v45 = vpop.f32.mrf.mxu3  ;;  %v4481_v3 = vld [vmem:[#allocation2 + $0xb4] sm:$0xf]  ;;  %v11046_v2 = vpack.c.b16 %v5552_v19, %v5551_v29  ;;  %v4444_v19 = vld [vmem:[#allocation2 + $0xc0] sm:$0xf] }
 0x3dd   : > { %4440 = vst [vmem:[#allocation2 + $0xb8] sm:$0xf] %v4272_v39  ;;  %v4882_v59 = vsel %vm8806_vm10, %v4877_v35, %v4881_v30  ;;  %v4017_v23 = vpack.c.bf16 %v3985_v20, %v3985_v20  ;;  %v3729_v54 = vadd.f32 %v3695_v45, %v3539_v25  ;;  %v4884_v40 = vshrl.u32 %v4481_v3, 16 }
 0x3de   : > { %4443 = vst [vmem:[#allocation2 + $0xbc] sm:$0x1] %v4442_v8  ;;  %5477 = vmatmul.bf16.gmra.mxu2 %v10924_v44  ;;  %v5129_v12 = vunpack.c.l.b16 %v4882_v59  ;;  %v11049_v26 = vpop.f32.mrf.mxu0  ;;  %v4887_v0 = vshll.u32 %v4481_v3, 16  ;;  %v5128_v35 = vunpack.c.l.b16 %v4872_v41  ;;  %v5022_v8 = vrot.slane %v5020_v24, 4 }
 0x3df   : > { %12265 = vst [vmem:[#allocation15_spill] sm:$0xff] %v11046_v2  ;;  %v4275_v57 = vshrl.u32 %v4017_v23, 16  ;;  %v3919_v7 = vadd.f32 %v10944_v36, %v3729_v54  ;;  %v4278_v30 = vshll.u32 %v4017_v23, 16  ;;  %v4886_v29 = vrot.slane %v4884_v40, 4  ;;  %v8412_v54 = vld [vmem:[%s11933_s5 + $0x178] sm:$0xff] }
 0x3e0   : > { %v11055_v39 = vpack.c.b16 %v5129_v12, %v5128_v35  ;;  %v4889_v59 = vrot.slane %v4887_v0, 5  ;;  %v8420_v40 = vld [vmem:[%s11933_s5 + $0x1b8] sm:$0xff]  ;;  %6252 = vmatpush.bf16.msra.mxu2 %v8412_v54 }
 0x3e1   : > { %v5438_v60 = vpop.f32.mrf.mxu2  ;;  %v4277_v25 = vrot.slane %v4275_v57, 7  ;;  %5695 = vmatmul.bf16.gmra.mxu3 %v11046_v2  ;;  %v3954_v44 = vadd.f32 %v10144_v51, %v3919_v7  ;;  %v5023_v7 = vrot.slane %v10744_v15, 5  ;;  %v11082_v15 = vld [vmem:[#allocation2 + $0x84] sm:$0xff] }
 0x3e2   : > { %v5439_v13 = vadd.f32 %v5438_v60, %v10720_v18  ;;  %12266 = vst [vmem:[#allocation9_spill] sm:$0xff] %v11055_v39  ;;  %v11057_v36 = vpop.f32.mrf.mxu1  ;;  %6477 = vmatpush.bf16.msra.mxu3 %v8420_v40 }
 0x3e3   : > { %v4280_v20 = vor.u32 %v4278_v30, %v4277_v25  ;;  %v3986_v22 = vmax.f32 %v3954_v44, 0.0  ;;  %v7755_v44 = vrot.slane %v4514_v43, 9  ;;  %12267 = vst [vmem:[#allocation58_spill] sm:$0xff] %v11082_v15  ;;  %v4281_v2 = vrot.slane %v4277_v25, 4 }
 0x3e4   : > { %v11059_v45 = vld [vmem:[#allocation2 + $0xb8] sm:$0xf]  ;;  %v5656_v3 = vpop.f32.mrf.mxu3 }
 0x3e5   : > { %v11061_v23 = vld [vmem:[#allocation2 + $0xbc] sm:$0x1]  ;;  %v4893_v51 = vshll.u32 %v11059_v45, 16  ;;  %v4897_v18 = vshrl.u32 %v11059_v45, 16  ;;  %v4445_v41 = vsel %vm8787_vm6, %v4280_v20, %v4444_v19  ;;  %v4018_v12 = vpack.c.bf16 %v3986_v22, %v3986_v22  ;;  %5290 = vmatmul.bf16.gmra.mxu1 %v11055_v39 }
 0x3e6   : > { %v11070_v57 = vadd.f32 %v5656_v3, %v5439_v13  ;;  %4446 = vst [vmem:[#allocation2 + $0xc0] sm:$0xf] %v4445_v41  ;;  %v11077_v0 = vpop.f32.mrf.mxu0  ;;  %v4903_v30 = vshll.u32 %v11061_v23, 16  ;;  %v5024_v13 = vsel %vm9381_vm14, %v5022_v8, %v5023_v7  ;;  %v4890_v19 = vor.u32 %v4889_v59, %v4886_v29  ;;  %v4448_v59 = vld [vmem:[#allocation2 + $0xc8] sm:$0x1] }
 0x3e7   : > { %v4895_v60 = vrot.slane %v4893_v51, 5  ;;  %v4899_v35 = vrot.slane %v4897_v18, 4  ;;  %v4283_v4 = vshrl.u32 %v4018_v12, 16  ;;  %v4286_v41 = vshll.u32 %v4018_v12, 16 }
 0x3e8   : > { %v5021_v51 = vsel %vm9381_vm14, %v7755_v44, %v5020_v24  ;;  %v5554_v54 = vunpack.c.l.b16 %v5024_v13  ;;  %v4905_v39 = vrot.slane %v4903_v30, 5  ;;  %v4891_v29 = vrot.slane %v4890_v19, 4  ;;  %v8436_v24 = vld [vmem:[%s11933_s5 + $0x238] sm:$0xff] }
 0x3e9   : > { %v5440_v20 = vpop.f32.mrf.mxu2  ;;  %v4900_v22 = vor.u32 %v4899_v35, %v4895_v60  ;;  %v4285_v3 = vrot.slane %v4283_v4, 7  ;;  %5930 = vmatmul.bf16.gmra.mxu0 %v11082_v15  ;;  %v5553_v35 = vunpack.c.l.b16 %v5021_v51  ;;  %6857 = vmatpush.bf16.msra.mxu1 %v8436_v24  ;;  %v4515_v51 = vld [vmem:[#allocation2 + $0x78] sm:$0xe] }
 0x3ea   : > { %v5441_v18 = vadd.f32 %v5440_v20, %v10753_v55  ;;  %v11088_v16 = vpop.f32.mrf.mxu1  ;;  %v8428_v55 = vld [vmem:[%s11933_s5 + $0x1f8] sm:$0xff] }
 0x3eb   : > { %v4901_v43 = vrot.slane %v4900_v22, 4  ;;  %v4288_v8 = vor.u32 %v4286_v41, %v4285_v3  ;;  %v4290_v7 = vrot.slane %v4285_v3, 4  ;;  %6667 = vmatpush.bf16.msra.mxu0 %v8428_v55  ;;  %v11109_v19 = vpack.c.b16 %v5554_v54, %v5553_v35 }
 0x3ec   : > { %v5658_v40 = vpop.f32.mrf.mxu3  ;;  %v5029_v3 = vrot.slane %v5027_v17, 4 }
 0x3ed   : > { %v4906_v12 = vsel %vm8806_vm10, %v4901_v43, %v4905_v39  ;;  %v4289_v25 = vsel %vm8822_vm11, %v4281_v2, %v4288_v8  ;;  %v4449_v30 = vsel %vm8683_vm4, %v4290_v7, %v4448_v59  ;;  %v11102_v4 = vadd.f32 %v5658_v40, %v5441_v18  ;;  %12268 = vst [vmem:[#allocation59_spill] sm:$0xff] %v11109_v19 }
 0x3ee   : > { %5482 = vmatmul.bf16.gmra.mxu2 %v10973_v33  ;;  %v4896_v39 = vsel %vm8806_vm10, %v4891_v29, %v4895_v60  ;;  %4447 = vst [vmem:[#allocation2 + $0xc4] sm:$0xf] %v4289_v25  ;;  %v5131_v44 = vunpack.c.l.b16 %v4906_v12  ;;  %v11107_v13 = vpop.f32.mrf.mxu0  ;;  %v5030_v18 = vrot.slane %v10802_v50, 5  ;;  %v7756_v43 = vrot.slane %v4515_v51, 9  ;;  %v11158_v51 = vld [vmem:[#allocation2 + $0x9c] sm:$0xff] }
 0x3ef   : > { %4450 = vst [vmem:[#allocation2 + $0xc8] sm:$0x1] %v4449_v30  ;;  %v5130_v2 = vunpack.c.l.b16 %v4896_v39 }
 0x3f0   : > { %v5028_v29 = vsel %vm9381_vm14, %v7756_v43, %v5027_v17  ;;  %v8419_v17 = vld [vmem:[%s11933_s5 + $0x1b0] sm:$0xff]  ;;  %12273 = vst [vmem:[#allocation61_spill] sm:$0xff] %v11158_v51 }
 0x3f1   : > { %v5443_v61 = vpop.f32.mrf.mxu2  ;;  %5700 = vmatmul.bf16.gmra.mxu3 %v11109_v19  ;;  %v11114_v20 = vpack.c.b16 %v5131_v44, %v5130_v2  ;;  %v5555_v35 = vunpack.c.l.b16 %v5028_v29  ;;  %v8411_v2 = vld [vmem:[%s11933_s5 + $0x170] sm:$0xff] }
 0x3f2   : > { %v5444_v33 = vadd.f32 %v5443_v61, %v10784_v28  ;;  %v11116_v60 = vpop.f32.mrf.mxu1  ;;  %v5031_v28 = vsel %vm9381_vm14, %v5029_v3, %v5030_v18  ;;  %v5037_v3 = vrot.slane %v10858_v63, 5  ;;  %6253 = vmatpush.bf16.msra.mxu2 %v8411_v2  ;;  %6478 = vmatpush.bf16.msra.mxu3 %v8419_v17  ;;  %v5041_v2 = vrot.slane %v10907_v32, 5 }
 0x3f3   : > { %12269 = vst [vmem:[#allocation60_spill] sm:$0xff] %v11114_v20  ;;  %v5556_v59 = vunpack.c.l.b16 %v5031_v28 }
 0x3f4   : > { %v5661_v22 = vpop.f32.mrf.mxu3 }
 0x3f5   : > { %v11118_v41 = vadd.f32 %v5661_v22, %v5444_v33  ;;  %5295 = vmatmul.bf16.gmra.mxu1 %v11114_v20  ;;  %v11139_v24 = vpack.c.b16 %v5556_v59, %v5555_v35  ;;  %v4516_v22 = vld [vmem:[#allocation2 + $0x84] sm:$0xe]  ;;  %v8427_v35 = vld [vmem:[%s11933_s5 + $0x1f0] sm:$0xff] }
 0x3f6   : > { %v11122_v54 = vpop.f32.mrf.mxu0  ;;  %v7757_v18 = vrot.slane %v4516_v22, 9  ;;  %6668 = vmatpush.bf16.msra.mxu0 %v8427_v35 }
 0x3f7   : > { %12271 = vst [vmem:[#allocation16_spill] sm:$0xff] %v11139_v24 }
 0x3f9   : > { %v5445_v8 = vpop.f32.mrf.mxu2  ;;  %5935 = vmatmul.bf16.gmra.mxu0 %v11124_v38 }
 0x3fa   : > { %v5446_v7 = vadd.f32 %v5445_v8, %v10815_v56  ;;  %v11132_v40 = vpop.f32.mrf.mxu1  ;;  %v5034_v56 = vrot.slane %v10853_v49, 5  ;;  %v12272_v49 = vld [vmem:[#allocation42_spill] sm:$0xff]  ;;  %v12274_v8 = vld [vmem:[#allocation56_spill] sm:$0xff] }
 0x3fc   : > { %v5663_v50 = vpop.f32.mrf.mxu3  ;;  %v5036_v61 = vrot.slane %v5034_v56, 4  ;;  %v5035_v29 = vsel %vm9381_vm14, %v7757_v18, %v5034_v56  ;;  %v5043_v18 = vrot.slane %v5041_v2, 4 }
 0x3fd   : > { %v11134_v12 = vadd.f32 %v5663_v50, %v5446_v7 }
 0x3fe   : > { %5487 = vmatmul.bf16.gmra.mxu2 %v11028_v5  ;;  %v11137_v55 = vpop.f32.mrf.mxu0  ;;  %v5038_v43 = vsel %vm9381_vm14, %v5036_v61, %v5037_v3 }
 0x3ff   : > { %v5558_v59 = vunpack.c.l.b16 %v5038_v43 }
 0x401   : > { %v5448_v25 = vpop.f32.mrf.mxu2  ;;  %5705 = vmatmul.bf16.gmra.mxu3 %v11139_v24 }
 0x402   : > { %v5449_v30 = vadd.f32 %v5448_v25, %v10841_v14  ;;  %v11144_v39 = vpop.f32.mrf.mxu1  ;;  %v8435_v25 = vld [vmem:[%s11933_s5 + $0x230] sm:$0xff] }
 0x403   : > { %6858 = vmatpush.bf16.msra.mxu1 %v8435_v25 }
 0x404   : > { %v5666_v44 = vpop.f32.mrf.mxu3 }
 0x405   : > { %v11152_v33 = vadd.f32 %v5666_v44, %v5449_v30  ;;  %6070 = vmatmul.bf16.vlgmr.msrb.gmra.mxu1 %v12272_v49  ;;  %v5557_v30 = vunpack.c.l.b16 %v5035_v29  ;;  %v11190_v29 = vld [vmem:[#allocation2 + $0xa8] sm:$0xff] }
 0x406   : > { %v11156_v14 = vpop.f32.mrf.mxu0  ;;  %12277 = vst [vmem:[#allocation18_spill] sm:$0xff] %v11190_v29 }
 0x407   : > { %v11177_v56 = vpack.c.b16 %v5558_v59, %v5557_v30 }
 0x409   : > { %v5450_v28 = vpop.f32.mrf.mxu2  ;;  %5940 = vmatmul.bf16.gmra.mxu0 %v11158_v51  ;;  %12275 = vst [vmem:[#allocation34_spill] sm:$0xff] %v11177_v56 }
 0x40a   : > { %v5451_v7 = vadd.f32 %v5450_v28, %v12274_v8  ;;  %v11166_v63 = vpop.f32.mrf.mxu1  ;;  %v4517_v28 = vld [vmem:[#allocation2 + $0x90] sm:$0xe]  ;;  %v12276_v8 = vld [vmem:[#allocation39_spill] sm:$0xff] }
 0x40b   : > { %v7758_v32 = vrot.slane %v4517_v28, 9 }
 0x40c   : > { %v5668_v50 = vpop.f32.mrf.mxu3 }
 0x40d   : > { %v11174_v44 = vadd.f32 %v5668_v50, %v5451_v7  ;;  %v5044_v7 = vrot.slane %v10912_v48, 5  ;;  %v5042_v35 = vsel %vm9381_vm14, %v7758_v32, %v5041_v2 }
 0x40e   : > { %5492 = vmatmul.bf16.gmra.mxu2 %v11082_v15  ;;  %v11182_v22 = vpop.f32.mrf.mxu0 }
 0x40f   : > { %v5045_v59 = vsel %vm9381_vm14, %v5043_v18, %v5044_v7 }
 0x410   : > { %v5560_v25 = vunpack.c.l.b16 %v5045_v59 }
 0x411   : > { %v5453_v61 = vpop.f32.mrf.mxu2  ;;  %5710 = vmatmul.bf16.gmra.mxu3 %v11177_v56 }
 0x412   : > { %v5454_v17 = vadd.f32 %v5453_v61, %v10895_v62  ;;  %v11184_v49 = vpop.f32.mrf.mxu1 }
 0x414   : > { %v5671_v3 = vpop.f32.mrf.mxu3 }
 0x415   : > { %v11186_v43 = vadd.f32 %v5671_v3, %v5454_v17  ;;  %6075 = vmatmul.bf16.gmra.mxu1 %v12276_v8  ;;  %v5559_v17 = vunpack.c.l.b16 %v5042_v35 }
 0x416   : > { %v11200_v61 = vpop.f32.mrf.mxu0 }
 0x417   : > { %v11205_v18 = vpack.c.b16 %v5560_v25, %v5559_v17  ;;  %v4518_v25 = vld [vmem:[#allocation2 + $0x9c] sm:$0xe]  ;;  %v5051_v17 = vrot.slane %v10970_v37, 5 }
 0x419   : > { %v5455_v62 = vpop.f32.mrf.mxu2  ;;  %5945 = vmatmul.bf16.gmra.mxu0 %v11190_v29  ;;  %12278 = vst [vmem:[#allocation62_spill] sm:$0xff] %v11205_v18 }
 0x41a   : > { %v5456_v50 = vadd.f32 %v5455_v62, %v10927_v31  ;;  %v11198_v30 = vpop.f32.mrf.mxu1  ;;  %v5048_v31 = vrot.slane %v10968_v52, 5  ;;  %v8410_v62 = vld [vmem:[%s11933_s5 + $0x168] sm:$0xff] }
 0x41b   : > { %v8418_v52 = vld [vmem:[%s11933_s5 + $0x1a8] sm:$0xff]  ;;  %6254 = vmatpush.bf16.msra.mxu2 %v8410_v62 }
 0x41c   : > { %v5673_v48 = vpop.f32.mrf.mxu3  ;;  %v5050_v59 = vrot.slane %v5048_v31, 4  ;;  %6479 = vmatpush.bf16.msra.mxu3 %v8418_v52  ;;  %v8424_v52 = vld [vmem:[%s11933_s5 + $0x1d8] sm:$0xff] }
 0x41d   : > { %v11202_v3 = vadd.f32 %v5673_v48, %v5456_v50  ;;  %v8426_v50 = vld [vmem:[%s11933_s5 + $0x1e8] sm:$0xff]  ;;  %v12279_v48 = vld [vmem:[#allocation4_spill] sm:$0xff] }
 0x41e   : > { %5497 = vmatmul.bf16.gmra.mxu2 %v11124_v38  ;;  %6669 = vmatpush.bf16.msra.mxu0 %v8426_v50  ;;  %v7759_v38 = vrot.slane %v4518_v25, 9 }
 0x420   : > { %v5049_v37 = vsel %vm9381_vm14, %v7759_v38, %v5048_v31  ;;  %v8434_v38 = vld [vmem:[%s11933_s5 + $0x228] sm:$0xff] }
 0x421   : > { %v5458_v28 = vpop.f32.mrf.mxu2  ;;  %5715 = vmatmul.bf16.gmra.mxu3 %v11205_v18  ;;  %v8425_v18 = vld [vmem:[%s11933_s5 + $0x1e0] sm:$0xff]  ;;  %v5561_v25 = vunpack.c.l.b16 %v5049_v37  ;;  %6859 = vmatpush.bf16.msra.mxu1 %v8434_v38  ;;  %v8416_v37 = vld [vmem:[%s11933_s5 + $0x198] sm:$0xff]  ;;  %v4519_v38 = vld [vmem:[#allocation2 + $0xa8] sm:$0xe] }
 0x422   : > { %v5459_v2 = vadd.f32 %v5458_v28, %v10948_v42  ;;  %v11210_v7 = vpop.f32.mrf.mxu1  ;;  %v11223_v42 = vpop.f32.mrf.mxu0  ;;  %v11227_v28 = vld [vmem:[#allocation2 + $0xb4] sm:$0xff]  ;;  %6670 = vmatpush.bf16.msra.mxu0 %v8425_v18 }
 0x423   : > { %12280 = vst [vmem:[#allocation33_spill] sm:$0xff] %v11227_v28 }
 0x424   : > { %v5676_v32 = vpop.f32.mrf.mxu3 }
 0x425   : > { %v11221_v35 = vadd.f32 %v5676_v32, %v5459_v2  ;;  %6080 = vmatmul.bf16.gmra.mxu1 %v12279_v48  ;;  %v5052_v2 = vsel %vm9381_vm14, %v5050_v59, %v5051_v17  ;;  %v8417_v59 = vld [vmem:[%s11933_s5 + $0x1a0] sm:$0xff] }
 0x426   : > { %v5562_v62 = vunpack.c.l.b16 %v5052_v2  ;;  %6480 = vmatpush.bf16.msra.mxu3 %v8417_v59  ;;  %6671 = vmatpush.bf16.msra.mxu0 %v8424_v52  ;;  %v5055_v2 = vrot.slane %v11012_v9, 5  ;;  %v8422_v9 = vld [vmem:[%s11933_s5 + $0x1c8] sm:$0xff]  ;;  %v8409_v59 = vld [vmem:[%s11933_s5 + $0x160] sm:$0xff] }
 0x427   : > { %6255 = vmatpush.bf16.msra.mxu2 %v8409_v59 }
 0x428   : > { %v11252_v18 = vpack.c.b16 %v5562_v62, %v5561_v25  ;;  %v5057_v52 = vrot.slane %v5055_v2, 4 }
 0x429   : > { %v5460_v32 = vpop.f32.mrf.mxu2  ;;  %5950 = vmatmul.bf16.gmra.mxu0 %v11227_v28 }
 0x42a   : > { %v5461_v56 = vadd.f32 %v5460_v32, %v10978_v46  ;;  %v11238_v15 = vpop.f32.mrf.mxu1  ;;  %12281 = vst [vmem:[#allocation14_spill] sm:$0xff] %v11252_v18  ;;  %v11254_v31 = vpop.f32.mrf.mxu0  ;;  %v8423_v32 = vld [vmem:[%s11933_s5 + $0x1d0] sm:$0xff]  ;;  %6481 = vmatpush.bf16.msra.mxu3 %v8416_v37  ;;  %v11280_v37 = vld [vmem:[#allocation2 + $0xc0] sm:$0xff] }
 0x42b   : > { %12282 = vst [vmem:[#allocation63_spill] sm:$0xff] %v11254_v31  ;;  %6672 = vmatpush.bf16.msra.mxu0 %v8423_v32  ;;  %v5058_v32 = vrot.slane %v11016_v10, 5 }
 0x42c   : > { %v5678_v50 = vpop.f32.mrf.mxu3  ;;  %12284 = vst [vmem:[#allocation37_spill] sm:$0xff] %v11280_v37 }
 0x42d   : > { %v11246_v46 = vadd.f32 %v5678_v50, %v5461_v56 }
 0x42e   : > { %5502 = vmatmul.bf16.gmra.mxu2 %v11158_v51  ;;  %v8414_v51 = vld [vmem:[%s11933_s5 + $0x188] sm:$0xff] }
 0x42f   : > { %6673 = vmatpush.bf16.msra.mxu0 %v8422_v9 }
 0x431   : > { %v5463_v17 = vpop.f32.mrf.mxu2  ;;  %5720 = vmatmul.bf16.gmra.mxu3 %v11252_v18  ;;  %v8421_v18 = vld [vmem:[%s11933_s5 + $0x1c0] sm:$0xff] }
 0x432   : > { %v5464_v56 = vadd.f32 %v5463_v17, %v11010_v47  ;;  %v11265_v62 = vpop.f32.mrf.mxu1  ;;  %v8415_v47 = vld [vmem:[%s11933_s5 + $0x190] sm:$0xff]  ;;  %v11290_v24 = vpop.f32.mrf.mxu0 }
 0x433   : > { %v12283_v17 = vld [vmem:[#allocation46_spill] sm:$0xff]  ;;  %6482 = vmatpush.bf16.msra.mxu3 %v8415_v47  ;;  %12285 = vst [vmem:[#allocation21_spill] sm:$0xff] %v11290_v24  ;;  %6674 = vmatpush.bf16.msra.mxu0 %v8421_v18  ;;  %v11310_v18 = vld [vmem:[#allocation2 + $0xc4] sm:$0xf] }
 0x434   : > { %v5681_v50 = vpop.f32.mrf.mxu3 }
 0x435   : > { %v11276_v25 = vadd.f32 %v5681_v50, %v5464_v56  ;;  %6085 = vmatmul.bf16.gmra.mxu1 %v12283_v17  ;;  %v7760_v56 = vrot.slane %v4519_v38, 9  ;;  %v5059_v50 = vsel %vm9381_vm14, %v5057_v52, %v5058_v32  ;;  %v8408_v52 = vld [vmem:[%s11933_s5 + $0x158] sm:$0xff]  ;;  %v8413_v38 = vld [vmem:[%s11933_s5 + $0x180] sm:$0xff] }
 0x436   : > { %v5564_v47 = vunpack.c.l.b16 %v5059_v50  ;;  %6256 = vmatpush.bf16.msra.mxu2 %v8408_v52  ;;  %v5797_v50 = vrot.slane %v11310_v18, 5 }
 0x437   : > { %v5056_v9 = vsel %vm9381_vm14, %v7760_v56, %v5055_v2  ;;  %6483 = vmatpush.bf16.msra.mxu3 %v8414_v51  ;;  %v4521_v2 = vld [vmem:[#allocation2 + $0xc0] sm:$0xe]  ;;  %v8407_v51 = vld [vmem:[%s11933_s5 + $0x150] sm:$0xff]  ;;  %v11314_v56 = vld [vmem:[#allocation2 + $0xc8] sm:$0x1] }
 0x438   : > { %12287 = vst [vmem:[#allocation36_spill] sm:$0xff] %v11314_v56 }
 0x439   : > { %v5465_v27 = vpop.f32.mrf.mxu2  ;;  %5955 = vmatmul.bf16.gmra.mxu0 %v11280_v37 }
 0x43a   : > { %v5466_v10 = vadd.f32 %v5465_v27, %v11039_v21  ;;  %v11296_v59 = vpop.f32.mrf.mxu1  ;;  %v5563_v27 = vunpack.c.l.b16 %v5056_v9  ;;  %6257 = vmatpush.bf16.msra.mxu2 %v8407_v51  ;;  %v4520_v51 = vld [vmem:[#allocation2 + $0xb4] sm:$0xe] }
 0x43b   : > { %6484 = vmatpush.bf16.msra.mxu3 %v8413_v38  ;;  %v11323_v38 = vpop.f32.mrf.mxu0  ;;  %v7761_v5 = vrot.slane %v4520_v51, 9 }
 0x43c   : > { %v5683_v20 = vpop.f32.mrf.mxu3  ;;  %v11312_v32 = vpack.c.b16 %v5564_v47, %v5563_v27  ;;  %v5800_v47 = vrot.slane %v11314_v56, 5  ;;  %12288 = vst [vmem:[#allocation20_spill] sm:$0xff] %v11323_v38  ;;  %v8405_v38 = vld [vmem:[%s11933_s5 + $0x140] sm:$0xff] }
 0x43d   : > { %v11304_v21 = vadd.f32 %v5683_v20, %v5466_v10  ;;  %v5062_v20 = vrot.slane %v11059_v45, 5  ;;  %v7954_v10 = vrot.slane %v4521_v2, 9  ;;  %v8406_v45 = vld [vmem:[%s11933_s5 + $0x148] sm:$0xff] }
 0x43e   : > { %5507 = vmatmul.bf16.gmra.mxu2 %v11190_v29  ;;  %12286 = vst [vmem:[#allocation64_spill] sm:$0xff] %v11312_v32  ;;  %v5799_v29 = vrot.slane %v5797_v50, 4 }
 0x43f   : > { %v5798_v37 = vsel %vm9381_vm14, %v7954_v10, %v5797_v50  ;;  %v5064_v31 = vrot.slane %v5062_v20, 4  ;;  %v12289_v10 = vld [vmem:[#allocation52_spill] sm:$0xff]  ;;  %6258 = vmatpush.bf16.msra.mxu2 %v8406_v45 }
 0x441   : > { %v5468_v9 = vpop.f32.mrf.mxu2  ;;  %5725 = vmatmul.bf16.gmra.mxu3 %v11312_v32  ;;  %v5065_v32 = vrot.slane %v11061_v23, 5 }
 0x442   : > { %v5469_v52 = vadd.f32 %v5468_v9, %v11057_v36  ;;  %v11325_v27 = vpop.f32.mrf.mxu1  ;;  %v5801_v36 = vsel %vm9381_vm14, %v5799_v29, %v5800_v47  ;;  %v6200_v9 = vunpack.c.l.b16 %v5798_v37  ;;  %v5063_v37 = vsel %vm9381_vm14, %v7761_v5, %v5062_v20 }
 0x443   : > { %v6201_v50 = vunpack.c.l.b16 %v5801_v36  ;;  %v5066_v29 = vsel %vm9381_vm14, %v5064_v31, %v5065_v32  ;;  %6259 = vmatpush.bf16.msra.mxu2 %v8405_v38  ;;  %v8433_v36 = vld [vmem:[%s11933_s5 + $0x220] sm:$0xff]  ;;  %v5565_v51 = vunpack.c.l.b16 %v5063_v37 }
 0x444   : > { %v5686_v24 = vpop.f32.mrf.mxu3  ;;  %v5566_v23 = vunpack.c.l.b16 %v5066_v29  ;;  %6860 = vmatpush.bf16.msra.mxu1 %v8433_v36 }
 0x445   : > { %v11332_v2 = vadd.f32 %v5686_v24, %v5469_v52  ;;  %6090 = vmatmul.bf16.gmra.mxu1 %v12289_v10  ;;  %v11339_v56 = vpack.c.b16 %v6201_v50, %v6200_v9  ;;  %v11352_v9 = vpop.f32.mrf.mxu0  ;;  %v12292_v50 = vld [vmem:[#allocation44_spill] sm:$0xff] }
 0x447   : > { %12290 = vst [vmem:[#allocation8_spill] sm:$0xff] %v11339_v56 }
 0x449   : > { %v5470_v24 = vpop.f32.mrf.mxu2  ;;  %6675 = vmatmul.bf16.vlgmr.msra.gmra.mxu0 %v12276_v8 }
 0x44a   : > { %v5471_v52 = vadd.f32 %v5470_v24, %v11088_v16  ;;  %v11347_v47 = vpop.f32.mrf.mxu1  ;;  %v11357_v16 = vpack.c.b16 %v5566_v23, %v5565_v51 }
 0x44c   : > { %v5688_v45 = vpop.f32.mrf.mxu3  ;;  %12291 = vst [vmem:[#allocation23_spill] sm:$0xff] %v11357_v16 }
 0x44d   : > { %v11354_v31 = vadd.f32 %v5688_v45, %v5471_v52  ;;  %v11366_v29 = vpop.f32.mrf.mxu0 }
 0x44e   : > { %5512 = vmatmul.bf16.gmra.mxu2 %v11227_v28 }
 0x451   : > { %v5473_v5 = vpop.f32.mrf.mxu2  ;;  %5730 = vmatmul.bf16.gmra.mxu3 %v11357_v16 }
 0x452   : > { %v5474_v8 = vadd.f32 %v5473_v5, %v11116_v60  ;;  %v11361_v32 = vpop.f32.mrf.mxu1  ;;  %v12293_v60 = vld [vmem:[#allocation6_spill] sm:$0xff]  ;;  %v8574_v5 = vld [vmem:[#allocation2 + $0x18] sm:$0xff] }
 0x454   : > { %v5691_v20 = vpop.f32.mrf.mxu3 }
 0x455   : > { %v11363_v38 = vadd.f32 %v5691_v20, %v5474_v8  ;;  %6095 = vmatmul.bf16.gmra.mxu1 %v12292_v50  ;;  %v11375_v51 = vpop.f32.mrf.mxu0 }
 0x456   : > { %12294 = vst [vmem:[#allocation19_spill] sm:$0xff] %v11375_v51 }
 0x459   : > { %v5475_v24 = vpop.f32.mrf.mxu2  ;;  %6680 = vmatmul.bf16.gmra.mxu0 %v12279_v48  ;;  %v12295_v48 = vld [vmem:[#allocation3_spill] sm:$0xff] }
 0x45a   : > { %v5476_v52 = vadd.f32 %v5475_v24, %v11132_v40  ;;  %v11370_v37 = vpop.f32.mrf.mxu1 }
 0x45c   : > { %v5693_v23 = vpop.f32.mrf.mxu3 }
 0x45d   : > { %v11372_v45 = vadd.f32 %v5693_v23, %v5476_v52  ;;  %v11385_v23 = vpop.f32.mrf.mxu0 }
 0x45e   : > { %6260 = vmatmul.bf16.vlgmr.msra.gmra.mxu2 %v12293_v60  ;;  %12296 = vst [vmem:[#allocation24_spill] sm:$0xff] %v11385_v23  ;;  %v12301_v23 = vld [vmem:[#allocation12_spill] sm:$0xff] }
 0x461   : > { %v5478_v36 = vpop.f32.mrf.mxu2  ;;  %6485 = vmatmul.bf16.vlgmr.msra.gmra.mxu3 %v8574_v5 }
 0x462   : > { %v5479_v8 = vadd.f32 %v5478_v36, %v11144_v39  ;;  %v11378_v20 = vpop.f32.mrf.mxu1  ;;  %v8432_v39 = vld [vmem:[%s11933_s5 + $0x218] sm:$0xff] }
 0x463   : > { %6861 = vmatpush.bf16.msra.mxu1 %v8432_v39 }
 0x464   : > { %v5696_v6 = vpop.f32.mrf.mxu3 }
 0x465   : > { %v11380_v40 = vadd.f32 %v5696_v6, %v5479_v8  ;;  %6100 = vmatmul.bf16.gmra.mxu1 %v12295_v48  ;;  %v12298_v6 = vld [vmem:[#allocation49_spill] sm:$0xff]  ;;  %v11398_v16 = vpop.f32.mrf.mxu0 }
 0x466   : > { %v8575_v8 = vld [vmem:[#allocation2 + $0x24] sm:$0xff]  ;;  %12299 = vst [vmem:[#allocation7_spill] sm:$0xff] %v11398_v16  ;;  %v8576_v16 = vld [vmem:[#allocation2 + $0x30] sm:$0xff] }
 0x469   : > { %v5480_v24 = vpop.f32.mrf.mxu2  ;;  %6685 = vmatmul.bf16.gmra.mxu0 %v12283_v17 }
 0x46a   : > { %v5481_v52 = vadd.f32 %v5480_v24, %v11166_v63  ;;  %v11387_v60 = vpop.f32.mrf.mxu1 }
 0x46c   : > { %v5698_v56 = vpop.f32.mrf.mxu3 }
 0x46d   : > { %v11392_v36 = vadd.f32 %v5698_v56, %v5481_v52 }
 0x46e   : > { %6265 = vmatmul.bf16.gmra.mxu2 %v12298_v6 }
 0x46f   : > { %12297 = vst [vmem:[#allocation17_spill] sm:$0xff] %v11392_v36 }
 0x471   : > { %v5483_v5 = vpop.f32.mrf.mxu2  ;;  %6490 = vmatmul.bf16.gmra.mxu3 %v8575_v8 }
 0x472   : > { %v5484_v63 = vadd.f32 %v5483_v5, %v11184_v49  ;;  %v11396_v17 = vpop.f32.mrf.mxu1  ;;  %v12303_v49 = vld [vmem:[#allocation45_spill] sm:$0xff]  ;;  %v11410_v5 = vpop.f32.mrf.mxu0 }
 0x473   : > { %12304 = vst [vmem:[#allocation27_spill] sm:$0xff] %v11410_v5 }
 0x474   : > { %v5701_v24 = vpop.f32.mrf.mxu3 }
 0x475   : > { %v11400_v28 = vadd.f32 %v5701_v24, %v5484_v63  ;;  %6105 = vmatmul.bf16.gmra.mxu1 %v12301_v23  ;;  %v5961_v24 = vadd.f32 %v10964_v11, %v11070_v57 }
 0x477   : > { %12300 = vst [vmem:[#allocation11_spill] sm:$0xff] %v11400_v28 }
 0x479   : > { %v5485_v51 = vpop.f32.mrf.mxu2  ;;  %6690 = vmatmul.bf16.gmra.mxu0 %v12289_v10 }
 0x47a   : > { %v5486_v56 = vadd.f32 %v5485_v51, %v11198_v30  ;;  %v11405_v52 = vpop.f32.mrf.mxu1 }
 0x47c   : > { %v5703_v39 = vpop.f32.mrf.mxu3 }
 0x47d   : > { %v11407_v8 = vadd.f32 %v5703_v39, %v5486_v56  ;;  %v12305_v56 = vld [vmem:[#allocation54_spill] sm:$0xff] }
 0x47e   : > { %6270 = vmatmul.bf16.gmra.mxu2 %v12303_v49 }
 0x47f   : > { %12302 = vst [vmem:[#allocation38_spill] sm:$0xff] %v11407_v8  ;;  %v11420_v8 = vpop.f32.mrf.mxu0 }
 0x481   : > { %v5488_v36 = vpop.f32.mrf.mxu2  ;;  %6495 = vmatmul.bf16.gmra.mxu3 %v8576_v16 }
 0x482   : > { %v5489_v63 = vadd.f32 %v5488_v36, %v11210_v7  ;;  %v6071_v30 = vpop.f32.mrf.mxu1  ;;  %v5962_v7 = vadd.f32 %v10989_v53, %v11102_v4  ;;  %v8431_v36 = vld [vmem:[%s11933_s5 + $0x210] sm:$0xff]  ;;  %v5963_v53 = vadd.f32 %v11024_v58, %v11118_v41 }
 0x483   : > { %v11415_v10 = vadd.f32 %v6071_v30, %v5961_v24  ;;  %v12306_v24 = vld [vmem:[#allocation48_spill] sm:$0xff]  ;;  %6862 = vmatpush.bf16.msra.mxu1 %v8431_v36 }
 0x484   : > { %v5706_v51 = vpop.f32.mrf.mxu3 }
 0x485   : > { %v11417_v28 = vadd.f32 %v5706_v51, %v5489_v63  ;;  %6110 = vmatmul.bf16.gmra.mxu1 %v12305_v56 }
 0x487   : > { %v11437_v4 = vpop.f32.mrf.mxu0 }
 0x489   : > { %v5490_v39 = vpop.f32.mrf.mxu2  ;;  %6695 = vmatmul.bf16.gmra.mxu0 %v12292_v50 }
 0x48a   : > { %v5491_v5 = vadd.f32 %v5490_v39, %v11238_v15  ;;  %v6073_v16 = vpop.f32.mrf.mxu1  ;;  %v8577_v15 = vld [vmem:[#allocation2 + $0x3c] sm:$0xff] }
 0x48b   : > { %v11426_v57 = vadd.f32 %v6073_v16, %v5962_v7 }
 0x48c   : > { %v5708_v11 = vpop.f32.mrf.mxu3 }
 0x48d   : > { %v11431_v63 = vadd.f32 %v5708_v11, %v5491_v5  ;;  %v12307_v5 = vld [vmem:[#allocation47_spill] sm:$0xff] }
 0x48e   : > { %6275 = vmatmul.bf16.gmra.mxu2 %v12306_v24 }
 0x491   : > { %v5493_v30 = vpop.f32.mrf.mxu2  ;;  %6500 = vmatmul.bf16.gmra.mxu3 %v8577_v15  ;;  %v11450_v15 = vpop.f32.mrf.mxu0 }
 0x492   : > { %v5494_v50 = vadd.f32 %v5493_v30, %v11265_v62  ;;  %v6076_v51 = vpop.f32.mrf.mxu1  ;;  %v5964_v62 = vadd.f32 %v11049_v26, %v11134_v12 }
 0x493   : > { %v11439_v7 = vadd.f32 %v6076_v51, %v5963_v53  ;;  %v8578_v51 = vld [vmem:[#allocation2 + $0x48] sm:$0xff] }
 0x494   : > { %v5711_v39 = vpop.f32.mrf.mxu3 }
 0x495   : > { %v11441_v16 = vadd.f32 %v5711_v39, %v5494_v50  ;;  %6115 = vmatmul.bf16.gmra.mxu1 %v12307_v5 }
 0x499   : > { %v5495_v11 = vpop.f32.mrf.mxu2  ;;  %6700 = vmatmul.bf16.gmra.mxu0 %v12295_v48  ;;  %v5965_v48 = vadd.f32 %v11077_v0, %v11152_v33 }
 0x49a   : > { %v5496_v36 = vadd.f32 %v5495_v11, %v11296_v59  ;;  %v6078_v30 = vpop.f32.mrf.mxu1 }
 0x49b   : > { %v11448_v41 = vadd.f32 %v6078_v30, %v5964_v62  ;;  %v12308_v62 = vld [vmem:[#allocation50_spill] sm:$0xff] }
 0x49c   : > { %v5713_v58 = vpop.f32.mrf.mxu3 }
 0x49d   : > { %v11452_v53 = vadd.f32 %v5713_v58, %v5496_v36  ;;  %v11463_v36 = vpop.f32.mrf.mxu0 }
 0x49e   : > { %6280 = vmatmul.bf16.gmra.mxu2 %v10881_v1 }
 0x4a1   : > { %v5498_v50 = vpop.f32.mrf.mxu2  ;;  %6505 = vmatmul.bf16.gmra.mxu3 %v8578_v51  ;;  %v8430_v51 = vld [vmem:[%s11933_s5 + $0x208] sm:$0xff] }
 0x4a2   : > { %v5499_v59 = vadd.f32 %v5498_v50, %v11325_v27  ;;  %v6081_v39 = vpop.f32.mrf.mxu1  ;;  %v5966_v27 = vadd.f32 %v11107_v13, %v11174_v44  ;;  %6863 = vmatpush.bf16.msra.mxu1 %v8430_v51  ;;  %v5967_v44 = vadd.f32 %v11122_v54, %v11186_v43 }
 0x4a3   : > { %v11458_v12 = vadd.f32 %v6081_v39, %v5965_v48  ;;  %v12309_v48 = vld [vmem:[#allocation57_spill] sm:$0xff] }
 0x4a4   : > { %v5716_v26 = vpop.f32.mrf.mxu3 }
 0x4a5   : > { %v11460_v11 = vadd.f32 %v5716_v26, %v5499_v59  ;;  %6120 = vmatmul.bf16.gmra.mxu1 %v12308_v62 }
 0x4a9   : > { %v5500_v30 = vpop.f32.mrf.mxu2  ;;  %6705 = vmatmul.bf16.gmra.mxu0 %v12301_v23  ;;  %v8579_v23 = vld [vmem:[#allocation2 + $0x54] sm:$0xff] }
 0x4aa   : > { %v5501_v58 = vadd.f32 %v5500_v30, %v11347_v47  ;;  %v6083_v50 = vpop.f32.mrf.mxu1  ;;  %v11477_v47 = vpop.f32.mrf.mxu0 }
 0x4ab   : > { %v11469_v33 = vadd.f32 %v6083_v50, %v5966_v27 }
 0x4ac   : > { %v5718_v0 = vpop.f32.mrf.mxu3 }
 0x4ad   : > { %v11474_v59 = vadd.f32 %v5718_v0, %v5501_v58  ;;  %v12310_v58 = vld [vmem:[#allocation53_spill] sm:$0xff] }
 0x4ae   : > { %6285 = vmatmul.bf16.gmra.mxu2 %v12309_v48 }
 0x4b1   : > { %v5503_v39 = vpop.f32.mrf.mxu2  ;;  %6510 = vmatmul.bf16.gmra.mxu3 %v8579_v23  ;;  %v5968_v23 = vadd.f32 %v11137_v55, %v11202_v3 }
 0x4b2   : > { %v5504_v13 = vadd.f32 %v5503_v39, %v11361_v32  ;;  %v6086_v26 = vpop.f32.mrf.mxu1  ;;  %v11491_v32 = vpop.f32.mrf.mxu0 }
 0x4b3   : > { %v11482_v27 = vadd.f32 %v6086_v26, %v5967_v44  ;;  %v8580_v26 = vld [vmem:[#allocation2 + $0x60] sm:$0xff] }
 0x4b4   : > { %v5721_v30 = vpop.f32.mrf.mxu3 }
 0x4b5   : > { %v11484_v50 = vadd.f32 %v5721_v30, %v5504_v13  ;;  %6125 = vmatmul.bf16.gmra.mxu1 %v12310_v58 }
 0x4b9   : > { %v5505_v0 = vpop.f32.mrf.mxu2  ;;  %6710 = vmatmul.bf16.gmra.mxu0 %v12305_v56  ;;  %v5969_v56 = vadd.f32 %v11156_v14, %v11221_v35 }
 0x4ba   : > { %v5506_v51 = vadd.f32 %v5505_v0, %v11370_v37  ;;  %v6088_v39 = vpop.f32.mrf.mxu1  ;;  %v11503_v0 = vpop.f32.mrf.mxu0 }
 0x4bb   : > { %v11493_v43 = vadd.f32 %v6088_v39, %v5968_v23 }
 0x4bc   : > { %v5723_v54 = vpop.f32.mrf.mxu3 }
 0x4bd   : > { %v11495_v44 = vadd.f32 %v5723_v54, %v5506_v51  ;;  %v12311_v51 = vld [vmem:[#allocation51_spill] sm:$0xff] }
 0x4be   : > { %6290 = vmatmul.bf16.gmra.mxu2 %v10993_v34 }
 0x4c1   : > { %v5508_v13 = vpop.f32.mrf.mxu2  ;;  %6515 = vmatmul.bf16.gmra.mxu3 %v8580_v26  ;;  %v8429_v26 = vld [vmem:[%s11933_s5 + $0x200] sm:$0xff] }
 0x4c2   : > { %v5509_v37 = vadd.f32 %v5508_v13, %v11378_v20  ;;  %v6091_v30 = vpop.f32.mrf.mxu1  ;;  %v5970_v20 = vadd.f32 %v11182_v22, %v11246_v46  ;;  %6864 = vmatpush.bf16.msra.mxu1 %v8429_v26  ;;  %v5971_v46 = vadd.f32 %v11200_v61, %v11276_v25 }
 0x4c3   : > { %v11501_v3 = vadd.f32 %v6091_v30, %v5969_v56  ;;  %v12313_v56 = vld [vmem:[#allocation15_spill] sm:$0xff]  ;;  %v11520_v30 = vpop.f32.mrf.mxu0 }
 0x4c4   : > { %v5726_v55 = vpop.f32.mrf.mxu3  ;;  %12314 = vst [vmem:[#allocation41_spill] sm:$0xff] %v11520_v30 }
 0x4c5   : > { %v11505_v23 = vadd.f32 %v5726_v55, %v5509_v37  ;;  %6130 = vmatmul.bf16.gmra.mxu1 %v12311_v51 }
 0x4c9   : > { %v5510_v39 = vpop.f32.mrf.mxu2  ;;  %6715 = vmatmul.bf16.gmra.mxu0 %v12307_v5  ;;  %v8581_v5 = vld [vmem:[#allocation2 + $0x6c] sm:$0xff] }
 0x4ca   : > { %v5511_v54 = vadd.f32 %v5510_v39, %v11387_v60  ;;  %v6093_v13 = vpop.f32.mrf.mxu1 }
 0x4cb   : > { %v11512_v35 = vadd.f32 %v6093_v13, %v5970_v20  ;;  %v11530_v26 = vpop.f32.mrf.mxu0 }
 0x4cc   : > { %v5728_v14 = vpop.f32.mrf.mxu3  ;;  %12317 = vst [vmem:[#allocation13_spill] sm:$0xff] %v11530_v26 }
 0x4cd   : > { %v11517_v37 = vadd.f32 %v5728_v14, %v5511_v54  ;;  %v12316_v54 = vld [vmem:[#allocation9_spill] sm:$0xff] }
 0x4ce   : > { %6295 = vmatmul.bf16.gmra.mxu2 %v12313_v56 }
 0x4cf   : > { %12312 = vst [vmem:[#allocation22_spill] sm:$0xff] %v11517_v37 }
 0x4d1   : > { %v5513_v60 = vpop.f32.mrf.mxu2  ;;  %6520 = vmatmul.bf16.gmra.mxu3 %v8581_v5 }
 0x4d2   : > { %v5514_v22 = vadd.f32 %v5513_v60, %v11396_v17  ;;  %v6096_v55 = vpop.f32.mrf.mxu1  ;;  %v5972_v17 = vadd.f32 %v11223_v42, %v11304_v21 }
 0x4d3   : > { %v11525_v20 = vadd.f32 %v6096_v55, %v5971_v46  ;;  %v5778_v46 = vshll.u32 %v11310_v18, 16  ;;  %v5782_v55 = vshrl.u32 %v11310_v18, 16 }
 0x4d4   : > { %v5731_v39 = vpop.f32.mrf.mxu3 }
 0x4d5   : > { %v11527_v13 = vadd.f32 %v5731_v39, %v5514_v22  ;;  %6135 = vmatmul.bf16.gmra.mxu1 %v12316_v54  ;;  %v4483_v22 = vld [vmem:[#allocation2 + $0xc0] sm:$0xf]  ;;  %v5780_v21 = vrot.slane %v5778_v46, 5 }
 0x4d6   : > { %v5772_v42 = vshll.u32 %v4483_v22, 16 }
 0x4d7   : > { %12315 = vst [vmem:[#allocation29_spill] sm:$0xff] %v11527_v13  ;;  %v5784_v13 = vrot.slane %v5782_v55, 4 }
 0x4d8   : > { %v5774_v56 = vrot.slane %v5772_v42, 5 }
 0x4d9   : > { %v5515_v14 = vpop.f32.mrf.mxu2  ;;  %6720 = vmatmul.bf16.gmra.mxu0 %v12308_v62  ;;  %v5785_v30 = vor.u32 %v5784_v13, %v5780_v21 }
 0x4da   : > { %v5516_v37 = vadd.f32 %v5515_v14, %v11405_v52  ;;  %v6098_v60 = vpop.f32.mrf.mxu1  ;;  %v5769_v52 = vshrl.u32 %v4483_v22, 16  ;;  %v12319_v14 = vld [vmem:[#allocation55_spill] sm:$0xff] }
 0x4db   : > { %v11536_v25 = vadd.f32 %v6098_v60, %v5972_v17  ;;  %v12320_v17 = vld [vmem:[#allocation63_spill] sm:$0xff]  ;;  %v11547_v60 = vpop.f32.mrf.mxu0 }
 0x4dc   : > { %v5733_v61 = vpop.f32.mrf.mxu3  ;;  %v5771_v18 = vrot.slane %v5769_v52, 4 }
 0x4dd   : > { %v11538_v5 = vadd.f32 %v5733_v61, %v5516_v37  ;;  %v5973_v37 = vadd.f32 %v12320_v17, %v11332_v2  ;;  %v12324_v17 = vld [vmem:[#allocation21_spill] sm:$0xff] }
 0x4de   : > { %6300 = vmatmul.bf16.gmra.mxu2 %v11109_v19  ;;  %v5775_v2 = vor.u32 %v5774_v56, %v5771_v18  ;;  %v12327_v18 = vld [vmem:[#allocation58_spill] sm:$0xff] }
 0x4df   : > { %12318 = vst [vmem:[#allocation30_spill] sm:$0xff] %v11538_v5 }
 0x4e1   : > { %v6261_v39 = vpop.f32.mrf.mxu2  ;;  %6525 = vmatmul.bf16.gmra.mxu3 %v12319_v14  ;;  %v12322_v14 = vld [vmem:[#allocation60_spill] sm:$0xff] }
 0x4e2   : > { %v6341_v62 = vadd.f32 %v6261_v39, %v11415_v10  ;;  %v6101_v61 = vpop.f32.mrf.mxu1  ;;  %v12323_v10 = vld [vmem:[#allocation36_spill] sm:$0xff]  ;;  %v5786_v39 = vrot.slane %v5785_v30, 4 }
 0x4e3   : > { %v11549_v19 = vadd.f32 %v6101_v61, %v5973_v37  ;;  %v5788_v22 = vshll.u32 %v12323_v10, 16  ;;  %v5974_v37 = vadd.f32 %v12324_v17, %v11354_v31  ;;  %v11561_v13 = vpop.f32.mrf.mxu0  ;;  %v12325_v10 = vld [vmem:[#allocation16_spill] sm:$0xff] }
 0x4e4   : > { %v6486_v5 = vpop.f32.mrf.mxu3 }
 0x4e5   : > { %v11551_v26 = vadd.f32 %v6486_v5, %v6341_v62  ;;  %6140 = vmatmul.bf16.gmra.mxu1 %v12322_v14  ;;  %v5790_v5 = vrot.slane %v5788_v22, 5 }
 0x4e7   : > { %12321 = vst [vmem:[#allocation25_spill] sm:$0xff] %v11551_v26  ;;  %v5776_v26 = vrot.slane %v5775_v2, 4 }
 0x4e9   : > { %v6263_v46 = vpop.f32.mrf.mxu2  ;;  %6725 = vmatmul.bf16.gmra.mxu0 %v12310_v58  ;;  %v5791_v58 = vsel %vm8806_vm10, %v5786_v39, %v5790_v5  ;;  %v5781_v56 = vsel %vm8806_vm10, %v5776_v26, %v5780_v21 }
 0x4ea   : > { %v6342_v55 = vadd.f32 %v6263_v46, %v11426_v57  ;;  %v6103_v61 = vpop.f32.mrf.mxu1  ;;  %v6011_v31 = vunpack.c.l.b16 %v5791_v58  ;;  %v12328_v46 = vld [vmem:[#allocation20_spill] sm:$0xff] }
 0x4eb   : > { %v11559_v52 = vadd.f32 %v6103_v61, %v5974_v37  ;;  %v5975_v17 = vadd.f32 %v12328_v46, %v11363_v38  ;;  %v11581_v26 = vpop.f32.mrf.mxu0  ;;  %v5976_v38 = vadd.f32 %v11352_v9, %v11372_v45  ;;  %v12330_v46 = vld [vmem:[#allocation69_spill] sm:$0xff] }
 0x4ec   : > { %v6488_v62 = vpop.f32.mrf.mxu3 }
 0x4ed   : > { %v11563_v42 = vadd.f32 %v6488_v62, %v6342_v55  ;;  %v6010_v55 = vunpack.c.l.b16 %v5781_v56 }
 0x4ee   : > { %6305 = vmatmul.bf16.gmra.mxu2 %v12325_v10 }
 0x4ef   : > { %v11576_v2 = vpack.c.b16 %v6011_v31, %v6010_v55  ;;  %v12329_v31 = vld [vmem:[#allocation34_spill] sm:$0xff] }
 0x4f1   : > { %v6266_v30 = vpop.f32.mrf.mxu2  ;;  %6530 = vmatmul.bf16.gmra.mxu3 %v12327_v18 }
 0x4f2   : > { %v6343_v22 = vadd.f32 %v6266_v30, %v11439_v7  ;;  %v6106_v37 = vpop.f32.mrf.mxu1 }
 0x4f3   : > { %v11574_v62 = vadd.f32 %v6106_v37, %v5975_v17 }
 0x4f4   : > { %v6491_v61 = vpop.f32.mrf.mxu3 }
 0x4f5   : > { %v11578_v39 = vadd.f32 %v6491_v61, %v6343_v22  ;;  %6145 = vmatmul.bf16.gmra.mxu1 %v11576_v2  ;;  %v11592_v22 = vpop.f32.mrf.mxu0 }
 0x4f9   : > { %v6268_v21 = vpop.f32.mrf.mxu2  ;;  %6730 = vmatmul.bf16.gmra.mxu0 %v12311_v51  ;;  %v5977_v51 = vadd.f32 %v11366_v29, %v11380_v40 }
 0x4fa   : > { %v6344_v5 = vadd.f32 %v6268_v21, %v11448_v41  ;;  %v6108_v7 = vpop.f32.mrf.mxu1  ;;  %v12331_v21 = vld [vmem:[#allocation17_spill] sm:$0xff] }
 0x4fb   : > { %v11587_v56 = vadd.f32 %v6108_v7, %v5976_v38 }
 0x4fc   : > { %v6493_v58 = vpop.f32.mrf.mxu3 }
 0x4fd   : > { %v11589_v30 = vadd.f32 %v6493_v58, %v6344_v5  ;;  %v12332_v5 = vld [vmem:[#allocation19_spill] sm:$0xff] }
 0x4fe   : > { %6310 = vmatmul.bf16.gmra.mxu2 %v12329_v31  ;;  %v5978_v38 = vadd.f32 %v12332_v5, %v12331_v21 }
 0x501   : > { %v6271_v18 = vpop.f32.mrf.mxu2  ;;  %6535 = vmatmul.bf16.gmra.mxu3 %v12330_v46 }
 0x502   : > { %v6345_v41 = vadd.f32 %v6271_v18, %v11458_v12  ;;  %v6111_v17 = vpop.f32.mrf.mxu1  ;;  %v11607_v12 = vpop.f32.mrf.mxu0  ;;  %v12333_v18 = vld [vmem:[#allocation62_spill] sm:$0xff] }
 0x503   : > { %v11598_v45 = vadd.f32 %v6111_v17, %v5977_v51 }
 0x504   : > { %v6496_v9 = vpop.f32.mrf.mxu3 }
 0x505   : > { %v11600_v55 = vadd.f32 %v6496_v9, %v6345_v41  ;;  %6865 = vmatmul.bf16.vlgmr.msra.gmra.mxu1 %v12298_v6  ;;  %v12334_v6 = vld [vmem:[#allocation61_spill] sm:$0xff]  ;;  %v12335_v41 = vld [vmem:[#allocation11_spill] sm:$0xff] }
 0x509   : > { %v6273_v37 = vpop.f32.mrf.mxu2  ;;  %6735 = vmatmul.bf16.gmra.mxu0 %v12316_v54  ;;  %v12336_v54 = vld [vmem:[#allocation24_spill] sm:$0xff] }
 0x50a   : > { %v6346_v61 = vadd.f32 %v6273_v37, %v11469_v33  ;;  %v6113_v7 = vpop.f32.mrf.mxu1  ;;  %v5979_v51 = vadd.f32 %v12336_v54, %v12335_v41  ;;  %v11620_v21 = vpop.f32.mrf.mxu0 }
 0x50b   : > { %v11609_v40 = vadd.f32 %v6113_v7, %v5978_v38  ;;  %v12337_v7 = vld [vmem:[#allocation38_spill] sm:$0xff] }
 0x50c   : > { %v6498_v29 = vpop.f32.mrf.mxu3 }
 0x50d   : > { %v11611_v58 = vadd.f32 %v6498_v29, %v6346_v61 }
 0x50e   : > { %6315 = vmatmul.bf16.gmra.mxu2 %v12333_v18 }
 0x511   : > { %v6276_v46 = vpop.f32.mrf.mxu2  ;;  %6540 = vmatmul.bf16.gmra.mxu3 %v12334_v6 }
 0x512   : > { %v6347_v33 = vadd.f32 %v6276_v46, %v11482_v27  ;;  %v6116_v17 = vpop.f32.mrf.mxu1  ;;  %v12338_v27 = vld [vmem:[#allocation7_spill] sm:$0xff] }
 0x513   : > { %v11618_v37 = vadd.f32 %v6116_v17, %v5979_v51  ;;  %v5980_v29 = vadd.f32 %v12338_v27, %v12337_v7  ;;  %v12339_v51 = vld [vmem:[#allocation14_spill] sm:$0xff] }
 0x514   : > { %v6501_v9 = vpop.f32.mrf.mxu3 }
 0x515   : > { %v11622_v5 = vadd.f32 %v6501_v9, %v6347_v33  ;;  %6870 = vmatmul.bf16.gmra.mxu1 %v12303_v49  ;;  %v11634_v33 = vpop.f32.mrf.mxu0  ;;  %v12340_v49 = vld [vmem:[#allocation18_spill] sm:$0xff] }
 0x519   : > { %v6278_v61 = vpop.f32.mrf.mxu2  ;;  %6740 = vmatmul.bf16.gmra.mxu0 %v12322_v14  ;;  %v12341_v14 = vld [vmem:[#allocation27_spill] sm:$0xff] }
 0x51a   : > { %v6348_v38 = vadd.f32 %v6278_v61, %v11493_v43  ;;  %v6118_v46 = vpop.f32.mrf.mxu1  ;;  %v5981_v9 = vadd.f32 %v12341_v14, %v11417_v28 }
 0x51b   : > { %v11629_v41 = vadd.f32 %v6118_v46, %v5980_v29 }
 0x51c   : > { %v6503_v6 = vpop.f32.mrf.mxu3 }
 0x51d   : > { %v11631_v54 = vadd.f32 %v6503_v6, %v6348_v38  ;;  %v11645_v46 = vpop.f32.mrf.mxu0 }
 0x51e   : > { %6320 = vmatmul.bf16.gmra.mxu2 %v12339_v51 }
 0x521   : > { %v6281_v17 = vpop.f32.mrf.mxu2  ;;  %6545 = vmatmul.bf16.gmra.mxu3 %v12340_v49 }
 0x522   : > { %v6349_v43 = vadd.f32 %v6281_v17, %v11501_v3  ;;  %v6121_v61 = vpop.f32.mrf.mxu1  ;;  %v5982_v3 = vadd.f32 %v11420_v8, %v11431_v63 }
 0x523   : > { %v11640_v27 = vadd.f32 %v6121_v61, %v5981_v9 }
 0x524   : > { %v6506_v7 = vpop.f32.mrf.mxu3 }
 0x525   : > { %v11642_v29 = vadd.f32 %v6506_v7, %v6349_v43  ;;  %6875 = vmatmul.bf16.gmra.mxu1 %v12306_v24  ;;  %v12343_v43 = vld [vmem:[#allocation64_spill] sm:$0xff]  ;;  %v12344_v24 = vld [vmem:[#allocation33_spill] sm:$0xff] }
 0x529   : > { %v6283_v38 = vpop.f32.mrf.mxu2  ;;  %6745 = vmatmul.bf16.gmra.mxu0 %v11576_v2 }
 0x52a   : > { %v6350_v6 = vadd.f32 %v6283_v38, %v11512_v35  ;;  %v6123_v17 = vpop.f32.mrf.mxu1  ;;  %v5983_v35 = vadd.f32 %v11437_v4, %v11441_v16  ;;  %v12347_v4 = vld [vmem:[#allocation23_spill] sm:$0xff] }
 0x52b   : > { %v11651_v49 = vadd.f32 %v6123_v17, %v5982_v3  ;;  %v5984_v3 = vadd.f32 %v11450_v15, %v11452_v53 }
 0x52c   : > { %v6508_v28 = vpop.f32.mrf.mxu3 }
 0x52d   : > { %12342 = vst [vmem:[#allocation32_spill] sm:$0xff] %v11651_v49  ;;  %v11653_v14 = vadd.f32 %v6508_v28, %v6350_v6 }
 0x52e   : > { %6325 = vmatmul.bf16.gmra.mxu2 %v12343_v43 }
 0x531   : > { %v6286_v9 = vpop.f32.mrf.mxu2  ;;  %6550 = vmatmul.bf16.gmra.mxu3 %v12344_v24  ;;  %v12348_v24 = vld [vmem:[#allocation37_spill] sm:$0xff] }
 0x532   : > { %v6351_v61 = vadd.f32 %v6286_v9, %v11525_v20  ;;  %v6126_v2 = vpop.f32.mrf.mxu1 }
 0x533   : > { %v11660_v38 = vadd.f32 %v6126_v2, %v5983_v35  ;;  %v4485_v2 = vld [vmem:[#allocation2 + $0xcc] sm:$0xf] }
 0x534   : > { %v6511_v7 = vpop.f32.mrf.mxu3 }
 0x535   : > { %12345 = vst [vmem:[#allocation26_spill] sm:$0xff] %v11660_v38  ;;  %v11662_v8 = vadd.f32 %v6511_v7, %v6351_v61  ;;  %6880 = vmatmul.bf16.gmra.mxu1 %v10881_v1  ;;  %v5985_v1 = vadd.f32 %v11463_v36, %v11460_v11  ;;  %v11681_v7 = vld [vmem:[#allocation2 + $0xd0] sm:$0xf] }
 0x536   : > { %12350 = vst [vmem:[#allocation35_spill] sm:$0xff] %v11681_v7  ;;  %v6387_v11 = vshrl.u32 %v11681_v7, 16 }
 0x539   : > { %v6288_v63 = vpop.f32.mrf.mxu2 }
 0x53a   : > { %v6352_v6 = vadd.f32 %v6288_v63, %v11536_v25  ;;  %v6128_v17 = vpop.f32.mrf.mxu1  ;;  %v11677_v25 = vpop.f32.mrf.mxu0  ;;  %v11683_v63 = vld [vmem:[#allocation2 + $0xd4] sm:$0x1] }
 0x53b   : > { %v11668_v20 = vadd.f32 %v6128_v17, %v5984_v3  ;;  %12351 = vst [vmem:[#allocation66_spill] sm:$0xff] %v11683_v63  ;;  %v6374_v3 = vshrl.u32 %v4485_v2, 16  ;;  %v6377_v17 = vshll.u32 %v4485_v2, 16  ;;  %v6393_v36 = vshll.u32 %v11683_v63, 16 }
 0x53c   : > { %v6513_v28 = vpop.f32.mrf.mxu3 }
 0x53d   : > { %12346 = vst [vmem:[#allocation28_spill] sm:$0xff] %v11668_v20  ;;  %v11670_v9 = vadd.f32 %v6513_v28, %v6352_v6  ;;  %v6376_v28 = vrot.slane %v6374_v3, 4  ;;  %v6395_v2 = vrot.slane %v6393_v36, 5 }
 0x53e   : > { %6330 = vmatmul.bf16.gmra.mxu2 %v12347_v4 }
 0x541   : > { %v6291_v16 = vpop.f32.mrf.mxu2  ;;  %6555 = vmatmul.bf16.gmra.mxu3 %v12348_v24 }
 0x542   : > { %v6353_v61 = vadd.f32 %v6291_v16, %v11549_v19  ;;  %v6131_v35 = vpop.f32.mrf.mxu1  ;;  %v6383_v19 = vshll.u32 %v11681_v7, 16  ;;  %v6379_v16 = vrot.slane %v6377_v17, 5  ;;  %v11696_v63 = vpop.f32.mrf.mxu0  ;;  %v12353_v17 = vld [vmem:[#allocation8_spill] sm:$0xff] }
 0x543   : > { %v11679_v53 = vadd.f32 %v6131_v35, %v5985_v1  ;;  %v6389_v35 = vrot.slane %v6387_v11, 4 }
 0x544   : > { %v6516_v15 = vpop.f32.mrf.mxu3  ;;  %v6385_v24 = vrot.slane %v6383_v19, 5  ;;  %v6380_v20 = vor.u32 %v6379_v16, %v6376_v28  ;;  %v8364_v19 = vld [vmem:[#allocation2 + $0xcc] sm:$0xff] }
 0x545   : > { %12349 = vst [vmem:[#allocation65_spill] sm:$0xff] %v11679_v53  ;;  %v11685_v6 = vadd.f32 %v6516_v15, %v6353_v61  ;;  %6885 = vmatmul.bf16.gmra.mxu1 %v12309_v48  ;;  %v5986_v61 = vadd.f32 %v11477_v47, %v11474_v59 }
 0x546   : > { %v6390_v15 = vor.u32 %v6389_v35, %v6385_v24  ;;  %v6381_v49 = vrot.slane %v6380_v20, 4 }
 0x547   : > { %12352 = vst [vmem:[#allocation31_spill] sm:$0xff] %v11685_v6 }
 0x548   : > { %v6391_v7 = vrot.slane %v6390_v15, 4 }
 0x549   : > { %v6293_v1 = vpop.f32.mrf.mxu2 }
 0x54a   : > { %v6354_v53 = vadd.f32 %v6293_v1, %v11559_v52  ;;  %v6133_v38 = vpop.f32.mrf.mxu1  ;;  %v6386_v52 = vsel %vm8806_vm10, %v6381_v49, %v6385_v24  ;;  %v6396_v59 = vsel %vm8806_vm10, %v6391_v7, %v6395_v2  ;;  %v11713_v57 = vpop.f32.mrf.mxu0 }
 0x54b   : > { %v11694_v6 = vadd.f32 %v6133_v38, %v5986_v61  ;;  %v6615_v47 = vunpack.c.l.b16 %v6386_v52  ;;  %v6616_v11 = vunpack.c.l.b16 %v6396_v59 }
 0x54c   : > { %v6518_v48 = vpop.f32.mrf.mxu3 }
 0x54d   : > { %v11698_v3 = vadd.f32 %v6518_v48, %v6354_v53  ;;  %v6617_v36 = vpack.c.b16 %v6616_v11, %v6615_v47  ;;  %v5987_v53 = vadd.f32 %v11491_v32, %v11484_v50 }
 0x54e   : > { %6335 = vmatmul.bf16.gmra.mxu2 %v12353_v17 }
 0x54f   : > { %6750 = vmatmul.bf16.gmra.mxu0 %v6617_v36 }
 0x551   : > { %v6296_v20 = vpop.f32.mrf.mxu2  ;;  %6560 = vmatmul.bf16.gmra.mxu3 %v8364_v19 }
 0x552   : > { %v6355_v38 = vadd.f32 %v6296_v20, %v11574_v62  ;;  %v6136_v28 = vpop.f32.mrf.mxu1  ;;  %v5988_v62 = vadd.f32 %v11503_v0, %v11495_v44  ;;  %v11722_v2 = vpop.f32.mrf.mxu0  ;;  %v12355_v44 = vld [vmem:[#allocation15_spill] sm:$0xff]  ;;  %v12356_v20 = vld [vmem:[#allocation22_spill] sm:$0xff] }
 0x553   : > { %v11708_v1 = vadd.f32 %v6136_v28, %v5987_v53 }
 0x554   : > { %v6521_v16 = vpop.f32.mrf.mxu3 }
 0x555   : > { %v11710_v35 = vadd.f32 %v6521_v16, %v6355_v38  ;;  %6890 = vmatmul.bf16.gmra.mxu1 %v10993_v34  ;;  %v12354_v34 = vld [vmem:[#allocation41_spill] sm:$0xff] }
 0x556   : > { %v5989_v19 = vadd.f32 %v12354_v34, %v11505_v23  ;;  %v12357_v38 = vld [vmem:[#allocation13_spill] sm:$0xff] }
 0x557   : > { %v5990_v36 = vadd.f32 %v12357_v38, %v12356_v20 }
 0x559   : > { %v6298_v49 = vpop.f32.mrf.mxu2 }
 0x55a   : > { %v6356_v7 = vadd.f32 %v6298_v49, %v11587_v56  ;;  %v6138_v24 = vpop.f32.mrf.mxu1  ;;  %v11735_v53 = vpop.f32.mrf.mxu0 }
 0x55b   : > { %v11718_v50 = vadd.f32 %v6138_v24, %v5988_v62  ;;  %v12358_v62 = vld [vmem:[#allocation29_spill] sm:$0xff] }
 0x55c   : > { %v6523_v61 = vpop.f32.mrf.mxu3  ;;  %v5991_v24 = vadd.f32 %v11547_v60, %v12358_v62  ;;  %v6978_v60 = vld [vmem:[%s11934_s6] sm:$0x1] }
 0x55d   : > { %v11720_v32 = vadd.f32 %v6523_v61, %v6356_v7 }
 0x561   : > { %v6301_v15 = vpop.f32.mrf.mxu2 }
 0x562   : > { %v6357_v48 = vadd.f32 %v6301_v15, %v11598_v45  ;;  %v6141_v52 = vpop.f32.mrf.mxu1 }
 0x563   : > { %v11727_v56 = vadd.f32 %v6141_v52, %v5989_v19  ;;  %v12359_v19 = vld [vmem:[#allocation59_spill] sm:$0xff] }
 0x564   : > { %v6526_v59 = vpop.f32.mrf.mxu3 }
 0x565   : > { %v11729_v47 = vadd.f32 %v6526_v59, %v6357_v48  ;;  %6895 = vmatmul.bf16.gmra.mxu1 %v12355_v44  ;;  %v11746_v48 = vpop.f32.mrf.mxu0  ;;  %v12360_v44 = vld [vmem:[#allocation30_spill] sm:$0xff] }
 0x569   : > { %v6303_v0 = vpop.f32.mrf.mxu2 }
 0x56a   : > { %v6358_v11 = vadd.f32 %v6303_v0, %v11609_v40  ;;  %v6143_v45 = vpop.f32.mrf.mxu1 }
 0x56b   : > { %v11737_v16 = vadd.f32 %v6143_v45, %v5990_v36  ;;  %v6979_v36 = vunpack.c.l.bf16 %v6978_v60 }
 0x56c   : > { %v6528_v28 = vpop.f32.mrf.mxu3 }
 0x56d   : > { %v11739_v23 = vadd.f32 %v6528_v28, %v6358_v11  ;;  %v11761_v45 = vpop.f32.mrf.mxu0 }
 0x571   : > { %v6306_v49 = vpop.f32.mrf.mxu2 }
 0x572   : > { %v6359_v7 = vadd.f32 %v6306_v49, %v11618_v37  ;;  %v6146_v61 = vpop.f32.mrf.mxu1  ;;  %v5992_v37 = vadd.f32 %v11561_v13, %v12360_v44  ;;  %v12361_v13 = vld [vmem:[#allocation25_spill] sm:$0xff]  ;;  %v6757_v44 = vadd.f32 %v11592_v22, %v11563_v42 }
 0x573   : > { %v11744_v40 = vadd.f32 %v6146_v61, %v5991_v24 }
 0x574   : > { %v6531_v15 = vpop.f32.mrf.mxu3 }
 0x575   : > { %v11748_v34 = vadd.f32 %v6531_v15, %v6359_v7  ;;  %6900 = vmatmul.bf16.gmra.mxu1 %v12359_v19  ;;  %v11773_v7 = vperm.slane %v6979_v36, 0  ;;  %v7013_v15 = vld [vmem:[%s11769_s10] sm:$0xff] }
 0x579   : > { %v6308_v52 = vpop.f32.mrf.mxu2 }
 0x57a   : > { %v6360_v59 = vadd.f32 %v6308_v52, %v11629_v41  ;;  %v6148_v0 = vpop.f32.mrf.mxu1  ;;  %v6756_v41 = vadd.f32 %v11581_v26, %v12361_v13 }
 0x57b   : > { %v11757_v20 = vadd.f32 %v6148_v0, %v5992_v37  ;;  %v7014_v0 = vld [vmem:[%s11769_s10 + $0x8] sm:$0xff] }
 0x57c   : > { %v6533_v11 = vpop.f32.mrf.mxu3 }
 0x57d   : > { %v11759_v38 = vadd.f32 %v6533_v11, %v6360_v59  ;;  %v11780_v59 = vpop.f32.mrf.mxu0 }
 0x581   : > { %v6311_v28 = vpop.f32.mrf.mxu2 }
 0x582   : > { %v6361_v49 = vadd.f32 %v6311_v28, %v11640_v27  ;;  %v6866_v62 = vpop.f32.mrf.mxu1 }
 0x583   : > { %v6946_v61 = vadd.f32 %v6866_v62, %v6756_v41 }
 0x584   : > { %v6536_v24 = vpop.f32.mrf.mxu3 }
 0x585   : > { %v11776_v19 = vadd.f32 %v6536_v24, %v6361_v49  ;;  %v6981_v27 = vadd.f32 %v11773_v7, %v6946_v61  ;;  %6905 = vmatmul.bf16.gmra.mxu1 %v12325_v10  ;;  %v6758_v49 = vadd.f32 %v11607_v12, %v11578_v39  ;;  %v11788_v10 = vpop.f32.mrf.mxu0  ;;  %v7015_v24 = vld [vmem:[%s11769_s10 + $0x10] sm:$0xff]  ;;  %v7016_v12 = vld [vmem:[%s11769_s10 + $0x18] sm:$0xff] }
 0x587   : > { %v7045_v52 = vsub.f32 %v6981_v27, %v7013_v15  ;;  %v6759_v15 = vadd.f32 %v11620_v21, %v11589_v30 }
 0x589   : > { %v7077_v36 = vmul.f32 %v7045_v52, %v7045_v52 }
 0x58a   : > { %v6868_v26 = vpop.f32.mrf.mxu1 }
 0x58b   : > { %v6947_v37 = vadd.f32 %v6868_v26, %v6757_v44 }
 0x58d   : > { %v6982_v60 = vadd.f32 %v11773_v7, %v6947_v37  ;;  %v11795_v39 = vpop.f32.mrf.mxu0 }
 0x58f   : > { %v7046_v11 = vsub.f32 %v6982_v60, %v7014_v0 }
 0x591   : > { %v7078_v28 = vmul.f32 %v7046_v11, %v7046_v11 }
 0x592   : > { %v6871_v13 = vpop.f32.mrf.mxu1 }
 0x593   : > { %v7109_v41 = vadd.f32 %v7078_v28, %v7077_v36  ;;  %v6948_v62 = vadd.f32 %v6871_v13, %v6758_v49  ;;  %v7017_v28 = vld [vmem:[%s11769_s10 + $0x20] sm:$0xff] }
 0x595   : > { %v6983_v42 = vadd.f32 %v11773_v7, %v6948_v62  ;;  %6910 = vmatmul.bf16.gmra.mxu1 %v12329_v31  ;;  %v6760_v31 = vadd.f32 %v11634_v33, %v11600_v55  ;;  %v11804_v21 = vpop.f32.mrf.mxu0  ;;  %v7018_v55 = vld [vmem:[%s11769_s10 + $0x28] sm:$0xff] }
 0x597   : > { %v7047_v22 = vsub.f32 %v6983_v42, %v7015_v24 }
 0x599   : > { %v7079_v61 = vmul.f32 %v7047_v22, %v7047_v22 }
 0x59a   : > { %v6873_v27 = vpop.f32.mrf.mxu1 }
 0x59b   : > { %v7110_v52 = vadd.f32 %v7109_v41, %v7079_v61  ;;  %v6949_v44 = vadd.f32 %v6873_v27, %v6759_v15  ;;  %v6761_v41 = vadd.f32 %v11645_v46, %v11611_v58 }
 0x59d   : > { %v6984_v26 = vadd.f32 %v11773_v7, %v6949_v44  ;;  %v11810_v61 = vpop.f32.mrf.mxu0 }
 0x59f   : > { %v7048_v37 = vsub.f32 %v6984_v26, %v7016_v12  ;;  %v7019_v12 = vld [vmem:[%s11769_s10 + $0x30] sm:$0xff] }
 0x5a1   : > { %v7080_v0 = vmul.f32 %v7048_v37, %v7048_v37  ;;  %v6763_v37 = vadd.f32 %v11696_v63, %v11631_v54  ;;  %v7021_v54 = vld [vmem:[%s11769_s10 + $0x40] sm:$0xff] }
 0x5a2   : > { %v6876_v60 = vpop.f32.mrf.mxu1 }
 0x5a3   : > { %v7111_v11 = vadd.f32 %v7110_v52, %v7080_v0  ;;  %v6950_v36 = vadd.f32 %v6876_v60, %v6760_v31 }
 0x5a5   : > { %v6985_v30 = vadd.f32 %v11773_v7, %v6950_v36  ;;  %6915 = vmatmul.bf16.gmra.mxu1 %v12333_v18  ;;  %v6762_v18 = vadd.f32 %v11677_v25, %v11622_v5  ;;  %v11819_v0 = vpop.f32.mrf.mxu0  ;;  %v7020_v5 = vld [vmem:[%s11769_s10 + $0x38] sm:$0xff] }
 0x5a7   : > { %v7049_v49 = vsub.f32 %v6985_v30, %v7017_v28 }
 0x5a9   : > { %v7081_v13 = vmul.f32 %v7049_v49, %v7049_v49 }
 0x5aa   : > { %v6878_v62 = vpop.f32.mrf.mxu1 }
 0x5ab   : > { %v7112_v24 = vadd.f32 %v7111_v11, %v7081_v13  ;;  %v6951_v42 = vadd.f32 %v6878_v62, %v6761_v41 }
 0x5ad   : > { %v6986_v33 = vadd.f32 %v11773_v7, %v6951_v42  ;;  %v11825_v41 = vpop.f32.mrf.mxu0  ;;  %v6765_v42 = vadd.f32 %v11722_v2, %v11653_v14  ;;  %v7023_v14 = vld [vmem:[%s11769_s10 + $0x50] sm:$0xff] }
 0x5af   : > { %v7050_v22 = vsub.f32 %v6986_v33, %v7018_v55 }
 0x5b1   : > { %v7082_v15 = vmul.f32 %v7050_v22, %v7050_v22 }
 0x5b2   : > { %v6881_v27 = vpop.f32.mrf.mxu1 }
 0x5b3   : > { %v7113_v52 = vadd.f32 %v7112_v24, %v7082_v15  ;;  %v6952_v44 = vadd.f32 %v6881_v27, %v6762_v18 }
 0x5b5   : > { %v6987_v58 = vadd.f32 %v11773_v7, %v6952_v44  ;;  %6920 = vmatmul.bf16.gmra.mxu1 %v12339_v51  ;;  %v6764_v51 = vadd.f32 %v11713_v57, %v11642_v29  ;;  %v7022_v29 = vld [vmem:[%s11769_s10 + $0x48] sm:$0xff]  ;;  %v6726_v15 = vpop.f32.mrf.mxu0 }
 0x5b6   : > { %v11835_v27 = vadd.f32 %v6726_v15, %v11776_v19 }
 0x5b7   : > { %v7051_v46 = vsub.f32 %v6987_v58, %v7019_v12 }
 0x5b9   : > { %v7083_v26 = vmul.f32 %v7051_v46, %v7051_v46 }
 0x5ba   : > { %v6883_v31 = vpop.f32.mrf.mxu1 }
 0x5bb   : > { %v7114_v60 = vadd.f32 %v7113_v52, %v7083_v26  ;;  %v6953_v11 = vadd.f32 %v6883_v31, %v6763_v37  ;;  %v6767_v37 = vadd.f32 %v11746_v48, %v11670_v9 }
 0x5bd   : > { %v6988_v25 = vadd.f32 %v11773_v7, %v6953_v11  ;;  %v7024_v11 = vld [vmem:[%s11769_s10 + $0x58] sm:$0xff] }
 0x5bf   : > { %v7052_v36 = vsub.f32 %v6988_v25, %v7020_v5  ;;  %v12362_v25 = vld [vmem:[#allocation31_spill] sm:$0xff] }
 0x5c1   : > { %v7084_v28 = vmul.f32 %v7052_v36, %v7052_v36  ;;  %v6768_v36 = vadd.f32 %v11761_v45, %v12362_v25  ;;  %v6769_v45 = vadd.f32 %v11780_v59, %v11698_v3  ;;  %v6770_v3 = vadd.f32 %v11788_v10, %v11710_v35 }
 0x5c2   : > { %v6886_v30 = vpop.f32.mrf.mxu1 }
 0x5c3   : > { %v7115_v49 = vadd.f32 %v7114_v60, %v7084_v28  ;;  %v6954_v13 = vadd.f32 %v6886_v30, %v6764_v51  ;;  %v12363_v51 = vld [vmem:[#allocation35_spill] sm:$0xff] }
 0x5c5   : > { %v6989_v63 = vadd.f32 %v11773_v7, %v6954_v13  ;;  %6925 = vmatmul.bf16.gmra.mxu1 %v12343_v43  ;;  %v6766_v43 = vadd.f32 %v11735_v53, %v11662_v8  ;;  %v4522_v13 = vld [vmem:[#allocation2 + $0xcc] sm:$0xe] }
 0x5c6   : > { %v8103_v48 = vrot.slane %v4522_v13, 9 }
 0x5c7   : > { %v7053_v62 = vsub.f32 %v6989_v63, %v7021_v54  ;;  %v7025_v54 = vld [vmem:[%s11769_s10 + $0x60] sm:$0xff] }
 0x5c9   : > { %v7085_v24 = vmul.f32 %v7053_v62, %v7053_v62  ;;  %v12364_v62 = vld [vmem:[#allocation66_spill] sm:$0xff] }
 0x5ca   : > { %v6888_v55 = vpop.f32.mrf.mxu1 }
 0x5cb   : > { %v7116_v33 = vadd.f32 %v7115_v49, %v7085_v24  ;;  %v6955_v22 = vadd.f32 %v6888_v55, %v6765_v42  ;;  %v6405_v24 = vrot.slane %v12364_v62, 5  ;;  %v7030_v62 = vld [vmem:[%s11769_s10 + $0x88] sm:$0xff] }
 0x5cd   : > { %v6990_v57 = vadd.f32 %v11773_v7, %v6955_v22 }
 0x5cf   : > { %v7054_v18 = vsub.f32 %v6990_v57, %v7022_v29 }
 0x5d1   : > { %v7086_v52 = vmul.f32 %v7054_v18, %v7054_v18 }
 0x5d2   : > { %v6891_v44 = vpop.f32.mrf.mxu1 }
 0x5d3   : > { %v7117_v12 = vadd.f32 %v7116_v33, %v7086_v52  ;;  %v6956_v58 = vadd.f32 %v6891_v44, %v6766_v43 }
 0x5d5   : > { %v6991_v2 = vadd.f32 %v11773_v7, %v6956_v58  ;;  %6930 = vmatmul.bf16.gmra.mxu1 %v12347_v4  ;;  %v6402_v4 = vrot.slane %v12363_v51, 5 }
 0x5d7   : > { %v7055_v46 = vsub.f32 %v6991_v2, %v7023_v14  ;;  %v6404_v63 = vrot.slane %v6402_v4, 4  ;;  %v6403_v29 = vsel %vm9381_vm14, %v8103_v48, %v6402_v4 }
 0x5d8   : > { %v6805_v43 = vunpack.c.l.b16 %v6403_v29 }
 0x5d9   : > { %v7087_v26 = vmul.f32 %v7055_v46, %v7055_v46  ;;  %v6406_v57 = vsel %vm9381_vm14, %v6404_v63, %v6405_v24 }
 0x5da   : > { %v6893_v19 = vpop.f32.mrf.mxu1  ;;  %v6806_v44 = vunpack.c.l.b16 %v6406_v57 }
 0x5db   : > { %v7118_v31 = vadd.f32 %v7117_v12, %v7087_v26  ;;  %v6957_v60 = vadd.f32 %v6893_v19, %v6767_v37  ;;  %v7027_v26 = vld [vmem:[%s11769_s10 + $0x70] sm:$0xff] }
 0x5dc   : > { %v6807_v59 = vpack.c.b16 %v6806_v44, %v6805_v43 }
 0x5dd   : > { %v6992_v8 = vadd.f32 %v11773_v7, %v6957_v60  ;;  %v6771_v60 = vadd.f32 %v11795_v39, %v11720_v32  ;;  %v6773_v39 = vadd.f32 %v11810_v61, %v11739_v23  ;;  %v7031_v61 = vld [vmem:[%s11769_s10 + $0x90] sm:$0xff] }
 0x5df   : > { %v7056_v53 = vsub.f32 %v6992_v8, %v7024_v11 }
 0x5e1   : > { %v7088_v5 = vmul.f32 %v7056_v53, %v7056_v53 }
 0x5e2   : > { %v6896_v28 = vpop.f32.mrf.mxu1 }
 0x5e3   : > { %v7119_v30 = vadd.f32 %v7118_v31, %v7088_v5  ;;  %v6958_v49 = vadd.f32 %v6896_v28, %v6768_v36  ;;  %v7028_v5 = vld [vmem:[%s11769_s10 + $0x78] sm:$0xff]  ;;  %v6772_v36 = vadd.f32 %v11804_v21, %v11729_v47  ;;  %v6538_v21 = vpop.f32.mrf.mxu3 }
 0x5e5   : > { %v6993_v9 = vadd.f32 %v11773_v7, %v6958_v49  ;;  %6935 = vmatmul.bf16.gmra.mxu1 %v12353_v17  ;;  %v7026_v17 = vld [vmem:[%s11769_s10 + $0x68] sm:$0xff] }
 0x5e7   : > { %v7057_v42 = vsub.f32 %v6993_v9, %v7025_v54  ;;  %v6313_v54 = vpop.f32.mrf.mxu2 }
 0x5e9   : > { %v7089_v55 = vmul.f32 %v7057_v42, %v7057_v42 }
 0x5ea   : > { %v6898_v33 = vpop.f32.mrf.mxu1 }
 0x5eb   : > { %v7120_v15 = vadd.f32 %v7119_v30, %v7089_v55  ;;  %v6959_v18 = vadd.f32 %v6898_v33, %v6769_v45  ;;  %v7029_v30 = vld [vmem:[%s11769_s10 + $0x80] sm:$0xff]  ;;  %v6774_v55 = vadd.f32 %v11819_v0, %v11748_v34  ;;  %v6728_v33 = vpop.f32.mrf.mxu0 }
 0x5ed   : > { %v6994_v52 = vadd.f32 %v11773_v7, %v6959_v18 }
 0x5ef   : > { %v7058_v12 = vsub.f32 %v6994_v52, %v7026_v17  ;;  %v6316_v23 = vpop.f32.mrf.mxu2  ;;  %v6775_v17 = vadd.f32 %v11825_v41, %v11759_v38  ;;  %v6541_v52 = vpop.f32.mrf.mxu3  ;;  %v7033_v41 = vld [vmem:[%s11769_s10 + $0xa0] sm:$0xff] }
 0x5f1   : > { %v7090_v58 = vmul.f32 %v7058_v12, %v7058_v12 }
 0x5f2   : > { %v6901_v14 = vpop.f32.mrf.mxu1 }
 0x5f3   : > { %v7121_v2 = vadd.f32 %v7120_v15, %v7090_v58  ;;  %v6960_v46 = vadd.f32 %v6901_v14, %v6770_v3  ;;  %v7032_v58 = vld [vmem:[%s11769_s10 + $0x98] sm:$0xff]  ;;  %v6731_v34 = vpop.f32.mrf.mxu0  ;;  %v12366_v14 = vld [vmem:[#allocation32_spill] sm:$0xff] }
 0x5f5   : > { %v6995_v37 = vadd.f32 %v11773_v7, %v6960_v46  ;;  %6940 = vmatmul.bf16.gmra.mxu1 %v6807_v59 }
 0x5f7   : > { %v7059_v19 = vsub.f32 %v6995_v37, %v7027_v26  ;;  %v6318_v3 = vpop.f32.mrf.mxu2  ;;  %v6543_v38 = vpop.f32.mrf.mxu3 }
 0x5f9   : > { %v7091_v31 = vmul.f32 %v7059_v19, %v7059_v19 }
 0x5fa   : > { %v6903_v11 = vpop.f32.mrf.mxu1 }
 0x5fb   : > { %v7122_v8 = vadd.f32 %v7121_v2, %v7091_v31  ;;  %v6961_v53 = vadd.f32 %v6903_v11, %v6771_v60  ;;  %v6362_v2 = vadd.f32 %v6313_v54, %v12366_v14  ;;  %v6733_v11 = vpop.f32.mrf.mxu0 }
 0x5fd   : > { %v6996_v35 = vadd.f32 %v11773_v7, %v6961_v53  ;;  %v6587_v31 = vadd.f32 %v6538_v21, %v6362_v2  ;;  %v7035_v21 = vld [vmem:[%s11769_s10 + $0xb0] sm:$0xff] }
 0x5ff   : > { %v7060_v10 = vsub.f32 %v6996_v35, %v7028_v5  ;;  %v6321_v53 = vpop.f32.mrf.mxu2  ;;  %v12367_v5 = vld [vmem:[#allocation26_spill] sm:$0xff] }
 0x600   : > { %v6363_v35 = vadd.f32 %v6316_v23, %v12367_v5 }
 0x601   : > { %v7092_v25 = vmul.f32 %v7060_v10, %v7060_v10 }
 0x602   : > { %v6906_v28 = vpop.f32.mrf.mxu1 }
 0x603   : > { %v7123_v51 = vadd.f32 %v7122_v8, %v7092_v25  ;;  %v6962_v4 = vadd.f32 %v6906_v28, %v6772_v36  ;;  %v6777_v25 = vadd.f32 %v6728_v33, %v6587_v31 }
 0x605   : > { %v6997_v49 = vadd.f32 %v11773_v7, %v6962_v4  ;;  %v7034_v4 = vld [vmem:[%s11769_s10 + $0xa8] sm:$0xff] }
 0x607   : > { %v7061_v13 = vsub.f32 %v6997_v49, %v7029_v30  ;;  %v6588_v30 = vadd.f32 %v6541_v52, %v6363_v35  ;;  %v6546_v49 = vpop.f32.mrf.mxu3 }
 0x609   : > { %v7093_v32 = vmul.f32 %v7061_v13, %v7061_v13 }
 0x60a   : > { %v6908_v9 = vpop.f32.mrf.mxu1 }
 0x60b   : > { %v7124_v48 = vadd.f32 %v7123_v51, %v7093_v32  ;;  %v6963_v63 = vadd.f32 %v6908_v9, %v6773_v39  ;;  %v6736_v32 = vpop.f32.mrf.mxu0  ;;  %v12368_v39 = vld [vmem:[#allocation28_spill] sm:$0xff] }
 0x60c   : > { %v6364_v54 = vadd.f32 %v6318_v3, %v12368_v39  ;;  %v7039_v39 = vld [vmem:[%s11769_s10 + $0xd0] sm:$0xff] }
 0x60d   : > { %v6998_v24 = vadd.f32 %v11773_v7, %v6963_v63  ;;  %v6323_v63 = vpop.f32.mrf.mxu2 }
 0x60f   : > { %v7062_v47 = vsub.f32 %v6998_v24, %v7030_v62  ;;  %v6548_v33 = vpop.f32.mrf.mxu3 }
 0x611   : > { %v7094_v42 = vmul.f32 %v7062_v47, %v7062_v47 }
 0x612   : > { %v6911_v45 = vpop.f32.mrf.mxu1 }
 0x613   : > { %v7125_v22 = vadd.f32 %v7124_v48, %v7094_v42  ;;  %v6964_v29 = vadd.f32 %v6911_v45, %v6774_v55  ;;  %v6778_v48 = vadd.f32 %v6731_v34, %v6588_v30  ;;  %v6589_v42 = vadd.f32 %v6543_v38, %v6364_v54 }
 0x614   : > { %v6366_v34 = vadd.f32 %v6323_v63, %v11694_v6 }
 0x615   : > { %v6999_v57 = vadd.f32 %v11773_v7, %v6964_v29  ;;  %v6326_v52 = vpop.f32.mrf.mxu2 }
 0x617   : > { %v7063_v15 = vsub.f32 %v6999_v57, %v7031_v61  ;;  %v6779_v61 = vadd.f32 %v6733_v11, %v6589_v42 }
 0x619   : > { %v7095_v18 = vmul.f32 %v7063_v15, %v7063_v15  ;;  %v6738_v15 = vpop.f32.mrf.mxu0 }
 0x61a   : > { %v6913_v43 = vpop.f32.mrf.mxu1 }
 0x61b   : > { %v7126_v44 = vadd.f32 %v7125_v22, %v7095_v18  ;;  %v6965_v12 = vadd.f32 %v6913_v43, %v6775_v17  ;;  %v12369_v22 = vld [vmem:[#allocation65_spill] sm:$0xff]  ;;  %v7036_v43 = vld [vmem:[%s11769_s10 + $0xb8] sm:$0xff] }
 0x61c   : > { %v6365_v29 = vadd.f32 %v6321_v53, %v12369_v22 }
 0x61d   : > { %v7000_v0 = vadd.f32 %v11773_v7, %v6965_v12 }
 0x61f   : > { %v7064_v59 = vsub.f32 %v7000_v0, %v7032_v58 }
 0x621   : > { %v7096_v46 = vmul.f32 %v7064_v59, %v7064_v59  ;;  %v6551_v59 = vpop.f32.mrf.mxu3 }
 0x622   : > { %v6916_v26 = vpop.f32.mrf.mxu1 }
 0x623   : > { %v7127_v37 = vadd.f32 %v7126_v44, %v7096_v46  ;;  %v6966_v19 = vadd.f32 %v6916_v26, %v11835_v27  ;;  %v6590_v44 = vadd.f32 %v6546_v49, %v6365_v29  ;;  %v7037_v26 = vld [vmem:[%s11769_s10 + $0xc0] sm:$0xff] }
 0x625   : > { %v7001_v60 = vadd.f32 %v11773_v7, %v6966_v19  ;;  %v6780_v3 = vadd.f32 %v6736_v32, %v6590_v44  ;;  %v6591_v19 = vadd.f32 %v6548_v33, %v6366_v34  ;;  %v7040_v33 = vld [vmem:[%s11769_s10 + $0xd8] sm:$0xff] }
 0x627   : > { %v7065_v8 = vsub.f32 %v7001_v60, %v7033_v41  ;;  %v6328_v41 = vpop.f32.mrf.mxu2  ;;  %v6367_v60 = vadd.f32 %v6326_v52, %v11708_v1 }
 0x628   : > { %v6368_v30 = vadd.f32 %v6328_v41, %v11718_v50 }
 0x629   : > { %v7097_v10 = vmul.f32 %v7065_v8, %v7065_v8  ;;  %v6781_v8 = vadd.f32 %v6738_v15, %v6591_v19  ;;  %v6553_v35 = vpop.f32.mrf.mxu3  ;;  %v7042_v19 = vld [vmem:[%s11769_s10 + $0xe8] sm:$0xff] }
 0x62a   : > { %v6918_v36 = vpop.f32.mrf.mxu1  ;;  %v6593_v54 = vadd.f32 %v6553_v35, %v6368_v30 }
 0x62b   : > { %v7128_v28 = vadd.f32 %v7127_v37, %v7097_v10  ;;  %v6967_v51 = vadd.f32 %v6918_v36, %v6777_v25  ;;  %v6741_v37 = vpop.f32.mrf.mxu0  ;;  %v7038_v10 = vld [vmem:[%s11769_s10 + $0xc8] sm:$0xff]  ;;  %v6592_v25 = vadd.f32 %v6551_v59, %v6367_v60 }
 0x62d   : > { %v7002_v27 = vadd.f32 %v11773_v7, %v6967_v51  ;;  %v6782_v49 = vadd.f32 %v6741_v37, %v6592_v25 }
 0x62f   : > { %v7066_v13 = vsub.f32 %v7002_v27, %v7034_v4  ;;  %v6331_v4 = vpop.f32.mrf.mxu2 }
 0x631   : > { %v7098_v9 = vmul.f32 %v7066_v13, %v7066_v13 }
 0x632   : > { %v6921_v62 = vpop.f32.mrf.mxu1 }
 0x633   : > { %v7129_v24 = vadd.f32 %v7128_v28, %v7098_v9  ;;  %v6968_v47 = vadd.f32 %v6921_v62, %v6778_v48  ;;  %v6743_v28 = vpop.f32.mrf.mxu0  ;;  %v6556_v48 = vpop.f32.mrf.mxu3 }
 0x635   : > { %v7003_v55 = vadd.f32 %v11773_v7, %v6968_v47 }
 0x637   : > { %v7067_v45 = vsub.f32 %v7003_v55, %v7035_v21  ;;  %v6783_v21 = vadd.f32 %v6743_v28, %v6593_v54  ;;  %v6333_v42 = vpop.f32.mrf.mxu2 }
 0x639   : > { %v7099_v23 = vmul.f32 %v7067_v45, %v7067_v45 }
 0x63a   : > { %v6923_v57 = vpop.f32.mrf.mxu1 }
 0x63b   : > { %v7130_v18 = vadd.f32 %v7129_v24, %v7099_v23  ;;  %v6969_v17 = vadd.f32 %v6923_v57, %v6779_v61  ;;  %v6746_v62 = vpop.f32.mrf.mxu0  ;;  %v6369_v24 = vadd.f32 %v6331_v4, %v11727_v56  ;;  %v6558_v61 = vpop.f32.mrf.mxu3  ;;  %v6370_v57 = vadd.f32 %v6333_v42, %v11737_v16 }
 0x63d   : > { %v7004_v12 = vadd.f32 %v11773_v7, %v6969_v17  ;;  %v6594_v22 = vadd.f32 %v6556_v48, %v6369_v24 }
 0x63f   : > { %v7068_v58 = vsub.f32 %v7004_v12, %v7036_v43  ;;  %v6336_v44 = vpop.f32.mrf.mxu2  ;;  %v7041_v12 = vld [vmem:[%s11769_s10 + $0xe0] sm:$0xff] }
 0x640   : > { %v6371_v59 = vadd.f32 %v6336_v44, %v11744_v40 }
 0x641   : > { %v7100_v0 = vmul.f32 %v7068_v58, %v7068_v58  ;;  %v6595_v58 = vadd.f32 %v6558_v61, %v6370_v57 }
 0x642   : > { %v6926_v14 = vpop.f32.mrf.mxu1 }
 0x643   : > { %v7131_v2 = vadd.f32 %v7130_v18, %v7100_v0  ;;  %v6970_v46 = vadd.f32 %v6926_v14, %v6780_v3  ;;  %v6784_v18 = vadd.f32 %v6746_v62, %v6594_v22  ;;  %v6748_v43 = vpop.f32.mrf.mxu0  ;;  %v6561_v3 = vpop.f32.mrf.mxu3 }
 0x645   : > { %v7005_v38 = vadd.f32 %v11773_v7, %v6970_v46 }
 0x647   : > { %v7069_v31 = vsub.f32 %v7005_v38, %v7037_v26  ;;  %v6596_v38 = vadd.f32 %v6561_v3, %v6371_v59 }
 0x649   : > { %v7101_v11 = vmul.f32 %v7069_v31, %v7069_v31  ;;  %v6338_v31 = vpop.f32.mrf.mxu2 }
 0x64a   : > { %v6928_v53 = vpop.f32.mrf.mxu1 }
 0x64b   : > { %v7132_v6 = vadd.f32 %v7131_v2, %v7101_v11  ;;  %v6971_v5 = vadd.f32 %v6928_v53, %v6781_v8  ;;  %v6785_v2 = vadd.f32 %v6748_v43, %v6595_v58  ;;  %v6751_v37 = vpop.f32.mrf.mxu0  ;;  %v6372_v8 = vadd.f32 %v6338_v31, %v11757_v20 }
 0x64c   : > { %v6786_v11 = vadd.f32 %v6751_v37, %v6596_v38 }
 0x64d   : > { %v7006_v36 = vadd.f32 %v11773_v7, %v6971_v5 }
 0x64f   : > { %v7070_v51 = vsub.f32 %v7006_v36, %v7038_v10  ;;  %v7043_v10 = vld [vmem:[%s11769_s10 + $0xf0] sm:$0xff] }
 0x651   : > { %v7102_v27 = vmul.f32 %v7070_v51, %v7070_v51 }
 0x652   : > { %v6931_v13 = vpop.f32.mrf.mxu1 }
 0x653   : > { %v7133_v1 = vadd.f32 %v7132_v6, %v7102_v27  ;;  %v6972_v32 = vadd.f32 %v6931_v13, %v6782_v49  ;;  %v6563_v6 = vpop.f32.mrf.mxu3  ;;  %v6753_v28 = vpop.f32.mrf.mxu0 }
 0x654   : > { %v6597_v25 = vadd.f32 %v6563_v6, %v6372_v8 }
 0x655   : > { %v7007_v9 = vadd.f32 %v11773_v7, %v6972_v32 }
 0x656   : > { %v6787_v4 = vadd.f32 %v6753_v28, %v6597_v25 }
 0x657   : > { %v7071_v63 = vsub.f32 %v7007_v9, %v7039_v39 }
 0x659   : > { %v7103_v47 = vmul.f32 %v7071_v63, %v7071_v63 }
 0x65a   : > { %v6933_v55 = vpop.f32.mrf.mxu1 }
 0x65b   : > { %v7134_v50 = vadd.f32 %v7133_v1, %v7103_v47  ;;  %v6973_v45 = vadd.f32 %v6933_v55, %v6783_v21  ;;  %v7044_v1 = vld [vmem:[%s11769_s10 + $0xf8] sm:$0xff] }
 0x65d   : > { %v7008_v29 = vadd.f32 %v11773_v7, %v6973_v45 }
 0x65f   : > { %v7072_v23 = vsub.f32 %v7008_v29, %v7040_v33 }
 0x661   : > { %v7104_v15 = vmul.f32 %v7072_v23, %v7072_v23 }
 0x662   : > { %v6936_v17 = vpop.f32.mrf.mxu1 }
 0x663   : > { %v7135_v52 = vadd.f32 %v7134_v50, %v7104_v15  ;;  %v6974_v56 = vadd.f32 %v6936_v17, %v6784_v18 }
 0x665   : > { %v7009_v34 = vadd.f32 %v11773_v7, %v6974_v56 }
 0x667   : > { %v7073_v0 = vsub.f32 %v7009_v34, %v7041_v12 }
 0x669   : > { %v7105_v14 = vmul.f32 %v7073_v0, %v7073_v0 }
 0x66a   : > { %v6938_v46 = vpop.f32.mrf.mxu1 }
 0x66b   : > { %v7136_v16 = vadd.f32 %v7135_v52, %v7105_v14  ;;  %v6975_v26 = vadd.f32 %v6938_v46, %v6785_v2 }
 0x66d   : > { %v7010_v41 = vadd.f32 %v11773_v7, %v6975_v26 }
 0x66f   : > { %v7074_v60 = vsub.f32 %v7010_v41, %v7042_v19 }
 0x671   : > { %v7106_v53 = vmul.f32 %v7074_v60, %v7074_v60 }
 0x672   : > { %v6941_v40 = vpop.f32.mrf.mxu1 }
 0x673   : > { %v6976_v5 = vadd.f32 %v6941_v40, %v6786_v11  ;;  %v7137_v35 = vadd.f32 %v7136_v16, %v7106_v53 }
 0x675   : > { %v7011_v36 = vadd.f32 %v11773_v7, %v6976_v5 }
 0x677   : > { %v7075_v51 = vsub.f32 %v7011_v36, %v7043_v10 }
 0x679   : > { %v7107_v30 = vmul.f32 %v7075_v51, %v7075_v51 }
 0x67a   : > { %v6943_v27 = vpop.f32.mrf.mxu1 }
 0x67b   : > { %v6977_v49 = vadd.f32 %v6943_v27, %v6787_v4  ;;  %v7138_v13 = vadd.f32 %v7137_v35, %v7107_v30 }
 0x67d   : > { %v7012_v20 = vadd.f32 %v11773_v7, %v6977_v49 }
 0x67f   : > { %v7076_v32 = vsub.f32 %v7012_v20, %v7044_v1 }
 0x681   : > { %v7108_v39 = vmul.f32 %v7076_v32, %v7076_v32 }
 0x683   : > { %v7139_v54 = vadd.f32 %v7138_v13, %v7108_v39 }
 0x685   : > { %7140 = vadd.xlane.f32.xlu2 %v7139_v54 }
 0x6f8   : > { %v7141_v9 = vpop.xlane.xlu2 %7140 }
 0x6f9   : > { %v7142_v48 = vrot.slane %v7141_v9, 4 }
 0x6fb   : > { %v7143_v63 = vadd.f32 %v7142_v48, %v7141_v9 }
 0x6fd   : > { %v7144_v62 = vrot.slane %v7143_v63, 2 }
 0x6ff   : > { %v7145_v24 = vadd.f32 %v7144_v62, %v7143_v63 }
 0x701   : > { %v7146_v47 = vrot.slane %v7145_v24, 1 }
 0x703   : > { %v7147_v21 = vadd.f32 %v7146_v47, %v7145_v24 }
 0x705   : > { %8532 = vpush %v7147_v21 }
 0x736   : > { %s8533_s9 = spop %8532 }
 0x737   : > { %v7149_v42 = vstv %s8533_s9 }
 0x738   : > { %7150 = vst [vmem:[%s316_s8] sm:$0xff] %v7149_v42 }
 0x739 PF: > { %s17_s24 = sadd.s32 1, %s8588_s24  }
 0x73a   : > { %p14_p4 = scmp.ge.s32.totalorder %s17_s24, 4  }
 0x73c   :  { %16 = sbr.rel (!%p14_p4) target bundleno = 1 (0x1), region = 102 }

</bundles_post_ra>
